<compile_context>
chip_gen: v7x
topology: tpu7x:2x2x1
jax: 0.10.0
libtpu: 0.0.40
codegen_flags: <defaults>
</compile_context>

<pallas_src>
import jax
import jax.numpy as jnp
from jax import lax
from jax.experimental import pallas as pl
from jax.experimental.pallas import tpu as pltpu

H = W = 28                    # MNIST spatial size (32*14*14 == 6272 required)
C = 32                        # conv1 output channels
FEAT = C * 14 * 14            # 6272
HID = 100
HIDP = 128                    # HID padded to a lane-dense 128
BN_EPS = 1e-5
JPAD = 16                     # 14 pooled-W positions padded to 16 (zero cols)
HALF = JPAD * C               # 512 lanes per W-parity half
LANES = 2 * HALF              # 1024 = 8 * 128 conv-output lanes
KCOLS = 3 * (W + 2)           # 90 real im2row columns (3 kh slabs of width 30)
KPAD = 128                    # contraction depth padded to 128 (lane-dense)
P_ROWS = 2                    # pooled rows per matmul grid step
P_STEPS = 14 // P_ROWS        # 7 matmul steps; grid = (1 + P_STEPS,)


def _fold_channels(v):
    """(1, LANES) -> (1, C): sum all lanes with the same channel (lane % C)."""
    width = v.shape[1]
    while width > C:
        width //= 2
        v = v[:, :width] + v[:, width:]
    return v


# ---------------------------------------------------------------------------
# Fused kernel: Conv(1->32,3x3,'same') + BN(batch stats) + ReLU + MaxPool(2,2)
#               + Linear(6272,100) + ReLU + Linear(100,100) + ReLU
#               + mean over batch + Linear(100,100) + ReLU + Linear(100,E)
# Grid step 0: conv matmul + BN stats + affine + ReLU -> bf16 scratch.
# Grid steps 1..P_STEPS: pool 2 rows each + accumulated bf16 matmul against a
# streamed w1p block.  Last step runs the small MLP head and writes the output.
# ---------------------------------------------------------------------------
def _task_encoder_kernel(x2_ref, cm_ref, gamma_ref, beta_ref, w1p_ref, b1_ref,
                         w2_ref, b2_ref, w3_ref, b3_ref, w4_ref, b4_ref,
                         out_ref, y_scr, acc1_scr):
    step = pl.program_id(0)
    nb = y_scr.shape[1]                               # batch size N

    @pl.when(step == 0)
    def _():
        # Conv as one bf16 MXU matmul (f32 accumulate).
        # acc[h*N + n, parity*512 + j*32 + c] == conv(x)[n, c, h, 2*j + parity]
        acc = jnp.dot(x2_ref[...], cm_ref[...],
                      preferred_element_type=jnp.float32)
        # BatchNorm2d(track_running_stats=False): batch stats, biased variance,
        # single pass.  Conv bias omitted: cancels with the batch-mean subtract.
        # Zero-padded lanes contribute 0 to both sums.
        s1 = _fold_channels(jnp.sum(acc, axis=0, keepdims=True))        # (1,C)
        s2 = _fold_channels(jnp.sum(acc * acc, axis=0, keepdims=True))  # (1,C)
        cnt = jnp.float32(nb * H * W)
        mu = s1 / cnt
        var = s2 / cnt - mu * mu
        scale_c = gamma_ref[...] * lax.rsqrt(var + BN_EPS)              # (1,C)
        shift_c = beta_ref[...] - mu * scale_c
        scale = jnp.tile(scale_c, (1, LANES // C))                      # (1,1024)
        shift = jnp.tile(shift_c, (1, LANES // C))
        y = jnp.maximum(acc * scale + shift, 0.0)                       # BN+ReLU
        y_scr[...] = y.astype(jnp.bfloat16).reshape(H, nb, LANES)
        acc1_scr[...] = jnp.zeros_like(acc1_scr)

    @pl.when(step > 0)
    def _():
        # MaxPool2d(2,2) fused with Linear(6272,100); w1p block streams per step.
        part = jnp.zeros((nb, HIDP), jnp.float32)
        for r in range(P_ROWS):
            i = (step - 1) * P_ROWS + r                                 # pooled row
            hp = jnp.maximum(y_scr[2 * i], y_scr[2 * i + 1])            # H pool
            wp = jnp.maximum(hp[:, :HALF], hp[:, HALF:])                # W pool
            part = part + jnp.dot(wp, w1p_ref[r],
                                  preferred_element_type=jnp.float32)
        acc1_scr[...] += part

    @pl.when(step == pl.num_programs(0) - 1)
    def _():
        h1 = jnp.maximum(acc1_scr[...] + b1_ref[...], 0.0)              # (N,128)
        h2 = jnp.dot(h1, w2_ref[...],
                     preferred_element_type=jnp.float32) + b2_ref[...]
        h2 = jnp.maximum(h2, 0.0)
        m = jnp.mean(h2, axis=0, keepdims=True)                         # batch mean
        h3 = jnp.dot(m, w3_ref[...],
                     preferred_element_type=jnp.float32) + b3_ref[...]
        h3 = jnp.maximum(h3, 0.0)
        out_ref[...] = (jnp.dot(h3, w4_ref[...],
                                preferred_element_type=jnp.float32) + b4_ref[...])


# ---------------------------------------------------------------------------
# One-time (init-time) parameter repack into kernel-friendly layouts.
# ---------------------------------------------------------------------------
def _build_conv_matrix(w_conv):
    """(3,3,C) taps -> (128, 1024) bf16 so that im2row(xpad) @ M == 'same' conv."""
    m = jnp.zeros((KPAD, 2, JPAD, C), jnp.float32)
    w_idx = jnp.arange(W)                   # output column w = 0..27
    parity = w_idx % 2
    j = w_idx // 2
    for kh in range(3):
        for kw in range(3):
            cols = kh * (W + 2) + w_idx + kw
            upd = jnp.broadcast_to(w_conv[kh, kw, :], (W, C))
            m = m.at[cols, parity, j, :].add(upd)
    return m.reshape(KPAD, LANES).astype(jnp.bfloat16)   # lane = p*512 + j*32 + c


def _pad2(a, rows, cols):
    return jnp.pad(a, ((0, rows - a.shape[0]), (0, cols - a.shape[1])))


def prepare_params(params):
    """Repack torch-layout params once: conv -> bf16 matmul matrix, w1 ->
    permuted, zero-padded bf16 (14, 512, 128); head weights padded to 128."""
    w1 = params["w1"]                                           # (6272, 100)
    w1p = w1.reshape(C, 14, 14, HID).transpose(1, 2, 0, 3)      # [i, j, c, o]
    w1p = jnp.pad(w1p, ((0, 0), (0, JPAD - 14), (0, 0), (0, HIDP - HID)))
    w1p = w1p.reshape(14, HALF, HIDP).astype(jnp.bfloat16)
    emb = params["w4"].shape[1]
    return {
        "conv_mat": _build_conv_matrix(params["w_conv"]),
        # conv bias intentionally dropped: cancels against the BN batch mean.
        "gamma": params["gamma"], "beta": params["beta"],
        "w1p": w1p,
        "b1": _pad2(params["b1"], 1, HIDP),
        "w2": _pad2(params["w2"], HIDP, HIDP),
        "b2": _pad2(params["b2"], 1, HIDP),
        "w3": _pad2(params["w3"], HIDP, HIDP),
        "b3": _pad2(params["b3"], 1, HIDP),
        "w4": _pad2(params["w4"], HIDP, emb),
        "b4": params["b4"],
    }


# ---------------------------------------------------------------------------
# Wrapper
# ---------------------------------------------------------------------------
def task_encoder_mnist_forward(x, prepped):
    """x: (N, 1, 28, 28) float32 (NCHW).  Returns (embedding_size,)."""
    n = x.shape[0]
    emb = prepped["w4"].shape[1]

    # im2row over kh only: x2[h*N + n, kh*30 + wi] = xpad[n, h + kh, wi]
    xpad = jnp.pad(x[:, 0].astype(jnp.float32), ((0, 0), (1, 1), (1, 1)))  # (N,30,30)
    xpad_t = jnp.transpose(xpad, (1, 0, 2))                                # (30,N,30)
    x2 = jnp.concatenate(
        [xpad_t[kh:kh + H].reshape(H * n, W + 2) for kh in range(3)], axis=1)
    x2 = jnp.pad(x2, ((0, 0), (0, KPAD - KCOLS))).astype(jnp.bfloat16)     # (28N,128)

    def full(shape):
        return pl.BlockSpec(shape, lambda s, _nd=len(shape): (0,) * _nd)

    # w1p streams one (P_ROWS, 512, 128) block per matmul step (block 0 at step 0
    # is the prologue fetch; the rest overlap the conv / pooled matmuls).
    w1p_spec = pl.BlockSpec((P_ROWS, HALF, HIDP),
                            lambda s: (jnp.maximum(s - 1, 0), 0, 0))

    flops = (2 * (H * n) * KPAD * LANES            # conv matmul
             + 2 * n * 14 * HALF * HIDP            # Linear(6272,100)
             + 2 * n * HIDP * HIDP                 # Linear(100,100)
             + 2 * HIDP * HIDP + 2 * HIDP * emb)   # head after batch mean
    bytes_accessed = (int(x2.size) * x2.dtype.itemsize
                      + sum(int(v.size) * v.dtype.itemsize
                            for v in prepped.values())
                      + emb * 4)

    out = pl.pallas_call(
        _task_encoder_kernel,
        out_shape=jax.ShapeDtypeStruct((1, emb), jnp.float32),
        grid_spec=pltpu.PrefetchScalarGridSpec(
            num_scalar_prefetch=0, grid=(1 + P_STEPS,),
            in_specs=[full(x2.shape), full(prepped["conv_mat"].shape),
                      full(prepped["gamma"].shape), full(prepped["beta"].shape),
                      w1p_spec, full(prepped["b1"].shape),
                      full(prepped["w2"].shape), full(prepped["b2"].shape),
                      full(prepped["w3"].shape), full(prepped["b3"].shape),
                      full(prepped["w4"].shape), full(prepped["b4"].shape)],
            out_specs=full((1, emb)),
            scratch_shapes=[pltpu.VMEM((H, n, LANES), jnp.bfloat16),   # BN+ReLU'd conv
                            pltpu.VMEM((n, HIDP), jnp.float32)]),      # Linear1 acc
        compiler_params=pltpu.CompilerParams(dimension_semantics=("arbitrary",)),
        cost_estimate=pl.CostEstimate(flops=flops, transcendentals=C,
                                      bytes_accessed=bytes_accessed),
    )(x2, prepped["conv_mat"], prepped["gamma"], prepped["beta"],
      prepped["w1p"], prepped["b1"], prepped["w2"], prepped["b2"],
      prepped["w3"], prepped["b3"], prepped["w4"], prepped["b4"])

    return out[0]                                   # (embedding_size,)


# ---------------------------------------------------------------------------
# Deterministic parameter init (PyTorch-default-style uniform bounds).
# w_conv stored (3, 3, C) == permuted torch conv.weight (C,1,3,3);
# Linear weights stored (in, out) == torch Linear.weight.T.
# ---------------------------------------------------------------------------
def init_params(key, embedding_size):
    ks = jax.random.split(key, 10)

    def u(k, shape, fan_in):
        b = 1.0 / jnp.sqrt(jnp.float32(fan_in))
        return jax.random.uniform(k, shape, jnp.float32, -b, b)

    return {
        "w_conv": u(ks[0], (3, 3, C), 9),
        "b_conv": u(ks[1], (1, C), 9),
        "gamma": jnp.ones((1, C), jnp.float32),
        "beta": jnp.zeros((1, C), jnp.float32),
        "w1": u(ks[2], (FEAT, HID), FEAT),
        "b1": u(ks[3], (1, HID), FEAT),
        "w2": u(ks[4], (HID, HID), HID),
        "b2": u(ks[5], (1, HID), HID),
        "w3": u(ks[6], (HID, HID), HID),
        "b3": u(ks[7], (1, HID), HID),
        "w4": u(ks[8], (HID, embedding_size), HID),
        "b4": u(ks[9], (1, embedding_size), HID),
    }


# Pure-JAX reference (NCHW, includes the conv bias) used to validate the kernel.
def reference_forward(x, params):
    n = x.shape[0]
    hp = lax.Precision.HIGHEST
    w_oihw = jnp.transpose(params["w_conv"], (2, 0, 1))[:, None]     # (C,1,3,3)
    out = lax.conv_general_dilated(x, w_oihw, (1, 1), "SAME",
                                   dimension_numbers=("NCHW", "OIHW", "NCHW"),
                                   precision=hp)
    out = out + params["b_conv"].reshape(1, C, 1, 1)
    mu = out.mean(axis=(0, 2, 3), keepdims=True)
    var = ((out - mu) ** 2).mean(axis=(0, 2, 3), keepdims=True)
    out = (out - mu) * lax.rsqrt(var + BN_EPS)
    out = out * params["gamma"].reshape(1, C, 1, 1) + params["beta"].reshape(1, C, 1, 1)
    out = jnp.maximum(out, 0.0)
    out = out.reshape(n, C, 14, 2, 14, 2).max(axis=(3, 5))
    feat = out.reshape(n, FEAT)
    h1 = jnp.maximum(jnp.dot(feat, params["w1"], precision=hp) + params["b1"], 0.0)
    h2 = jnp.maximum(jnp.dot(h1, params["w2"], precision=hp) + params["b2"], 0.0)
    m = h2.mean(axis=0)
    h3 = jnp.maximum(jnp.dot(m, params["w3"], precision=hp) + params["b3"][0], 0.0)
    return jnp.dot(h3, params["w4"], precision=hp) + params["b4"][0]


if __name__ == "__main__":
    config_params = {"embedding_size": 32}
    key = jax.random.PRNGKey(0)
    kx, kp = jax.random.split(key)
    x = jax.random.normal(kx, (8, 1, 28, 28), jnp.float32)   # NCHW MNIST-shaped batch
    params = init_params(kp, config_params["embedding_size"])
    prepped = prepare_params(params)                         # one-time repack

    fwd = jax.jit(task_encoder_mnist_forward)
    out = jax.block_until_ready(fwd(x, prepped))
    ref = jax.block_until_ready(reference_forward(x, params))

    assert out.shape == (config_params["embedding_size"],), out.shape
    err = float(jnp.max(jnp.abs(out - ref)))
    assert err < 7.5e-2, f"max abs error too large: {err}"
    print("KERNEL_OK")
</pallas_src>

<mosaic_0001>
module attributes {stable_mosaic.version = 11 : i64} {
  func.func @_task_encoder_kernel(%arg0: i32, %arg1: memref<224x128xbf16, #tpu.memory_space<vmem>>, %arg2: memref<128x1024xbf16, #tpu.memory_space<vmem>>, %arg3: memref<1x32xf32, #tpu.memory_space<vmem>>, %arg4: memref<1x32xf32, #tpu.memory_space<vmem>>, %arg5: memref<2x512x128xbf16, #tpu.memory_space<vmem>>, %arg6: memref<1x128xf32, #tpu.memory_space<vmem>>, %arg7: memref<128x128xf32, #tpu.memory_space<vmem>>, %arg8: memref<1x128xf32, #tpu.memory_space<vmem>>, %arg9: memref<128x128xf32, #tpu.memory_space<vmem>>, %arg10: memref<1x128xf32, #tpu.memory_space<vmem>>, %arg11: memref<128x32xf32, #tpu.memory_space<vmem>>, %arg12: memref<1x32xf32, #tpu.memory_space<vmem>>, %arg13: memref<1x32xf32, #tpu.memory_space<vmem>>, %arg14: memref<28x8x1024xbf16, #tpu.memory_space<vmem>>, %arg15: memref<8x128xf32, #tpu.memory_space<vmem>>) attributes {dimension_semantics = [#tpu.dimension_semantics<arbitrary>], iteration_bounds = array<i64: 8>, scalar_prefetch = 0 : i64, scratch_operands = 2 : i64, tpu.core_type = #tpu.core_type<tc>, window_params = [{pipeline_mode = #tpu.pipeline_mode<synchronous>, transform_indices = @transform_0, window_bounds = array<i64: 224, 128>}, {pipeline_mode = #tpu.pipeline_mode<synchronous>, transform_indices = @transform_1, window_bounds = array<i64: 128, 1024>}, {pipeline_mode = #tpu.pipeline_mode<synchronous>, transform_indices = @transform_2, window_bounds = array<i64: 1, 32>}, {pipeline_mode = #tpu.pipeline_mode<synchronous>, transform_indices = @transform_3, window_bounds = array<i64: 1, 32>}, {transform_indices = @transform_4, window_bounds = array<i64: 2, 512, 128>}, {pipeline_mode = #tpu.pipeline_mode<synchronous>, transform_indices = @transform_5, window_bounds = array<i64: 1, 128>}, {pipeline_mode = #tpu.pipeline_mode<synchronous>, transform_indices = @transform_6, window_bounds = array<i64: 128, 128>}, {pipeline_mode = #tpu.pipeline_mode<synchronous>, transform_indices = @transform_7, window_bounds = array<i64: 1, 128>}, {pipeline_mode = #tpu.pipeline_mode<synchronous>, transform_indices = @transform_8, window_bounds = array<i64: 128, 128>}, {pipeline_mode = #tpu.pipeline_mode<synchronous>, transform_indices = @transform_9, window_bounds = array<i64: 1, 128>}, {pipeline_mode = #tpu.pipeline_mode<synchronous>, transform_indices = @transform_10, window_bounds = array<i64: 128, 32>}, {pipeline_mode = #tpu.pipeline_mode<synchronous>, transform_indices = @transform_11, window_bounds = array<i64: 1, 32>}, {pipeline_mode = #tpu.pipeline_mode<synchronous>, transform_indices = @transform_12, window_bounds = array<i64: 1, 32>}]} {
    %c0_i32 = arith.constant 0 : i32
    %0 = arith.cmpi eq, %arg0, %c0_i32 : i32
    %1 = arith.extui %0 : i1 to i32
    %c0_i32_0 = arith.constant 0 : i32
    %2 = arith.cmpi ne, %1, %c0_i32_0 : i32
    scf.if %2 {
      %c0 = arith.constant 0 : index
      %c0_4 = arith.constant 0 : index
      %9 = vector.load %arg1[%c0, %c0_4] : memref<224x128xbf16, #tpu.memory_space<vmem>>, vector<224x128xbf16>
      %c0_5 = arith.constant 0 : index
      %c0_6 = arith.constant 0 : index
      %10 = vector.load %arg2[%c0_5, %c0_6] : memref<128x1024xbf16, #tpu.memory_space<vmem>>, vector<128x1024xbf16>
      %cst = arith.constant dense<0.000000e+00> : vector<224x1024xf32>
      %11 = tpu.matmul %9, %10, %cst {dimension_numbers = #tpu.dot_dimension_numbers<[1], [0], [0], [1], [0, 0, 1, 1], [], []>} : vector<224x128xbf16>, vector<128x1024xbf16>, vector<224x1024xf32> -> vector<224x1024xf32>
      %cst_7 = arith.constant dense<0.000000e+00> : vector<1024xf32>
      %12 = vector.multi_reduction <add>, %11, %cst_7 [0] : vector<224x1024xf32> to vector<1024xf32>
      %13 = vector.shape_cast %12 : vector<1024xf32> to vector<1x1024xf32>
      %14 = vector.extract_strided_slice %13 {offsets = [0, 0], sizes = [1, 512], strides = [1, 1]} : vector<1x1024xf32> to vector<1x512xf32>
      %15 = vector.extract_strided_slice %13 {offsets = [0, 512], sizes = [1, 512], strides = [1, 1]} : vector<1x1024xf32> to vector<1x512xf32>
      %16 = arith.addf %14, %15 : vector<1x512xf32>
      %17 = vector.extract_strided_slice %16 {offsets = [0, 0], sizes = [1, 256], strides = [1, 1]} : vector<1x512xf32> to vector<1x256xf32>
      %18 = vector.extract_strided_slice %16 {offsets = [0, 256], sizes = [1, 256], strides = [1, 1]} : vector<1x512xf32> to vector<1x256xf32>
      %19 = arith.addf %17, %18 : vector<1x256xf32>
      %20 = vector.extract_strided_slice %19 {offsets = [0, 0], sizes = [1, 128], strides = [1, 1]} : vector<1x256xf32> to vector<1x128xf32>
      %21 = vector.extract_strided_slice %19 {offsets = [0, 128], sizes = [1, 128], strides = [1, 1]} : vector<1x256xf32> to vector<1x128xf32>
      %22 = arith.addf %20, %21 : vector<1x128xf32>
      %23 = vector.extract_strided_slice %22 {offsets = [0, 0], sizes = [1, 64], strides = [1, 1]} : vector<1x128xf32> to vector<1x64xf32>
      %24 = vector.extract_strided_slice %22 {offsets = [0, 64], sizes = [1, 64], strides = [1, 1]} : vector<1x128xf32> to vector<1x64xf32>
      %25 = arith.addf %23, %24 : vector<1x64xf32>
      %26 = vector.extract_strided_slice %25 {offsets = [0, 0], sizes = [1, 32], strides = [1, 1]} : vector<1x64xf32> to vector<1x32xf32>
      %27 = vector.extract_strided_slice %25 {offsets = [0, 32], sizes = [1, 32], strides = [1, 1]} : vector<1x64xf32> to vector<1x32xf32>
      %28 = arith.addf %26, %27 : vector<1x32xf32>
      %29 = arith.mulf %11, %11 : vector<224x1024xf32>
      %cst_8 = arith.constant dense<0.000000e+00> : vector<1024xf32>
      %30 = vector.multi_reduction <add>, %29, %cst_8 [0] : vector<224x1024xf32> to vector<1024xf32>
      %31 = vector.shape_cast %30 : vector<1024xf32> to vector<1x1024xf32>
      %32 = vector.extract_strided_slice %31 {offsets = [0, 0], sizes = [1, 512], strides = [1, 1]} : vector<1x1024xf32> to vector<1x512xf32>
      %33 = vector.extract_strided_slice %31 {offsets = [0, 512], sizes = [1, 512], strides = [1, 1]} : vector<1x1024xf32> to vector<1x512xf32>
      %34 = arith.addf %32, %33 : vector<1x512xf32>
      %35 = vector.extract_strided_slice %34 {offsets = [0, 0], sizes = [1, 256], strides = [1, 1]} : vector<1x512xf32> to vector<1x256xf32>
      %36 = vector.extract_strided_slice %34 {offsets = [0, 256], sizes = [1, 256], strides = [1, 1]} : vector<1x512xf32> to vector<1x256xf32>
      %37 = arith.addf %35, %36 : vector<1x256xf32>
      %38 = vector.extract_strided_slice %37 {offsets = [0, 0], sizes = [1, 128], strides = [1, 1]} : vector<1x256xf32> to vector<1x128xf32>
      %39 = vector.extract_strided_slice %37 {offsets = [0, 128], sizes = [1, 128], strides = [1, 1]} : vector<1x256xf32> to vector<1x128xf32>
      %40 = arith.addf %38, %39 : vector<1x128xf32>
      %41 = vector.extract_strided_slice %40 {offsets = [0, 0], sizes = [1, 64], strides = [1, 1]} : vector<1x128xf32> to vector<1x64xf32>
      %42 = vector.extract_strided_slice %40 {offsets = [0, 64], sizes = [1, 64], strides = [1, 1]} : vector<1x128xf32> to vector<1x64xf32>
      %43 = arith.addf %41, %42 : vector<1x64xf32>
      %44 = vector.extract_strided_slice %43 {offsets = [0, 0], sizes = [1, 32], strides = [1, 1]} : vector<1x64xf32> to vector<1x32xf32>
      %45 = vector.extract_strided_slice %43 {offsets = [0, 32], sizes = [1, 32], strides = [1, 1]} : vector<1x64xf32> to vector<1x32xf32>
      %46 = arith.addf %44, %45 : vector<1x32xf32>
      %cst_9 = arith.constant 6.272000e+03 : f32
      %47 = vector.broadcast %cst_9 : f32 to vector<1x32xf32>
      %48 = arith.divf %28, %47 : vector<1x32xf32>
      %cst_10 = arith.constant 6.272000e+03 : f32
      %49 = vector.broadcast %cst_10 : f32 to vector<1x32xf32>
      %50 = arith.divf %46, %49 : vector<1x32xf32>
      %51 = arith.mulf %48, %48 : vector<1x32xf32>
      %52 = arith.subf %50, %51 : vector<1x32xf32>
      %c0_11 = arith.constant 0 : index
      %c0_12 = arith.constant 0 : index
      %53 = vector.load %arg3[%c0_11, %c0_12] : memref<1x32xf32, #tpu.memory_space<vmem>>, vector<1x32xf32>
      %cst_13 = arith.constant 9.99999974E-6 : f32
      %54 = vector.broadcast %cst_13 : f32 to vector<1x32xf32>
      %55 = arith.addf %52, %54 : vector<1x32xf32>
      %56 = math.rsqrt %55 : vector<1x32xf32>
      %57 = arith.mulf %53, %56 : vector<1x32xf32>
      %c0_14 = arith.constant 0 : index
      %c0_15 = arith.constant 0 : index
      %58 = vector.load %arg4[%c0_14, %c0_15] : memref<1x32xf32, #tpu.memory_space<vmem>>, vector<1x32xf32>
      %59 = arith.mulf %48, %57 : vector<1x32xf32>
      %60 = arith.subf %58, %59 : vector<1x32xf32>
      %61 = tpu.concatenate %57, %57, %57, %57, %57, %57, %57, %57, %57, %57, %57, %57, %57, %57, %57, %57, %57, %57, %57, %57, %57, %57, %57, %57, %57, %57, %57, %57, %57, %57, %57, %57 in 1 : vector<1x32xf32>, vector<1x32xf32>, vector<1x32xf32>, vector<1x32xf32>, vector<1x32xf32>, vector<1x32xf32>, vector<1x32xf32>, vector<1x32xf32>, vector<1x32xf32>, vector<1x32xf32>, vector<1x32xf32>, vector<1x32xf32>, vector<1x32xf32>, vector<1x32xf32>, vector<1x32xf32>, vector<1x32xf32>, vector<1x32xf32>, vector<1x32xf32>, vector<1x32xf32>, vector<1x32xf32>, vector<1x32xf32>, vector<1x32xf32>, vector<1x32xf32>, vector<1x32xf32>, vector<1x32xf32>, vector<1x32xf32>, vector<1x32xf32>, vector<1x32xf32>, vector<1x32xf32>, vector<1x32xf32>, vector<1x32xf32>, vector<1x32xf32> -> vector<1x1024xf32>
      %62 = tpu.concatenate %60, %60, %60, %60, %60, %60, %60, %60, %60, %60, %60, %60, %60, %60, %60, %60, %60, %60, %60, %60, %60, %60, %60, %60, %60, %60, %60, %60, %60, %60, %60, %60 in 1 : vector<1x32xf32>, vector<1x32xf32>, vector<1x32xf32>, vector<1x32xf32>, vector<1x32xf32>, vector<1x32xf32>, vector<1x32xf32>, vector<1x32xf32>, vector<1x32xf32>, vector<1x32xf32>, vector<1x32xf32>, vector<1x32xf32>, vector<1x32xf32>, vector<1x32xf32>, vector<1x32xf32>, vector<1x32xf32>, vector<1x32xf32>, vector<1x32xf32>, vector<1x32xf32>, vector<1x32xf32>, vector<1x32xf32>, vector<1x32xf32>, vector<1x32xf32>, vector<1x32xf32>, vector<1x32xf32>, vector<1x32xf32>, vector<1x32xf32>, vector<1x32xf32>, vector<1x32xf32>, vector<1x32xf32>, vector<1x32xf32>, vector<1x32xf32> -> vector<1x1024xf32>
      %63 = vector.broadcast %61 : vector<1x1024xf32> to vector<224x1024xf32>
      %64 = arith.mulf %11, %63 : vector<224x1024xf32>
      %65 = vector.broadcast %62 : vector<1x1024xf32> to vector<224x1024xf32>
      %66 = arith.addf %64, %65 : vector<224x1024xf32>
      %cst_16 = arith.constant 0.000000e+00 : f32
      %67 = vector.broadcast %cst_16 : f32 to vector<224x1024xf32>
      %68 = arith.maximumf %66, %67 : vector<224x1024xf32>
      %69 = arith.truncf %68 : vector<224x1024xf32> to vector<224x1024xbf16>
      %70 = vector.shape_cast %69 : vector<224x1024xbf16> to vector<28x8x1024xbf16>
      %c0_17 = arith.constant 0 : index
      %c0_18 = arith.constant 0 : index
      %c0_19 = arith.constant 0 : index
      %71 = vector.load %arg14[%c0_17, %c0_18, %c0_19] : memref<28x8x1024xbf16, #tpu.memory_space<vmem>>, vector<28x8x1024xbf16>
      tpu.vector_store %arg14[%c0_17, %c0_18, %c0_19], %70 {strides = array<i32>} : memref<28x8x1024xbf16, #tpu.memory_space<vmem>>, vector<28x8x1024xbf16>,
      %cst_20 = arith.constant 0.000000e+00 : f32
      %72 = vector.broadcast %cst_20 : f32 to vector<8x128xf32>
      %c0_21 = arith.constant 0 : index
      %c0_22 = arith.constant 0 : index
      %73 = vector.load %arg15[%c0_21, %c0_22] : memref<8x128xf32, #tpu.memory_space<vmem>>, vector<8x128xf32>
      tpu.vector_store %arg15[%c0_21, %c0_22], %72 {strides = array<i32>} : memref<8x128xf32, #tpu.memory_space<vmem>>, vector<8x128xf32>,
    } else {
    }
    %c0_i32_1 = arith.constant 0 : i32
    %3 = arith.cmpi sgt, %arg0, %c0_i32_1 : i32
    %4 = arith.extui %3 : i1 to i32
    %c0_i32_2 = arith.constant 0 : i32
    %5 = arith.cmpi ne, %4, %c0_i32_2 : i32
    scf.if %5 {
      %cst = arith.constant 0.000000e+00 : f32
      %9 = vector.broadcast %cst : f32 to vector<8x128xf32>
      %c1_i32 = arith.constant 1 : i32
      %10 = arith.subi %arg0, %c1_i32 : i32
      %c2_i32 = arith.constant 2 : i32
      %11 = arith.muli %10, %c2_i32 : i32
      %c0_i32_4 = arith.constant 0 : i32
      %12 = arith.addi %11, %c0_i32_4 : i32
      %c2_i32_5 = arith.constant 2 : i32
      %13 = arith.muli %c2_i32_5, %12 : i32
      %14 = arith.index_cast %13 : i32 to index
      %c0 = arith.constant 0 : index
      %c0_6 = arith.constant 0 : index
      %15 = vector.load %arg14[%14, %c0, %c0_6] : memref<28x8x1024xbf16, #tpu.memory_space<vmem>>, vector<1x8x1024xbf16>
      %16 = vector.shape_cast %15 : vector<1x8x1024xbf16> to vector<8x1024xbf16>
      %c2_i32_7 = arith.constant 2 : i32
      %17 = arith.muli %c2_i32_7, %12 : i32
      %c1_i32_8 = arith.constant 1 : i32
      %18 = arith.addi %17, %c1_i32_8 : i32
      %19 = arith.index_cast %18 : i32 to index
      %c0_9 = arith.constant 0 : index
      %c0_10 = arith.constant 0 : index
      %20 = vector.load %arg14[%19, %c0_9, %c0_10] : memref<28x8x1024xbf16, #tpu.memory_space<vmem>>, vector<1x8x1024xbf16>
      %21 = vector.shape_cast %20 : vector<1x8x1024xbf16> to vector<8x1024xbf16>
      %22 = arith.maximumf %16, %21 : vector<8x1024xbf16>
      %23 = vector.extract_strided_slice %22 {offsets = [0, 0], sizes = [8, 512], strides = [1, 1]} : vector<8x1024xbf16> to vector<8x512xbf16>
      %24 = vector.extract_strided_slice %22 {offsets = [0, 512], sizes = [8, 512], strides = [1, 1]} : vector<8x1024xbf16> to vector<8x512xbf16>
      %25 = arith.maximumf %23, %24 : vector<8x512xbf16>
      %c0_11 = arith.constant 0 : index
      %c0_12 = arith.constant 0 : index
      %c0_13 = arith.constant 0 : index
      %26 = vector.load %arg5[%c0_11, %c0_12, %c0_13] : memref<2x512x128xbf16, #tpu.memory_space<vmem>>, vector<1x512x128xbf16>
      %27 = vector.shape_cast %26 : vector<1x512x128xbf16> to vector<512x128xbf16>
      %cst_14 = arith.constant dense<0.000000e+00> : vector<8x128xf32>
      %28 = tpu.matmul %25, %27, %cst_14 {dimension_numbers = #tpu.dot_dimension_numbers<[1], [0], [0], [1], [0, 0, 1, 1], [], []>} : vector<8x512xbf16>, vector<512x128xbf16>, vector<8x128xf32> -> vector<8x128xf32>
      %29 = arith.addf %9, %28 : vector<8x128xf32>
      %c1_i32_15 = arith.constant 1 : i32
      %30 = arith.subi %arg0, %c1_i32_15 : i32
      %c2_i32_16 = arith.constant 2 : i32
      %31 = arith.muli %30, %c2_i32_16 : i32
      %c1_i32_17 = arith.constant 1 : i32
      %32 = arith.addi %31, %c1_i32_17 : i32
      %c2_i32_18 = arith.constant 2 : i32
      %33 = arith.muli %c2_i32_18, %32 : i32
      %34 = arith.index_cast %33 : i32 to index
      %c0_19 = arith.constant 0 : index
      %c0_20 = arith.constant 0 : index
      %35 = vector.load %arg14[%34, %c0_19, %c0_20] : memref<28x8x1024xbf16, #tpu.memory_space<vmem>>, vector<1x8x1024xbf16>
      %36 = vector.shape_cast %35 : vector<1x8x1024xbf16> to vector<8x1024xbf16>
      %c2_i32_21 = arith.constant 2 : i32
      %37 = arith.muli %c2_i32_21, %32 : i32
      %c1_i32_22 = arith.constant 1 : i32
      %38 = arith.addi %37, %c1_i32_22 : i32
      %39 = arith.index_cast %38 : i32 to index
      %c0_23 = arith.constant 0 : index
      %c0_24 = arith.constant 0 : index
      %40 = vector.load %arg14[%39, %c0_23, %c0_24] : memref<28x8x1024xbf16, #tpu.memory_space<vmem>>, vector<1x8x1024xbf16>
      %41 = vector.shape_cast %40 : vector<1x8x1024xbf16> to vector<8x1024xbf16>
      %42 = arith.maximumf %36, %41 : vector<8x1024xbf16>
      %43 = vector.extract_strided_slice %42 {offsets = [0, 0], sizes = [8, 512], strides = [1, 1]} : vector<8x1024xbf16> to vector<8x512xbf16>
      %44 = vector.extract_strided_slice %42 {offsets = [0, 512], sizes = [8, 512], strides = [1, 1]} : vector<8x1024xbf16> to vector<8x512xbf16>
      %45 = arith.maximumf %43, %44 : vector<8x512xbf16>
      %c1 = arith.constant 1 : index
      %c0_25 = arith.constant 0 : index
      %c0_26 = arith.constant 0 : index
      %46 = vector.load %arg5[%c1, %c0_25, %c0_26] : memref<2x512x128xbf16, #tpu.memory_space<vmem>>, vector<1x512x128xbf16>
      %47 = vector.shape_cast %46 : vector<1x512x128xbf16> to vector<512x128xbf16>
      %cst_27 = arith.constant dense<0.000000e+00> : vector<8x128xf32>
      %48 = tpu.matmul %45, %47, %cst_27 {dimension_numbers = #tpu.dot_dimension_numbers<[1], [0], [0], [1], [0, 0, 1, 1], [], []>} : vector<8x512xbf16>, vector<512x128xbf16>, vector<8x128xf32> -> vector<8x128xf32>
      %49 = arith.addf %29, %48 : vector<8x128xf32>
      %c0_28 = arith.constant 0 : index
      %c0_29 = arith.constant 0 : index
      %50 = vector.load %arg15[%c0_28, %c0_29] : memref<8x128xf32, #tpu.memory_space<vmem>>, vector<8x128xf32>
      %51 = arith.addf %50, %49 : vector<8x128xf32>
      %c0_30 = arith.constant 0 : index
      %c0_31 = arith.constant 0 : index
      %52 = vector.load %arg15[%c0_30, %c0_31] : memref<8x128xf32, #tpu.memory_space<vmem>>, vector<8x128xf32>
      tpu.vector_store %arg15[%c0_30, %c0_31], %51 {strides = array<i32>} : memref<8x128xf32, #tpu.memory_space<vmem>>, vector<8x128xf32>,
    } else {
    }
    %c7_i32 = arith.constant 7 : i32
    %6 = arith.cmpi eq, %arg0, %c7_i32 : i32
    %7 = arith.extui %6 : i1 to i32
    %c0_i32_3 = arith.constant 0 : i32
    %8 = arith.cmpi ne, %7, %c0_i32_3 : i32
    scf.if %8 {
      %c0 = arith.constant 0 : index
      %c0_4 = arith.constant 0 : index
      %9 = vector.load %arg15[%c0, %c0_4] : memref<8x128xf32, #tpu.memory_space<vmem>>, vector<8x128xf32>
      %c0_5 = arith.constant 0 : index
      %c0_6 = arith.constant 0 : index
      %10 = vector.load %arg6[%c0_5, %c0_6] : memref<1x128xf32, #tpu.memory_space<vmem>>, vector<1x128xf32>
      %11 = vector.broadcast %10 : vector<1x128xf32> to vector<8x128xf32>
      %12 = arith.addf %9, %11 : vector<8x128xf32>
      %cst = arith.constant 0.000000e+00 : f32
      %13 = vector.broadcast %cst : f32 to vector<8x128xf32>
      %14 = arith.maximumf %12, %13 : vector<8x128xf32>
      %c0_7 = arith.constant 0 : index
      %c0_8 = arith.constant 0 : index
      %15 = vector.load %arg7[%c0_7, %c0_8] : memref<128x128xf32, #tpu.memory_space<vmem>>, vector<128x128xf32>
      %cst_9 = arith.constant dense<0.000000e+00> : vector<8x128xf32>
      %16 = tpu.matmul %14, %15, %cst_9 {dimension_numbers = #tpu.dot_dimension_numbers<[1], [0], [0], [1], [0, 0, 1, 1], [], []>} : vector<8x128xf32>, vector<128x128xf32>, vector<8x128xf32> -> vector<8x128xf32>
      %c0_10 = arith.constant 0 : index
      %c0_11 = arith.constant 0 : index
      %17 = vector.load %arg8[%c0_10, %c0_11] : memref<1x128xf32, #tpu.memory_space<vmem>>, vector<1x128xf32>
      %18 = vector.broadcast %17 : vector<1x128xf32> to vector<8x128xf32>
      %19 = arith.addf %16, %18 : vector<8x128xf32>
      %cst_12 = arith.constant 0.000000e+00 : f32
      %20 = vector.broadcast %cst_12 : f32 to vector<8x128xf32>
      %21 = arith.maximumf %19, %20 : vector<8x128xf32>
      %cst_13 = arith.constant dense<0.000000e+00> : vector<128xf32>
      %22 = vector.multi_reduction <add>, %21, %cst_13 [0] : vector<8x128xf32> to vector<128xf32>
      %23 = vector.shape_cast %22 : vector<128xf32> to vector<1x128xf32>
      %cst_14 = arith.constant 8.000000e+00 : f32
      %24 = vector.broadcast %cst_14 : f32 to vector<1x128xf32>
      %25 = arith.divf %23, %24 : vector<1x128xf32>
      %c0_15 = arith.constant 0 : index
      %c0_16 = arith.constant 0 : index
      %26 = vector.load %arg9[%c0_15, %c0_16] : memref<128x128xf32, #tpu.memory_space<vmem>>, vector<128x128xf32>
      %cst_17 = arith.constant dense<0.000000e+00> : vector<1x128xf32>
      %27 = tpu.matmul %25, %26, %cst_17 {dimension_numbers = #tpu.dot_dimension_numbers<[1], [0], [0], [1], [0, 0, 1, 1], [], []>} : vector<1x128xf32>, vector<128x128xf32>, vector<1x128xf32> -> vector<1x128xf32>
      %c0_18 = arith.constant 0 : index
      %c0_19 = arith.constant 0 : index
      %28 = vector.load %arg10[%c0_18, %c0_19] : memref<1x128xf32, #tpu.memory_space<vmem>>, vector<1x128xf32>
      %29 = arith.addf %27, %28 : vector<1x128xf32>
      %cst_20 = arith.constant 0.000000e+00 : f32
      %30 = vector.broadcast %cst_20 : f32 to vector<1x128xf32>
      %31 = arith.maximumf %29, %30 : vector<1x128xf32>
      %c0_21 = arith.constant 0 : index
      %c0_22 = arith.constant 0 : index
      %32 = vector.load %arg11[%c0_21, %c0_22] : memref<128x32xf32, #tpu.memory_space<vmem>>, vector<128x32xf32>
      %cst_23 = arith.constant dense<0.000000e+00> : vector<1x32xf32>
      %33 = tpu.matmul %31, %32, %cst_23 {dimension_numbers = #tpu.dot_dimension_numbers<[1], [0], [0], [1], [0, 0, 1, 1], [], []>} : vector<1x128xf32>, vector<128x32xf32>, vector<1x32xf32> -> vector<1x32xf32>
      %c0_24 = arith.constant 0 : index
      %c0_25 = arith.constant 0 : index
      %34 = vector.load %arg12[%c0_24, %c0_25] : memref<1x32xf32, #tpu.memory_space<vmem>>, vector<1x32xf32>
      %35 = arith.addf %33, %34 : vector<1x32xf32>
      %c0_26 = arith.constant 0 : index
      %c0_27 = arith.constant 0 : index
      %36 = vector.load %arg13[%c0_26, %c0_27] : memref<1x32xf32, #tpu.memory_space<vmem>>, vector<1x32xf32>
      tpu.vector_store %arg13[%c0_26, %c0_27], %35 {strides = array<i32>} : memref<1x32xf32, #tpu.memory_space<vmem>>, vector<1x32xf32>,
    } else {
    }
    return
  }
  func.func @transform_0(%arg0: i32) -> (i32, i32) {
    %c0_i32 = arith.constant 0 : i32
    %c0_i32_0 = arith.constant 0 : i32
    %c0_i32_1 = arith.constant 0 : i32
    return %c0_i32, %c0_i32_0 : i32, i32
  }
  func.func @transform_1(%arg0: i32) -> (i32, i32) {
    %c0_i32 = arith.constant 0 : i32
    %c0_i32_0 = arith.constant 0 : i32
    %c0_i32_1 = arith.constant 0 : i32
    return %c0_i32, %c0_i32_0 : i32, i32
  }
  func.func @transform_2(%arg0: i32) -> (i32, i32) {
    %c0_i32 = arith.constant 0 : i32
    %c0_i32_0 = arith.constant 0 : i32
    %c0_i32_1 = arith.constant 0 : i32
    return %c0_i32, %c0_i32_0 : i32, i32
  }
  func.func @transform_3(%arg0: i32) -> (i32, i32) {
    %c0_i32 = arith.constant 0 : i32
    %c0_i32_0 = arith.constant 0 : i32
    %c0_i32_1 = arith.constant 0 : i32
    return %c0_i32, %c0_i32_0 : i32, i32
  }
  func.func @transform_4(%arg0: i32) -> (i32, i32, i32) {
    %c1_i32 = arith.constant 1 : i32
    %0 = arith.subi %arg0, %c1_i32 : i32
    %c0_i32 = arith.constant 0 : i32
    %1 = arith.maxsi %0, %c0_i32 : i32
    %c0_i32_0 = arith.constant 0 : i32
    %c0_i32_1 = arith.constant 0 : i32
    %c0_i32_2 = arith.constant 0 : i32
    return %1, %c0_i32_0, %c0_i32_1 : i32, i32, i32
  }
  func.func @transform_5(%arg0: i32) -> (i32, i32) {
    %c0_i32 = arith.constant 0 : i32
    %c0_i32_0 = arith.constant 0 : i32
    %c0_i32_1 = arith.constant 0 : i32
    return %c0_i32, %c0_i32_0 : i32, i32
  }
  func.func @transform_6(%arg0: i32) -> (i32, i32) {
    %c0_i32 = arith.constant 0 : i32
    %c0_i32_0 = arith.constant 0 : i32
    %c0_i32_1 = arith.constant 0 : i32
    return %c0_i32, %c0_i32_0 : i32, i32
  }
  func.func @transform_7(%arg0: i32) -> (i32, i32) {
    %c0_i32 = arith.constant 0 : i32
    %c0_i32_0 = arith.constant 0 : i32
    %c0_i32_1 = arith.constant 0 : i32
    return %c0_i32, %c0_i32_0 : i32, i32
  }
  func.func @transform_8(%arg0: i32) -> (i32, i32) {
    %c0_i32 = arith.constant 0 : i32
    %c0_i32_0 = arith.constant 0 : i32
    %c0_i32_1 = arith.constant 0 : i32
    return %c0_i32, %c0_i32_0 : i32, i32
  }
  func.func @transform_9(%arg0: i32) -> (i32, i32) {
    %c0_i32 = arith.constant 0 : i32
    %c0_i32_0 = arith.constant 0 : i32
    %c0_i32_1 = arith.constant 0 : i32
    return %c0_i32, %c0_i32_0 : i32, i32
  }
  func.func @transform_10(%arg0: i32) -> (i32, i32) {
    %c0_i32 = arith.constant 0 : i32
    %c0_i32_0 = arith.constant 0 : i32
    %c0_i32_1 = arith.constant 0 : i32
    return %c0_i32, %c0_i32_0 : i32, i32
  }
  func.func @transform_11(%arg0: i32) -> (i32, i32) {
    %c0_i32 = arith.constant 0 : i32
    %c0_i32_0 = arith.constant 0 : i32
    %c0_i32_1 = arith.constant 0 : i32
    return %c0_i32, %c0_i32_0 : i32, i32
  }
  func.func @transform_12(%arg0: i32) -> (i32, i32) {
    %c0_i32 = arith.constant 0 : i32
    %c0_i32_0 = arith.constant 0 : i32
    %c0_i32_1 = arith.constant 0 : i32
    return %c0_i32, %c0_i32_0 : i32, i32
  }
}

</mosaic_0001>

<bundles_post_ra>
// kernel: task_encoder_mnist_forward.1
= control target key start
LH: loop header
LB: loop body
LE: loop exit
PB: predicated region body
PF: predicated region fallthrough
CT: control target
= control target key end

     0   :  { %s11167_s0 = inlined_call_operand.vmem [shape: bf16[224,128], index: 0, kind: input, shape index: {}]   ;;  %s11168_s1 = inlined_call_operand.hbm [shape: bf16[128,1024], index: 1, kind: input, shape index: {}]   ;;  %s11169_s2 = inlined_call_operand.hbm [shape: f32[1,32], index: 2, kind: input, shape index: {}]   ;;  %s11170_s3 = inlined_call_operand.hbm [shape: f32[1,32], index: 3, kind: input, shape index: {}]   ;;  %s11171_s4 = inlined_call_operand.hbm [shape: bf16[14,512,128], index: 4, kind: input, shape index: {}]   ;;  %s11172_s5 = inlined_call_operand.hbm [shape: f32[1,128], index: 5, kind: input, shape index: {}]   ;;  %s11173_s6 = inlined_call_operand.hbm [shape: f32[128,128], index: 6, kind: input, shape index: {}]   ;;  %s11174_s7 = inlined_call_operand.hbm [shape: f32[1,128], index: 7, kind: input, shape index: {}]   ;;  %s11175_s8 = inlined_call_operand.hbm [shape: f32[128,128], index: 8, kind: input, shape index: {}]   ;;  %s11176_s9 = inlined_call_operand.hbm [shape: f32[1,128], index: 9, kind: input, shape index: {}]   ;;  %s11177_s10 = inlined_call_operand.vmem [shape: f32[128,32], index: 10, kind: input, shape index: {}]   ;;  %s11178_s11 = inlined_call_operand.hbm [shape: f32[1,32], index: 11, kind: input, shape index: {}]   ;;  %s11179_s12 = inlined_call_operand.hbm [shape: f32[1,32], index: 12, kind: output, shape index: {}]  }
   0x1   :  { %11572 = sst [smem:[#allocation233_spill]] %s11167_s0 }
   0x2   :  { %11573 = sst [smem:[#allocation234_spill]] %s11169_s2 }
   0x3   :  { %11574 = sst [smem:[#allocation235_spill]] %s11172_s5 }
   0x4   :  { %11575 = sst [smem:[#allocation236_spill]] %s11177_s10 }
   0x5   :  { %11576 = sst [smem:[#allocation237_spill]] %s11179_s12 }
   0x6   :  { %17 = vsyncpa [#allocation5], 0 }
   0x7   :  { %18 = vsyncpa [#allocation8], 0 }
   0x8   :  { %19 = vsyncpa [#allocation11], 0 }
   0x9   :  { %21 = vsyncpa [#allocation11 + $0x1], 0 }
   0xa   :  { %22 = vsyncpa [#allocation14], 0 }
   0xb   :  { %23 = vsyncpa [#allocation17], 0 }
   0xc   :  { %24 = vsyncpa [#allocation20], 0 }
   0xd   :  { %25 = vsyncpa [#allocation6], 0  ;;  %s6771_s21 = smov 0   ;;  %s6773_s22 = smov 0  }
   0xe   :  { %s6775_s23 = smov 0   ;;  %s6777_s24 = smov 0  }
   0xf LB: > { %s6681_s25 = smov [#allocation7]   ;;  %s6792_s27 = sadd.s32 4294967295, %s6679_s24   ;;  %s6679_s24 = sphi %s6777_s24, %s13102_s24   ;;  %s6675_s23 = sphi %s6775_s23, %s13101_s23   ;;  %s6671_s22 = sphi %s6773_s22, %s13100_s22   ;;  %s6667_s21 = sphi %s6771_s21, %s13099_s21  }
  0x10   : > { %s349_s26 = sshll.u32 %s6681_s25, 4  ;;  %p5257_p0 = scmp.ge.s32.totalorder %s6679_s24, 1  ;;  %s350_s26 = int_to_ptr.vmem [resolvable:$true] %s349_s26 }
  0x11   : > { %p11180_p1 = scmp.eq.s32.totalorder %s6792_s27, 0  ;;  %p320_p2 = scmp.lt.s32.totalorder %s6679_s24, 9 }
  0x12   : > { %s6682_s29 = smov [#allocation12]   ;;  %s6683_s13 = smov [#allocation13]  }
  0x13   : > { %p6798_p4 = pnand %p5257_p0, %p320_p2  ;;  %s371_s30 = sshll.u32 %s6682_s29, 4  ;;  %s6804_s30 = int_to_ptr.vmem [resolvable:$true] %s371_s30 }
  0x14   : > { %s381_s14 = sshll.u32 %s6683_s13, 4  ;;  %s11580_s2 = sld [smem:[#allocation234_spill]]  ;;  %s6812_s14 = int_to_ptr.vmem [resolvable:$true] %s381_s14 }
  0x15   : > { %s11577_s28 = scalar_select %p6798_p4, 1, 0 }
  0x16   : > { %p6120_p5 = pneg %p6798_p4 }
  0x17   : > { %11578 = sst [smem:[#allocation30_spill]] %s11577_s28 }
  0x18   : > { %p6808_p6 = pnand %p6120_p5, %p11180_p1 }
  0x1a   : > { %s6309_s18 = scalar_lea.hbm %s11580_s2, 16  ;;  %p6822_p8 = pneg %p6808_p6 }
  0x1b   : > { %p6310_p7 = scmp.ne.s32.totalorder %s11580_s2, %s6309_s18  ;;  %p6316_p11 = scmp.lt.u32.totalorder %s6309_s18, %s11580_s2 }
  0x1d   : > { %p6312_p9 = pnand %p6822_p8, %p6310_p7 }
  0x1f   : > { %p6313_p10 = pneg %p6312_p9 }
  0x21   : > { %p6318_p12 = pnand %p6316_p11, %p6313_p10 }
  0x23   : > { %6321 = shalt.err (!%p6318_p12)
}
  0x24   : > { %s6322_s16 = scalar_lea.vmem %s350_s26, 16  ;;  %s6329_s17 = scalar_lea.vmem %s350_s26, 32 }
  0x25   : > { %p6323_p13 = scmp.ne.s32.totalorder %s350_s26, %s6322_s16  ;;  %p6330_p5 = scmp.lt.s32.totalorder %s350_s26, %s350_s26 }
  0x26   : > { %p6331_p3 = scmp.lt.s32.totalorder %s6329_s17, %s6322_s16 }
  0x27   : > { %p6325_p0 = pnand %p6323_p13, %p6822_p8 }
  0x28   : > { %p6332_p1 = por %p6331_p3, %p6330_p5 }
  0x29   : > { %p6326_p2 = pneg %p6325_p0 }
  0x2b   : > { %p6333_p4 = pnand %p6332_p1, %p6326_p2 }
  0x2d   : > { %6336 = shalt.err (!%p6333_p4)
}
  0x2e   : > { %6126 = dma.hbm_to_vmem [thread:$0]  (!%p6808_p6), %s11580_s2, 16, %s350_s26, [#allocation8]  }
  0x2f   : > { %s11582_s5 = sld [smem:[#allocation235_spill]] }
  0x35   : > { %s6337_s13 = scalar_lea.hbm %s11582_s5, 16 }
  0x36   : > { %p6338_p7 = scmp.ne.s32.totalorder %s11582_s5, %s6337_s13  ;;  %p6344_p1 = scmp.lt.u32.totalorder %s6337_s13, %s11582_s5 }
  0x38   : > { %p6340_p9 = pnand %p6338_p7, %p6822_p8 }
  0x3a   : > { %p6341_p3 = pneg %p6340_p9 }
  0x3c   : > { %p6346_p4 = pnand %p6344_p1, %p6341_p3 }
  0x3e   : > { %6349 = shalt.err (!%p6346_p4)
}
  0x3f   : > { %s6350_s26 = scalar_lea.vmem %s6804_s30, 16  ;;  %s6357_s10 = scalar_lea.vmem %s6804_s30, 32 }
  0x40   : > { %p6351_p10 = scmp.ne.s32.totalorder %s6804_s30, %s6350_s26  ;;  %p6358_p13 = scmp.lt.s32.totalorder %s6804_s30, %s6804_s30 }
  0x41   : > { %p6359_p0 = scmp.lt.s32.totalorder %s6357_s10, %s6350_s26 }
  0x42   : > { %p6353_p11 = pnand %p6351_p10, %p6822_p8 }
  0x43   : > { %p6360_p2 = por %p6359_p0, %p6358_p13 }
  0x44   : > { %p6354_p12 = pneg %p6353_p11 }
  0x46   : > { %p6361_p5 = pnand %p6360_p2, %p6354_p12 }
  0x48   : > { %6364 = shalt.err (!%p6361_p5)
}
  0x49   : > { %6132 = dma.hbm_to_vmem [thread:$0]  (!%p6808_p6), %s11582_s5, 16, %s6804_s30, [#allocation11]  }
  0x4a   : > { %s6365_s29 = scalar_lea.hbm %s11173_s6, 2048 }
  0x4b   : > { %p6366_p7 = scmp.ne.s32.totalorder %s11173_s6, %s6365_s29  ;;  %p6372_p1 = scmp.lt.u32.totalorder %s6365_s29, %s11173_s6 }
  0x4d   : > { %p6368_p9 = pnand %p6366_p7, %p6822_p8 }
  0x4f   : > { %p6369_p3 = pneg %p6368_p9 }
  0x51   : > { %p6374_p4 = pnand %p6372_p1, %p6369_p3 }
  0x53   : > { %6377 = shalt.err (!%p6374_p4)
}
  0x54   : > { %s6378_s30 = scalar_lea.vmem %s6812_s14, 2048  ;;  %p6386_p13 = scmp.lt.s32.totalorder %s6812_s14, %s6812_s14 }
  0x55   : > { %p6379_p10 = scmp.ne.s32.totalorder %s6812_s14, %s6378_s30  ;;  %p6387_p0 = scmp.lt.s32.totalorder %s6378_s30, %s6378_s30 }
  0x57   : > { %p6381_p11 = pnand %p6379_p10, %p6822_p8  ;;  %p6388_p2 = por %p6387_p0, %p6386_p13 }
  0x59   : > { %p6382_p12 = pneg %p6381_p11 }
  0x5b   : > { %p6389_p5 = pnand %p6388_p2, %p6382_p12 }
  0x5d   : > { %6392 = shalt.err (!%p6389_p5)
}
  0x5e   : > { %s6684_s10 = smov 128   ;;  %s6685_s12 = smov 8  }
  0x5f   : > { %6135 = dma.hbm_to_vmem [thread:$0]  (!%p6808_p6), %s11173_s6, 2048, %s6812_s14, [#allocation14], %s6684_s10, %s6684_s10, %s6685_s12  }
  0x60   : > { %s6686_s18 = smov [#allocation16]   ;;  %s6687_s13 = smov [#allocation4]  }
  0x61   : > { %s405_s29 = sshll.u32 %s6686_s18, 4  ;;  %s335_s16 = sshll.u32 %s6687_s13, 4  ;;  %s406_s29 = int_to_ptr.vmem [resolvable:$true] %s405_s29  ;;  %s336_s16 = int_to_ptr.vmem [resolvable:$true] %s335_s16 }
  0x62   : > { %s6393_s30 = scalar_lea.hbm %s11175_s8, 2048 }
  0x63   : > { %p6394_p7 = scmp.ne.s32.totalorder %s11175_s8, %s6393_s30  ;;  %p6400_p1 = scmp.lt.u32.totalorder %s6393_s30, %s11175_s8 }
  0x65   : > { %p6396_p9 = pnand %p6394_p7, %p6822_p8 }
  0x67   : > { %p6397_p3 = pneg %p6396_p9 }
  0x69   : > { %p6402_p4 = pnand %p6400_p1, %p6397_p3 }
  0x6b   : > { %6405 = shalt.err (!%p6402_p4)
}
  0x6c   : > { %s6406_s14 = scalar_lea.vmem %s406_s29, 2048  ;;  %p6414_p13 = scmp.lt.s32.totalorder %s406_s29, %s406_s29 }
  0x6d   : > { %p6407_p10 = scmp.ne.s32.totalorder %s406_s29, %s6406_s14  ;;  %p6415_p0 = scmp.lt.s32.totalorder %s6406_s14, %s6406_s14 }
  0x6f   : > { %p6409_p11 = pnand %p6407_p10, %p6822_p8  ;;  %p6416_p2 = por %p6415_p0, %p6414_p13 }
  0x71   : > { %p6410_p12 = pneg %p6409_p11 }
  0x73   : > { %p6417_p5 = pnand %p6416_p2, %p6410_p12 }
  0x75   : > { %6420 = shalt.err (!%p6417_p5)
}
  0x76   : > { %6141 = dma.hbm_to_vmem [thread:$0]  (!%p6808_p6), %s11175_s8, 2048, %s406_s29, [#allocation17], %s6684_s10, %s6684_s10, %s6685_s12  }
  0x77   : > { %s6421_s19 = scalar_lea.hbm %s11168_s1, 8192 }
  0x78   : > { %p6422_p7 = scmp.ne.s32.totalorder %s11168_s1, %s6421_s19  ;;  %p6428_p1 = scmp.lt.u32.totalorder %s6421_s19, %s11168_s1 }
  0x7a   : > { %p6424_p9 = pnand %p6422_p7, %p6822_p8 }
  0x7c   : > { %p6425_p3 = pneg %p6424_p9 }
  0x7e   : > { %p6430_p4 = pnand %p6428_p1, %p6425_p3 }
  0x80   : > { %6433 = shalt.err (!%p6430_p4)
}
  0x81   : > { %s6434_s26 = scalar_lea.vmem %s336_s16, 8192  ;;  %p6442_p13 = scmp.lt.s32.totalorder %s336_s16, %s336_s16 }
  0x82   : > { %p6435_p10 = scmp.ne.s32.totalorder %s336_s16, %s6434_s26  ;;  %p6443_p0 = scmp.lt.s32.totalorder %s6434_s26, %s6434_s26 }
  0x84   : > { %p6437_p11 = pnand %p6435_p10, %p6822_p8  ;;  %p6444_p2 = por %p6443_p0, %p6442_p13 }
  0x86   : > { %p6438_p12 = pneg %p6437_p11 }
  0x88   : > { %p6445_p5 = pnand %p6444_p2, %p6438_p12 }
  0x8a   : > { %6448 = shalt.err (!%p6445_p5)
}
  0x8b   : > { %s6688_s10 = smov 512   ;;  %s6689_s12 = smov 32  }
  0x8c   : > { %6123 = dma.hbm_to_vmem [thread:$0]  (!%p6808_p6), %s11168_s1, 8192, %s336_s16, [#allocation5], %s6688_s10, %s6688_s10, %s6689_s12  }
  0x8d   : > { %s6690_s14 = smov [#allocation9]   ;;  %s6691_s5 = smov [#allocation15]  }
  0x8e   : > { %s360_s2 = sshll.u32 %s6690_s14, 4  ;;  %s395_s0 = sshll.u32 %s6691_s5, 4  ;;  %s361_s2 = int_to_ptr.vmem [resolvable:$true] %s360_s2  ;;  %s396_s0 = int_to_ptr.vmem [resolvable:$true] %s395_s0 }
  0x8f   : > { %s6449_s20 = scalar_lea.hbm %s11170_s3, 16 }
  0x90   : > { %p6450_p7 = scmp.ne.s32.totalorder %s11170_s3, %s6449_s20  ;;  %p6456_p1 = scmp.lt.u32.totalorder %s6449_s20, %s11170_s3 }
  0x92   : > { %p6452_p9 = pnand %p6450_p7, %p6822_p8 }
  0x94   : > { %p6453_p3 = pneg %p6452_p9 }
  0x96   : > { %p6458_p4 = pnand %p6456_p1, %p6453_p3 }
  0x98   : > { %6461 = shalt.err (!%p6458_p4)
}
  0x99   : > { %s6462_s16 = scalar_lea.vmem %s361_s2, 16  ;;  %s6469_s10 = scalar_lea.vmem %s361_s2, 32 }
  0x9a   : > { %p6463_p10 = scmp.ne.s32.totalorder %s361_s2, %s6462_s16  ;;  %p6470_p13 = scmp.lt.s32.totalorder %s361_s2, %s361_s2 }
  0x9b   : > { %p6471_p0 = scmp.lt.s32.totalorder %s6469_s10, %s6462_s16 }
  0x9c   : > { %p6465_p11 = pnand %p6463_p10, %p6822_p8 }
  0x9d   : > { %p6472_p2 = por %p6471_p0, %p6470_p13 }
  0x9e   : > { %p6466_p12 = pneg %p6465_p11 }
  0xa0   : > { %p6473_p5 = pnand %p6472_p2, %p6466_p12 }
  0xa2   : > { %6476 = shalt.err (!%p6473_p5)
}
  0xa3   : > { %6129 = dma.hbm_to_vmem [thread:$0]  (!%p6808_p6), %s11170_s3, 16, %s361_s2, [#allocation8]  }
  0xa4   : > { %s6477_s5 = scalar_lea.hbm %s11174_s7, 16 }
  0xa5   : > { %p6478_p7 = scmp.ne.s32.totalorder %s11174_s7, %s6477_s5  ;;  %p6484_p1 = scmp.lt.u32.totalorder %s6477_s5, %s11174_s7 }
  0xa7   : > { %p6480_p9 = pnand %p6478_p7, %p6822_p8 }
  0xa9   : > { %p6481_p3 = pneg %p6480_p9 }
  0xab   : > { %p6486_p4 = pnand %p6484_p1, %p6481_p3 }
  0xad   : > { %6489 = shalt.err (!%p6486_p4)
}
  0xae   : > { %s6490_s13 = scalar_lea.vmem %s396_s0, 16  ;;  %s6497_s2 = scalar_lea.vmem %s396_s0, 32 }
  0xaf   : > { %p6491_p10 = scmp.ne.s32.totalorder %s396_s0, %s6490_s13  ;;  %p6498_p13 = scmp.lt.s32.totalorder %s396_s0, %s396_s0 }
  0xb0   : > { %p6499_p0 = scmp.lt.s32.totalorder %s6497_s2, %s6490_s13 }
  0xb1   : > { %p6493_p11 = pnand %p6491_p10, %p6822_p8 }
  0xb2   : > { %p6500_p2 = por %p6499_p0, %p6498_p13 }
  0xb3   : > { %p6494_p12 = pneg %p6493_p11 }
  0xb5   : > { %p6501_p5 = pnand %p6500_p2, %p6494_p12 }
  0xb7   : > { %6504 = shalt.err (!%p6501_p5)
}
  0xb8   : > { %6138 = dma.hbm_to_vmem [thread:$0]  (!%p6808_p6), %s11174_s7, 16, %s396_s0, [#allocation14]  }
  0xb9   : > { %s6692_s16 = smov [#allocation18]   ;;  %s6693_s12 = smov [#allocation19]  }
  0xba   : > { %s419_s10 = sshll.u32 %s6692_s16, 4  ;;  %s433_s29 = sshll.u32 %s6693_s12, 4  ;;  %s420_s10 = int_to_ptr.vmem [resolvable:$true] %s419_s10  ;;  %s434_s29 = int_to_ptr.vmem [resolvable:$true] %s433_s29 }
  0xbb   : > { %s6505_s5 = scalar_lea.hbm %s11176_s9, 16 }
  0xbc   : > { %p6506_p7 = scmp.ne.s32.totalorder %s11176_s9, %s6505_s5  ;;  %p6512_p1 = scmp.lt.u32.totalorder %s6505_s5, %s11176_s9 }
  0xbe   : > { %p6508_p9 = pnand %p6506_p7, %p6822_p8 }
  0xc0   : > { %p6509_p3 = pneg %p6508_p9 }
  0xc2   : > { %p6514_p4 = pnand %p6512_p1, %p6509_p3 }
  0xc4   : > { %6517 = shalt.err (!%p6514_p4)
}
  0xc5   : > { %s6518_s0 = scalar_lea.vmem %s420_s10, 16  ;;  %s6525_s13 = scalar_lea.vmem %s420_s10, 32 }
  0xc6   : > { %p6519_p10 = scmp.ne.s32.totalorder %s420_s10, %s6518_s0  ;;  %p6526_p13 = scmp.lt.s32.totalorder %s420_s10, %s420_s10 }
  0xc7   : > { %p6527_p0 = scmp.lt.s32.totalorder %s6525_s13, %s6518_s0 }
  0xc8   : > { %p6521_p11 = pnand %p6519_p10, %p6822_p8 }
  0xc9   : > { %p6528_p2 = por %p6527_p0, %p6526_p13 }
  0xca   : > { %p6522_p12 = pneg %p6521_p11 }
  0xcc   : > { %p6529_p5 = pnand %p6528_p2, %p6522_p12 }
  0xce   : > { %6532 = shalt.err (!%p6529_p5)
}
  0xcf   : > { %6144 = dma.hbm_to_vmem [thread:$0]  (!%p6808_p6), %s11176_s9, 16, %s420_s10, [#allocation17]  }
  0xd0   : > { %s6533_s12 = scalar_lea.hbm %s11178_s11, 16 }
  0xd1   : > { %p6534_p7 = scmp.ne.s32.totalorder %s11178_s11, %s6533_s12  ;;  %p6540_p1 = scmp.lt.u32.totalorder %s6533_s12, %s11178_s11 }
  0xd3   : > { %p6536_p9 = pnand %p6534_p7, %p6822_p8 }
  0xd5   : > { %p6537_p3 = pneg %p6536_p9 }
  0xd7   : > { %p6542_p4 = pnand %p6540_p1, %p6537_p3 }
  0xd9   : > { %6545 = shalt.err (!%p6542_p4)
}
  0xda   : > { %s6546_s19 = scalar_lea.vmem %s434_s29, 16  ;;  %s6553_s10 = scalar_lea.vmem %s434_s29, 32 }
  0xdb   : > { %p6547_p10 = scmp.ne.s32.totalorder %s434_s29, %s6546_s19  ;;  %p6554_p13 = scmp.lt.s32.totalorder %s434_s29, %s434_s29 }
  0xdc   : > { %p6555_p0 = scmp.lt.s32.totalorder %s6553_s10, %s6546_s19 }
  0xdd   : > { %p6549_p11 = pnand %p6547_p10, %p6822_p8 }
  0xde   : > { %p6556_p2 = por %p6555_p0, %p6554_p13 }
  0xdf   : > { %p6550_p12 = pneg %p6549_p11 }
  0xe1   : > { %p6557_p5 = pnand %p6556_p2, %p6550_p12 }
  0xe3   : > { %6560 = shalt.err (!%p6557_p5)
}
  0xe4   : > { %6147 = dma.hbm_to_vmem [thread:$0]  (!%p6808_p6), %s11178_s11, 16, %s434_s29, [#allocation20]  }
  0xe5   : > { %s6994_s25 = sadd.s32 1, %s6679_s24   ;;  %p120_p8 = scmp.gt.s32.totalorder %s6792_s27, 0 }
  0xe6   : > { %s5256_s15 = sadd.s32 4294967295, %s6994_s25  ;;  %s128_s0 = sadd.s32 1, %s6675_s23 }
  0xe7   : > { %p123_p7 = scmp.gt.s32.totalorder %s5256_s15, 0  ;;  %p135_p9 = scmp.ne.s32.totalorder %s6675_s23, %s6671_s22 }
  0xe8   : > { %s121_s13 = scalar_select %p120_p8, %s6792_s27, 0 }
  0xe9   : > { %s13104_s15 = smov (!%p123_p7, %s5256_s15), 0  ;;  %p136_p3 = scmp.eq.s32.totalorder %s6679_s24, 0 }
  0xea   : > { %s125_s2 = ssub.s32 %s121_s13, %s13104_s15  ;;  %p141_p1 = scmp.ne.s32.totalorder %s6671_s22, %s6667_s21 }
  0xeb   : > { %p126_p4 = scmp.eq.s32.totalorder %s125_s2, 0  ;;  %p137_p10 = por %p136_p3, %p135_p9 }
  0xec   : > { %p11583_p11 = scmp.eq.s32.totalorder %s6792_s27, 0  ;;  %p6161_p12 = scmp.lt.s32.totalorder %s6679_s24, 8 }
  0xed   : > { %s7013_s17 = scalar_select %p126_p4, %s6675_s23, %s128_s0  }
  0xee   : > { %p7007_p6 = por %p11583_p11, %p141_p1  ;;  %s444_s26 = sand.u32 1, %s6679_s24  }
  0xef   : > { %s446_s16 = sand.u32 1, %s6675_s23   ;;  %s5643_s30 = sshll.u32 %s121_s13, 13 }
  0xf0   : > { %s5268_s12 = sshll.u32 %s446_s16, 9  ;;  %s7020_s28 = scalar_lea.hbm %s11171_s4, %s5643_s30 }
  0xf1   : > { %s448_s21 = scalar_lea.vmem [#allocation10], %s5268_s12  ;;  %p7024_p13 = pnand %p6161_p12, %p137_p10 }
  0xf2   : > { %s459_s19 = sshll.u32 %s448_s21, 4  ;;  %s7028_s24 = scalar_lea.sflag [#allocation11], %s444_s26  ;;  %s7022_s19 = int_to_ptr.vmem [resolvable:$true] %s459_s19 }
  0xf3   : > { %s6561_s20 = scalar_lea.hbm %s7020_s28, 8192  ;;  %p6563_p2 = pneg %p7024_p13 }
  0xf4   : > { %p6562_p0 = scmp.ne.s32.totalorder %s7020_s28, %s6561_s20  ;;  %s6566_s0 = scalar_lea.hbm %s11171_s4, 57344 }
  0xf5   : > { %p6567_p7 = scmp.lt.u32.totalorder %s7020_s28, %s11171_s4  ;;  %p6568_p9 = scmp.lt.u32.totalorder %s6566_s0, %s6561_s20 }
  0xf6   : > { %p6564_p5 = pnand %p6563_p2, %p6562_p0  ;;  %p6570_p1 = scmp.lt.u32.totalorder %s6561_s20, %s7020_s28 }
  0xf7   : > { %p6569_p3 = por %p6568_p9, %p6567_p7 }
  0xf8   : > { %p6565_p8 = pneg %p6564_p5 }
  0xf9   : > { %p6571_p4 = por %p6570_p1, %p6569_p3 }
  0xfb   : > { %p6572_p10 = pnand %p6571_p4, %p6565_p8 }
  0xfd   : > { %6575 = shalt.err (!%p6572_p10)
}
  0xfe   : > { %s6576_s26 = scalar_lea.vmem %s7022_s19, 8192  ;;  %s6694_s16 = smov [#allocation10]  }
  0xff   : > { %p6577_p11 = scmp.ne.s32.totalorder %s7022_s19, %s6576_s26  ;;  %s6581_s12 = sshll.u32 %s6694_s16, 4  ;;  %s6582_s12 = int_to_ptr.vmem [resolvable:$false] %s6581_s12 }
 0x100   : > { %s6583_s30 = scalar_lea.vmem %s6582_s12, 16384  ;;  %p6584_p5 = scmp.lt.s32.totalorder %s7022_s19, %s6582_s12 }
 0x101   : > { %p6579_p12 = pnand %p6577_p11, %p6563_p2  ;;  %p6585_p7 = scmp.lt.s32.totalorder %s6583_s30, %s6576_s26 }
 0x103   : > { %p6580_p0 = pneg %p6579_p12  ;;  %p6586_p9 = por %p6585_p7, %p6584_p5 }
 0x105   : > { %p6587_p3 = pnand %p6586_p9, %p6580_p0 }
 0x107   : > { %6590 = shalt.err (!%p6587_p3)
}
 0x108   : > { %s6695_s14 = smov 64   ;;  %s6696_s5 = smov 4  }
 0x109   : > { %6151 = dma.hbm_to_vmem [thread:$0]  (!%p7024_p13), %s7020_s28, 8192, %s7022_s19, %s7028_s24, %s6695_s14, %s6695_s14, %s6696_s5  }
 0x10a   : > { %s11586_s21 = sld [smem:[#allocation30_spill]] }
 0x110   : > { %p11587_p2 = scmp.ne.s32.totalorder %s11586_s21, 0 }
 0x111   : > { %p11588_p8 = scmp.eq.s32.totalorder (!%p11587_p2), %s6792_s27, 0 }
 0x112   : > { %471 = sbr.rel (%p11587_p2) target bundleno = 2493 (0x9bd), region = 68 }
 0x119   : > { %6634 = dma.done.wait (%p11588_p8), [#allocation5], 8192   ;;  %p11589_p1 = pmov %p11588_p8 }
 0x11b   : > { %6636 = vsyncadd (%p11589_p1), [#allocation5], 4294959104  ;;  %p11590_p4 = pmov %p11589_p1 }
 0x11c   : > { %p11591_p10 = pmov %p11589_p1 }
 0x11d   : > { %6638 = dma.done.wait (%p11590_p4), [#allocation8], 32  }
 0x11e   : > { %6640 = vsyncadd (%p11591_p10), [#allocation8], 4294967264  ;;  %s485_s10 = sand.u32 1, %s6792_s27   ;;  %s487_s28 = sand.u32 1, %s6671_s22  }
 0x11f   : > { %s5277_s19 = sshll.u32 %s487_s28, 9  ;;  %s486_s24 = scalar_lea.sflag [#allocation11], %s485_s10 }
 0x120   : > { %s7068_s20 = scalar_lea.vmem [#allocation10], %s5277_s19 }
 0x121   : > { %6642 = dma.done.wait (%p7007_p6), %s486_s24, 8192  }
 0x122   : > { %6644 = vsyncadd (%p7007_p6), %s486_s24, 4294959104  ;;  %p11592_p13 = pmov %p11589_p1 }
 0x123   : > { %p11593_p11 = pmov %p11589_p1 }
 0x124   : > { %6646 = dma.done.wait (%p11592_p13), [#allocation11], 16  }
 0x125   : > { %6648 = vsyncadd (%p11593_p11), [#allocation11], 4294967280  ;;  %p11594_p12 = pmov %p11589_p1 }
 0x126   : > { %p11595_p0 = pmov %p11589_p1 }
 0x127   : > { %6650 = dma.done.wait (%p11594_p12), [#allocation14], 2064  }
 0x128   : > { %6652 = vsyncadd (%p11595_p0), [#allocation14], 4294965232  ;;  %p11596_p5 = pmov %p11595_p0 }
 0x129   : > { %p11597_p7 = pmov %p11595_p0 }
 0x12a   : > { %6654 = dma.done.wait (%p11596_p5), [#allocation17], 2064  }
 0x12b   : > { %6656 = vsyncadd (%p11597_p7), [#allocation17], 4294965232  ;;  %p11598_p6 = pmov %p11595_p0 }
 0x12c   : > { %p11599_p9 = pmov %p11595_p0 }
 0x12d   : > { %6658 = dma.done.wait (%p11598_p6), [#allocation20], 16  }
 0x12e   : > { %6660 = vsyncadd (%p11599_p9), [#allocation20], 4294967280  ;;  %p11600_p3 = scmp.ne.s32.totalorder %s6792_s27, 0 }
 0x130   : > { %557 = sbr.rel (%p11600_p3) target bundleno = 1477 (0x5c5), region = 112 }
 0x137   : > { %v586_v0 = vld [vmem:[#allocation4] sm:$0xff]  ;;  %v587_v2 = vld [vmem:[#allocation4 + $0x8] sm:$0xff]  ;;  %v6697_v8 = vmov 0   ;;  %v588_v63 = vld [vmem:[#allocation4 + $0x10] sm:$0xff]  ;;  %s11601_s15 = sld [smem:[#allocation233_spill]]  ;;  %s6698_s10 = smov 64  }
 0x138   : > { %v590_v1 = vld [vmem:[#allocation4 + $0x20] sm:$0xff]  ;;  %v591_v4 = vld [vmem:[#allocation4 + $0x28] sm:$0xff]  ;;  %1086 = vmatprep.mubr.bf16.mxu0 %v6697_v8  ;;  %1259 = vmatprep.mubr.bf16.mxu1 %v6697_v8  ;;  %s6699_s28 = smov 96   ;;  %s6700_s19 = smov 32   ;;  %vm2558_vm0 = vcmask 261120   ;;  %vm2560_vm1 = vcmask 523264  }
 0x139   : > { %v5300_v3 = vcombine.high %v586_v0, %v590_v1  ;;  %v5299_v5 = vcombine.low %v586_v0, %v590_v1  ;;  %v594_v6 = vld [vmem:[#allocation4 + $0x40] sm:$0xff]  ;;  %v5302_v9 = vcombine.high %v587_v2, %v591_v4  ;;  %v5301_v10 = vcombine.low %v587_v2, %v591_v4  ;;  %v595_v12 = vld [vmem:[#allocation4 + $0x48] sm:$0xff]  ;;  %v592_v0 = vld [vmem:[#allocation4 + $0x30] sm:$0xff] }
 0x13a   : > { %v598_v7 = vld [vmem:[#allocation4 + $0x60] sm:$0xff]  ;;  %v599_v13 = vld [vmem:[#allocation4 + $0x68] sm:$0xff]  ;;  %v589_v1 = vld [vmem:[#allocation4 + $0x18] sm:$0xff]  ;;  %vm2562_vm2 = vcmask 785408  }
 0x13b   : > { %v5308_v11 = vcombine.high %v594_v6, %v598_v7  ;;  %v602_v14 = vld [vmem:[#allocation4 + $0x80] sm:$0xff]  ;;  %1054 = vmatprep.subr.bf16.mxu0 %v5300_v3  ;;  %v5310_v15 = vcombine.high %v595_v12, %v599_v13  ;;  %v603_v17 = vld [vmem:[#allocation4 + $0x88] sm:$0xff]  ;;  %1227 = vmatprep.subr.bf16.mxu1 %v5302_v9  ;;  %v5307_v19 = vcombine.low %v594_v6, %v598_v7  ;;  %v593_v2 = vld [vmem:[#allocation4 + $0x38] sm:$0xff] }
 0x13c   : > { %v606_v16 = vld [vmem:[#allocation4 + $0xa0] sm:$0xff]  ;;  %v607_v18 = vld [vmem:[#allocation4 + $0xa8] sm:$0xff]  ;;  %1055 = vmatpush1.bf16.msra.mxu0 %v5299_v5  ;;  %1228 = vmatpush1.bf16.msra.mxu1 %v5301_v10  ;;  %v5309_v20 = vcombine.low %v595_v12, %v599_v13  ;;  %v5304_v5 = vcombine.high %v588_v63, %v592_v0  ;;  %v5306_v7 = vcombine.high %v589_v1, %v593_v2  ;;  %v596_v9 = vld [vmem:[#allocation4 + $0x50] sm:$0xff] }
 0x13d   : > { %1056 = vmatprep.subr.bf16.mxu0 %v5308_v11  ;;  %v5316_v21 = vcombine.high %v602_v14, %v606_v16  ;;  %1229 = vmatprep.subr.bf16.mxu1 %v5310_v15  ;;  %v5318_v22 = vcombine.high %v603_v17, %v607_v18  ;;  %v610_v23 = vld [vmem:[#allocation4 + $0xc0] sm:$0xff]  ;;  %v611_v25 = vld [vmem:[#allocation4 + $0xc8] sm:$0xff]  ;;  %v5315_v27 = vcombine.low %v602_v14, %v606_v16  ;;  %v7097_v6 = vld [vmem:[%s11601_s15] sm:$0xff]  }
 0x13e   : > { %v614_v24 = vld [vmem:[#allocation4 + $0xe0] sm:$0xff]  ;;  %v615_v26 = vld [vmem:[#allocation4 + $0xe8] sm:$0xff]  ;;  %v5317_v28 = vcombine.low %v603_v17, %v607_v18  ;;  %v600_v10 = vld [vmem:[#allocation4 + $0x70] sm:$0xff]  ;;  %v5303_v12 = vcombine.low %v588_v63, %v592_v0  ;;  %v5305_v14 = vcombine.low %v589_v1, %v593_v2 }
 0x13f   : > { %v5324_v29 = vcombine.high %v610_v23, %v614_v24  ;;  %v5326_v30 = vcombine.high %v611_v25, %v615_v26  ;;  %v618_v31 = vld [vmem:[#allocation4 + $0x100] sm:$0xff]  ;;  %v619_v33 = vld [vmem:[#allocation4 + $0x108] sm:$0xff]  ;;  %v5323_v35 = vcombine.low %v610_v23, %v614_v24  ;;  %v5325_v36 = vcombine.low %v611_v25, %v615_v26  ;;  %v597_v11 = vld [vmem:[#allocation4 + $0x58] sm:$0xff] }
 0x140   : > { %1057 = vmatpush1.bf16.msra.mxu0 %v5307_v19  ;;  %1230 = vmatpush1.bf16.msra.mxu1 %v5309_v20  ;;  %v622_v32 = vld [vmem:[#allocation4 + $0x120] sm:$0xff]  ;;  %v623_v34 = vld [vmem:[#allocation4 + $0x128] sm:$0xff]  ;;  %v601_v13 = vld [vmem:[#allocation4 + $0x78] sm:$0xff]  ;;  %v5312_v16 = vcombine.high %v596_v9, %v600_v10 }
 0x141   : > { %1058 = vmatprep.subr.bf16.mxu0 %v5316_v21  ;;  %1231 = vmatprep.subr.bf16.mxu1 %v5318_v22  ;;  %v5332_v37 = vcombine.high %v618_v31, %v622_v32  ;;  %v5334_v38 = vcombine.high %v619_v33, %v623_v34  ;;  %v626_v39 = vld [vmem:[#allocation4 + $0x140] sm:$0xff]  ;;  %v627_v41 = vld [vmem:[#allocation4 + $0x148] sm:$0xff]  ;;  %v5331_v43 = vcombine.low %v618_v31, %v622_v32  ;;  %v604_v15 = vld [vmem:[#allocation4 + $0x90] sm:$0xff] }
 0x142   : > { %v630_v40 = vld [vmem:[#allocation4 + $0x160] sm:$0xff]  ;;  %v631_v42 = vld [vmem:[#allocation4 + $0x168] sm:$0xff]  ;;  %v5333_v44 = vcombine.low %v619_v33, %v623_v34  ;;  %v608_v17 = vld [vmem:[#allocation4 + $0xb0] sm:$0xff]  ;;  %v5314_v18 = vcombine.high %v597_v11, %v601_v13  ;;  %v5311_v21 = vcombine.low %v596_v9, %v600_v10  ;;  %v5313_v22 = vcombine.low %v597_v11, %v601_v13 }
 0x143   : > { %v5340_v45 = vcombine.high %v626_v39, %v630_v40  ;;  %v634_v46 = vld [vmem:[#allocation4 + $0x180] sm:$0xff]  ;;  %v5342_v47 = vcombine.high %v627_v41, %v631_v42  ;;  %v635_v49 = vld [vmem:[#allocation4 + $0x188] sm:$0xff]  ;;  %v5339_v51 = vcombine.low %v626_v39, %v630_v40  ;;  %v5341_v52 = vcombine.low %v627_v41, %v631_v42  ;;  %v605_v19 = vld [vmem:[#allocation4 + $0x98] sm:$0xff] }
 0x144   : > { %1059 = vmatpush1.bf16.msra.mxu0 %v5315_v27  ;;  %1232 = vmatpush1.bf16.msra.mxu1 %v5317_v28  ;;  %v638_v48 = vld [vmem:[#allocation4 + $0x1a0] sm:$0xff]  ;;  %v639_v50 = vld [vmem:[#allocation4 + $0x1a8] sm:$0xff]  ;;  %v609_v20 = vld [vmem:[#allocation4 + $0xb8] sm:$0xff]  ;;  %v5320_v23 = vcombine.high %v604_v15, %v608_v17 }
 0x145   : > { %1060 = vmatprep.subr.bf16.mxu0 %v5324_v29  ;;  %1233 = vmatprep.subr.bf16.mxu1 %v5326_v30  ;;  %v5348_v53 = vcombine.high %v634_v46, %v638_v48  ;;  %v642_v54 = vld [vmem:[#allocation4 + $0x1c0] sm:$0xff]  ;;  %v5350_v56 = vcombine.high %v635_v49, %v639_v50  ;;  %v643_v57 = vld [vmem:[#allocation4 + $0x1c8] sm:$0xff]  ;;  %v5347_v59 = vcombine.low %v634_v46, %v638_v48  ;;  %v612_v26 = vld [vmem:[#allocation4 + $0xd0] sm:$0xff] }
 0x146   : > { %v646_v55 = vld [vmem:[#allocation4 + $0x1e0] sm:$0xff]  ;;  %v647_v58 = vld [vmem:[#allocation4 + $0x1e8] sm:$0xff]  ;;  %v5349_v60 = vcombine.low %v635_v49, %v639_v50  ;;  %v5322_v24 = vcombine.high %v605_v19, %v609_v20  ;;  %v616_v27 = vld [vmem:[#allocation4 + $0xf0] sm:$0xff]  ;;  %v5319_v30 = vcombine.low %v604_v15, %v608_v17  ;;  %v5321_v31 = vcombine.low %v605_v19, %v609_v20 }
 0x147   : > { %v5356_v61 = vcombine.high %v642_v54, %v646_v55  ;;  %v5358_v62 = vcombine.high %v643_v57, %v647_v58  ;;  %v5355_v3 = vcombine.low %v642_v54, %v646_v55  ;;  %v5357_v4 = vcombine.low %v643_v57, %v647_v58  ;;  %v7106_v25 = vld [vmem:[%s11601_s15 + $0x8] sm:$0xff]   ;;  %v613_v28 = vld [vmem:[#allocation4 + $0xd8] sm:$0xff]  ;;  %v620_v34 = vld [vmem:[#allocation4 + $0x110] sm:$0xff] }
 0x148   : > { %1061 = vmatpush1.bf16.msra.mxu0 %v5323_v35  ;;  %1234 = vmatpush1.bf16.msra.mxu1 %v5325_v36  ;;  %v617_v29 = vld [vmem:[#allocation4 + $0xf8] sm:$0xff]  ;;  %v5328_v32 = vcombine.high %v612_v26, %v616_v27  ;;  %v624_v35 = vld [vmem:[#allocation4 + $0x130] sm:$0xff]  ;;  %v7115_v41 = vld [vmem:[%s11601_s15 + $0x10] sm:$0xff]  }
 0x149   : > { %1062 = vmatprep.subr.bf16.mxu0 %v5332_v37  ;;  %1235 = vmatprep.subr.bf16.mxu1 %v5334_v38  ;;  %v5330_v33 = vcombine.high %v613_v28, %v617_v29  ;;  %v621_v36 = vld [vmem:[#allocation4 + $0x118] sm:$0xff]  ;;  %v5327_v38 = vcombine.low %v612_v26, %v616_v27  ;;  %v5329_v39 = vcombine.low %v613_v28, %v617_v29  ;;  %v7124_v58 = vld [vmem:[%s11601_s15 + $0x18] sm:$0xff]   ;;  %v7142_v9 = vld [vmem:[%s11601_s15 + $0x28] sm:$0xff]  }
 0x14a   : > { %v625_v37 = vld [vmem:[#allocation4 + $0x138] sm:$0xff]  ;;  %v5336_v40 = vcombine.high %v620_v34, %v624_v35  ;;  %v7151_v10 = vld [vmem:[%s11601_s15 + $0x30] sm:$0xff]   ;;  %v7160_v11 = vld [vmem:[%s11601_s15 + $0x38] sm:$0xff]  }
 0x14b   : > { %v5338_v42 = vcombine.high %v621_v36, %v625_v37  ;;  %v633_v46 = vld [vmem:[#allocation4 + $0x178] sm:$0xff]  ;;  %v5337_v48 = vcombine.low %v621_v36, %v625_v37  ;;  %v6238_v13 = vld [vmem:[%s11601_s15 + $0x48] sm:$0xff]   ;;  %v6240_v15 = vld [vmem:[%s11601_s15 + $0x58] sm:$0xff]  }
 0x14c   : > { %1063 = vmatpush1.bf16.msra.mxu0 %v5331_v43  ;;  %1236 = vmatpush1.bf16.msra.mxu1 %v5333_v44  ;;  %v628_v43 = vld [vmem:[#allocation4 + $0x150] sm:$0xff]  ;;  %v641_v54 = vld [vmem:[#allocation4 + $0x1b8] sm:$0xff]  ;;  %v7194_v17 = vld [vmem:[%s11601_s15 + $0x68] sm:$0xff]  }
 0x14d   : > { %1064 = vmatprep.subr.bf16.mxu0 %v5340_v45  ;;  %1237 = vmatprep.subr.bf16.mxu1 %v5342_v47  ;;  %v632_v44 = vld [vmem:[#allocation4 + $0x170] sm:$0xff]  ;;  %v629_v45 = vld [vmem:[#allocation4 + $0x158] sm:$0xff]  ;;  %v5335_v47 = vcombine.low %v620_v34, %v624_v35 }
 0x14e   : > { %v5344_v49 = vcombine.high %v628_v43, %v632_v44  ;;  %v5346_v50 = vcombine.high %v629_v45, %v633_v46  ;;  %v5343_v55 = vcombine.low %v628_v43, %v632_v44  ;;  %v649_v63 = vld [vmem:[#allocation4 + $0x1f8] sm:$0xff] }
 0x150   : > { %1065 = vmatpush1.bf16.msra.mxu0 %v5339_v51  ;;  %1238 = vmatpush1.bf16.msra.mxu1 %v5341_v52  ;;  %v636_v51 = vld [vmem:[#allocation4 + $0x190] sm:$0xff] }
 0x151   : > { %1066 = vmatprep.subr.bf16.mxu0 %v5348_v53  ;;  %1239 = vmatprep.subr.bf16.mxu1 %v5350_v56  ;;  %v640_v52 = vld [vmem:[#allocation4 + $0x1b0] sm:$0xff]  ;;  %v637_v53 = vld [vmem:[#allocation4 + $0x198] sm:$0xff]  ;;  %v5345_v56 = vcombine.low %v629_v45, %v633_v46 }
 0x152   : > { %v5352_v57 = vcombine.high %v636_v51, %v640_v52  ;;  %v5351_v0 = vcombine.low %v636_v51, %v640_v52  ;;  %v5353_v1 = vcombine.low %v637_v53, %v641_v54 }
 0x154   : > { %1067 = vmatpush1.bf16.msra.mxu0 %v5347_v59  ;;  %1240 = vmatpush1.bf16.msra.mxu1 %v5349_v60  ;;  %v5354_v59 = vcombine.high %v637_v53, %v641_v54  ;;  %v644_v60 = vld [vmem:[#allocation4 + $0x1d0] sm:$0xff] }
 0x155   : > { %1068 = vmatprep.subr.bf16.mxu0 %v5356_v61  ;;  %1241 = vmatprep.subr.bf16.mxu1 %v5358_v62  ;;  %v648_v61 = vld [vmem:[#allocation4 + $0x1f0] sm:$0xff]  ;;  %v645_v62 = vld [vmem:[#allocation4 + $0x1d8] sm:$0xff] }
 0x156   : > { %v5360_v2 = vcombine.high %v644_v60, %v648_v61 }
 0x158   : > { %1069 = vmatpush1.bf16.msra.mxu0 %v5355_v3  ;;  %1242 = vmatpush1.bf16.msra.mxu1 %v5357_v4  ;;  %v5362_v3 = vcombine.high %v645_v62, %v649_v63  ;;  %v5359_v4 = vcombine.low %v644_v60, %v648_v61 }
 0x159   : > { %1400 = vmatprep.subr.bf16.mxu0 %v5304_v5  ;;  %1573 = vmatprep.subr.bf16.mxu1 %v5306_v7  ;;  %v5361_v5 = vcombine.low %v645_v62, %v649_v63  ;;  %v7133_v7 = vld [vmem:[%s11601_s15 + $0x20] sm:$0xff]  }
 0x15b   : > { %1087 = vmatmul.mubr.bf16.vlgmr.msra.gmra.mrb[0].mxu0 %v7097_v6  ;;  %1260 = vmatmul.mubr.bf16.vlgmr.msra.gmra.mrb[0].mxu1 %v7097_v6 }
 0x15c   : > { %1401 = vmatpush1.bf16.msra.mxu0 %v5303_v12  ;;  %1574 = vmatpush1.bf16.msra.mxu1 %v5305_v14  ;;  %v6237_v12 = vld [vmem:[%s11601_s15 + $0x40] sm:$0xff]   ;;  %v6239_v14 = vld [vmem:[%s11601_s15 + $0x50] sm:$0xff]  }
 0x15d   : > { %1096 = vmatprep.mubr.bf16.mxu0 %v6697_v8  ;;  %1269 = vmatprep.mubr.bf16.mxu1 %v6697_v8 }
 0x15e   : > { %1402 = vmatprep.subr.bf16.mxu0 %v5312_v16  ;;  %1575 = vmatprep.subr.bf16.mxu1 %v5314_v18  ;;  %v6241_v16 = vld [vmem:[%s11601_s15 + $0x60] sm:$0xff]  }
 0x160   : > { %1403 = vmatpush1.bf16.msra.mxu0 %v5311_v21  ;;  %1576 = vmatpush1.bf16.msra.mxu1 %v5313_v22 }
 0x161   : > { %1404 = vmatprep.subr.bf16.mxu0 %v5320_v23  ;;  %1577 = vmatprep.subr.bf16.mxu1 %v5322_v24 }
 0x163   : > { %1097 = vmatmul.mubr.bf16.gmra.mrb[4].mxu0 %v7106_v25  ;;  %1270 = vmatmul.mubr.bf16.gmra.mrb[4].mxu1 %v7106_v25 }
 0x164   : > { %1106 = vmatprep.mubr.bf16.mxu0 %v6697_v8  ;;  %1279 = vmatprep.mubr.bf16.mxu1 %v6697_v8 }
 0x165   : > { %1405 = vmatpush1.bf16.msra.mxu0 %v5319_v30  ;;  %1578 = vmatpush1.bf16.msra.mxu1 %v5321_v31 }
 0x166   : > { %1406 = vmatprep.subr.bf16.mxu0 %v5328_v32  ;;  %1579 = vmatprep.subr.bf16.mxu1 %v5330_v33 }
 0x169   : > { %1407 = vmatpush1.bf16.msra.mxu0 %v5327_v38  ;;  %1580 = vmatpush1.bf16.msra.mxu1 %v5329_v39 }
 0x16a   : > { %1408 = vmatprep.subr.bf16.mxu0 %v5336_v40  ;;  %1581 = vmatprep.subr.bf16.mxu1 %v5338_v42 }
 0x16b   : > { %1107 = vmatmul.mubr.bf16.gmra.mrb[8].mxu0 %v7115_v41  ;;  %1280 = vmatmul.mubr.bf16.gmra.mrb[8].mxu1 %v7115_v41 }
 0x16c   : > { %1116 = vmatprep.mubr.bf16.mxu0 %v6697_v8  ;;  %1289 = vmatprep.mubr.bf16.mxu1 %v6697_v8 }
 0x16d   : > { %1409 = vmatpush1.bf16.msra.mxu0 %v5335_v47  ;;  %1582 = vmatpush1.bf16.msra.mxu1 %v5337_v48 }
 0x16e   : > { %1410 = vmatprep.subr.bf16.mxu0 %v5344_v49  ;;  %1583 = vmatprep.subr.bf16.mxu1 %v5346_v50 }
 0x171   : > { %1411 = vmatpush1.bf16.msra.mxu0 %v5343_v55  ;;  %1584 = vmatpush1.bf16.msra.mxu1 %v5345_v56 }
 0x172   : > { %1412 = vmatprep.subr.bf16.mxu0 %v5352_v57  ;;  %1585 = vmatprep.subr.bf16.mxu1 %v5354_v59 }
 0x173   : > { %1117 = vmatmul.mubr.bf16.gmra.mrb[12].mxu0 %v7124_v58  ;;  %1290 = vmatmul.mubr.bf16.gmra.mrb[12].mxu1 %v7124_v58 }
 0x174   : > { %1126 = vmatprep.mubr.bf16.mxu0 %v6697_v8  ;;  %1299 = vmatprep.mubr.bf16.mxu1 %v6697_v8 }
 0x175   : > { %1413 = vmatpush1.bf16.msra.mxu0 %v5351_v0  ;;  %1586 = vmatpush1.bf16.msra.mxu1 %v5353_v1 }
 0x176   : > { %1414 = vmatprep.subr.bf16.mxu0 %v5360_v2  ;;  %1587 = vmatprep.subr.bf16.mxu1 %v5362_v3 }
 0x179   : > { %1415 = vmatpush1.bf16.msra.mxu0 %v5359_v4  ;;  %1588 = vmatpush1.bf16.msra.mxu1 %v5361_v5 }
 0x17b   : > { %1127 = vmatmul.mubr.bf16.gmra.mrb[16].mxu0 %v7133_v7  ;;  %1300 = vmatmul.mubr.bf16.gmra.mrb[16].mxu1 %v7133_v7 }
 0x17c   : > { %1136 = vmatprep.mubr.bf16.mxu0 %v6697_v8  ;;  %1309 = vmatprep.mubr.bf16.mxu1 %v6697_v8 }
 0x183   : > { %1137 = vmatmul.mubr.bf16.gmra.mrb[20].mxu0 %v7142_v9  ;;  %1310 = vmatmul.mubr.bf16.gmra.mrb[20].mxu1 %v7142_v9 }
 0x184   : > { %1146 = vmatprep.mubr.bf16.mxu0 %v6697_v8  ;;  %1319 = vmatprep.mubr.bf16.mxu1 %v6697_v8 }
 0x18b   : > { %1147 = vmatmul.mubr.bf16.gmra.mrb[24].mxu0 %v7151_v10  ;;  %1320 = vmatmul.mubr.bf16.gmra.mrb[24].mxu1 %v7151_v10 }
 0x18c   : > { %1156 = vmatprep.mubr.bf16.mxu0 %v6697_v8  ;;  %1329 = vmatprep.mubr.bf16.mxu1 %v6697_v8 }
 0x193   : > { %1157 = vmatmul.mubr.bf16.gmra.mrb[28].mxu0 %v7160_v11  ;;  %1330 = vmatmul.mubr.bf16.gmra.mrb[28].mxu1 %v7160_v11 }
 0x194   : > { %1166 = vmatprep.mubr.bf16.mxu0 %v6697_v8  ;;  %1339 = vmatprep.mubr.bf16.mxu1 %v6697_v8 }
 0x19b   : > { %1167 = vmatmul.mubr.bf16.gmra.mrb[32].mxu0 %v6237_v12  ;;  %1340 = vmatmul.mubr.bf16.gmra.mrb[32].mxu1 %v6237_v12 }
 0x19c   : > { %1176 = vmatprep.mubr.bf16.mxu0 %v6697_v8  ;;  %1349 = vmatprep.mubr.bf16.mxu1 %v6697_v8 }
 0x1a3   : > { %1177 = vmatmul.mubr.bf16.gmra.mrb[36].mxu0 %v6238_v13  ;;  %1350 = vmatmul.mubr.bf16.gmra.mrb[36].mxu1 %v6238_v13 }
 0x1a4   : > { %1186 = vmatprep.mubr.bf16.mxu0 %v6697_v8  ;;  %1359 = vmatprep.mubr.bf16.mxu1 %v6697_v8 }
 0x1ab   : > { %1187 = vmatmul.mubr.bf16.gmra.mrb[40].mxu0 %v6239_v14  ;;  %1360 = vmatmul.mubr.bf16.gmra.mrb[40].mxu1 %v6239_v14 }
 0x1ac   : > { %1196 = vmatprep.mubr.bf16.mxu0 %v6697_v8  ;;  %1369 = vmatprep.mubr.bf16.mxu1 %v6697_v8 }
 0x1b3   : > { %1197 = vmatmul.mubr.bf16.gmra.mrb[44].mxu0 %v6240_v15  ;;  %1370 = vmatmul.mubr.bf16.gmra.mrb[44].mxu1 %v6240_v15 }
 0x1b4   : > { %1206 = vmatprep.mubr.bf16.mxu0 %v6697_v8  ;;  %1379 = vmatprep.mubr.bf16.mxu1 %v6697_v8 }
 0x1bb   : > { %1207 = vmatmul.mubr.bf16.gmra.mrb[48].mxu0 %v6241_v16  ;;  %1380 = vmatmul.mubr.bf16.gmra.mrb[48].mxu1 %v6241_v16 }
 0x1bc   : > { %1216 = vmatprep.mubr.bf16.mxu0 %v6697_v8  ;;  %1389 = vmatprep.mubr.bf16.mxu1 %v6697_v8 }
 0x1c3   : > { %1217 = vmatmul.mubr.bf16.gmra.mrb[52].mxu0 %v7194_v17  ;;  %1390 = vmatmul.mubr.bf16.gmra.mrb[52].mxu1 %v7194_v17 }
 0x1c4   : > { %1432 = vmatprep.mubr.bf16.mxu0 %v6697_v8  ;;  %1605 = vmatprep.mubr.bf16.mxu1 %v6697_v8 }
 0x1cb   : > { %1433 = vmatmul.mubr.bf16.vlgmr.msra.gmra.mrb[56].mxu0 %v7097_v6  ;;  %1606 = vmatmul.mubr.bf16.vlgmr.msra.gmra.mrb[56].mxu1 %v7097_v6 }
 0x1cc   : > { %1442 = vmatprep.mubr.bf16.mxu0 %v6697_v8  ;;  %1615 = vmatprep.mubr.bf16.mxu1 %v6697_v8 }
 0x1d3   : > { %1443 = vmatmul.mubr.bf16.gmra.mrb[60].mxu0 %v7106_v25  ;;  %1616 = vmatmul.mubr.bf16.gmra.mrb[60].mxu1 %v7106_v25 }
 0x1d4   : > { %1452 = vmatprep.mubr.bf16.mxu0 %v6697_v8  ;;  %1625 = vmatprep.mubr.bf16.mxu1 %v6697_v8 }
 0x1db   : > { %1453 = vmatmul.mubr.bf16.gmra.mrb[64].mxu0 %v7115_v41  ;;  %1626 = vmatmul.mubr.bf16.gmra.mrb[64].mxu1 %v7115_v41 }
 0x1dc   : > { %1462 = vmatprep.mubr.bf16.mxu0 %v6697_v8  ;;  %1635 = vmatprep.mubr.bf16.mxu1 %v6697_v8 }
 0x1e3   : > { %1463 = vmatmul.mubr.bf16.gmra.mrb[68].mxu0 %v7124_v58  ;;  %1636 = vmatmul.mubr.bf16.gmra.mrb[68].mxu1 %v7124_v58 }
 0x1e4   : > { %1472 = vmatprep.mubr.bf16.mxu0 %v6697_v8  ;;  %1645 = vmatprep.mubr.bf16.mxu1 %v6697_v8 }
 0x1eb   : > { %1473 = vmatmul.mubr.bf16.gmra.mrb[72].mxu0 %v7133_v7  ;;  %1646 = vmatmul.mubr.bf16.gmra.mrb[72].mxu1 %v7133_v7 }
 0x1ec   : > { %1482 = vmatprep.mubr.bf16.mxu0 %v6697_v8  ;;  %1655 = vmatprep.mubr.bf16.mxu1 %v6697_v8 }
 0x1f3   : > { %1483 = vmatmul.mubr.bf16.gmra.mrb[76].mxu0 %v7142_v9  ;;  %1656 = vmatmul.mubr.bf16.gmra.mrb[76].mxu1 %v7142_v9 }
 0x1f4   : > { %1492 = vmatprep.mubr.bf16.mxu0 %v6697_v8  ;;  %1665 = vmatprep.mubr.bf16.mxu1 %v6697_v8 }
 0x1fb   : > { %1493 = vmatmul.mubr.bf16.gmra.mrb[80].mxu0 %v7151_v10  ;;  %1666 = vmatmul.mubr.bf16.gmra.mrb[80].mxu1 %v7151_v10 }
 0x1fc   : > { %1502 = vmatprep.mubr.bf16.mxu0 %v6697_v8  ;;  %1675 = vmatprep.mubr.bf16.mxu1 %v6697_v8 }
 0x203   : > { %1503 = vmatmul.mubr.bf16.gmra.mrb[84].mxu0 %v7160_v11  ;;  %1676 = vmatmul.mubr.bf16.gmra.mrb[84].mxu1 %v7160_v11 }
 0x204   : > { %1512 = vmatprep.mubr.bf16.mxu0 %v6697_v8  ;;  %1685 = vmatprep.mubr.bf16.mxu1 %v6697_v8 }
 0x20b   : > { %1513 = vmatmul.mubr.bf16.gmra.mrb[88].mxu0 %v6237_v12  ;;  %1686 = vmatmul.mubr.bf16.gmra.mrb[88].mxu1 %v6237_v12 }
 0x20c   : > { %1522 = vmatprep.mubr.bf16.mxu0 %v6697_v8  ;;  %1695 = vmatprep.mubr.bf16.mxu1 %v6697_v8 }
 0x213   : > { %1523 = vmatmul.mubr.bf16.gmra.mrb[92].mxu0 %v6238_v13  ;;  %1696 = vmatmul.mubr.bf16.gmra.mrb[92].mxu1 %v6238_v13 }
 0x214   : > { %1532 = vmatprep.mubr.bf16.mxu0 %v6697_v8  ;;  %1705 = vmatprep.mubr.bf16.mxu1 %v6697_v8 }
 0x21b   : > { %1533 = vmatmul.mubr.bf16.gmra.mrb[96].mxu0 %v6239_v14  ;;  %1706 = vmatmul.mubr.bf16.gmra.mrb[96].mxu1 %v6239_v14 }
 0x21c   : > { %1542 = vmatprep.mubr.bf16.mxu0 %v6697_v8  ;;  %1715 = vmatprep.mubr.bf16.mxu1 %v6697_v8 }
 0x223   : > { %1543 = vmatmul.mubr.bf16.gmra.mrb[100].mxu0 %v6240_v15  ;;  %1716 = vmatmul.mubr.bf16.gmra.mrb[100].mxu1 %v6240_v15 }
 0x224   : > { %1552 = vmatprep.mubr.bf16.mxu0 %v6697_v8  ;;  %1725 = vmatprep.mubr.bf16.mxu1 %v6697_v8 }
 0x22b   : > { %1553 = vmatmul.mubr.bf16.gmra.mrb[104].mxu0 %v6241_v16  ;;  %1726 = vmatmul.mubr.bf16.gmra.mrb[104].mxu1 %v6241_v16 }
 0x22c   : > { %1562 = vmatprep.mubr.bf16.mxu0 %v6697_v8  ;;  %1735 = vmatprep.mubr.bf16.mxu1 %v6697_v8 }
 0x22e   : > { %v7242_v6 = vpop.f32.mrb[0].mxu0  ;;  %v7244_v18 = vpop.f32.mrb[0].mxu1 }
 0x22f   : > { %v7246_v19 = vpop.f32.mrb[1].mxu0  ;;  %v2027_v20 = vmul.f32 %v7242_v6, %v7242_v6  ;;  %v7250_v21 = vpop.f32.mrb[1].mxu1  ;;  %v2029_v23 = vmul.f32 %v7244_v18, %v7244_v18 }
 0x230   : > { %v7252_v22 = vpop.f32.mrb[2].mxu0  ;;  %v2028_v24 = vmul.f32 %v7246_v19, %v7246_v19  ;;  %v7262_v26 = vpop.f32.mrb[2].mxu1  ;;  %v2030_v33 = vmul.f32 %v7250_v21, %v7250_v21 }
 0x231   : > { %v1746_v8 = vadd.f32 %v7252_v22, %v7242_v6  ;;  %v2035_v25 = vmul.f32 %v7252_v22, %v7252_v22  ;;  %v7264_v27 = vpop.f32.mrb[3].mxu0  ;;  %v1812_v28 = vadd.f32 %v7262_v26, %v7244_v18  ;;  %v2037_v29 = vmul.f32 %v7262_v26, %v7262_v26  ;;  %v7274_v32 = vpop.f32.mrb[3].mxu1 }
 0x232   : > { %v1779_v30 = vadd.f32 %v7264_v27, %v7246_v19  ;;  %v2036_v31 = vmul.f32 %v7264_v27, %v7264_v27  ;;  %v1845_v35 = vadd.f32 %v7274_v32, %v7250_v21  ;;  %v2038_v36 = vmul.f32 %v7274_v32, %v7274_v32 }
 0x233   : > { %v2251_v34 = vadd.f32 %v2035_v25, %v2027_v20  ;;  %1563 = vmatmul.mubr.bf16.gmra.mrb[108].mxu0 %v7194_v17  ;;  %v2317_v37 = vadd.f32 %v2037_v29, %v2029_v23  ;;  %1736 = vmatmul.mubr.bf16.gmra.mrb[108].mxu1 %v7194_v17 }
 0x234   : > { %v2284_v38 = vadd.f32 %v2036_v31, %v2028_v24  ;;  %v2350_v39 = vadd.f32 %v2038_v36, %v2030_v33 }
 0x236   : > { %v7284_v40 = vpop.f32.mrb[4].mxu0  ;;  %v7289_v43 = vpop.f32.mrb[4].mxu1 }
 0x237   : > { %v1747_v41 = vadd.f32 %v1746_v8, %v7284_v40  ;;  %v2043_v42 = vmul.f32 %v7284_v40, %v7284_v40  ;;  %v7291_v44 = vpop.f32.mrb[5].mxu0  ;;  %v1813_v45 = vadd.f32 %v1812_v28, %v7289_v43  ;;  %v2045_v46 = vmul.f32 %v7289_v43, %v7289_v43  ;;  %v7299_v49 = vpop.f32.mrb[5].mxu1 }
 0x238   : > { %v1780_v47 = vadd.f32 %v1779_v30, %v7291_v44  ;;  %v2044_v48 = vmul.f32 %v7291_v44, %v7291_v44  ;;  %v7301_v50 = vpop.f32.mrb[6].mxu0  ;;  %v1846_v52 = vadd.f32 %v1845_v35, %v7299_v49  ;;  %v2046_v53 = vmul.f32 %v7299_v49, %v7299_v49  ;;  %v7307_v55 = vpop.f32.mrb[6].mxu1 }
 0x239   : > { %11602 = vst [vmem:[#allocation31_spill] sm:$0xff] %v7301_v50  ;;  %v2252_v51 = vadd.f32 %v2251_v34, %v2043_v42  ;;  %v1748_v54 = vadd.f32 %v1747_v41, %v7301_v50  ;;  %11603 = vst [vmem:[#allocation32_spill] sm:$0xff] %v7307_v55  ;;  %v7309_v56 = vpop.f32.mrb[7].mxu0  ;;  %v2318_v57 = vadd.f32 %v2317_v37, %v2045_v46  ;;  %v7314_v61 = vpop.f32.mrb[7].mxu1 }
 0x23a   : > { %11604 = vst [vmem:[#allocation33_spill] sm:$0xff] %v7309_v56  ;;  %v2285_v58 = vadd.f32 %v2284_v38, %v2044_v48  ;;  %v2051_v59 = vmul.f32 %v7301_v50, %v7301_v50  ;;  %v1814_v60 = vadd.f32 %v1813_v45, %v7307_v55  ;;  %11605 = vst [vmem:[#allocation34_spill] sm:$0xff] %v7314_v61 }
 0x23b   : > { %v2351_v62 = vadd.f32 %v2350_v39, %v2046_v53  ;;  %v2053_v63 = vmul.f32 %v7307_v55, %v7307_v55  ;;  %v1781_v0 = vadd.f32 %v1780_v47, %v7309_v56  ;;  %v2052_v1 = vmul.f32 %v7309_v56, %v7309_v56 }
 0x23c   : > { %v2253_v2 = vadd.f32 %v2252_v51, %v2051_v59  ;;  %v1847_v3 = vadd.f32 %v1846_v52, %v7314_v61  ;;  %v2054_v4 = vmul.f32 %v7314_v61, %v7314_v61 }
 0x23d   : > { %v2319_v5 = vadd.f32 %v2318_v57, %v2053_v63  ;;  %v2286_v7 = vadd.f32 %v2285_v58, %v2052_v1 }
 0x23e   : > { %v2352_v9 = vadd.f32 %v2351_v62, %v2054_v4  ;;  %v7324_v10 = vpop.f32.mrb[8].mxu0  ;;  %v7329_v13 = vpop.f32.mrb[8].mxu1 }
 0x23f   : > { %11606 = vst [vmem:[#allocation35_spill] sm:$0xff] %v7324_v10  ;;  %v1749_v11 = vadd.f32 %v1748_v54, %v7324_v10  ;;  %v2059_v12 = vmul.f32 %v7324_v10, %v7324_v10  ;;  %11607 = vst [vmem:[#allocation36_spill] sm:$0xff] %v7329_v13  ;;  %v7331_v14 = vpop.f32.mrb[9].mxu0  ;;  %v1815_v15 = vadd.f32 %v1814_v60, %v7329_v13  ;;  %v7339_v23 = vpop.f32.mrb[9].mxu1 }
 0x240   : > { %11608 = vst [vmem:[#allocation37_spill] sm:$0xff] %v7331_v14  ;;  %v2061_v16 = vmul.f32 %v7329_v13, %v7329_v13  ;;  %v1782_v17 = vadd.f32 %v1781_v0, %v7331_v14  ;;  %v2060_v20 = vmul.f32 %v7331_v14, %v7331_v14  ;;  %11609 = vst [vmem:[#allocation38_spill] sm:$0xff] %v7339_v23  ;;  %v7341_v24 = vpop.f32.mrb[10].mxu0  ;;  %v7347_v30 = vpop.f32.mrb[10].mxu1 }
 0x241   : > { %11610 = vst [vmem:[#allocation39_spill] sm:$0xff] %v7341_v24  ;;  %v2254_v8 = vadd.f32 %v2253_v2, %v2059_v12  ;;  %v1848_v25 = vadd.f32 %v1847_v3, %v7339_v23  ;;  %v2062_v28 = vmul.f32 %v7339_v23, %v7339_v23  ;;  %v1750_v29 = vadd.f32 %v1749_v11, %v7341_v24  ;;  %v7349_v31 = vpop.f32.mrb[11].mxu0  ;;  %v7354_v37 = vpop.f32.mrb[11].mxu1 }
 0x242   : > { %11611 = vst [vmem:[#allocation40_spill] sm:$0xff] %v7347_v30  ;;  %11612 = vst [vmem:[#allocation41_spill] sm:$0xff] %v7349_v31  ;;  %v2320_v33 = vadd.f32 %v2319_v5, %v2061_v16  ;;  %v2287_v34 = vadd.f32 %v2286_v7, %v2060_v20  ;;  %v2067_v35 = vmul.f32 %v7341_v24, %v7341_v24 }
 0x243   : > { %v1816_v36 = vadd.f32 %v1815_v15, %v7347_v30  ;;  %11613 = vst [vmem:[#allocation42_spill] sm:$0xff] %v7354_v37  ;;  %v2353_v38 = vadd.f32 %v2352_v9, %v2062_v28  ;;  %v2069_v39 = vmul.f32 %v7347_v30, %v7347_v30  ;;  %v1783_v41 = vadd.f32 %v1782_v17, %v7349_v31 }
 0x244   : > { %v2068_v42 = vmul.f32 %v7349_v31, %v7349_v31  ;;  %v2255_v45 = vadd.f32 %v2254_v8, %v2067_v35  ;;  %v1849_v46 = vadd.f32 %v1848_v25, %v7354_v37  ;;  %v2070_v47 = vmul.f32 %v7354_v37, %v7354_v37 }
 0x245   : > { %v2321_v48 = vadd.f32 %v2320_v33, %v2069_v39 }
 0x246   : > { %v2288_v51 = vadd.f32 %v2287_v34, %v2068_v42  ;;  %v2354_v52 = vadd.f32 %v2353_v38, %v2070_v47  ;;  %v7364_v53 = vpop.f32.mrb[12].mxu0  ;;  %v7369_v58 = vpop.f32.mrb[12].mxu1 }
 0x247   : > { %11614 = vst [vmem:[#allocation43_spill] sm:$0xff] %v7364_v53  ;;  %v1751_v54 = vadd.f32 %v1750_v29, %v7364_v53  ;;  %v2075_v57 = vmul.f32 %v7364_v53, %v7364_v53  ;;  %11615 = vst [vmem:[#allocation44_spill] sm:$0xff] %v7369_v58  ;;  %v7371_v59 = vpop.f32.mrb[13].mxu0  ;;  %v1817_v60 = vadd.f32 %v1816_v36, %v7369_v58  ;;  %v7379_v1 = vpop.f32.mrb[13].mxu1 }
 0x248   : > { %11616 = vst [vmem:[#allocation45_spill] sm:$0xff] %v7371_v59  ;;  %v2077_v62 = vmul.f32 %v7369_v58, %v7369_v58  ;;  %v1784_v63 = vadd.f32 %v1783_v41, %v7371_v59  ;;  %v2076_v0 = vmul.f32 %v7371_v59, %v7371_v59  ;;  %11617 = vst [vmem:[#allocation46_spill] sm:$0xff] %v7379_v1  ;;  %v7381_v2 = vpop.f32.mrb[14].mxu0  ;;  %v7387_v9 = vpop.f32.mrb[14].mxu1 }
 0x249   : > { %11618 = vst [vmem:[#allocation47_spill] sm:$0xff] %v7381_v2  ;;  %v2256_v3 = vadd.f32 %v2255_v45, %v2075_v57  ;;  %v1850_v4 = vadd.f32 %v1849_v46, %v7379_v1  ;;  %v2078_v5 = vmul.f32 %v7379_v1, %v7379_v1  ;;  %v1752_v7 = vadd.f32 %v1751_v54, %v7381_v2  ;;  %v7389_v11 = vpop.f32.mrb[15].mxu0  ;;  %v7394_v20 = vpop.f32.mrb[15].mxu1 }
 0x24a   : > { %11619 = vst [vmem:[#allocation48_spill] sm:$0xff] %v7387_v9  ;;  %11620 = vst [vmem:[#allocation49_spill] sm:$0xff] %v7389_v11  ;;  %v2322_v12 = vadd.f32 %v2321_v48, %v2077_v62  ;;  %v2289_v15 = vadd.f32 %v2288_v51, %v2076_v0  ;;  %v2083_v16 = vmul.f32 %v7381_v2, %v7381_v2 }
 0x24b   : > { %v1818_v17 = vadd.f32 %v1817_v60, %v7387_v9  ;;  %11621 = vst [vmem:[#allocation50_spill] sm:$0xff] %v7394_v20  ;;  %v2355_v8 = vadd.f32 %v2354_v52, %v2078_v5  ;;  %v2085_v25 = vmul.f32 %v7387_v9, %v7387_v9  ;;  %v1785_v28 = vadd.f32 %v1784_v63, %v7389_v11 }
 0x24c   : > { %v2084_v29 = vmul.f32 %v7389_v11, %v7389_v11  ;;  %v2257_v33 = vadd.f32 %v2256_v3, %v2083_v16  ;;  %v1851_v34 = vadd.f32 %v1850_v4, %v7394_v20  ;;  %v2086_v35 = vmul.f32 %v7394_v20, %v7394_v20 }
 0x24d   : > { %v2323_v36 = vadd.f32 %v2322_v12, %v2085_v25 }
 0x24e   : > { %v2290_v38 = vadd.f32 %v2289_v15, %v2084_v29  ;;  %v2356_v39 = vadd.f32 %v2355_v8, %v2086_v35  ;;  %v7404_v41 = vpop.f32.mrb[16].mxu0  ;;  %v7409_v46 = vpop.f32.mrb[16].mxu1 }
 0x24f   : > { %11622 = vst [vmem:[#allocation51_spill] sm:$0xff] %v7404_v41  ;;  %v1753_v42 = vadd.f32 %v1752_v7, %v7404_v41  ;;  %v2091_v45 = vmul.f32 %v7404_v41, %v7404_v41  ;;  %11623 = vst [vmem:[#allocation52_spill] sm:$0xff] %v7409_v46  ;;  %v7411_v47 = vpop.f32.mrb[17].mxu0  ;;  %v1819_v48 = vadd.f32 %v1818_v17, %v7409_v46  ;;  %v7419_v57 = vpop.f32.mrb[17].mxu1 }
 0x250   : > { %11624 = vst [vmem:[#allocation53_spill] sm:$0xff] %v7411_v47  ;;  %v2093_v51 = vmul.f32 %v7409_v46, %v7409_v46  ;;  %v1786_v52 = vadd.f32 %v1785_v28, %v7411_v47  ;;  %v2092_v54 = vmul.f32 %v7411_v47, %v7411_v47  ;;  %11625 = vst [vmem:[#allocation54_spill] sm:$0xff] %v7419_v57  ;;  %v7421_v60 = vpop.f32.mrb[18].mxu0  ;;  %v7427_v4 = vpop.f32.mrb[18].mxu1 }
 0x251   : > { %11626 = vst [vmem:[#allocation55_spill] sm:$0xff] %v7421_v60  ;;  %v2258_v62 = vadd.f32 %v2257_v33, %v2091_v45  ;;  %v1852_v63 = vadd.f32 %v1851_v34, %v7419_v57  ;;  %v2094_v0 = vmul.f32 %v7419_v57, %v7419_v57  ;;  %v1754_v3 = vadd.f32 %v1753_v42, %v7421_v60  ;;  %v7429_v5 = vpop.f32.mrb[19].mxu0  ;;  %v7434_v17 = vpop.f32.mrb[19].mxu1 }
 0x252   : > { %11627 = vst [vmem:[#allocation56_spill] sm:$0xff] %v7427_v4  ;;  %11628 = vst [vmem:[#allocation57_spill] sm:$0xff] %v7429_v5  ;;  %v2324_v7 = vadd.f32 %v2323_v36, %v2093_v51  ;;  %v2291_v12 = vadd.f32 %v2290_v38, %v2092_v54  ;;  %v2099_v15 = vmul.f32 %v7421_v60, %v7421_v60 }
 0x253   : > { %v1820_v16 = vadd.f32 %v1819_v48, %v7427_v4  ;;  %11629 = vst [vmem:[#allocation58_spill] sm:$0xff] %v7434_v17  ;;  %v2357_v8 = vadd.f32 %v2356_v39, %v2094_v0  ;;  %v2101_v25 = vmul.f32 %v7427_v4, %v7427_v4  ;;  %v1787_v28 = vadd.f32 %v1786_v52, %v7429_v5 }
 0x254   : > { %v2100_v29 = vmul.f32 %v7429_v5, %v7429_v5  ;;  %v2259_v33 = vadd.f32 %v2258_v62, %v2099_v15  ;;  %v1853_v34 = vadd.f32 %v1852_v63, %v7434_v17  ;;  %v2102_v35 = vmul.f32 %v7434_v17, %v7434_v17 }
 0x255   : > { %v2325_v36 = vadd.f32 %v2324_v7, %v2101_v25 }
 0x256   : > { %v2292_v38 = vadd.f32 %v2291_v12, %v2100_v29  ;;  %v2358_v42 = vadd.f32 %v2357_v8, %v2102_v35  ;;  %v7444_v45 = vpop.f32.mrb[20].mxu0  ;;  %v7449_v51 = vpop.f32.mrb[20].mxu1 }
 0x257   : > { %11630 = vst [vmem:[#allocation59_spill] sm:$0xff] %v7444_v45  ;;  %v1755_v39 = vadd.f32 %v1754_v3, %v7444_v45  ;;  %v2107_v48 = vmul.f32 %v7444_v45, %v7444_v45  ;;  %11631 = vst [vmem:[#allocation60_spill] sm:$0xff] %v7449_v51  ;;  %v7451_v52 = vpop.f32.mrb[21].mxu0  ;;  %v1821_v54 = vadd.f32 %v1820_v16, %v7449_v51  ;;  %v7459_v7 = vpop.f32.mrb[21].mxu1 }
 0x258   : > { %11632 = vst [vmem:[#allocation61_spill] sm:$0xff] %v7451_v52  ;;  %v2109_v62 = vmul.f32 %v7449_v51, %v7449_v51  ;;  %v1788_v63 = vadd.f32 %v1787_v28, %v7451_v52  ;;  %v2108_v0 = vmul.f32 %v7451_v52, %v7451_v52  ;;  %11633 = vst [vmem:[#allocation62_spill] sm:$0xff] %v7459_v7  ;;  %v7461_v3 = vpop.f32.mrb[22].mxu0  ;;  %v7467_v25 = vpop.f32.mrb[22].mxu1 }
 0x259   : > { %11634 = vst [vmem:[#allocation63_spill] sm:$0xff] %v7461_v3  ;;  %v2260_v12 = vadd.f32 %v2259_v33, %v2107_v48  ;;  %v1854_v15 = vadd.f32 %v1853_v34, %v7459_v7  ;;  %v2110_v8 = vmul.f32 %v7459_v7, %v7459_v7  ;;  %v1756_v16 = vadd.f32 %v1755_v39, %v7461_v3  ;;  %v7469_v29 = vpop.f32.mrb[23].mxu0  ;;  %v7474_v45 = vpop.f32.mrb[23].mxu1 }
 0x25a   : > { %11635 = vst [vmem:[#allocation64_spill] sm:$0xff] %v7467_v25  ;;  %11636 = vst [vmem:[#allocation65_spill] sm:$0xff] %v7469_v29  ;;  %v2326_v28 = vadd.f32 %v2325_v36, %v2109_v62  ;;  %v2293_v35 = vadd.f32 %v2292_v38, %v2108_v0  ;;  %v2115_v51 = vmul.f32 %v7461_v3, %v7461_v3 }
 0x25b   : > { %v1822_v52 = vadd.f32 %v1821_v54, %v7467_v25  ;;  %11637 = vst [vmem:[#allocation66_spill] sm:$0xff] %v7474_v45  ;;  %v2359_v33 = vadd.f32 %v2358_v42, %v2110_v8  ;;  %v2117_v34 = vmul.f32 %v7467_v25, %v7467_v25  ;;  %v1789_v48 = vadd.f32 %v1788_v63, %v7469_v29 }
 0x25c   : > { %v2116_v39 = vmul.f32 %v7469_v29, %v7469_v29  ;;  %v2261_v7 = vadd.f32 %v2260_v12, %v2115_v51  ;;  %v1855_v36 = vadd.f32 %v1854_v15, %v7474_v45  ;;  %v2118_v38 = vmul.f32 %v7474_v45, %v7474_v45 }
 0x25d   : > { %v2327_v62 = vadd.f32 %v2326_v28, %v2117_v34 }
 0x25e   : > { %v2294_v0 = vadd.f32 %v2293_v35, %v2116_v39  ;;  %v2360_v54 = vadd.f32 %v2359_v33, %v2118_v38  ;;  %v7484_v3 = vpop.f32.mrb[24].mxu0  ;;  %v7489_v63 = vpop.f32.mrb[24].mxu1 }
 0x25f   : > { %11638 = vst [vmem:[#allocation67_spill] sm:$0xff] %v7484_v3  ;;  %v1757_v42 = vadd.f32 %v1756_v16, %v7484_v3  ;;  %v2123_v8 = vmul.f32 %v7484_v3, %v7484_v3  ;;  %11639 = vst [vmem:[#allocation68_spill] sm:$0xff] %v7489_v63  ;;  %v7491_v25 = vpop.f32.mrb[25].mxu0  ;;  %v1823_v51 = vadd.f32 %v1822_v52, %v7489_v63  ;;  %v7499_v35 = vpop.f32.mrb[25].mxu1 }
 0x260   : > { %11640 = vst [vmem:[#allocation69_spill] sm:$0xff] %v7491_v25  ;;  %v2125_v12 = vmul.f32 %v7489_v63, %v7489_v63  ;;  %v1790_v15 = vadd.f32 %v1789_v48, %v7491_v25  ;;  %v2124_v28 = vmul.f32 %v7491_v25, %v7491_v25  ;;  %11641 = vst [vmem:[#allocation70_spill] sm:$0xff] %v7499_v35  ;;  %v7501_v16 = vpop.f32.mrb[26].mxu0  ;;  %v7507_v38 = vpop.f32.mrb[26].mxu1 }
 0x261   : > { %11642 = vst [vmem:[#allocation71_spill] sm:$0xff] %v7501_v16  ;;  %v2262_v33 = vadd.f32 %v2261_v7, %v2123_v8  ;;  %v1856_v34 = vadd.f32 %v1855_v36, %v7499_v35  ;;  %v2126_v39 = vmul.f32 %v7499_v35, %v7499_v35  ;;  %v1758_v52 = vadd.f32 %v1757_v42, %v7501_v16  ;;  %v7509_v63 = vpop.f32.mrb[27].mxu0  ;;  %v7514_v29 = vpop.f32.mrb[27].mxu1 }
 0x262   : > { %11643 = vst [vmem:[#allocation72_spill] sm:$0xff] %v7507_v38  ;;  %11644 = vst [vmem:[#allocation73_spill] sm:$0xff] %v7509_v63  ;;  %v2328_v48 = vadd.f32 %v2327_v62, %v2125_v12  ;;  %v2295_v3 = vadd.f32 %v2294_v0, %v2124_v28  ;;  %v2131_v25 = vmul.f32 %v7501_v16, %v7501_v16 }
 0x263   : > { %v1824_v45 = vadd.f32 %v1823_v51, %v7507_v38  ;;  %11645 = vst [vmem:[#allocation74_spill] sm:$0xff] %v7514_v29  ;;  %v2361_v7 = vadd.f32 %v2360_v54, %v2126_v39  ;;  %v2133_v36 = vmul.f32 %v7507_v38, %v7507_v38  ;;  %v1791_v8 = vadd.f32 %v1790_v15, %v7509_v63 }
 0x264   : > { %v2132_v42 = vmul.f32 %v7509_v63, %v7509_v63  ;;  %v2263_v35 = vadd.f32 %v2262_v33, %v2131_v25  ;;  %v1857_v62 = vadd.f32 %v1856_v34, %v7514_v29  ;;  %v2134_v0 = vmul.f32 %v7514_v29, %v7514_v29 }
 0x265   : > { %v2329_v12 = vadd.f32 %v2328_v48, %v2133_v36 }
 0x266   : > { %v2296_v28 = vadd.f32 %v2295_v3, %v2132_v42  ;;  %v2362_v51 = vadd.f32 %v2361_v7, %v2134_v0  ;;  %v7524_v16 = vpop.f32.mrb[28].mxu0  ;;  %v7529_v15 = vpop.f32.mrb[28].mxu1 }
 0x267   : > { %11646 = vst [vmem:[#allocation75_spill] sm:$0xff] %v7524_v16  ;;  %v1759_v54 = vadd.f32 %v1758_v52, %v7524_v16  ;;  %v2139_v39 = vmul.f32 %v7524_v16, %v7524_v16  ;;  %11647 = vst [vmem:[#allocation76_spill] sm:$0xff] %v7529_v15  ;;  %v7531_v38 = vpop.f32.mrb[29].mxu0  ;;  %v1825_v25 = vadd.f32 %v1824_v45, %v7529_v15  ;;  %v7539_v48 = vpop.f32.mrb[29].mxu1 }
 0x268   : > { %11648 = vst [vmem:[#allocation77_spill] sm:$0xff] %v7531_v38  ;;  %v2141_v33 = vmul.f32 %v7529_v15, %v7529_v15  ;;  %v1792_v34 = vadd.f32 %v1791_v8, %v7531_v38  ;;  %v2140_v3 = vmul.f32 %v7531_v38, %v7531_v38  ;;  %11649 = vst [vmem:[#allocation78_spill] sm:$0xff] %v7539_v48  ;;  %v7541_v52 = vpop.f32.mrb[30].mxu0  ;;  %v7547_v0 = vpop.f32.mrb[30].mxu1 }
 0x269   : > { %11650 = vst [vmem:[#allocation79_spill] sm:$0xff] %v7541_v52  ;;  %v2264_v7 = vadd.f32 %v2263_v35, %v2139_v39  ;;  %v1858_v36 = vadd.f32 %v1857_v62, %v7539_v48  ;;  %v2142_v42 = vmul.f32 %v7539_v48, %v7539_v48  ;;  %v1760_v45 = vadd.f32 %v1759_v54, %v7541_v52  ;;  %v7549_v15 = vpop.f32.mrb[31].mxu0  ;;  %v7554_v63 = vpop.f32.mrb[31].mxu1 }
 0x26a   : > { %11651 = vst [vmem:[#allocation80_spill] sm:$0xff] %v7547_v0  ;;  %11652 = vst [vmem:[#allocation81_spill] sm:$0xff] %v7549_v15  ;;  %v2330_v8 = vadd.f32 %v2329_v12, %v2141_v33  ;;  %v2297_v16 = vadd.f32 %v2296_v28, %v2140_v3  ;;  %v2147_v38 = vmul.f32 %v7541_v52, %v7541_v52 }
 0x26b   : > { %v1826_v29 = vadd.f32 %v1825_v25, %v7547_v0  ;;  %11653 = vst [vmem:[#allocation82_spill] sm:$0xff] %v7554_v63  ;;  %v2363_v35 = vadd.f32 %v2362_v51, %v2142_v42  ;;  %v2149_v62 = vmul.f32 %v7547_v0, %v7547_v0  ;;  %v1793_v39 = vadd.f32 %v1792_v34, %v7549_v15 }
 0x26c   : > { %v2148_v54 = vmul.f32 %v7549_v15, %v7549_v15  ;;  %v2265_v48 = vadd.f32 %v2264_v7, %v2147_v38  ;;  %v1859_v12 = vadd.f32 %v1858_v36, %v7554_v63  ;;  %v2150_v28 = vmul.f32 %v7554_v63, %v7554_v63 }
 0x26d   : > { %v2331_v33 = vadd.f32 %v2330_v8, %v2149_v62 }
 0x26e   : > { %v2298_v3 = vadd.f32 %v2297_v16, %v2148_v54  ;;  %v2364_v25 = vadd.f32 %v2363_v35, %v2150_v28  ;;  %v7564_v52 = vpop.f32.mrb[32].mxu0  ;;  %v7569_v34 = vpop.f32.mrb[32].mxu1 }
 0x26f   : > { %11654 = vst [vmem:[#allocation83_spill] sm:$0xff] %v7564_v52  ;;  %v1761_v51 = vadd.f32 %v1760_v45, %v7564_v52  ;;  %v2155_v42 = vmul.f32 %v7564_v52, %v7564_v52  ;;  %11655 = vst [vmem:[#allocation84_spill] sm:$0xff] %v7569_v34  ;;  %v7571_v0 = vpop.f32.mrb[33].mxu0  ;;  %v1827_v38 = vadd.f32 %v1826_v29, %v7569_v34  ;;  %v7579_v8 = vpop.f32.mrb[33].mxu1 }
 0x270   : > { %11656 = vst [vmem:[#allocation85_spill] sm:$0xff] %v7571_v0  ;;  %v2157_v7 = vmul.f32 %v7569_v34, %v7569_v34  ;;  %v1794_v36 = vadd.f32 %v1793_v39, %v7571_v0  ;;  %v2156_v16 = vmul.f32 %v7571_v0, %v7571_v0  ;;  %11657 = vst [vmem:[#allocation86_spill] sm:$0xff] %v7579_v8  ;;  %v7581_v45 = vpop.f32.mrb[34].mxu0  ;;  %v7587_v28 = vpop.f32.mrb[34].mxu1 }
 0x271   : > { %11658 = vst [vmem:[#allocation87_spill] sm:$0xff] %v7581_v45  ;;  %v2266_v35 = vadd.f32 %v2265_v48, %v2155_v42  ;;  %v1860_v62 = vadd.f32 %v1859_v12, %v7579_v8  ;;  %v2158_v54 = vmul.f32 %v7579_v8, %v7579_v8  ;;  %v1762_v29 = vadd.f32 %v1761_v51, %v7581_v45  ;;  %v7589_v34 = vpop.f32.mrb[35].mxu0  ;;  %v7594_v15 = vpop.f32.mrb[35].mxu1 }
 0x272   : > { %11659 = vst [vmem:[#allocation88_spill] sm:$0xff] %v7587_v28  ;;  %11660 = vst [vmem:[#allocation89_spill] sm:$0xff] %v7589_v34  ;;  %v2332_v39 = vadd.f32 %v2331_v33, %v2157_v7  ;;  %v2299_v52 = vadd.f32 %v2298_v3, %v2156_v16  ;;  %v2163_v0 = vmul.f32 %v7581_v45, %v7581_v45 }
 0x273   : > { %v1828_v63 = vadd.f32 %v1827_v38, %v7587_v28  ;;  %11661 = vst [vmem:[#allocation90_spill] sm:$0xff] %v7594_v15  ;;  %v2365_v48 = vadd.f32 %v2364_v25, %v2158_v54  ;;  %v2165_v12 = vmul.f32 %v7587_v28, %v7587_v28  ;;  %v1795_v42 = vadd.f32 %v1794_v36, %v7589_v34 }
 0x274   : > { %v2164_v51 = vmul.f32 %v7589_v34, %v7589_v34  ;;  %v2267_v8 = vadd.f32 %v2266_v35, %v2163_v0  ;;  %v1861_v33 = vadd.f32 %v1860_v62, %v7594_v15  ;;  %v2166_v3 = vmul.f32 %v7594_v15, %v7594_v15 }
 0x275   : > { %v2333_v7 = vadd.f32 %v2332_v39, %v2165_v12 }
 0x276   : > { %v2300_v16 = vadd.f32 %v2299_v52, %v2164_v51  ;;  %v2366_v38 = vadd.f32 %v2365_v48, %v2166_v3  ;;  %v7604_v45 = vpop.f32.mrb[36].mxu0  ;;  %v7609_v36 = vpop.f32.mrb[36].mxu1 }
 0x277   : > { %11662 = vst [vmem:[#allocation91_spill] sm:$0xff] %v7604_v45  ;;  %v1763_v25 = vadd.f32 %v1762_v29, %v7604_v45  ;;  %v2171_v54 = vmul.f32 %v7604_v45, %v7604_v45  ;;  %11663 = vst [vmem:[#allocation92_spill] sm:$0xff] %v7609_v36  ;;  %v7611_v28 = vpop.f32.mrb[37].mxu0  ;;  %v1829_v0 = vadd.f32 %v1828_v63, %v7609_v36  ;;  %v7619_v39 = vpop.f32.mrb[37].mxu1 }
 0x278   : > { %11664 = vst [vmem:[#allocation93_spill] sm:$0xff] %v7611_v28  ;;  %v2173_v35 = vmul.f32 %v7609_v36, %v7609_v36  ;;  %v1796_v62 = vadd.f32 %v1795_v42, %v7611_v28  ;;  %v2172_v52 = vmul.f32 %v7611_v28, %v7611_v28  ;;  %11665 = vst [vmem:[#allocation94_spill] sm:$0xff] %v7619_v39  ;;  %v7621_v29 = vpop.f32.mrb[38].mxu0  ;;  %v7627_v3 = vpop.f32.mrb[38].mxu1 }
 0x279   : > { %11666 = vst [vmem:[#allocation95_spill] sm:$0xff] %v7621_v29  ;;  %v2268_v48 = vadd.f32 %v2267_v8, %v2171_v54  ;;  %v1862_v12 = vadd.f32 %v1861_v33, %v7619_v39  ;;  %v2174_v51 = vmul.f32 %v7619_v39, %v7619_v39  ;;  %v1764_v63 = vadd.f32 %v1763_v25, %v7621_v29  ;;  %v7629_v36 = vpop.f32.mrb[39].mxu0  ;;  %v7634_v34 = vpop.f32.mrb[39].mxu1 }
 0x27a   : > { %11667 = vst [vmem:[#allocation96_spill] sm:$0xff] %v7627_v3  ;;  %11668 = vst [vmem:[#allocation97_spill] sm:$0xff] %v7629_v36  ;;  %v2334_v42 = vadd.f32 %v2333_v7, %v2173_v35  ;;  %v2301_v45 = vadd.f32 %v2300_v16, %v2172_v52  ;;  %v2179_v28 = vmul.f32 %v7621_v29, %v7621_v29 }
 0x27b   : > { %v1830_v15 = vadd.f32 %v1829_v0, %v7627_v3  ;;  %11669 = vst [vmem:[#allocation98_spill] sm:$0xff] %v7634_v34  ;;  %v2367_v8 = vadd.f32 %v2366_v38, %v2174_v51  ;;  %v2181_v33 = vmul.f32 %v7627_v3, %v7627_v3  ;;  %v1797_v54 = vadd.f32 %v1796_v62, %v7629_v36 }
 0x27c   : > { %v2180_v25 = vmul.f32 %v7629_v36, %v7629_v36  ;;  %v2269_v39 = vadd.f32 %v2268_v48, %v2179_v28  ;;  %v1863_v7 = vadd.f32 %v1862_v12, %v7634_v34  ;;  %v2182_v16 = vmul.f32 %v7634_v34, %v7634_v34 }
 0x27d   : > { %v2335_v35 = vadd.f32 %v2334_v42, %v2181_v33 }
 0x27e   : > { %v2302_v52 = vadd.f32 %v2301_v45, %v2180_v25  ;;  %v2368_v0 = vadd.f32 %v2367_v8, %v2182_v16  ;;  %v7644_v29 = vpop.f32.mrb[40].mxu0  ;;  %v7649_v62 = vpop.f32.mrb[40].mxu1 }
 0x27f   : > { %11670 = vst [vmem:[#allocation99_spill] sm:$0xff] %v7644_v29  ;;  %v1765_v38 = vadd.f32 %v1764_v63, %v7644_v29  ;;  %v2187_v51 = vmul.f32 %v7644_v29, %v7644_v29  ;;  %11671 = vst [vmem:[#allocation100_spill] sm:$0xff] %v7649_v62  ;;  %v7651_v3 = vpop.f32.mrb[41].mxu0  ;;  %v1831_v28 = vadd.f32 %v1830_v15, %v7649_v62  ;;  %v7659_v42 = vpop.f32.mrb[41].mxu1 }
 0x280   : > { %11672 = vst [vmem:[#allocation101_spill] sm:$0xff] %v7651_v3  ;;  %v2189_v48 = vmul.f32 %v7649_v62, %v7649_v62  ;;  %v1798_v12 = vadd.f32 %v1797_v54, %v7651_v3  ;;  %v2188_v45 = vmul.f32 %v7651_v3, %v7651_v3  ;;  %11673 = vst [vmem:[#allocation102_spill] sm:$0xff] %v7659_v42  ;;  %v7661_v63 = vpop.f32.mrb[42].mxu0  ;;  %v7667_v16 = vpop.f32.mrb[42].mxu1 }
 0x281   : > { %11674 = vst [vmem:[#allocation103_spill] sm:$0xff] %v7661_v63  ;;  %v2270_v8 = vadd.f32 %v2269_v39, %v2187_v51  ;;  %v1864_v33 = vadd.f32 %v1863_v7, %v7659_v42  ;;  %v2190_v25 = vmul.f32 %v7659_v42, %v7659_v42  ;;  %v1766_v15 = vadd.f32 %v1765_v38, %v7661_v63  ;;  %v7669_v62 = vpop.f32.mrb[43].mxu0  ;;  %v7674_v36 = vpop.f32.mrb[43].mxu1 }
 0x282   : > { %11675 = vst [vmem:[#allocation104_spill] sm:$0xff] %v7667_v16  ;;  %11676 = vst [vmem:[#allocation105_spill] sm:$0xff] %v7669_v62  ;;  %v2336_v54 = vadd.f32 %v2335_v35, %v2189_v48  ;;  %v2303_v29 = vadd.f32 %v2302_v52, %v2188_v45  ;;  %v2195_v3 = vmul.f32 %v7661_v63, %v7661_v63 }
 0x283   : > { %v1832_v34 = vadd.f32 %v1831_v28, %v7667_v16  ;;  %11677 = vst [vmem:[#allocation106_spill] sm:$0xff] %v7674_v36  ;;  %v2369_v39 = vadd.f32 %v2368_v0, %v2190_v25  ;;  %v2197_v7 = vmul.f32 %v7667_v16, %v7667_v16  ;;  %v1799_v51 = vadd.f32 %v1798_v12, %v7669_v62 }
 0x284   : > { %v2196_v38 = vmul.f32 %v7669_v62, %v7669_v62  ;;  %v2271_v42 = vadd.f32 %v2270_v8, %v2195_v3  ;;  %v1865_v35 = vadd.f32 %v1864_v33, %v7674_v36  ;;  %v2198_v52 = vmul.f32 %v7674_v36, %v7674_v36 }
 0x285   : > { %v2337_v48 = vadd.f32 %v2336_v54, %v2197_v7 }
 0x286   : > { %v2304_v45 = vadd.f32 %v2303_v29, %v2196_v38  ;;  %v2370_v28 = vadd.f32 %v2369_v39, %v2198_v52  ;;  %v7684_v63 = vpop.f32.mrb[44].mxu0  ;;  %v7689_v12 = vpop.f32.mrb[44].mxu1 }
 0x287   : > { %11678 = vst [vmem:[#allocation107_spill] sm:$0xff] %v7684_v63  ;;  %v1767_v0 = vadd.f32 %v1766_v15, %v7684_v63  ;;  %v2203_v25 = vmul.f32 %v7684_v63, %v7684_v63  ;;  %11679 = vst [vmem:[#allocation108_spill] sm:$0xff] %v7689_v12  ;;  %v7691_v16 = vpop.f32.mrb[45].mxu0  ;;  %v1833_v3 = vadd.f32 %v1832_v34, %v7689_v12  ;;  %v7699_v54 = vpop.f32.mrb[45].mxu1 }
 0x288   : > { %11680 = vst [vmem:[#allocation109_spill] sm:$0xff] %v7691_v16  ;;  %v2205_v8 = vmul.f32 %v7689_v12, %v7689_v12  ;;  %v1800_v33 = vadd.f32 %v1799_v51, %v7691_v16  ;;  %v2204_v29 = vmul.f32 %v7691_v16, %v7691_v16  ;;  %11681 = vst [vmem:[#allocation110_spill] sm:$0xff] %v7699_v54  ;;  %v7701_v15 = vpop.f32.mrb[46].mxu0  ;;  %v7707_v52 = vpop.f32.mrb[46].mxu1 }
 0x289   : > { %11682 = vst [vmem:[#allocation111_spill] sm:$0xff] %v7701_v15  ;;  %v2272_v39 = vadd.f32 %v2271_v42, %v2203_v25  ;;  %v1866_v7 = vadd.f32 %v1865_v35, %v7699_v54  ;;  %v2206_v38 = vmul.f32 %v7699_v54, %v7699_v54  ;;  %v1768_v34 = vadd.f32 %v1767_v0, %v7701_v15  ;;  %v7709_v12 = vpop.f32.mrb[47].mxu0  ;;  %v7714_v62 = vpop.f32.mrb[47].mxu1 }
 0x28a   : > { %11683 = vst [vmem:[#allocation112_spill] sm:$0xff] %v7707_v52  ;;  %11684 = vst [vmem:[#allocation113_spill] sm:$0xff] %v7709_v12  ;;  %v2338_v51 = vadd.f32 %v2337_v48, %v2205_v8  ;;  %v2305_v63 = vadd.f32 %v2304_v45, %v2204_v29  ;;  %v2211_v16 = vmul.f32 %v7701_v15, %v7701_v15 }
 0x28b   : > { %v1834_v36 = vadd.f32 %v1833_v3, %v7707_v52  ;;  %11685 = vst [vmem:[#allocation114_spill] sm:$0xff] %v7714_v62  ;;  %v2371_v42 = vadd.f32 %v2370_v28, %v2206_v38  ;;  %v2213_v35 = vmul.f32 %v7707_v52, %v7707_v52  ;;  %v1801_v25 = vadd.f32 %v1800_v33, %v7709_v12 }
 0x28c   : > { %v2212_v0 = vmul.f32 %v7709_v12, %v7709_v12  ;;  %v2273_v54 = vadd.f32 %v2272_v39, %v2211_v16  ;;  %v1867_v48 = vadd.f32 %v1866_v7, %v7714_v62  ;;  %v2214_v45 = vmul.f32 %v7714_v62, %v7714_v62 }
 0x28d   : > { %v2339_v8 = vadd.f32 %v2338_v51, %v2213_v35 }
 0x28e   : > { %v2306_v29 = vadd.f32 %v2305_v63, %v2212_v0  ;;  %v2372_v3 = vadd.f32 %v2371_v42, %v2214_v45  ;;  %v7724_v15 = vpop.f32.mrb[48].mxu0  ;;  %v7729_v33 = vpop.f32.mrb[48].mxu1 }
 0x28f   : > { %11686 = vst [vmem:[#allocation115_spill] sm:$0xff] %v7724_v15  ;;  %v1769_v28 = vadd.f32 %v1768_v34, %v7724_v15  ;;  %v2219_v38 = vmul.f32 %v7724_v15, %v7724_v15  ;;  %11687 = vst [vmem:[#allocation116_spill] sm:$0xff] %v7729_v33  ;;  %v7731_v52 = vpop.f32.mrb[49].mxu0  ;;  %v1835_v16 = vadd.f32 %v1834_v36, %v7729_v33  ;;  %v7739_v51 = vpop.f32.mrb[49].mxu1 }
 0x290   : > { %11688 = vst [vmem:[#allocation117_spill] sm:$0xff] %v7731_v52  ;;  %v2221_v39 = vmul.f32 %v7729_v33, %v7729_v33  ;;  %v1802_v7 = vadd.f32 %v1801_v25, %v7731_v52  ;;  %v2220_v63 = vmul.f32 %v7731_v52, %v7731_v52  ;;  %11689 = vst [vmem:[#allocation118_spill] sm:$0xff] %v7739_v51  ;;  %v7741_v34 = vpop.f32.mrb[50].mxu0  ;;  %v7747_v45 = vpop.f32.mrb[50].mxu1 }
 0x291   : > { %11690 = vst [vmem:[#allocation119_spill] sm:$0xff] %v7741_v34  ;;  %v2274_v42 = vadd.f32 %v2273_v54, %v2219_v38  ;;  %v1868_v35 = vadd.f32 %v1867_v48, %v7739_v51  ;;  %v2222_v0 = vmul.f32 %v7739_v51, %v7739_v51  ;;  %v1770_v36 = vadd.f32 %v1769_v28, %v7741_v34  ;;  %v7749_v33 = vpop.f32.mrb[51].mxu0  ;;  %v7754_v12 = vpop.f32.mrb[51].mxu1 }
 0x292   : > { %11691 = vst [vmem:[#allocation120_spill] sm:$0xff] %v7747_v45  ;;  %11692 = vst [vmem:[#allocation121_spill] sm:$0xff] %v7749_v33  ;;  %v2340_v25 = vadd.f32 %v2339_v8, %v2221_v39  ;;  %v2307_v15 = vadd.f32 %v2306_v29, %v2220_v63  ;;  %v2227_v52 = vmul.f32 %v7741_v34, %v7741_v34 }
 0x293   : > { %v1836_v62 = vadd.f32 %v1835_v16, %v7747_v45  ;;  %11693 = vst [vmem:[#allocation122_spill] sm:$0xff] %v7754_v12  ;;  %v2373_v54 = vadd.f32 %v2372_v3, %v2222_v0  ;;  %v2229_v48 = vmul.f32 %v7747_v45, %v7747_v45  ;;  %v1803_v38 = vadd.f32 %v1802_v7, %v7749_v33 }
 0x294   : > { %v2228_v28 = vmul.f32 %v7749_v33, %v7749_v33  ;;  %v2275_v51 = vadd.f32 %v2274_v42, %v2227_v52  ;;  %v1869_v8 = vadd.f32 %v1868_v35, %v7754_v12  ;;  %v2230_v29 = vmul.f32 %v7754_v12, %v7754_v12 }
 0x295   : > { %v2341_v39 = vadd.f32 %v2340_v25, %v2229_v48 }
 0x296   : > { %v2308_v63 = vadd.f32 %v2307_v15, %v2228_v28  ;;  %v2374_v16 = vadd.f32 %v2373_v54, %v2230_v29  ;;  %v7764_v34 = vpop.f32.mrb[52].mxu0  ;;  %v7769_v7 = vpop.f32.mrb[52].mxu1 }
 0x297   : > { %11694 = vst [vmem:[#allocation123_spill] sm:$0xff] %v7764_v34  ;;  %v1771_v3 = vadd.f32 %v1770_v36, %v7764_v34  ;;  %v2235_v0 = vmul.f32 %v7764_v34, %v7764_v34  ;;  %11695 = vst [vmem:[#allocation124_spill] sm:$0xff] %v7769_v7  ;;  %v7771_v45 = vpop.f32.mrb[53].mxu0  ;;  %v1837_v52 = vadd.f32 %v1836_v62, %v7769_v7  ;;  %v7779_v25 = vpop.f32.mrb[53].mxu1 }
 0x298   : > { %11696 = vst [vmem:[#allocation125_spill] sm:$0xff] %v7771_v45  ;;  %v2237_v42 = vmul.f32 %v7769_v7, %v7769_v7  ;;  %v1804_v35 = vadd.f32 %v1803_v38, %v7771_v45  ;;  %v2236_v15 = vmul.f32 %v7771_v45, %v7771_v45  ;;  %11697 = vst [vmem:[#allocation126_spill] sm:$0xff] %v7779_v25  ;;  %v7781_v36 = vpop.f32.mrb[54].mxu0  ;;  %v7789_v29 = vpop.f32.mrb[54].mxu1 }
 0x299   : > { %11698 = vst [vmem:[#allocation127_spill] sm:$0xff] %v7781_v36  ;;  %v2276_v54 = vadd.f32 %v2275_v51, %v2235_v0  ;;  %v1870_v48 = vadd.f32 %v1869_v8, %v7779_v25  ;;  %v2238_v28 = vmul.f32 %v7779_v25, %v7779_v25  ;;  %v7787_v62 = vadd.f32 %v1771_v3, %v7781_v36  ;;  %v7791_v7 = vpop.f32.mrb[55].mxu0  ;;  %v7798_v51 = vpop.f32.mrb[55].mxu1 }
 0x29a   : > { %11699 = vst [vmem:[#allocation128_spill] sm:$0xff] %v7789_v29  ;;  %11700 = vst [vmem:[#allocation129_spill] sm:$0xff] %v7791_v7  ;;  %v2342_v38 = vadd.f32 %v2341_v39, %v2237_v42  ;;  %v2309_v34 = vadd.f32 %v2308_v63, %v2236_v15  ;;  %v2243_v45 = vmul.f32 %v7781_v36, %v7781_v36 }
 0x29b   : > { %v7796_v12 = vadd.f32 %v1837_v52, %v7789_v29  ;;  %11701 = vst [vmem:[#allocation130_spill] sm:$0xff] %v7798_v51  ;;  %v2375_v8 = vadd.f32 %v2374_v16, %v2238_v28  ;;  %v2245_v0 = vmul.f32 %v7789_v29, %v7789_v29  ;;  %v7803_v3 = vadd.f32 %v1804_v35, %v7791_v7 }
 0x29c   : > { %v7805_v25 = vadd.f32 %v2276_v54, %v2243_v45  ;;  %v2244_v39 = vmul.f32 %v7791_v7, %v7791_v7  ;;  %v7810_v63 = vadd.f32 %v1870_v48, %v7798_v51  ;;  %v2246_v52 = vmul.f32 %v7798_v51, %v7798_v51 }
 0x29d   : > { %v7812_v42 = vadd.f32 %v2342_v38, %v2245_v0 }
 0x29e   : > { %v7816_v16 = vadd.f32 %v2309_v34, %v2244_v39  ;;  %v7818_v15 = vpop.f32.mrb[56].mxu0  ;;  %v7820_v28 = vadd.f32 %v2375_v8, %v2246_v52  ;;  %v7822_v35 = vpop.f32.mrb[56].mxu1 }
 0x29f   : > { %v7824_v45 = vpop.f32.mrb[57].mxu0  ;;  %v7826_v54 = vpop.f32.mrb[57].mxu1  ;;  %v2031_v34 = vmul.f32 %v7818_v15, %v7818_v15  ;;  %v2033_v51 = vmul.f32 %v7822_v35, %v7822_v35 }
 0x2a0   : > { %v7828_v29 = vpop.f32.mrb[58].mxu0  ;;  %v7830_v48 = vpop.f32.mrb[58].mxu1  ;;  %v2032_v4 = vmul.f32 %v7824_v45, %v7824_v45  ;;  %v2034_v41 = vmul.f32 %v7826_v54, %v7826_v54 }
 0x2a1   : > { %v7832_v38 = vpop.f32.mrb[59].mxu0  ;;  %v7834_v0 = vpop.f32.mrb[59].mxu1  ;;  %v1878_v8 = vadd.f32 %v7828_v29, %v7818_v15  ;;  %v2039_v39 = vmul.f32 %v7828_v29, %v7828_v29  ;;  %v1944_v7 = vadd.f32 %v7830_v48, %v7822_v35  ;;  %v2041_v36 = vmul.f32 %v7830_v48, %v7830_v48 }
 0x2a2   : > { %v1911_v60 = vadd.f32 %v7832_v38, %v7824_v45  ;;  %v2040_v57 = vmul.f32 %v7832_v38, %v7832_v38  ;;  %v1977_v9 = vadd.f32 %v7834_v0, %v7826_v54 }
 0x2a3   : > { %v2383_v5 = vadd.f32 %v2039_v39, %v2031_v34  ;;  %v2449_v20 = vadd.f32 %v2041_v36, %v2033_v51  ;;  %v2042_v34 = vmul.f32 %v7834_v0, %v7834_v0 }
 0x2a4   : > { %v2416_v2 = vadd.f32 %v2040_v57, %v2032_v4 }
 0x2a5   : > { %v2482_v36 = vadd.f32 %v2042_v34, %v2034_v41 }
 0x2a6   : > { %v7842_v52 = vpop.f32.mrb[60].mxu0  ;;  %v7850_v33 = vpop.f32.mrb[60].mxu1 }
 0x2a7   : > { %11702 = vst [vmem:[#allocation131_spill] sm:$0xff] %v7850_v33  ;;  %v7852_v17 = vpop.f32.mrb[61].mxu0  ;;  %v7860_v46 = vpop.f32.mrb[61].mxu1  ;;  %v1879_v1 = vadd.f32 %v1878_v8, %v7842_v52  ;;  %v2047_v58 = vmul.f32 %v7842_v52, %v7842_v52  ;;  %v1945_v59 = vadd.f32 %v1944_v7, %v7850_v33  ;;  %v2049_v51 = vmul.f32 %v7850_v33, %v7850_v33 }
 0x2a8   : > { %11703 = vst [vmem:[#allocation132_spill] sm:$0xff] %v7860_v46  ;;  %v7862_v47 = vpop.f32.mrb[62].mxu0  ;;  %v7870_v39 = vpop.f32.mrb[62].mxu1  ;;  %v1912_v37 = vadd.f32 %v1911_v60, %v7852_v17  ;;  %v2048_v30 = vmul.f32 %v7852_v17, %v7852_v17  ;;  %v1978_v57 = vadd.f32 %v1977_v9, %v7860_v46  ;;  %v2050_v4 = vmul.f32 %v7860_v46, %v7860_v46 }
 0x2a9   : > { %11704 = vst [vmem:[#allocation133_spill] sm:$0xff] %v7862_v47  ;;  %11705 = vst [vmem:[#allocation134_spill] sm:$0xff] %v7870_v39  ;;  %v7872_v11 = vpop.f32.mrb[63].mxu0  ;;  %v7878_v53 = vpop.f32.mrb[63].mxu1  ;;  %v2384_v31 = vadd.f32 %v2383_v5, %v2047_v58  ;;  %v1880_v8 = vadd.f32 %v1879_v1, %v7862_v47  ;;  %v2450_v7 = vadd.f32 %v2449_v20, %v2049_v51 }
 0x2aa   : > { %11706 = vst [vmem:[#allocation135_spill] sm:$0xff] %v7872_v11  ;;  %11707 = vst [vmem:[#allocation136_spill] sm:$0xff] %v7878_v53  ;;  %v2417_v24 = vadd.f32 %v2416_v2, %v2048_v30  ;;  %v2055_v41 = vmul.f32 %v7862_v47, %v7862_v47  ;;  %v1946_v34 = vadd.f32 %v1945_v59, %v7870_v39 }
 0x2ab   : > { %v2483_v23 = vadd.f32 %v2482_v36, %v2050_v4  ;;  %v2057_v60 = vmul.f32 %v7870_v39, %v7870_v39  ;;  %v1913_v58 = vadd.f32 %v1912_v37, %v7872_v11  ;;  %v2056_v9 = vmul.f32 %v7872_v11, %v7872_v11 }
 0x2ac   : > { %v2385_v13 = vadd.f32 %v2384_v31, %v2055_v41  ;;  %v1979_v1 = vadd.f32 %v1978_v57, %v7878_v53  ;;  %v2058_v30 = vmul.f32 %v7878_v53, %v7878_v53 }
 0x2ad   : > { %v2451_v36 = vadd.f32 %v2450_v7, %v2057_v60  ;;  %v2418_v51 = vadd.f32 %v2417_v24, %v2056_v9 }
 0x2ae   : > { %v7897_v5 = vpop.f32.mrb[64].mxu0  ;;  %v7903_v59 = vpop.f32.mrb[64].mxu1  ;;  %v2484_v57 = vadd.f32 %v2483_v23, %v2058_v30 }
 0x2af   : > { %11708 = vst [vmem:[#allocation137_spill] sm:$0xff] %v7897_v5  ;;  %v1881_v2 = vadd.f32 %v1880_v8, %v7897_v5  ;;  %11709 = vst [vmem:[#allocation138_spill] sm:$0xff] %v7903_v59  ;;  %v7905_v20 = vpop.f32.mrb[65].mxu0  ;;  %v2063_v37 = vmul.f32 %v7897_v5, %v7897_v5  ;;  %v1947_v4 = vadd.f32 %v1946_v34, %v7903_v59  ;;  %v7910_v14 = vpop.f32.mrb[65].mxu1 }
 0x2b0   : > { %11710 = vst [vmem:[#allocation139_spill] sm:$0xff] %v7905_v20  ;;  %11711 = vst [vmem:[#allocation140_spill] sm:$0xff] %v7910_v14  ;;  %v7912_v31 = vpop.f32.mrb[66].mxu0  ;;  %v2065_v41 = vmul.f32 %v7903_v59, %v7903_v59  ;;  %v1914_v8 = vadd.f32 %v1913_v58, %v7905_v20  ;;  %v2064_v10 = vmul.f32 %v7905_v20, %v7905_v20  ;;  %v7919_v7 = vpop.f32.mrb[66].mxu1 }
 0x2b1   : > { %11712 = vst [vmem:[#allocation141_spill] sm:$0xff] %v7912_v31  ;;  %11713 = vst [vmem:[#allocation142_spill] sm:$0xff] %v7919_v7  ;;  %v7921_v24 = vpop.f32.mrb[67].mxu0  ;;  %v2386_v60 = vadd.f32 %v2385_v13, %v2063_v37  ;;  %v1980_v34 = vadd.f32 %v1979_v1, %v7910_v14  ;;  %v2066_v9 = vmul.f32 %v7910_v14, %v7910_v14  ;;  %v7927_v30 = vpop.f32.mrb[67].mxu1 }
 0x2b2   : > { %11714 = vst [vmem:[#allocation143_spill] sm:$0xff] %v7921_v24  ;;  %v1882_v23 = vadd.f32 %v1881_v2, %v7912_v31  ;;  %11715 = vst [vmem:[#allocation144_spill] sm:$0xff] %v7927_v30  ;;  %v2452_v59 = vadd.f32 %v2451_v36, %v2065_v41  ;;  %v2419_v5 = vadd.f32 %v2418_v51, %v2064_v10 }
 0x2b3   : > { %v2071_v58 = vmul.f32 %v7912_v31, %v7912_v31  ;;  %v1948_v20 = vadd.f32 %v1947_v4, %v7919_v7  ;;  %v2485_v53 = vadd.f32 %v2484_v57, %v2066_v9  ;;  %v2073_v13 = vmul.f32 %v7919_v7, %v7919_v7 }
 0x2b4   : > { %v1915_v1 = vadd.f32 %v1914_v8, %v7921_v24  ;;  %v2072_v37 = vmul.f32 %v7921_v24, %v7921_v24  ;;  %v1981_v2 = vadd.f32 %v1980_v34, %v7927_v30  ;;  %v2074_v10 = vmul.f32 %v7927_v30, %v7927_v30 }
 0x2b5   : > { %v2387_v14 = vadd.f32 %v2386_v60, %v2071_v58  ;;  %v2453_v36 = vadd.f32 %v2452_v59, %v2073_v13 }
 0x2b6   : > { %v2420_v51 = vadd.f32 %v2419_v5, %v2072_v37  ;;  %v7940_v41 = vpop.f32.mrb[68].mxu0  ;;  %v2486_v4 = vadd.f32 %v2485_v53, %v2074_v10  ;;  %v7945_v8 = vpop.f32.mrb[68].mxu1 }
 0x2b7   : > { %11716 = vst [vmem:[#allocation145_spill] sm:$0xff] %v7940_v41  ;;  %v1883_v57 = vadd.f32 %v1882_v23, %v7940_v41  ;;  %v2079_v9 = vmul.f32 %v7940_v41, %v7940_v41  ;;  %11717 = vst [vmem:[#allocation146_spill] sm:$0xff] %v7945_v8  ;;  %v7947_v7 = vpop.f32.mrb[69].mxu0  ;;  %v1949_v60 = vadd.f32 %v1948_v20, %v7945_v8  ;;  %v7955_v53 = vpop.f32.mrb[69].mxu1 }
 0x2b8   : > { %11718 = vst [vmem:[#allocation147_spill] sm:$0xff] %v7947_v7  ;;  %v2081_v34 = vmul.f32 %v7945_v8, %v7945_v8  ;;  %v1916_v59 = vadd.f32 %v1915_v1, %v7947_v7  ;;  %v2080_v5 = vmul.f32 %v7947_v7, %v7947_v7  ;;  %11719 = vst [vmem:[#allocation148_spill] sm:$0xff] %v7955_v53  ;;  %v7957_v23 = vpop.f32.mrb[70].mxu0  ;;  %v7963_v10 = vpop.f32.mrb[70].mxu1 }
 0x2b9   : > { %11720 = vst [vmem:[#allocation149_spill] sm:$0xff] %v7957_v23  ;;  %v2388_v58 = vadd.f32 %v2387_v14, %v2079_v9  ;;  %v1982_v13 = vadd.f32 %v1981_v2, %v7955_v53  ;;  %v2082_v37 = vmul.f32 %v7955_v53, %v7955_v53  ;;  %v1884_v20 = vadd.f32 %v1883_v57, %v7957_v23  ;;  %v7965_v8 = vpop.f32.mrb[71].mxu0  ;;  %v7970_v24 = vpop.f32.mrb[71].mxu1 }
 0x2ba   : > { %11721 = vst [vmem:[#allocation150_spill] sm:$0xff] %v7963_v10  ;;  %11722 = vst [vmem:[#allocation151_spill] sm:$0xff] %v7965_v8  ;;  %v2454_v1 = vadd.f32 %v2453_v36, %v2081_v34  ;;  %v2421_v41 = vadd.f32 %v2420_v51, %v2080_v5  ;;  %v2087_v7 = vmul.f32 %v7957_v23, %v7957_v23 }
 0x2bb   : > { %v1950_v30 = vadd.f32 %v1949_v60, %v7963_v10  ;;  %11723 = vst [vmem:[#allocation152_spill] sm:$0xff] %v7970_v24  ;;  %v2487_v14 = vadd.f32 %v2486_v4, %v2082_v37  ;;  %v2089_v2 = vmul.f32 %v7963_v10, %v7963_v10  ;;  %v1917_v9 = vadd.f32 %v1916_v59, %v7965_v8 }
 0x2bc   : > { %v2088_v57 = vmul.f32 %v7965_v8, %v7965_v8  ;;  %v2389_v53 = vadd.f32 %v2388_v58, %v2087_v7  ;;  %v1983_v36 = vadd.f32 %v1982_v13, %v7970_v24  ;;  %v2090_v51 = vmul.f32 %v7970_v24, %v7970_v24 }
 0x2bd   : > { %v2455_v34 = vadd.f32 %v2454_v1, %v2089_v2 }
 0x2be   : > { %v2422_v5 = vadd.f32 %v2421_v41, %v2088_v57  ;;  %v2488_v60 = vadd.f32 %v2487_v14, %v2090_v51  ;;  %v7980_v23 = vpop.f32.mrb[72].mxu0  ;;  %v7985_v59 = vpop.f32.mrb[72].mxu1 }
 0x2bf   : > { %11724 = vst [vmem:[#allocation153_spill] sm:$0xff] %v7980_v23  ;;  %v1885_v4 = vadd.f32 %v1884_v20, %v7980_v23  ;;  %v2095_v37 = vmul.f32 %v7980_v23, %v7980_v23  ;;  %11725 = vst [vmem:[#allocation154_spill] sm:$0xff] %v7985_v59  ;;  %v7987_v10 = vpop.f32.mrb[73].mxu0  ;;  %v1951_v7 = vadd.f32 %v1950_v30, %v7985_v59  ;;  %v7995_v1 = vpop.f32.mrb[73].mxu1 }
 0x2c0   : > { %11726 = vst [vmem:[#allocation155_spill] sm:$0xff] %v7987_v10  ;;  %v2097_v58 = vmul.f32 %v7985_v59, %v7985_v59  ;;  %v1918_v13 = vadd.f32 %v1917_v9, %v7987_v10  ;;  %v2096_v41 = vmul.f32 %v7987_v10, %v7987_v10  ;;  %11727 = vst [vmem:[#allocation156_spill] sm:$0xff] %v7995_v1  ;;  %v7997_v20 = vpop.f32.mrb[74].mxu0  ;;  %v8003_v51 = vpop.f32.mrb[74].mxu1 }
 0x2c1   : > { %11728 = vst [vmem:[#allocation157_spill] sm:$0xff] %v7997_v20  ;;  %v2390_v14 = vadd.f32 %v2389_v53, %v2095_v37  ;;  %v1984_v2 = vadd.f32 %v1983_v36, %v7995_v1  ;;  %v2098_v57 = vmul.f32 %v7995_v1, %v7995_v1  ;;  %v1886_v30 = vadd.f32 %v1885_v4, %v7997_v20  ;;  %v8005_v59 = vpop.f32.mrb[75].mxu0  ;;  %v8010_v8 = vpop.f32.mrb[75].mxu1 }
 0x2c2   : > { %11729 = vst [vmem:[#allocation158_spill] sm:$0xff] %v8003_v51  ;;  %11730 = vst [vmem:[#allocation159_spill] sm:$0xff] %v8005_v59  ;;  %v2456_v9 = vadd.f32 %v2455_v34, %v2097_v58  ;;  %v2423_v23 = vadd.f32 %v2422_v5, %v2096_v41  ;;  %v2103_v10 = vmul.f32 %v7997_v20, %v7997_v20 }
 0x2c3   : > { %v1952_v24 = vadd.f32 %v1951_v7, %v8003_v51  ;;  %11731 = vst [vmem:[#allocation160_spill] sm:$0xff] %v8010_v8  ;;  %v2489_v53 = vadd.f32 %v2488_v60, %v2098_v57  ;;  %v2105_v36 = vmul.f32 %v8003_v51, %v8003_v51  ;;  %v1919_v37 = vadd.f32 %v1918_v13, %v8005_v59 }
 0x2c4   : > { %v2104_v4 = vmul.f32 %v8005_v59, %v8005_v59  ;;  %v2391_v1 = vadd.f32 %v2390_v14, %v2103_v10  ;;  %v1985_v34 = vadd.f32 %v1984_v2, %v8010_v8  ;;  %v2106_v5 = vmul.f32 %v8010_v8, %v8010_v8 }
 0x2c5   : > { %v2457_v58 = vadd.f32 %v2456_v9, %v2105_v36 }
 0x2c6   : > { %v2424_v41 = vadd.f32 %v2423_v23, %v2104_v4  ;;  %v2490_v7 = vadd.f32 %v2489_v53, %v2106_v5  ;;  %v8020_v20 = vpop.f32.mrb[76].mxu0  ;;  %v8025_v13 = vpop.f32.mrb[76].mxu1 }
 0x2c7   : > { %11732 = vst [vmem:[#allocation161_spill] sm:$0xff] %v8020_v20  ;;  %v1887_v60 = vadd.f32 %v1886_v30, %v8020_v20  ;;  %v2111_v57 = vmul.f32 %v8020_v20, %v8020_v20  ;;  %11733 = vst [vmem:[#allocation162_spill] sm:$0xff] %v8025_v13  ;;  %v8027_v51 = vpop.f32.mrb[77].mxu0  ;;  %v1953_v10 = vadd.f32 %v1952_v24, %v8025_v13  ;;  %v8035_v9 = vpop.f32.mrb[77].mxu1 }
 0x2c8   : > { %11734 = vst [vmem:[#allocation163_spill] sm:$0xff] %v8027_v51  ;;  %v2113_v14 = vmul.f32 %v8025_v13, %v8025_v13  ;;  %v1920_v2 = vadd.f32 %v1919_v37, %v8027_v51  ;;  %v2112_v23 = vmul.f32 %v8027_v51, %v8027_v51  ;;  %11735 = vst [vmem:[#allocation164_spill] sm:$0xff] %v8035_v9  ;;  %v8037_v30 = vpop.f32.mrb[78].mxu0  ;;  %v8043_v5 = vpop.f32.mrb[78].mxu1 }
 0x2c9   : > { %11736 = vst [vmem:[#allocation165_spill] sm:$0xff] %v8037_v30  ;;  %v2392_v53 = vadd.f32 %v2391_v1, %v2111_v57  ;;  %v1986_v36 = vadd.f32 %v1985_v34, %v8035_v9  ;;  %v2114_v4 = vmul.f32 %v8035_v9, %v8035_v9  ;;  %v1888_v24 = vadd.f32 %v1887_v60, %v8037_v30  ;;  %v8045_v13 = vpop.f32.mrb[79].mxu0  ;;  %v8050_v59 = vpop.f32.mrb[79].mxu1 }
 0x2ca   : > { %11737 = vst [vmem:[#allocation166_spill] sm:$0xff] %v8043_v5  ;;  %11738 = vst [vmem:[#allocation167_spill] sm:$0xff] %v8045_v13  ;;  %v2458_v37 = vadd.f32 %v2457_v58, %v2113_v14  ;;  %v2425_v20 = vadd.f32 %v2424_v41, %v2112_v23  ;;  %v2119_v51 = vmul.f32 %v8037_v30, %v8037_v30 }
 0x2cb   : > { %v1954_v8 = vadd.f32 %v1953_v10, %v8043_v5  ;;  %11739 = vst [vmem:[#allocation168_spill] sm:$0xff] %v8050_v59  ;;  %v2491_v1 = vadd.f32 %v2490_v7, %v2114_v4  ;;  %v2121_v34 = vmul.f32 %v8043_v5, %v8043_v5  ;;  %v1921_v57 = vadd.f32 %v1920_v2, %v8045_v13 }
 0x2cc   : > { %v2120_v60 = vmul.f32 %v8045_v13, %v8045_v13  ;;  %v2393_v9 = vadd.f32 %v2392_v53, %v2119_v51  ;;  %v1987_v58 = vadd.f32 %v1986_v36, %v8050_v59  ;;  %v2122_v41 = vmul.f32 %v8050_v59, %v8050_v59 }
 0x2cd   : > { %v2459_v14 = vadd.f32 %v2458_v37, %v2121_v34 }
 0x2ce   : > { %v2426_v23 = vadd.f32 %v2425_v20, %v2120_v60  ;;  %v2492_v10 = vadd.f32 %v2491_v1, %v2122_v41  ;;  %v8060_v30 = vpop.f32.mrb[80].mxu0  ;;  %v8065_v2 = vpop.f32.mrb[80].mxu1 }
 0x2cf   : > { %11740 = vst [vmem:[#allocation169_spill] sm:$0xff] %v8060_v30  ;;  %v1889_v7 = vadd.f32 %v1888_v24, %v8060_v30  ;;  %v2127_v4 = vmul.f32 %v8060_v30, %v8060_v30  ;;  %11741 = vst [vmem:[#allocation170_spill] sm:$0xff] %v8065_v2  ;;  %v8067_v5 = vpop.f32.mrb[81].mxu0  ;;  %v1955_v51 = vadd.f32 %v1954_v8, %v8065_v2  ;;  %v8075_v37 = vpop.f32.mrb[81].mxu1 }
 0x2d0   : > { %11742 = vst [vmem:[#allocation171_spill] sm:$0xff] %v8067_v5  ;;  %v2129_v53 = vmul.f32 %v8065_v2, %v8065_v2  ;;  %v1922_v36 = vadd.f32 %v1921_v57, %v8067_v5  ;;  %v2128_v20 = vmul.f32 %v8067_v5, %v8067_v5  ;;  %11743 = vst [vmem:[#allocation172_spill] sm:$0xff] %v8075_v37  ;;  %v8077_v24 = vpop.f32.mrb[82].mxu0  ;;  %v8083_v41 = vpop.f32.mrb[82].mxu1 }
 0x2d1   : > { %11744 = vst [vmem:[#allocation173_spill] sm:$0xff] %v8077_v24  ;;  %v2394_v1 = vadd.f32 %v2393_v9, %v2127_v4  ;;  %v1988_v34 = vadd.f32 %v1987_v58, %v8075_v37  ;;  %v2130_v60 = vmul.f32 %v8075_v37, %v8075_v37  ;;  %v1890_v8 = vadd.f32 %v1889_v7, %v8077_v24  ;;  %v8085_v2 = vpop.f32.mrb[83].mxu0  ;;  %v8090_v13 = vpop.f32.mrb[83].mxu1 }
 0x2d2   : > { %11745 = vst [vmem:[#allocation174_spill] sm:$0xff] %v8083_v41  ;;  %11746 = vst [vmem:[#allocation175_spill] sm:$0xff] %v8085_v2  ;;  %v2460_v57 = vadd.f32 %v2459_v14, %v2129_v53  ;;  %v2427_v30 = vadd.f32 %v2426_v23, %v2128_v20  ;;  %v2135_v5 = vmul.f32 %v8077_v24, %v8077_v24 }
 0x2d3   : > { %v1956_v59 = vadd.f32 %v1955_v51, %v8083_v41  ;;  %11747 = vst [vmem:[#allocation176_spill] sm:$0xff] %v8090_v13  ;;  %v2493_v9 = vadd.f32 %v2492_v10, %v2130_v60  ;;  %v2137_v58 = vmul.f32 %v8083_v41, %v8083_v41  ;;  %v1923_v4 = vadd.f32 %v1922_v36, %v8085_v2 }
 0x2d4   : > { %v2136_v7 = vmul.f32 %v8085_v2, %v8085_v2  ;;  %v2395_v37 = vadd.f32 %v2394_v1, %v2135_v5  ;;  %v1989_v14 = vadd.f32 %v1988_v34, %v8090_v13  ;;  %v2138_v23 = vmul.f32 %v8090_v13, %v8090_v13 }
 0x2d5   : > { %v2461_v53 = vadd.f32 %v2460_v57, %v2137_v58 }
 0x2d6   : > { %v2428_v20 = vadd.f32 %v2427_v30, %v2136_v7  ;;  %v2494_v51 = vadd.f32 %v2493_v9, %v2138_v23  ;;  %v8100_v24 = vpop.f32.mrb[84].mxu0  ;;  %v8105_v36 = vpop.f32.mrb[84].mxu1 }
 0x2d7   : > { %11748 = vst [vmem:[#allocation177_spill] sm:$0xff] %v8100_v24  ;;  %v1891_v10 = vadd.f32 %v1890_v8, %v8100_v24  ;;  %v2143_v60 = vmul.f32 %v8100_v24, %v8100_v24  ;;  %11749 = vst [vmem:[#allocation178_spill] sm:$0xff] %v8105_v36  ;;  %v8107_v41 = vpop.f32.mrb[85].mxu0  ;;  %v1957_v5 = vadd.f32 %v1956_v59, %v8105_v36  ;;  %v8115_v57 = vpop.f32.mrb[85].mxu1 }
 0x2d8   : > { %11750 = vst [vmem:[#allocation179_spill] sm:$0xff] %v8107_v41  ;;  %v2145_v1 = vmul.f32 %v8105_v36, %v8105_v36  ;;  %v1924_v34 = vadd.f32 %v1923_v4, %v8107_v41  ;;  %v2144_v30 = vmul.f32 %v8107_v41, %v8107_v41  ;;  %11751 = vst [vmem:[#allocation180_spill] sm:$0xff] %v8115_v57  ;;  %v8117_v8 = vpop.f32.mrb[86].mxu0  ;;  %v8123_v23 = vpop.f32.mrb[86].mxu1 }
 0x2d9   : > { %11752 = vst [vmem:[#allocation181_spill] sm:$0xff] %v8117_v8  ;;  %v2396_v9 = vadd.f32 %v2395_v37, %v2143_v60  ;;  %v1990_v58 = vadd.f32 %v1989_v14, %v8115_v57  ;;  %v2146_v7 = vmul.f32 %v8115_v57, %v8115_v57  ;;  %v1892_v59 = vadd.f32 %v1891_v10, %v8117_v8  ;;  %v8125_v36 = vpop.f32.mrb[87].mxu0  ;;  %v8130_v2 = vpop.f32.mrb[87].mxu1 }
 0x2da   : > { %11753 = vst [vmem:[#allocation182_spill] sm:$0xff] %v8123_v23  ;;  %11754 = vst [vmem:[#allocation183_spill] sm:$0xff] %v8125_v36  ;;  %v2462_v4 = vadd.f32 %v2461_v53, %v2145_v1  ;;  %v2429_v24 = vadd.f32 %v2428_v20, %v2144_v30  ;;  %v2151_v41 = vmul.f32 %v8117_v8, %v8117_v8  ;;  %v1773_v1 = vrot.slane %v7787_v62, 4 }
 0x2db   : > { %v1958_v13 = vadd.f32 %v1957_v5, %v8123_v23  ;;  %11755 = vst [vmem:[#allocation184_spill] sm:$0xff] %v8130_v2  ;;  %v2495_v37 = vadd.f32 %v2494_v51, %v2146_v7  ;;  %v2153_v14 = vmul.f32 %v8123_v23, %v8123_v23  ;;  %v1925_v60 = vadd.f32 %v1924_v34, %v8125_v36 }
 0x2dc   : > { %v2152_v10 = vmul.f32 %v8125_v36, %v8125_v36  ;;  %v2397_v57 = vadd.f32 %v2396_v9, %v2151_v41  ;;  %v1991_v53 = vadd.f32 %v1990_v58, %v8130_v2  ;;  %v2154_v20 = vmul.f32 %v8130_v2, %v8130_v2 }
 0x2dd   : > { %v2463_v5 = vadd.f32 %v2462_v4, %v2153_v14  ;;  %v2278_v51 = vrot.slane %v7805_v25, 4  ;;  %v1839_v7 = vrot.slane %v7796_v12, 4  ;;  %v1806_v23 = vrot.slane %v7803_v3, 4 }
 0x2de   : > { %v2430_v30 = vadd.f32 %v2429_v24, %v2152_v10  ;;  %v2496_v34 = vadd.f32 %v2495_v37, %v2154_v20  ;;  %v8144_v8 = vpop.f32.mrb[88].mxu0  ;;  %v2311_v41 = vrot.slane %v7816_v16, 4  ;;  %v1872_v9 = vrot.slane %v7810_v63, 4  ;;  %v8151_v4 = vpop.f32.mrb[88].mxu1 }
 0x2df   : > { %11756 = vst [vmem:[#allocation185_spill] sm:$0xff] %v8144_v8  ;;  %v1893_v58 = vadd.f32 %v1892_v59, %v8144_v8  ;;  %v2159_v2 = vmul.f32 %v8144_v8, %v8144_v8  ;;  %11757 = vst [vmem:[#allocation186_spill] sm:$0xff] %v8151_v4  ;;  %v8153_v24 = vpop.f32.mrb[89].mxu0  ;;  %v1959_v14 = vadd.f32 %v1958_v13, %v8151_v4  ;;  %v8161_v36 = vpop.f32.mrb[89].mxu1 }
 0x2e0   : > { %11758 = vst [vmem:[#allocation187_spill] sm:$0xff] %v8153_v24  ;;  %v2161_v37 = vmul.f32 %v8151_v4, %v8151_v4  ;;  %v1926_v10 = vadd.f32 %v1925_v60, %v8153_v24  ;;  %v2160_v20 = vmul.f32 %v8153_v24, %v8153_v24  ;;  %11759 = vst [vmem:[#allocation188_spill] sm:$0xff] %v8161_v36  ;;  %v8163_v59 = vpop.f32.mrb[90].mxu0  ;;  %v8169_v11 = vpop.f32.mrb[90].mxu1 }
 0x2e1   : > { %11760 = vst [vmem:[#allocation189_spill] sm:$0xff] %v8163_v59  ;;  %v2398_v31 = vadd.f32 %v2397_v57, %v2159_v2  ;;  %v1992_v8 = vadd.f32 %v1991_v53, %v8161_v36  ;;  %v2162_v39 = vmul.f32 %v8161_v36, %v8161_v36  ;;  %v1894_v13 = vadd.f32 %v1893_v58, %v8163_v59  ;;  %v8171_v4 = vpop.f32.mrb[91].mxu0  ;;  %v8176_v55 = vpop.f32.mrb[91].mxu1 }
 0x2e2   : > { %11761 = vst [vmem:[#allocation190_spill] sm:$0xff] %v8169_v11  ;;  %11762 = vst [vmem:[#allocation191_spill] sm:$0xff] %v8171_v4  ;;  %v2464_v60 = vadd.f32 %v2463_v5, %v2161_v37  ;;  %v2431_v47 = vadd.f32 %v2430_v30, %v2160_v20  ;;  %v2167_v24 = vmul.f32 %v8163_v59, %v8163_v59 }
 0x2e3   : > { %v1960_v61 = vadd.f32 %v1959_v14, %v8169_v11  ;;  %11763 = vst [vmem:[#allocation192_spill] sm:$0xff] %v8176_v55  ;;  %v2497_v2 = vadd.f32 %v2496_v34, %v2162_v39  ;;  %v2169_v57 = vmul.f32 %v8169_v11, %v8169_v11  ;;  %v1927_v53 = vadd.f32 %v1926_v10, %v8171_v4 }
 0x2e4   : > { %v2168_v58 = vmul.f32 %v8171_v4, %v8171_v4  ;;  %v8184_v36 = vadd.f32 %v1773_v1, %v7787_v62  ;;  %v2399_v5 = vadd.f32 %v2398_v31, %v2167_v24  ;;  %v1993_v30 = vadd.f32 %v1992_v8, %v8176_v55 }
 0x2e5   : > { %v2170_v14 = vmul.f32 %v8176_v55, %v8176_v55  ;;  %v8190_v37 = vadd.f32 %v1839_v7, %v7796_v12  ;;  %v2344_v39 = vrot.slane %v7812_v42, 4  ;;  %v2465_v34 = vadd.f32 %v2464_v60, %v2169_v57 }
 0x2e6   : > { %v2432_v20 = vadd.f32 %v2431_v47, %v2168_v58  ;;  %v8194_v10 = vadd.f32 %v2278_v51, %v7805_v25  ;;  %v8197_v11 = vadd.f32 %v1806_v23, %v7803_v3  ;;  %v8200_v62 = vadd.f32 %v1872_v9, %v7810_v63  ;;  %v8202_v8 = vpop.f32.mrb[92].mxu0  ;;  %v8211_v25 = vpop.f32.mrb[92].mxu1 }
 0x2e7   : > { %v2498_v31 = vadd.f32 %v2497_v2, %v2170_v14  ;;  %11764 = vst [vmem:[#allocation193_spill] sm:$0xff] %v8202_v8  ;;  %v8205_v1 = vadd.f32 %v2311_v41, %v7816_v16  ;;  %v2377_v12 = vrot.slane %v7820_v28, 4  ;;  %v1895_v7 = vadd.f32 %v1894_v13, %v8202_v8  ;;  %11765 = vst [vmem:[#allocation194_spill] sm:$0xff] %v8211_v25  ;;  %v8213_v3 = vpop.f32.mrb[93].mxu0  ;;  %v8221_v41 = vpop.f32.mrb[93].mxu1 }
 0x2e8   : > { %v2175_v47 = vmul.f32 %v8202_v8, %v8202_v8  ;;  %11766 = vst [vmem:[#allocation195_spill] sm:$0xff] %v8213_v3  ;;  %v1961_v63 = vadd.f32 %v1960_v61, %v8211_v25  ;;  %v2177_v23 = vmul.f32 %v8211_v25, %v8211_v25  ;;  %v1928_v51 = vadd.f32 %v1927_v53, %v8213_v3  ;;  %v8223_v9 = vpop.f32.mrb[94].mxu0  ;;  %v8229_v2 = vpop.f32.mrb[94].mxu1 }
 0x2e9   : > { %v2176_v16 = vmul.f32 %v8213_v3, %v8213_v3  ;;  %11767 = vst [vmem:[#allocation196_spill] sm:$0xff] %v8221_v41  ;;  %11768 = vst [vmem:[#allocation197_spill] sm:$0xff] %v8223_v9  ;;  %v1994_v13 = vadd.f32 %v1993_v30, %v8221_v41  ;;  %v2178_v60 = vmul.f32 %v8221_v41, %v8221_v41  ;;  %v8231_v57 = vpop.f32.mrb[95].mxu0  ;;  %v8236_v3 = vpop.f32.mrb[95].mxu1  ;;  %v1775_v41 = vrot.slane %v8184_v36, 2 }
 0x2ea   : > { %v2400_v24 = vadd.f32 %v2399_v5, %v2175_v47  ;;  %v1896_v61 = vadd.f32 %v1895_v7, %v8223_v9  ;;  %11769 = vst [vmem:[#allocation198_spill] sm:$0xff] %v8229_v2  ;;  %11770 = vst [vmem:[#allocation199_spill] sm:$0xff] %v8231_v57  ;;  %v2466_v53 = vadd.f32 %v2465_v34, %v2177_v23 }
 0x2eb   : > { %v2433_v58 = vadd.f32 %v2432_v20, %v2176_v16  ;;  %v2183_v14 = vmul.f32 %v8223_v9, %v8223_v9  ;;  %v1962_v25 = vadd.f32 %v1961_v63, %v8229_v2  ;;  %11771 = vst [vmem:[#allocation200_spill] sm:$0xff] %v8236_v3  ;;  %v2499_v5 = vadd.f32 %v2498_v31, %v2178_v60 }
 0x2ec   : > { %v2185_v30 = vmul.f32 %v8229_v2, %v8229_v2  ;;  %v1929_v47 = vadd.f32 %v1928_v51, %v8231_v57  ;;  %v2184_v7 = vmul.f32 %v8231_v57, %v8231_v57  ;;  %v1995_v20 = vadd.f32 %v1994_v13, %v8236_v3 }
 0x2ed   : > { %v2401_v34 = vadd.f32 %v2400_v24, %v2183_v14  ;;  %v2186_v23 = vmul.f32 %v8236_v3, %v8236_v3  ;;  %v1841_v63 = vrot.slane %v8190_v37, 2  ;;  %v8249_v31 = vadd.f32 %v2344_v39, %v7812_v42 }
 0x2ee   : > { %v2467_v16 = vadd.f32 %v2466_v53, %v2185_v30  ;;  %v2434_v60 = vadd.f32 %v2433_v58, %v2184_v7  ;;  %v2280_v51 = vrot.slane %v8194_v10, 2  ;;  %v1808_v2 = vrot.slane %v8197_v11, 2  ;;  %v8254_v24 = vpop.f32.mrb[96].mxu0  ;;  %v8263_v39 = vpop.f32.mrb[96].mxu1 }
 0x2ef   : > { %v1874_v57 = vrot.slane %v8200_v62, 2  ;;  %v2500_v9 = vadd.f32 %v2499_v5, %v2186_v23  ;;  %11772 = vst [vmem:[#allocation201_spill] sm:$0xff] %v8254_v24  ;;  %v2313_v13 = vrot.slane %v8205_v1, 2  ;;  %v8258_v14 = vadd.f32 %v2377_v12, %v7820_v28  ;;  %11773 = vst [vmem:[#allocation202_spill] sm:$0xff] %v8263_v39  ;;  %v8265_v53 = vpop.f32.mrb[97].mxu0  ;;  %v8273_v12 = vpop.f32.mrb[97].mxu1 }
 0x2f0   : > { %v1897_v3 = vadd.f32 %v1896_v61, %v8254_v24  ;;  %v2191_v42 = vmul.f32 %v8254_v24, %v8254_v24  ;;  %11774 = vst [vmem:[#allocation203_spill] sm:$0xff] %v8265_v53  ;;  %v1963_v58 = vadd.f32 %v1962_v25, %v8263_v39  ;;  %v2193_v5 = vmul.f32 %v8263_v39, %v8263_v39  ;;  %v8275_v61 = vpop.f32.mrb[98].mxu0  ;;  %v8281_v8 = vpop.f32.mrb[98].mxu1 }
 0x2f1   : > { %v1930_v30 = vadd.f32 %v1929_v47, %v8265_v53  ;;  %v2192_v28 = vmul.f32 %v8265_v53, %v8265_v53  ;;  %11775 = vst [vmem:[#allocation204_spill] sm:$0xff] %v8273_v12  ;;  %11776 = vst [vmem:[#allocation205_spill] sm:$0xff] %v8275_v61  ;;  %v1996_v23 = vadd.f32 %v1995_v20, %v8273_v12  ;;  %v8283_v39 = vpop.f32.mrb[99].mxu0  ;;  %v8288_v59 = vpop.f32.mrb[99].mxu1 }
 0x2f2   : > { %v2402_v7 = vadd.f32 %v2401_v34, %v2191_v42  ;;  %v2194_v24 = vmul.f32 %v8273_v12, %v8273_v12  ;;  %v1898_v25 = vadd.f32 %v1897_v3, %v8275_v61  ;;  %11777 = vst [vmem:[#allocation206_spill] sm:$0xff] %v8281_v8  ;;  %11778 = vst [vmem:[#allocation207_spill] sm:$0xff] %v8283_v39 }
 0x2f3   : > { %v2468_v47 = vadd.f32 %v2467_v16, %v2193_v5  ;;  %v2435_v55 = vadd.f32 %v2434_v60, %v2192_v28  ;;  %v2199_v53 = vmul.f32 %v8275_v61, %v8275_v61  ;;  %v1964_v4 = vadd.f32 %v1963_v58, %v8281_v8  ;;  %11779 = vst [vmem:[#allocation208_spill] sm:$0xff] %v8288_v59 }
 0x2f4   : > { %v2501_v34 = vadd.f32 %v2500_v9, %v2194_v24  ;;  %v2201_v20 = vmul.f32 %v8281_v8, %v8281_v8  ;;  %v1931_v42 = vadd.f32 %v1930_v30, %v8283_v39  ;;  %v2200_v3 = vmul.f32 %v8283_v39, %v8283_v39 }
 0x2f5   : > { %v8296_v12 = vadd.f32 %v1775_v41, %v8184_v36  ;;  %v2403_v16 = vadd.f32 %v2402_v7, %v2199_v53  ;;  %v1997_v60 = vadd.f32 %v1996_v23, %v8288_v59  ;;  %v2202_v58 = vmul.f32 %v8288_v59, %v8288_v59 }
 0x2f6   : > { %v8302_v5 = vadd.f32 %v1841_v63, %v8190_v37  ;;  %v2346_v9 = vrot.slane %v8249_v31, 2  ;;  %v2469_v24 = vadd.f32 %v2468_v47, %v2201_v20  ;;  %v2436_v28 = vadd.f32 %v2435_v55, %v2200_v3  ;;  %v8314_v53 = vpop.f32.mrb[100].mxu0 }
 0x2f7   : > { %v8306_v30 = vadd.f32 %v2280_v51, %v8194_v10  ;;  %v8309_v8 = vadd.f32 %v1808_v2, %v8197_v11  ;;  %v8312_v36 = vadd.f32 %v1874_v57, %v8200_v62  ;;  %v2502_v41 = vadd.f32 %v2501_v34, %v2202_v58  ;;  %11780 = vst [vmem:[#allocation209_spill] sm:$0xff] %v8314_v53  ;;  %v8323_v10 = vpop.f32.mrb[100].mxu1  ;;  %v8325_v11 = vpop.f32.mrb[101].mxu0 }
 0x2f8   : > { %v8317_v7 = vadd.f32 %v2313_v13, %v8205_v1  ;;  %v2379_v37 = vrot.slane %v8258_v14, 2  ;;  %v1899_v63 = vadd.f32 %v1898_v25, %v8314_v53  ;;  %v2207_v55 = vmul.f32 %v8314_v53, %v8314_v53  ;;  %11781 = vst [vmem:[#allocation210_spill] sm:$0xff] %v8323_v10  ;;  %11782 = vst [vmem:[#allocation211_spill] sm:$0xff] %v8325_v11  ;;  %v8333_v51 = vpop.f32.mrb[101].mxu1  ;;  %v8335_v13 = vpop.f32.mrb[102].mxu0 }
 0x2f9   : > { %v1965_v62 = vadd.f32 %v1964_v4, %v8323_v10  ;;  %v2209_v2 = vmul.f32 %v8323_v10, %v8323_v10  ;;  %v1932_v57 = vadd.f32 %v1931_v42, %v8325_v11  ;;  %v2208_v1 = vmul.f32 %v8325_v11, %v8325_v11  ;;  %11783 = vst [vmem:[#allocation212_spill] sm:$0xff] %v8333_v51  ;;  %v8341_v34 = vpop.f32.mrb[102].mxu1  ;;  %v8343_v20 = vpop.f32.mrb[103].mxu0 }
 0x2fa   : > { %11784 = vst [vmem:[#allocation213_spill] sm:$0xff] %v8335_v13  ;;  %v2404_v23 = vadd.f32 %v2403_v16, %v2207_v55  ;;  %v1998_v25 = vadd.f32 %v1997_v60, %v8333_v51  ;;  %v2210_v47 = vmul.f32 %v8333_v51, %v8333_v51  ;;  %v1900_v4 = vadd.f32 %v1899_v63, %v8335_v13  ;;  %v8348_v11 = vpop.f32.mrb[103].mxu1 }
 0x2fb   : > { %11785 = vst [vmem:[#allocation214_spill] sm:$0xff] %v8341_v34  ;;  %11786 = vst [vmem:[#allocation215_spill] sm:$0xff] %v8343_v20  ;;  %v2470_v42 = vadd.f32 %v2469_v24, %v2209_v2  ;;  %v2437_v3 = vadd.f32 %v2436_v28, %v2208_v1  ;;  %v2215_v58 = vmul.f32 %v8335_v13, %v8335_v13  ;;  %v2282_v2 = vrot.slane %v8306_v30, 1 }
 0x2fc   : > { %v1966_v10 = vadd.f32 %v1965_v62, %v8341_v34  ;;  %11787 = vst [vmem:[#allocation216_spill] sm:$0xff] %v8348_v11  ;;  %v2503_v16 = vadd.f32 %v2502_v41, %v2210_v47  ;;  %v2217_v60 = vmul.f32 %v8341_v34, %v8341_v34  ;;  %v1933_v55 = vadd.f32 %v1932_v57, %v8343_v20 }
 0x2fd   : > { %v2216_v63 = vmul.f32 %v8343_v20, %v8343_v20  ;;  %v8356_v51 = vadd.f32 %v2346_v9, %v8249_v31  ;;  %v2405_v24 = vadd.f32 %v2404_v23, %v2215_v58  ;;  %v1999_v28 = vadd.f32 %v1998_v25, %v8348_v11 }
 0x2fe   : > { %v2218_v62 = vmul.f32 %v8348_v11, %v8348_v11  ;;  %v8363_v41 = vadd.f32 %v2379_v37, %v8258_v14  ;;  %v2471_v1 = vadd.f32 %v2470_v42, %v2217_v60  ;;  %v2315_v57 = vrot.slane %v8317_v7, 1  ;;  %v8366_v20 = vpop.f32.mrb[104].mxu0  ;;  %v8373_v58 = vpop.f32.mrb[104].mxu1 }
 0x2ff   : > { %v2438_v47 = vadd.f32 %v2437_v3, %v2216_v63  ;;  %11788 = vst [vmem:[#allocation217_spill] sm:$0xff] %v8366_v20  ;;  %v1777_v31 = vrot.slane %v8296_v12, 1  ;;  %v1810_v9 = vrot.slane %v8309_v8, 1  ;;  %v1901_v23 = vadd.f32 %v1900_v4, %v8366_v20  ;;  %11789 = vst [vmem:[#allocation218_spill] sm:$0xff] %v8373_v58  ;;  %v8375_v14 = vpop.f32.mrb[105].mxu0  ;;  %v8385_v63 = vpop.f32.mrb[105].mxu1 }
 0x300   : > { %v2504_v34 = vadd.f32 %v2503_v16, %v2218_v62  ;;  %v2223_v25 = vmul.f32 %v8366_v20, %v8366_v20  ;;  %11790 = vst [vmem:[#allocation219_spill] sm:$0xff] %v8375_v14  ;;  %v1843_v37 = vrot.slane %v8302_v5, 1  ;;  %v1876_v42 = vrot.slane %v8312_v36, 1  ;;  %11791 = vst [vmem:[#allocation220_spill] sm:$0xff] %v8385_v63  ;;  %v8387_v62 = vpop.f32.mrb[106].mxu0  ;;  %v8393_v53 = vpop.f32.mrb[106].mxu1 }
 0x301   : > { %v1967_v3 = vadd.f32 %v1966_v10, %v8373_v58  ;;  %v2225_v16 = vmul.f32 %v8373_v58, %v8373_v58  ;;  %v1934_v60 = vadd.f32 %v1933_v55, %v8375_v14  ;;  %v2224_v4 = vmul.f32 %v8375_v14, %v8375_v14  ;;  %11792 = vst [vmem:[#allocation221_spill] sm:$0xff] %v8387_v62  ;;  %v8395_v58 = vpop.f32.mrb[107].mxu0  ;;  %v8400_v61 = vpop.f32.mrb[107].mxu1 }
 0x302   : > { %v2406_v20 = vadd.f32 %v2405_v24, %v2223_v25  ;;  %v2000_v11 = vadd.f32 %v1999_v28, %v8385_v63  ;;  %v2226_v13 = vmul.f32 %v8385_v63, %v8385_v63  ;;  %v1902_v10 = vadd.f32 %v1901_v23, %v8387_v62  ;;  %11793 = vst [vmem:[#allocation222_spill] sm:$0xff] %v8393_v53 }
 0x303   : > { %11794 = vst [vmem:[#allocation223_spill] sm:$0xff] %v8395_v58  ;;  %v2472_v55 = vadd.f32 %v2471_v1, %v2225_v16  ;;  %v2439_v59 = vadd.f32 %v2438_v47, %v2224_v4  ;;  %v2231_v14 = vmul.f32 %v8387_v62, %v8387_v62  ;;  %v1968_v39 = vadd.f32 %v1967_v3, %v8393_v53 }
 0x304   : > { %11795 = vst [vmem:[#allocation224_spill] sm:$0xff] %v8400_v61  ;;  %v2505_v24 = vadd.f32 %v2504_v34, %v2226_v13  ;;  %v2233_v28 = vmul.f32 %v8393_v53, %v8393_v53  ;;  %v1935_v25 = vadd.f32 %v1934_v60, %v8395_v58  ;;  %v2232_v23 = vmul.f32 %v8395_v58, %v8395_v58 }
 0x305   : > { %v2407_v1 = vadd.f32 %v2406_v20, %v2231_v14  ;;  %v2001_v47 = vadd.f32 %v2000_v11, %v8400_v61  ;;  %v2234_v16 = vmul.f32 %v8400_v61, %v8400_v61  ;;  %v8413_v34 = vadd.f32 %v1777_v31, %v8296_v12 }
 0x306   : > { %v2473_v4 = vadd.f32 %v2472_v55, %v2233_v28  ;;  %v2440_v13 = vadd.f32 %v2439_v59, %v2232_v23  ;;  %v8415_v60 = vpop.f32.mrb[108].mxu0  ;;  %v8418_v58 = vadd.f32 %v1810_v9, %v8309_v8  ;;  %v8421_v20 = vadd.f32 %v1843_v37, %v8302_v5  ;;  %v8429_v55 = vpop.f32.mrb[108].mxu1 }
 0x307   : > { %v2506_v53 = vadd.f32 %v2505_v24, %v2234_v16  ;;  %11796 = vst [vmem:[#allocation225_spill] sm:$0xff] %v8415_v60  ;;  %v8424_v11 = vadd.f32 %v2282_v2, %v8306_v30  ;;  %v1903_v14 = vadd.f32 %v1902_v10, %v8415_v60  ;;  %v2239_v59 = vmul.f32 %v8415_v60, %v8415_v60  ;;  %v8431_v12 = vpop.f32.mrb[109].mxu0  ;;  %v8445_v37 = vpop.f32.mrb[109].mxu1 }
 0x308   : > { %11797 = vst [vmem:[#allocation226_spill] sm:$0xff] %v8429_v55  ;;  %11798 = vst [vmem:[#allocation227_spill] sm:$0xff] %v8431_v12  ;;  %v8434_v31 = vadd.f32 %v1876_v42, %v8312_v36  ;;  %v8437_v8 = vadd.f32 %v2315_v57, %v8317_v7  ;;  %v1969_v5 = vadd.f32 %v1968_v39, %v8429_v55  ;;  %v8447_v10 = vpop.f32.mrb[110].mxu0  ;;  %v8453_v57 = vpop.f32.mrb[110].mxu1 }
 0x309   : > { %v2241_v30 = vmul.f32 %v8429_v55, %v8429_v55  ;;  %v1936_v2 = vadd.f32 %v1935_v25, %v8431_v12  ;;  %v2240_v9 = vmul.f32 %v8431_v12, %v8431_v12  ;;  %11799 = vst [vmem:[#allocation228_spill] sm:$0xff] %v8445_v37  ;;  %11800 = vst [vmem:[#allocation229_spill] sm:$0xff] %v8447_v10  ;;  %v8455_v42 = vpop.f32.mrb[111].mxu0  ;;  %v8460_v3 = vpop.f32.mrb[111].mxu1 }
 0x30a   : > { %v2408_v24 = vadd.f32 %v2407_v1, %v2239_v59  ;;  %v2002_v36 = vadd.f32 %v2001_v47, %v8445_v37  ;;  %v2242_v7 = vmul.f32 %v8445_v37, %v8445_v37  ;;  %v1904_v39 = vadd.f32 %v1903_v14, %v8447_v10  ;;  %11801 = vst [vmem:[#allocation230_spill] sm:$0xff] %v8453_v57 }
 0x30b   : > { %11802 = vst [vmem:[#allocation231_spill] sm:$0xff] %v8455_v42  ;;  %v2474_v28 = vadd.f32 %v2473_v4, %v2241_v30  ;;  %v2441_v25 = vadd.f32 %v2440_v13, %v2240_v9  ;;  %v2247_v23 = vmul.f32 %v8447_v10, %v8447_v10  ;;  %v1970_v16 = vadd.f32 %v1969_v5, %v8453_v57 }
 0x30c   : > { %11803 = vst [vmem:[#allocation232_spill] sm:$0xff] %v8460_v3  ;;  %v2507_v1 = vadd.f32 %v2506_v53, %v2242_v7  ;;  %v1905_v47 = vrot.slane %v1904_v39, 4  ;;  %v2249_v59 = vmul.f32 %v8453_v57, %v8453_v57  ;;  %v1937_v14 = vadd.f32 %v1936_v2, %v8455_v42 }
 0x30d   : > { %v2409_v63 = vadd.f32 %v2408_v24, %v2247_v23  ;;  %v1971_v37 = vrot.slane %v1970_v16, 4  ;;  %v2248_v4 = vmul.f32 %v8455_v42, %v8455_v42  ;;  %v2003_v13 = vadd.f32 %v2002_v36, %v8460_v3 }
 0x30e   : > { %v1906_v30 = vadd.f32 %v1905_v47, %v1904_v39  ;;  %v2475_v9 = vadd.f32 %v2474_v28, %v2249_v59  ;;  %v1938_v10 = vrot.slane %v1937_v14, 4  ;;  %v2250_v5 = vmul.f32 %v8460_v3, %v8460_v3 }
 0x30f   : > { %v2410_v53 = vrot.slane %v2409_v63, 4  ;;  %v1972_v7 = vadd.f32 %v1971_v37, %v1970_v16  ;;  %v2442_v55 = vadd.f32 %v2441_v25, %v2248_v4  ;;  %v2004_v12 = vrot.slane %v2003_v13, 4 }
 0x310   : > { %v1907_v57 = vrot.slane %v1906_v30, 2  ;;  %v2476_v60 = vrot.slane %v2475_v9, 4  ;;  %v1939_v2 = vadd.f32 %v1938_v10, %v1937_v14  ;;  %v2508_v24 = vadd.f32 %v2507_v1, %v2250_v5 }
 0x311   : > { %v2411_v23 = vadd.f32 %v2410_v53, %v2409_v63  ;;  %v1973_v61 = vrot.slane %v1972_v7, 2  ;;  %v2443_v62 = vrot.slane %v2442_v55, 4  ;;  %v2005_v42 = vadd.f32 %v2004_v12, %v2003_v13 }
 0x312   : > { %v1908_v56 = vadd.f32 %v1907_v57, %v1906_v30  ;;  %v2477_v36 = vadd.f32 %v2476_v60, %v2475_v9  ;;  %v1940_v39 = vrot.slane %v1939_v2, 2  ;;  %v2509_v28 = vrot.slane %v2508_v24, 4 }
 0x313   : > { %v2412_v47 = vrot.slane %v2411_v23, 2  ;;  %v1974_v59 = vadd.f32 %v1973_v61, %v1972_v7  ;;  %v2444_v50 = vadd.f32 %v2443_v62, %v2442_v55  ;;  %v2006_v3 = vrot.slane %v2005_v42, 2 }
 0x314   : > { %v2478_v46 = vrot.slane %v2477_v36, 2  ;;  %v1941_v37 = vadd.f32 %v1940_v39, %v1939_v2  ;;  %v2510_v25 = vadd.f32 %v2509_v28, %v2508_v24  ;;  %v1909_v16 = vrot.slane %v1908_v56, 1 }
 0x315   : > { %v2413_v4 = vadd.f32 %v2412_v47, %v2411_v23  ;;  %v2445_v33 = vrot.slane %v2444_v50, 2  ;;  %v2007_v10 = vadd.f32 %v2006_v3, %v2005_v42  ;;  %v1975_v1 = vrot.slane %v1974_v59, 1 }
 0x316   : > { %v2479_v63 = vadd.f32 %v2478_v46, %v2477_v36  ;;  %v1942_v14 = vrot.slane %v1941_v37, 1  ;;  %v2511_v5 = vrot.slane %v2510_v25, 2  ;;  %v1910_v12 = vadd.f32 %v1909_v16, %v1908_v56 }
 0x317   : > { %v2414_v57 = vrot.slane %v2413_v4, 1  ;;  %v2446_v60 = vadd.f32 %v2445_v33, %v2444_v50  ;;  %v2008_v13 = vrot.slane %v2007_v10, 1  ;;  %v1976_v30 = vadd.f32 %v1975_v1, %v1974_v59 }
 0x318   : > { %v2480_v9 = vrot.slane %v2479_v63, 1  ;;  %v2512_v61 = vadd.f32 %v2511_v5, %v2510_v25  ;;  %v1943_v62 = vadd.f32 %v1942_v14, %v1941_v37  ;;  %v2010_v55 = vadd.f32 %v1910_v12, %v8413_v34 }
 0x319   : > { %v2447_v53 = vrot.slane %v2446_v60, 1  ;;  %v2009_v7 = vadd.f32 %v2008_v13, %v2007_v10  ;;  %v2012_v2 = vadd.f32 %v1976_v30, %v8421_v20  ;;  %v2415_v24 = vadd.f32 %v2414_v57, %v2413_v4 }
 0x31a   : > { %v2513_v3 = vrot.slane %v2512_v61, 1  ;;  %v2011_v46 = vadd.f32 %v1943_v62, %v8418_v58  ;;  %v11804_v56 = vrot.slane %v8356_v51, 1  ;;  %v2481_v50 = vadd.f32 %v2480_v9, %v2479_v63 }
 0x31b   : > { %v2448_v33 = vadd.f32 %v2447_v53, %v2446_v60  ;;  %v2013_v23 = vadd.f32 %v2009_v7, %v8434_v31  ;;  %v2014_v36 = vadd.f32 %v2012_v2, %v2010_v55  ;;  %v2515_v39 = vadd.f32 %v2415_v24, %v8424_v11  ;;  %v2541_v7 = vld [vmem:[#allocation9] sm:$0x1] }
 0x31c   : > { %v2349_v42 = vadd.f32 %v11804_v56, %v8356_v51  ;;  %v2514_v34 = vadd.f32 %v2513_v3, %v2512_v61  ;;  %v11805_v28 = vrot.slane %v8363_v41, 1  ;;  %v2545_v30 = vlaneseq  ;;  %v2537_v61 = vld [vmem:[#allocation7] sm:$0x1] }
 0x31d   : > { %v2015_v59 = vadd.f32 %v2013_v23, %v2011_v46  ;;  %v2516_v58 = vadd.f32 %v2448_v33, %v8437_v8 }
 0x31e   : > { %v2382_v20 = vadd.f32 %v11805_v28, %v8363_v41  ;;  %v2517_v47 = vadd.f32 %v2481_v50, %v2349_v42  ;;  %v2546_v9 = vshrl.u32 %v2545_v30, 7  ;;  %v11817_v30 = vld [vmem:[#allocation37_spill] sm:$0xff] }
 0x31f   : > { %v2016_v16 = vadd.f32 %v2015_v59, %v2014_v36 }
 0x320   : > { %v2518_v37 = vadd.f32 %v2514_v34, %v2382_v20  ;;  %v2519_v25 = vadd.f32 %v2517_v47, %v2515_v39  ;;  %v8486_v62 = vsub.s32 0, %v2546_v9 }
 0x321   : > { %2018 = vrot.lane.b32.xlu0 %v2016_v16, %s6698_s10 }
 0x322   : > { %v2520_v51 = vadd.f32 %v2518_v37, %v2516_v58 }
 0x324   : > { %v2521_v31 = vadd.f32 %v2520_v51, %v2519_v25  ;;  %v11806_v25 = vld [vmem:[#allocation131_spill] sm:$0xff] }
 0x325   : > { %v11808_v51 = vld [vmem:[#allocation31_spill] sm:$0xff] }
 0x326   : > { %2523 = vrot.lane.b32.xlu0 %v2521_v31, %s6698_s10 }
 0x393   : > { %v2019_v11 = vpop.permute.xlu0 %2018 }
 0x394   : > { %v2021_v4 = vadd.f32 %v2019_v11, %v2016_v16  ;;  %v11807_v16 = vld [vmem:[#allocation132_spill] sm:$0xff] }
 0x395   : > { %v11810_v11 = vld [vmem:[#allocation32_spill] sm:$0xff] }
 0x396   : > { %2023 = vrot.lane.b32.xlu1 %v2021_v4, %s6699_s28 }
 0x398   : > { %v2524_v41 = vpop.permute.xlu0 %2523 }
 0x399   : > { %v2526_v10 = vadd.f32 %v2524_v41, %v2521_v31  ;;  %v11809_v31 = vld [vmem:[#allocation33_spill] sm:$0xff] }
 0x39b   : > { %2528 = vrot.lane.b32.xlu1 %v2526_v10, %s6699_s28 }
 0x408   : > { %v2024_v8 = vpop.permute.xlu1 %2023 }
 0x409   : > { %v2026_v1 = vadd.f32 %v2024_v8, %v2021_v4  ;;  %v11811_v4 = vld [vmem:[#allocation34_spill] sm:$0xff] }
 0x40b   : > { %v2533_v63 = vmul.f32 0.00015943877, %v2026_v1  ;;  %v11813_v1 = vld [vmem:[#allocation135_spill] sm:$0xff] }
 0x40d   : > { %v2529_v14 = vpop.permute.xlu1 %2528  ;;  %v2535_v12 = vmul.f32 %v2533_v63, %v2533_v63 }
 0x40e   : > { %v2531_v5 = vadd.f32 %v2529_v14, %v2526_v10  ;;  %v11812_v10 = vld [vmem:[#allocation133_spill] sm:$0xff]  ;;  %v11814_v14 = vld [vmem:[#allocation134_spill] sm:$0xff] }
 0x410   : > { %v2534_v57 = vmul.f32 0.00015943877, %v2531_v5 }
 0x412   : > { %v2536_v60 = vsub.f32 %v2534_v57, %v2535_v12  ;;  %v11815_v12 = vld [vmem:[#allocation136_spill] sm:$0xff] }
 0x414   : > { %v2538_v13 = vadd.f32 1e-05, %v2536_v60  ;;  %v11816_v60 = vld [vmem:[#allocation35_spill] sm:$0xff] }
 0x416   : > { %6243 = vrsqrt.f32 %v2538_v13 }
 0x420   : > { %v6244_v55 = vpop.eup %6243 }
 0x421   : > { %v2540_v53 = vmul.f32 %v6244_v55, %v2537_v61  ;;  %v11818_v61 = vld [vmem:[#allocation36_spill] sm:$0xff] }
 0x423   : > { %v2548_v2 = vrot.slane %v2540_v53, %v8486_v62  ;;  %v2542_v24 = vmul.f32 %v2540_v53, %v2533_v63 }
 0x425   : > { %2552 = vrot.lane.b32.xlu1 %v2548_v2, %s6698_s10  ;;  %2549 = vrot.lane.b32.xlu0 %v2548_v2, %s6700_s19  ;;  %v2543_v3 = vsub.f32 %v2541_v7, %v2542_v24 }
 0x427   : > { %v2568_v46 = vrot.slane %v2543_v3, %v8486_v62 }
 0x429   : > { %2555 = vrot.lane.b32.xlu0 %v2548_v2, %s6699_s28  ;;  %2569 = vrot.lane.b32.xlu1 %v2568_v46, %s6700_s19  ;;  %v11820_v2 = vld [vmem:[#allocation137_spill] sm:$0xff] }
 0x42d   : > { %2572 = vrot.lane.b32.xlu0 %v2568_v46, %s6698_s10  ;;  %2575 = vrot.lane.b32.xlu1 %v2568_v46, %s6699_s28 }
 0x497   : > { %v2550_v56 = vpop.permute.xlu0 %2549  ;;  %v2553_v42 = vpop.permute.xlu1 %2552 }
 0x498   : > { %v2559_v50 = vsel %vm2558_vm0, %v2540_v53, %v2550_v56  ;;  %v11819_v53 = vld [vmem:[#allocation38_spill] sm:$0xff] }
 0x499   : > { %v2561_v33 = vsel %vm2560_vm1, %v2559_v50, %v2553_v42  ;;  %v11822_v56 = vld [vmem:[#allocation138_spill] sm:$0xff]  ;;  %v11823_v50 = vld [vmem:[#allocation140_spill] sm:$0xff] }
 0x49b   : > { %v2556_v23 = vpop.permute.xlu0 %2555  ;;  %v2570_v34 = vpop.permute.xlu1 %2569 }
 0x49c   : > { %v2563_v36 = vsel %vm2562_vm2, %v2561_v33, %v2556_v23  ;;  %v8511_v59 = vsel %vm2558_vm0, %v2543_v3, %v2570_v34  ;;  %v11821_v3 = vld [vmem:[#allocation139_spill] sm:$0xff]  ;;  %v11825_v34 = vld [vmem:[#allocation41_spill] sm:$0xff] }
 0x49d   : > { %v8497_v39 = vrot.slane %v2563_v36, %v8486_v62  ;;  %v11824_v23 = vld [vmem:[#allocation39_spill] sm:$0xff] }
 0x49f   : > { %v8501_v28 = vmul.f32 %v8497_v39, %v7242_v6  ;;  %v8505_v20 = vmul.f32 %v8497_v39, %v7246_v19  ;;  %v8509_v47 = vmul.f32 %v8497_v39, %v7244_v18  ;;  %v8515_v58 = vmul.f32 %v8497_v39, %v7250_v21 }
 0x4a0   : > { %v8519_v37 = vmul.f32 %v8497_v39, %v7818_v15  ;;  %v8523_v6 = vmul.f32 %v8497_v39, %v7824_v45  ;;  %v8527_v19 = vmul.f32 %v8497_v39, %v7822_v35  ;;  %v8531_v18 = vmul.f32 %v8497_v39, %v7826_v54 }
 0x4a1   : > { %v8535_v21 = vmul.f32 %v8497_v39, %v7252_v22  ;;  %v8539_v15 = vmul.f32 %v8497_v39, %v7264_v27  ;;  %v8543_v45 = vmul.f32 %v8497_v39, %v7262_v26  ;;  %v8547_v35 = vmul.f32 %v8497_v39, %v7274_v32 }
 0x4a2   : > { %v8551_v54 = vmul.f32 %v8497_v39, %v7828_v29  ;;  %v8555_v22 = vmul.f32 %v8497_v39, %v7832_v38  ;;  %v8559_v27 = vmul.f32 %v8497_v39, %v7830_v48  ;;  %v8563_v26 = vmul.f32 %v8497_v39, %v7834_v0 }
 0x4a3   : > { %v8567_v32 = vmul.f32 %v8497_v39, %v7284_v40  ;;  %v8571_v29 = vmul.f32 %v8497_v39, %v7291_v44  ;;  %v8575_v38 = vmul.f32 %v8497_v39, %v7289_v43  ;;  %v8579_v48 = vmul.f32 %v8497_v39, %v7299_v49 }
 0x4a4   : > { %v8583_v0 = vmul.f32 %v8497_v39, %v7842_v52  ;;  %v8587_v40 = vmul.f32 %v8497_v39, %v7852_v17  ;;  %v8591_v44 = vmul.f32 %v8497_v39, %v11806_v25  ;;  %v8595_v43 = vmul.f32 %v8497_v39, %v11807_v16  ;;  %v11826_v16 = vld [vmem:[#allocation40_spill] sm:$0xff] }
 0x4a5   : > { %v8599_v49 = vmul.f32 %v8497_v39, %v11808_v51  ;;  %v8603_v52 = vmul.f32 %v8497_v39, %v11809_v31  ;;  %v8607_v17 = vmul.f32 %v8497_v39, %v11810_v11  ;;  %v8611_v41 = vmul.f32 %v8497_v39, %v11811_v4  ;;  %v11827_v31 = vld [vmem:[#allocation42_spill] sm:$0xff]  ;;  %v11828_v4 = vld [vmem:[#allocation141_spill] sm:$0xff] }
 0x4a6   : > { %v8615_v8 = vmul.f32 %v8497_v39, %v11812_v10  ;;  %v8619_v63 = vmul.f32 %v8497_v39, %v11813_v1  ;;  %v8623_v5 = vmul.f32 %v8497_v39, %v11814_v14  ;;  %v8627_v57 = vmul.f32 %v8497_v39, %v11815_v12  ;;  %v11829_v1 = vld [vmem:[#allocation143_spill] sm:$0xff]  ;;  %v11830_v12 = vld [vmem:[#allocation142_spill] sm:$0xff] }
 0x4a7   : > { %v8631_v13 = vmul.f32 %v8497_v39, %v11816_v60  ;;  %v8635_v9 = vmul.f32 %v8497_v39, %v11817_v30  ;;  %v8639_v55 = vmul.f32 %v8497_v39, %v11818_v61  ;;  %v8643_v7 = vmul.f32 %v8497_v39, %v11819_v53  ;;  %v11831_v30 = vld [vmem:[#allocation144_spill] sm:$0xff]  ;;  %v11832_v53 = vld [vmem:[#allocation43_spill] sm:$0xff] }
 0x4a8   : > { %v8647_v24 = vmul.f32 %v8497_v39, %v11820_v2  ;;  %v8651_v46 = vmul.f32 %v8497_v39, %v11821_v3  ;;  %v8655_v42 = vmul.f32 %v8497_v39, %v11822_v56  ;;  %v8659_v33 = vmul.f32 %v8497_v39, %v11823_v50  ;;  %v11834_v3 = vld [vmem:[#allocation45_spill] sm:$0xff]  ;;  %v11836_v50 = vld [vmem:[#allocation44_spill] sm:$0xff] }
 0x4a9   : > { %v8663_v36 = vmul.f32 %v8497_v39, %v11824_v23  ;;  %v8667_v25 = vmul.f32 %v8497_v39, %v11825_v34  ;;  %v8671_v51 = vmul.f32 %v8497_v39, %v11826_v16  ;;  %v8675_v11 = vmul.f32 %v8497_v39, %v11827_v31  ;;  %v11838_v34 = vld [vmem:[#allocation46_spill] sm:$0xff]  ;;  %v11840_v31 = vld [vmem:[#allocation145_spill] sm:$0xff] }
 0x4aa   : > { %v8679_v10 = vmul.f32 %v8497_v39, %v11828_v4  ;;  %v8683_v14 = vmul.f32 %v8497_v39, %v11829_v1  ;;  %v8687_v60 = vmul.f32 %v8497_v39, %v11830_v12  ;;  %v8691_v61 = vmul.f32 %v8497_v39, %v11831_v30  ;;  %v11842_v1 = vld [vmem:[#allocation147_spill] sm:$0xff]  ;;  %v11844_v30 = vld [vmem:[#allocation146_spill] sm:$0xff] }
 0x4ab   : > { %v8695_v2 = vmul.f32 %v8497_v39, %v11832_v53  ;;  %v8699_v56 = vmul.f32 %v8497_v39, %v11834_v3  ;;  %v8703_v23 = vmul.f32 %v8497_v39, %v11836_v50  ;;  %v8707_v16 = vmul.f32 %v8497_v39, %v11838_v34  ;;  %v11846_v3 = vld [vmem:[#allocation148_spill] sm:$0xff] }
 0x4ac   : > { %v8711_v4 = vmul.f32 %v8497_v39, %v11840_v31  ;;  %v8715_v12 = vmul.f32 %v8497_v39, %v11842_v1  ;;  %v8719_v53 = vmul.f32 %v8497_v39, %v11844_v30  ;;  %v8723_v50 = vmul.f32 %v8497_v39, %v11846_v3 }
 0x4ad   : > { %11833 = vst [vmem:[#allocation131_spill] sm:$0xff] %v8695_v2  ;;  %11835 = vst [vmem:[#allocation132_spill] sm:$0xff] %v8699_v56  ;;  %v12142_v56 = vld [vmem:[#allocation122_spill] sm:$0xff]  ;;  %v12152_v2 = vld [vmem:[#allocation123_spill] sm:$0xff] }
 0x4ae   : > { %11837 = vst [vmem:[#allocation31_spill] sm:$0xff] %v8703_v23  ;;  %11839 = vst [vmem:[#allocation33_spill] sm:$0xff] %v8707_v16  ;;  %v11848_v23 = vld [vmem:[#allocation47_spill] sm:$0xff]  ;;  %v11850_v16 = vld [vmem:[#allocation49_spill] sm:$0xff] }
 0x4af   : > { %11841 = vst [vmem:[#allocation32_spill] sm:$0xff] %v8711_v4  ;;  %11843 = vst [vmem:[#allocation34_spill] sm:$0xff] %v8715_v12  ;;  %v8727_v34 = vmul.f32 %v8497_v39, %v11848_v23  ;;  %v8731_v31 = vmul.f32 %v8497_v39, %v11850_v16  ;;  %v11852_v4 = vld [vmem:[#allocation48_spill] sm:$0xff]  ;;  %v11854_v12 = vld [vmem:[#allocation50_spill] sm:$0xff] }
 0x4b0   : > { %11845 = vst [vmem:[#allocation133_spill] sm:$0xff] %v8719_v53  ;;  %11847 = vst [vmem:[#allocation135_spill] sm:$0xff] %v8723_v50  ;;  %v8735_v1 = vmul.f32 %v8497_v39, %v11852_v4  ;;  %v8739_v30 = vmul.f32 %v8497_v39, %v11854_v12  ;;  %v11856_v53 = vld [vmem:[#allocation149_spill] sm:$0xff]  ;;  %v11858_v50 = vld [vmem:[#allocation151_spill] sm:$0xff] }
 0x4b1   : > { %11849 = vst [vmem:[#allocation134_spill] sm:$0xff] %v8727_v34  ;;  %11851 = vst [vmem:[#allocation136_spill] sm:$0xff] %v8731_v31  ;;  %v8743_v3 = vmul.f32 %v8497_v39, %v11856_v53  ;;  %v8747_v23 = vmul.f32 %v8497_v39, %v11858_v50  ;;  %v11860_v34 = vld [vmem:[#allocation150_spill] sm:$0xff]  ;;  %v11862_v31 = vld [vmem:[#allocation152_spill] sm:$0xff] }
 0x4b2   : > { %11853 = vst [vmem:[#allocation35_spill] sm:$0xff] %v8735_v1  ;;  %11855 = vst [vmem:[#allocation37_spill] sm:$0xff] %v8739_v30  ;;  %v8751_v16 = vmul.f32 %v8497_v39, %v11860_v34  ;;  %v8755_v4 = vmul.f32 %v8497_v39, %v11862_v31  ;;  %v11864_v1 = vld [vmem:[#allocation51_spill] sm:$0xff]  ;;  %v11866_v30 = vld [vmem:[#allocation53_spill] sm:$0xff] }
 0x4b3   : > { %11857 = vst [vmem:[#allocation36_spill] sm:$0xff] %v8743_v3  ;;  %11859 = vst [vmem:[#allocation38_spill] sm:$0xff] %v8747_v23  ;;  %v8759_v12 = vmul.f32 %v8497_v39, %v11864_v1  ;;  %v8763_v53 = vmul.f32 %v8497_v39, %v11866_v30  ;;  %v11868_v3 = vld [vmem:[#allocation52_spill] sm:$0xff]  ;;  %v11870_v23 = vld [vmem:[#allocation54_spill] sm:$0xff] }
 0x4b4   : > { %11861 = vst [vmem:[#allocation137_spill] sm:$0xff] %v8751_v16  ;;  %11863 = vst [vmem:[#allocation139_spill] sm:$0xff] %v8755_v4  ;;  %v8767_v50 = vmul.f32 %v8497_v39, %v11868_v3  ;;  %v8771_v34 = vmul.f32 %v8497_v39, %v11870_v23  ;;  %v11872_v16 = vld [vmem:[#allocation153_spill] sm:$0xff]  ;;  %v11874_v4 = vld [vmem:[#allocation155_spill] sm:$0xff] }
 0x4b5   : > { %11865 = vst [vmem:[#allocation138_spill] sm:$0xff] %v8759_v12  ;;  %11867 = vst [vmem:[#allocation140_spill] sm:$0xff] %v8763_v53  ;;  %v8775_v31 = vmul.f32 %v8497_v39, %v11872_v16  ;;  %v8779_v1 = vmul.f32 %v8497_v39, %v11874_v4  ;;  %v11876_v12 = vld [vmem:[#allocation154_spill] sm:$0xff]  ;;  %v11878_v53 = vld [vmem:[#allocation156_spill] sm:$0xff] }
 0x4b6   : > { %11869 = vst [vmem:[#allocation39_spill] sm:$0xff] %v8767_v50  ;;  %11871 = vst [vmem:[#allocation41_spill] sm:$0xff] %v8771_v34  ;;  %v8783_v30 = vmul.f32 %v8497_v39, %v11876_v12  ;;  %v8787_v3 = vmul.f32 %v8497_v39, %v11878_v53  ;;  %v11880_v50 = vld [vmem:[#allocation55_spill] sm:$0xff]  ;;  %v11882_v34 = vld [vmem:[#allocation57_spill] sm:$0xff] }
 0x4b7   : > { %11873 = vst [vmem:[#allocation40_spill] sm:$0xff] %v8775_v31  ;;  %11875 = vst [vmem:[#allocation42_spill] sm:$0xff] %v8779_v1  ;;  %v8791_v23 = vmul.f32 %v8497_v39, %v11880_v50  ;;  %v8795_v16 = vmul.f32 %v8497_v39, %v11882_v34  ;;  %v11884_v31 = vld [vmem:[#allocation56_spill] sm:$0xff]  ;;  %v11886_v1 = vld [vmem:[#allocation58_spill] sm:$0xff] }
 0x4b8   : > { %11877 = vst [vmem:[#allocation141_spill] sm:$0xff] %v8783_v30  ;;  %11879 = vst [vmem:[#allocation143_spill] sm:$0xff] %v8787_v3  ;;  %v8799_v4 = vmul.f32 %v8497_v39, %v11884_v31  ;;  %v8803_v12 = vmul.f32 %v8497_v39, %v11886_v1  ;;  %v11888_v30 = vld [vmem:[#allocation157_spill] sm:$0xff]  ;;  %v11890_v3 = vld [vmem:[#allocation159_spill] sm:$0xff] }
 0x4b9   : > { %11881 = vst [vmem:[#allocation142_spill] sm:$0xff] %v8791_v23  ;;  %11883 = vst [vmem:[#allocation144_spill] sm:$0xff] %v8795_v16  ;;  %v8807_v53 = vmul.f32 %v8497_v39, %v11888_v30  ;;  %v8811_v50 = vmul.f32 %v8497_v39, %v11890_v3  ;;  %v11892_v23 = vld [vmem:[#allocation158_spill] sm:$0xff]  ;;  %v11894_v16 = vld [vmem:[#allocation160_spill] sm:$0xff] }
 0x4ba   : > { %11885 = vst [vmem:[#allocation43_spill] sm:$0xff] %v8799_v4  ;;  %11887 = vst [vmem:[#allocation45_spill] sm:$0xff] %v8803_v12  ;;  %v8815_v34 = vmul.f32 %v8497_v39, %v11892_v23  ;;  %v8819_v31 = vmul.f32 %v8497_v39, %v11894_v16  ;;  %v11896_v4 = vld [vmem:[#allocation59_spill] sm:$0xff]  ;;  %v11898_v12 = vld [vmem:[#allocation61_spill] sm:$0xff] }
 0x4bb   : > { %11889 = vst [vmem:[#allocation44_spill] sm:$0xff] %v8807_v53  ;;  %11891 = vst [vmem:[#allocation46_spill] sm:$0xff] %v8811_v50  ;;  %v8823_v1 = vmul.f32 %v8497_v39, %v11896_v4  ;;  %v8827_v30 = vmul.f32 %v8497_v39, %v11898_v12  ;;  %v11900_v53 = vld [vmem:[#allocation60_spill] sm:$0xff]  ;;  %v11902_v50 = vld [vmem:[#allocation62_spill] sm:$0xff] }
 0x4bc   : > { %11893 = vst [vmem:[#allocation145_spill] sm:$0xff] %v8815_v34  ;;  %11895 = vst [vmem:[#allocation147_spill] sm:$0xff] %v8819_v31  ;;  %v8831_v3 = vmul.f32 %v8497_v39, %v11900_v53  ;;  %v8835_v23 = vmul.f32 %v8497_v39, %v11902_v50  ;;  %v11904_v34 = vld [vmem:[#allocation161_spill] sm:$0xff]  ;;  %v11906_v31 = vld [vmem:[#allocation163_spill] sm:$0xff] }
 0x4bd   : > { %11897 = vst [vmem:[#allocation146_spill] sm:$0xff] %v8823_v1  ;;  %11899 = vst [vmem:[#allocation148_spill] sm:$0xff] %v8827_v30  ;;  %v8839_v16 = vmul.f32 %v8497_v39, %v11904_v34  ;;  %v8843_v4 = vmul.f32 %v8497_v39, %v11906_v31  ;;  %v11908_v1 = vld [vmem:[#allocation162_spill] sm:$0xff]  ;;  %v11910_v30 = vld [vmem:[#allocation164_spill] sm:$0xff] }
 0x4be   : > { %11901 = vst [vmem:[#allocation47_spill] sm:$0xff] %v8831_v3  ;;  %11903 = vst [vmem:[#allocation49_spill] sm:$0xff] %v8835_v23  ;;  %v8847_v12 = vmul.f32 %v8497_v39, %v11908_v1  ;;  %v8851_v53 = vmul.f32 %v8497_v39, %v11910_v30  ;;  %v11912_v3 = vld [vmem:[#allocation63_spill] sm:$0xff]  ;;  %v11914_v23 = vld [vmem:[#allocation65_spill] sm:$0xff] }
 0x4bf   : > { %11905 = vst [vmem:[#allocation48_spill] sm:$0xff] %v8839_v16  ;;  %11907 = vst [vmem:[#allocation50_spill] sm:$0xff] %v8843_v4  ;;  %v8855_v50 = vmul.f32 %v8497_v39, %v11912_v3  ;;  %v8859_v34 = vmul.f32 %v8497_v39, %v11914_v23  ;;  %v11916_v16 = vld [vmem:[#allocation64_spill] sm:$0xff]  ;;  %v11918_v4 = vld [vmem:[#allocation66_spill] sm:$0xff] }
 0x4c0   : > { %11909 = vst [vmem:[#allocation149_spill] sm:$0xff] %v8847_v12  ;;  %11911 = vst [vmem:[#allocation151_spill] sm:$0xff] %v8851_v53  ;;  %v8863_v31 = vmul.f32 %v8497_v39, %v11916_v16  ;;  %v8867_v1 = vmul.f32 %v8497_v39, %v11918_v4  ;;  %v11920_v12 = vld [vmem:[#allocation165_spill] sm:$0xff]  ;;  %v11922_v53 = vld [vmem:[#allocation167_spill] sm:$0xff] }
 0x4c1   : > { %11913 = vst [vmem:[#allocation150_spill] sm:$0xff] %v8855_v50  ;;  %11915 = vst [vmem:[#allocation152_spill] sm:$0xff] %v8859_v34  ;;  %v8871_v30 = vmul.f32 %v8497_v39, %v11920_v12  ;;  %v8875_v3 = vmul.f32 %v8497_v39, %v11922_v53  ;;  %v11924_v50 = vld [vmem:[#allocation166_spill] sm:$0xff]  ;;  %v11926_v34 = vld [vmem:[#allocation168_spill] sm:$0xff] }
 0x4c2   : > { %11917 = vst [vmem:[#allocation51_spill] sm:$0xff] %v8863_v31  ;;  %11919 = vst [vmem:[#allocation53_spill] sm:$0xff] %v8867_v1  ;;  %v8879_v23 = vmul.f32 %v8497_v39, %v11924_v50  ;;  %v8883_v16 = vmul.f32 %v8497_v39, %v11926_v34  ;;  %v11928_v31 = vld [vmem:[#allocation67_spill] sm:$0xff]  ;;  %v11930_v1 = vld [vmem:[#allocation69_spill] sm:$0xff] }
 0x4c3   : > { %11921 = vst [vmem:[#allocation52_spill] sm:$0xff] %v8871_v30  ;;  %11923 = vst [vmem:[#allocation54_spill] sm:$0xff] %v8875_v3  ;;  %v8887_v4 = vmul.f32 %v8497_v39, %v11928_v31  ;;  %v8891_v12 = vmul.f32 %v8497_v39, %v11930_v1  ;;  %v11932_v30 = vld [vmem:[#allocation68_spill] sm:$0xff]  ;;  %v11934_v3 = vld [vmem:[#allocation70_spill] sm:$0xff] }
 0x4c4   : > { %11925 = vst [vmem:[#allocation153_spill] sm:$0xff] %v8879_v23  ;;  %11927 = vst [vmem:[#allocation155_spill] sm:$0xff] %v8883_v16  ;;  %v8895_v53 = vmul.f32 %v8497_v39, %v11932_v30  ;;  %v8899_v50 = vmul.f32 %v8497_v39, %v11934_v3  ;;  %v11936_v23 = vld [vmem:[#allocation169_spill] sm:$0xff]  ;;  %v11938_v16 = vld [vmem:[#allocation171_spill] sm:$0xff] }
 0x4c5   : > { %11929 = vst [vmem:[#allocation154_spill] sm:$0xff] %v8887_v4  ;;  %11931 = vst [vmem:[#allocation156_spill] sm:$0xff] %v8891_v12  ;;  %v8903_v34 = vmul.f32 %v8497_v39, %v11936_v23  ;;  %v8907_v31 = vmul.f32 %v8497_v39, %v11938_v16  ;;  %v11940_v4 = vld [vmem:[#allocation170_spill] sm:$0xff]  ;;  %v11942_v12 = vld [vmem:[#allocation172_spill] sm:$0xff] }
 0x4c6   : > { %11933 = vst [vmem:[#allocation55_spill] sm:$0xff] %v8895_v53  ;;  %11935 = vst [vmem:[#allocation57_spill] sm:$0xff] %v8899_v50  ;;  %v8911_v1 = vmul.f32 %v8497_v39, %v11940_v4  ;;  %v8915_v30 = vmul.f32 %v8497_v39, %v11942_v12  ;;  %v11944_v53 = vld [vmem:[#allocation71_spill] sm:$0xff]  ;;  %v11946_v50 = vld [vmem:[#allocation73_spill] sm:$0xff] }
 0x4c7   : > { %11937 = vst [vmem:[#allocation56_spill] sm:$0xff] %v8903_v34  ;;  %11939 = vst [vmem:[#allocation58_spill] sm:$0xff] %v8907_v31  ;;  %v8919_v3 = vmul.f32 %v8497_v39, %v11944_v53  ;;  %v8923_v23 = vmul.f32 %v8497_v39, %v11946_v50  ;;  %v11948_v34 = vld [vmem:[#allocation72_spill] sm:$0xff]  ;;  %v11950_v31 = vld [vmem:[#allocation74_spill] sm:$0xff] }
 0x4c8   : > { %11941 = vst [vmem:[#allocation157_spill] sm:$0xff] %v8911_v1  ;;  %11943 = vst [vmem:[#allocation159_spill] sm:$0xff] %v8915_v30  ;;  %v8927_v16 = vmul.f32 %v8497_v39, %v11948_v34  ;;  %v8931_v4 = vmul.f32 %v8497_v39, %v11950_v31  ;;  %v11952_v1 = vld [vmem:[#allocation173_spill] sm:$0xff]  ;;  %v11954_v30 = vld [vmem:[#allocation175_spill] sm:$0xff] }
 0x4c9   : > { %11945 = vst [vmem:[#allocation158_spill] sm:$0xff] %v8919_v3  ;;  %11947 = vst [vmem:[#allocation160_spill] sm:$0xff] %v8923_v23  ;;  %v8935_v12 = vmul.f32 %v8497_v39, %v11952_v1  ;;  %v8939_v53 = vmul.f32 %v8497_v39, %v11954_v30  ;;  %v11956_v3 = vld [vmem:[#allocation174_spill] sm:$0xff]  ;;  %v11958_v23 = vld [vmem:[#allocation176_spill] sm:$0xff] }
 0x4ca   : > { %11949 = vst [vmem:[#allocation59_spill] sm:$0xff] %v8927_v16  ;;  %11951 = vst [vmem:[#allocation61_spill] sm:$0xff] %v8931_v4  ;;  %v8943_v50 = vmul.f32 %v8497_v39, %v11956_v3  ;;  %v8947_v34 = vmul.f32 %v8497_v39, %v11958_v23  ;;  %v11960_v16 = vld [vmem:[#allocation75_spill] sm:$0xff]  ;;  %v11962_v4 = vld [vmem:[#allocation77_spill] sm:$0xff] }
 0x4cb   : > { %11953 = vst [vmem:[#allocation60_spill] sm:$0xff] %v8935_v12  ;;  %11955 = vst [vmem:[#allocation62_spill] sm:$0xff] %v8939_v53  ;;  %v8951_v31 = vmul.f32 %v8497_v39, %v11960_v16  ;;  %v8955_v1 = vmul.f32 %v8497_v39, %v11962_v4  ;;  %v11964_v12 = vld [vmem:[#allocation76_spill] sm:$0xff]  ;;  %v11966_v53 = vld [vmem:[#allocation78_spill] sm:$0xff] }
 0x4cc   : > { %11957 = vst [vmem:[#allocation161_spill] sm:$0xff] %v8943_v50  ;;  %11959 = vst [vmem:[#allocation163_spill] sm:$0xff] %v8947_v34  ;;  %v8959_v30 = vmul.f32 %v8497_v39, %v11964_v12  ;;  %v8963_v3 = vmul.f32 %v8497_v39, %v11966_v53  ;;  %v11968_v50 = vld [vmem:[#allocation177_spill] sm:$0xff]  ;;  %v11970_v34 = vld [vmem:[#allocation179_spill] sm:$0xff] }
 0x4cd   : > { %11961 = vst [vmem:[#allocation162_spill] sm:$0xff] %v8951_v31  ;;  %11963 = vst [vmem:[#allocation164_spill] sm:$0xff] %v8955_v1  ;;  %v8967_v23 = vmul.f32 %v8497_v39, %v11968_v50  ;;  %v8971_v16 = vmul.f32 %v8497_v39, %v11970_v34  ;;  %v11972_v31 = vld [vmem:[#allocation178_spill] sm:$0xff]  ;;  %v11974_v1 = vld [vmem:[#allocation180_spill] sm:$0xff] }
 0x4ce   : > { %11965 = vst [vmem:[#allocation63_spill] sm:$0xff] %v8959_v30  ;;  %11967 = vst [vmem:[#allocation65_spill] sm:$0xff] %v8963_v3  ;;  %v8975_v4 = vmul.f32 %v8497_v39, %v11972_v31  ;;  %v8979_v12 = vmul.f32 %v8497_v39, %v11974_v1  ;;  %v11976_v30 = vld [vmem:[#allocation79_spill] sm:$0xff]  ;;  %v11978_v3 = vld [vmem:[#allocation81_spill] sm:$0xff] }
 0x4cf   : > { %11969 = vst [vmem:[#allocation64_spill] sm:$0xff] %v8967_v23  ;;  %11971 = vst [vmem:[#allocation66_spill] sm:$0xff] %v8971_v16  ;;  %v8983_v53 = vmul.f32 %v8497_v39, %v11976_v30  ;;  %v8987_v50 = vmul.f32 %v8497_v39, %v11978_v3  ;;  %v11980_v23 = vld [vmem:[#allocation80_spill] sm:$0xff]  ;;  %v11982_v16 = vld [vmem:[#allocation82_spill] sm:$0xff] }
 0x4d0   : > { %11973 = vst [vmem:[#allocation165_spill] sm:$0xff] %v8975_v4  ;;  %11975 = vst [vmem:[#allocation167_spill] sm:$0xff] %v8979_v12  ;;  %v8991_v34 = vmul.f32 %v8497_v39, %v11980_v23  ;;  %v8995_v31 = vmul.f32 %v8497_v39, %v11982_v16  ;;  %v11984_v4 = vld [vmem:[#allocation181_spill] sm:$0xff]  ;;  %v11986_v12 = vld [vmem:[#allocation183_spill] sm:$0xff] }
 0x4d1   : > { %11977 = vst [vmem:[#allocation166_spill] sm:$0xff] %v8983_v53  ;;  %11979 = vst [vmem:[#allocation168_spill] sm:$0xff] %v8987_v50  ;;  %v8999_v1 = vmul.f32 %v8497_v39, %v11984_v4  ;;  %v9003_v30 = vmul.f32 %v8497_v39, %v11986_v12  ;;  %v11988_v53 = vld [vmem:[#allocation182_spill] sm:$0xff]  ;;  %v11990_v50 = vld [vmem:[#allocation184_spill] sm:$0xff] }
 0x4d2   : > { %11981 = vst [vmem:[#allocation67_spill] sm:$0xff] %v8991_v34  ;;  %11983 = vst [vmem:[#allocation69_spill] sm:$0xff] %v8995_v31  ;;  %v9007_v3 = vmul.f32 %v8497_v39, %v11988_v53  ;;  %v9011_v23 = vmul.f32 %v8497_v39, %v11990_v50  ;;  %v11992_v34 = vld [vmem:[#allocation83_spill] sm:$0xff]  ;;  %v11994_v31 = vld [vmem:[#allocation85_spill] sm:$0xff] }
 0x4d3   : > { %11985 = vst [vmem:[#allocation68_spill] sm:$0xff] %v8999_v1  ;;  %11987 = vst [vmem:[#allocation70_spill] sm:$0xff] %v9003_v30  ;;  %v9015_v16 = vmul.f32 %v8497_v39, %v11992_v34  ;;  %v9019_v4 = vmul.f32 %v8497_v39, %v11994_v31  ;;  %v11996_v1 = vld [vmem:[#allocation84_spill] sm:$0xff]  ;;  %v11998_v30 = vld [vmem:[#allocation86_spill] sm:$0xff] }
 0x4d4   : > { %11989 = vst [vmem:[#allocation169_spill] sm:$0xff] %v9007_v3  ;;  %11991 = vst [vmem:[#allocation171_spill] sm:$0xff] %v9011_v23  ;;  %v9023_v12 = vmul.f32 %v8497_v39, %v11996_v1  ;;  %v9027_v53 = vmul.f32 %v8497_v39, %v11998_v30  ;;  %v12000_v3 = vld [vmem:[#allocation185_spill] sm:$0xff]  ;;  %v12002_v23 = vld [vmem:[#allocation187_spill] sm:$0xff] }
 0x4d5   : > { %11993 = vst [vmem:[#allocation170_spill] sm:$0xff] %v9015_v16  ;;  %11995 = vst [vmem:[#allocation172_spill] sm:$0xff] %v9019_v4  ;;  %v9031_v50 = vmul.f32 %v8497_v39, %v12000_v3  ;;  %v9035_v34 = vmul.f32 %v8497_v39, %v12002_v23  ;;  %v12004_v16 = vld [vmem:[#allocation186_spill] sm:$0xff]  ;;  %v12006_v4 = vld [vmem:[#allocation188_spill] sm:$0xff] }
 0x4d6   : > { %11997 = vst [vmem:[#allocation71_spill] sm:$0xff] %v9023_v12  ;;  %11999 = vst [vmem:[#allocation73_spill] sm:$0xff] %v9027_v53  ;;  %v9039_v31 = vmul.f32 %v8497_v39, %v12004_v16  ;;  %v9043_v1 = vmul.f32 %v8497_v39, %v12006_v4  ;;  %v12008_v12 = vld [vmem:[#allocation87_spill] sm:$0xff]  ;;  %v12010_v53 = vld [vmem:[#allocation89_spill] sm:$0xff] }
 0x4d7   : > { %12001 = vst [vmem:[#allocation72_spill] sm:$0xff] %v9031_v50  ;;  %12003 = vst [vmem:[#allocation74_spill] sm:$0xff] %v9035_v34  ;;  %v9047_v30 = vmul.f32 %v8497_v39, %v12008_v12  ;;  %v9051_v3 = vmul.f32 %v8497_v39, %v12010_v53  ;;  %v12012_v50 = vld [vmem:[#allocation88_spill] sm:$0xff]  ;;  %v12014_v34 = vld [vmem:[#allocation90_spill] sm:$0xff] }
 0x4d8   : > { %12005 = vst [vmem:[#allocation173_spill] sm:$0xff] %v9039_v31  ;;  %12007 = vst [vmem:[#allocation175_spill] sm:$0xff] %v9043_v1  ;;  %v9055_v23 = vmul.f32 %v8497_v39, %v12012_v50  ;;  %v9059_v16 = vmul.f32 %v8497_v39, %v12014_v34  ;;  %v12016_v31 = vld [vmem:[#allocation189_spill] sm:$0xff]  ;;  %v12018_v1 = vld [vmem:[#allocation191_spill] sm:$0xff] }
 0x4d9   : > { %12009 = vst [vmem:[#allocation174_spill] sm:$0xff] %v9047_v30  ;;  %12011 = vst [vmem:[#allocation176_spill] sm:$0xff] %v9051_v3  ;;  %v9063_v4 = vmul.f32 %v8497_v39, %v12016_v31  ;;  %v9067_v12 = vmul.f32 %v8497_v39, %v12018_v1  ;;  %v12020_v30 = vld [vmem:[#allocation190_spill] sm:$0xff]  ;;  %v12022_v3 = vld [vmem:[#allocation192_spill] sm:$0xff] }
 0x4da   : > { %12013 = vst [vmem:[#allocation75_spill] sm:$0xff] %v9055_v23  ;;  %12015 = vst [vmem:[#allocation77_spill] sm:$0xff] %v9059_v16  ;;  %v9071_v53 = vmul.f32 %v8497_v39, %v12020_v30  ;;  %v9075_v50 = vmul.f32 %v8497_v39, %v12022_v3  ;;  %v12024_v23 = vld [vmem:[#allocation91_spill] sm:$0xff]  ;;  %v12026_v16 = vld [vmem:[#allocation93_spill] sm:$0xff] }
 0x4db   : > { %12017 = vst [vmem:[#allocation76_spill] sm:$0xff] %v9063_v4  ;;  %12019 = vst [vmem:[#allocation78_spill] sm:$0xff] %v9067_v12  ;;  %v9079_v34 = vmul.f32 %v8497_v39, %v12024_v23  ;;  %v9083_v31 = vmul.f32 %v8497_v39, %v12026_v16  ;;  %v12028_v4 = vld [vmem:[#allocation92_spill] sm:$0xff]  ;;  %v12030_v12 = vld [vmem:[#allocation94_spill] sm:$0xff] }
 0x4dc   : > { %12021 = vst [vmem:[#allocation177_spill] sm:$0xff] %v9071_v53  ;;  %12023 = vst [vmem:[#allocation179_spill] sm:$0xff] %v9075_v50  ;;  %v9087_v1 = vmul.f32 %v8497_v39, %v12028_v4  ;;  %v9091_v30 = vmul.f32 %v8497_v39, %v12030_v12  ;;  %v12032_v53 = vld [vmem:[#allocation193_spill] sm:$0xff]  ;;  %v12034_v50 = vld [vmem:[#allocation195_spill] sm:$0xff] }
 0x4dd   : > { %12025 = vst [vmem:[#allocation178_spill] sm:$0xff] %v9079_v34  ;;  %12027 = vst [vmem:[#allocation180_spill] sm:$0xff] %v9083_v31  ;;  %v9095_v3 = vmul.f32 %v8497_v39, %v12032_v53  ;;  %v9099_v23 = vmul.f32 %v8497_v39, %v12034_v50  ;;  %v12036_v34 = vld [vmem:[#allocation194_spill] sm:$0xff]  ;;  %v12038_v31 = vld [vmem:[#allocation196_spill] sm:$0xff] }
 0x4de   : > { %12029 = vst [vmem:[#allocation79_spill] sm:$0xff] %v9087_v1  ;;  %12031 = vst [vmem:[#allocation81_spill] sm:$0xff] %v9091_v30  ;;  %v9103_v16 = vmul.f32 %v8497_v39, %v12036_v34  ;;  %v9107_v4 = vmul.f32 %v8497_v39, %v12038_v31  ;;  %v12040_v1 = vld [vmem:[#allocation95_spill] sm:$0xff]  ;;  %v12042_v30 = vld [vmem:[#allocation97_spill] sm:$0xff] }
 0x4df   : > { %12033 = vst [vmem:[#allocation80_spill] sm:$0xff] %v9095_v3  ;;  %12035 = vst [vmem:[#allocation82_spill] sm:$0xff] %v9099_v23  ;;  %v9111_v12 = vmul.f32 %v8497_v39, %v12040_v1  ;;  %v9115_v53 = vmul.f32 %v8497_v39, %v12042_v30  ;;  %v12044_v3 = vld [vmem:[#allocation96_spill] sm:$0xff]  ;;  %v12046_v23 = vld [vmem:[#allocation98_spill] sm:$0xff] }
 0x4e0   : > { %12037 = vst [vmem:[#allocation181_spill] sm:$0xff] %v9103_v16  ;;  %12039 = vst [vmem:[#allocation183_spill] sm:$0xff] %v9107_v4  ;;  %v9119_v50 = vmul.f32 %v8497_v39, %v12044_v3  ;;  %v9123_v34 = vmul.f32 %v8497_v39, %v12046_v23  ;;  %v12048_v16 = vld [vmem:[#allocation197_spill] sm:$0xff]  ;;  %v12050_v4 = vld [vmem:[#allocation199_spill] sm:$0xff] }
 0x4e1   : > { %12041 = vst [vmem:[#allocation182_spill] sm:$0xff] %v9111_v12  ;;  %12043 = vst [vmem:[#allocation184_spill] sm:$0xff] %v9115_v53  ;;  %v9127_v31 = vmul.f32 %v8497_v39, %v12048_v16  ;;  %v9131_v1 = vmul.f32 %v8497_v39, %v12050_v4  ;;  %v12052_v12 = vld [vmem:[#allocation198_spill] sm:$0xff]  ;;  %v12054_v53 = vld [vmem:[#allocation200_spill] sm:$0xff] }
 0x4e2   : > { %12045 = vst [vmem:[#allocation83_spill] sm:$0xff] %v9119_v50  ;;  %12047 = vst [vmem:[#allocation85_spill] sm:$0xff] %v9123_v34  ;;  %v9135_v30 = vmul.f32 %v8497_v39, %v12052_v12  ;;  %v9139_v3 = vmul.f32 %v8497_v39, %v12054_v53  ;;  %v12056_v50 = vld [vmem:[#allocation99_spill] sm:$0xff]  ;;  %v12058_v34 = vld [vmem:[#allocation101_spill] sm:$0xff] }
 0x4e3   : > { %12049 = vst [vmem:[#allocation84_spill] sm:$0xff] %v9127_v31  ;;  %12051 = vst [vmem:[#allocation86_spill] sm:$0xff] %v9131_v1  ;;  %v9143_v23 = vmul.f32 %v8497_v39, %v12056_v50  ;;  %v9147_v16 = vmul.f32 %v8497_v39, %v12058_v34  ;;  %v12060_v31 = vld [vmem:[#allocation100_spill] sm:$0xff]  ;;  %v12062_v1 = vld [vmem:[#allocation102_spill] sm:$0xff] }
 0x4e4   : > { %12053 = vst [vmem:[#allocation185_spill] sm:$0xff] %v9135_v30  ;;  %12055 = vst [vmem:[#allocation187_spill] sm:$0xff] %v9139_v3  ;;  %v9151_v4 = vmul.f32 %v8497_v39, %v12060_v31  ;;  %v9155_v12 = vmul.f32 %v8497_v39, %v12062_v1  ;;  %v12064_v30 = vld [vmem:[#allocation201_spill] sm:$0xff]  ;;  %v12066_v3 = vld [vmem:[#allocation203_spill] sm:$0xff] }
 0x4e5   : > { %12057 = vst [vmem:[#allocation186_spill] sm:$0xff] %v9143_v23  ;;  %12059 = vst [vmem:[#allocation188_spill] sm:$0xff] %v9147_v16  ;;  %v9159_v53 = vmul.f32 %v8497_v39, %v12064_v30  ;;  %v9163_v50 = vmul.f32 %v8497_v39, %v12066_v3  ;;  %v12068_v23 = vld [vmem:[#allocation202_spill] sm:$0xff]  ;;  %v12070_v16 = vld [vmem:[#allocation204_spill] sm:$0xff] }
 0x4e6   : > { %12061 = vst [vmem:[#allocation87_spill] sm:$0xff] %v9151_v4  ;;  %12063 = vst [vmem:[#allocation89_spill] sm:$0xff] %v9155_v12  ;;  %v9167_v34 = vmul.f32 %v8497_v39, %v12068_v23  ;;  %v9171_v31 = vmul.f32 %v8497_v39, %v12070_v16  ;;  %v12072_v4 = vld [vmem:[#allocation103_spill] sm:$0xff]  ;;  %v12074_v12 = vld [vmem:[#allocation105_spill] sm:$0xff] }
 0x4e7   : > { %12065 = vst [vmem:[#allocation88_spill] sm:$0xff] %v9159_v53  ;;  %12067 = vst [vmem:[#allocation90_spill] sm:$0xff] %v9163_v50  ;;  %v9175_v1 = vmul.f32 %v8497_v39, %v12072_v4  ;;  %v9179_v30 = vmul.f32 %v8497_v39, %v12074_v12  ;;  %v12076_v53 = vld [vmem:[#allocation104_spill] sm:$0xff]  ;;  %v12078_v50 = vld [vmem:[#allocation106_spill] sm:$0xff] }
 0x4e8   : > { %12069 = vst [vmem:[#allocation189_spill] sm:$0xff] %v9167_v34  ;;  %12071 = vst [vmem:[#allocation191_spill] sm:$0xff] %v9171_v31  ;;  %v9183_v3 = vmul.f32 %v8497_v39, %v12076_v53  ;;  %v9187_v23 = vmul.f32 %v8497_v39, %v12078_v50  ;;  %v12080_v34 = vld [vmem:[#allocation205_spill] sm:$0xff]  ;;  %v12082_v31 = vld [vmem:[#allocation207_spill] sm:$0xff] }
 0x4e9   : > { %12073 = vst [vmem:[#allocation190_spill] sm:$0xff] %v9175_v1  ;;  %12075 = vst [vmem:[#allocation192_spill] sm:$0xff] %v9179_v30  ;;  %v9191_v16 = vmul.f32 %v8497_v39, %v12080_v34  ;;  %v9195_v4 = vmul.f32 %v8497_v39, %v12082_v31  ;;  %v12084_v1 = vld [vmem:[#allocation206_spill] sm:$0xff]  ;;  %v12086_v30 = vld [vmem:[#allocation208_spill] sm:$0xff] }
 0x4ea   : > { %12077 = vst [vmem:[#allocation91_spill] sm:$0xff] %v9183_v3  ;;  %12079 = vst [vmem:[#allocation93_spill] sm:$0xff] %v9187_v23  ;;  %v9199_v12 = vmul.f32 %v8497_v39, %v12084_v1  ;;  %v9203_v53 = vmul.f32 %v8497_v39, %v12086_v30  ;;  %v12088_v3 = vld [vmem:[#allocation107_spill] sm:$0xff]  ;;  %v12090_v23 = vld [vmem:[#allocation109_spill] sm:$0xff] }
 0x4eb   : > { %12081 = vst [vmem:[#allocation92_spill] sm:$0xff] %v9191_v16  ;;  %12083 = vst [vmem:[#allocation94_spill] sm:$0xff] %v9195_v4  ;;  %v9207_v50 = vmul.f32 %v8497_v39, %v12088_v3  ;;  %v9211_v34 = vmul.f32 %v8497_v39, %v12090_v23  ;;  %v12092_v16 = vld [vmem:[#allocation108_spill] sm:$0xff]  ;;  %v12094_v4 = vld [vmem:[#allocation110_spill] sm:$0xff] }
 0x4ec   : > { %12085 = vst [vmem:[#allocation193_spill] sm:$0xff] %v9199_v12  ;;  %12087 = vst [vmem:[#allocation195_spill] sm:$0xff] %v9203_v53  ;;  %v9215_v31 = vmul.f32 %v8497_v39, %v12092_v16  ;;  %v9219_v1 = vmul.f32 %v8497_v39, %v12094_v4  ;;  %v12096_v12 = vld [vmem:[#allocation209_spill] sm:$0xff]  ;;  %v12098_v53 = vld [vmem:[#allocation211_spill] sm:$0xff] }
 0x4ed   : > { %12089 = vst [vmem:[#allocation194_spill] sm:$0xff] %v9207_v50  ;;  %12091 = vst [vmem:[#allocation196_spill] sm:$0xff] %v9211_v34  ;;  %v9223_v30 = vmul.f32 %v8497_v39, %v12096_v12  ;;  %v9227_v3 = vmul.f32 %v8497_v39, %v12098_v53  ;;  %v12100_v50 = vld [vmem:[#allocation210_spill] sm:$0xff]  ;;  %v12102_v34 = vld [vmem:[#allocation212_spill] sm:$0xff] }
 0x4ee   : > { %12093 = vst [vmem:[#allocation95_spill] sm:$0xff] %v9215_v31  ;;  %12095 = vst [vmem:[#allocation97_spill] sm:$0xff] %v9219_v1  ;;  %v9231_v23 = vmul.f32 %v8497_v39, %v12100_v50  ;;  %v9235_v16 = vmul.f32 %v8497_v39, %v12102_v34  ;;  %v12104_v31 = vld [vmem:[#allocation111_spill] sm:$0xff]  ;;  %v12106_v1 = vld [vmem:[#allocation113_spill] sm:$0xff] }
 0x4ef   : > { %12097 = vst [vmem:[#allocation96_spill] sm:$0xff] %v9223_v30  ;;  %12099 = vst [vmem:[#allocation98_spill] sm:$0xff] %v9227_v3  ;;  %v9239_v4 = vmul.f32 %v8497_v39, %v12104_v31  ;;  %v9243_v12 = vmul.f32 %v8497_v39, %v12106_v1  ;;  %v12108_v30 = vld [vmem:[#allocation112_spill] sm:$0xff]  ;;  %v12110_v3 = vld [vmem:[#allocation114_spill] sm:$0xff] }
 0x4f0   : > { %12101 = vst [vmem:[#allocation197_spill] sm:$0xff] %v9231_v23  ;;  %12103 = vst [vmem:[#allocation199_spill] sm:$0xff] %v9235_v16  ;;  %v9247_v53 = vmul.f32 %v8497_v39, %v12108_v30  ;;  %v9251_v50 = vmul.f32 %v8497_v39, %v12110_v3  ;;  %v12112_v23 = vld [vmem:[#allocation213_spill] sm:$0xff]  ;;  %v12114_v16 = vld [vmem:[#allocation215_spill] sm:$0xff] }
 0x4f1   : > { %12105 = vst [vmem:[#allocation198_spill] sm:$0xff] %v9239_v4  ;;  %12107 = vst [vmem:[#allocation200_spill] sm:$0xff] %v9243_v12  ;;  %v9255_v34 = vmul.f32 %v8497_v39, %v12112_v23  ;;  %v9259_v31 = vmul.f32 %v8497_v39, %v12114_v16  ;;  %v12116_v4 = vld [vmem:[#allocation214_spill] sm:$0xff]  ;;  %v12118_v12 = vld [vmem:[#allocation216_spill] sm:$0xff] }
 0x4f2   : > { %12109 = vst [vmem:[#allocation99_spill] sm:$0xff] %v9247_v53  ;;  %12111 = vst [vmem:[#allocation101_spill] sm:$0xff] %v9251_v50  ;;  %v9263_v1 = vmul.f32 %v8497_v39, %v12116_v4  ;;  %v9267_v30 = vmul.f32 %v8497_v39, %v12118_v12  ;;  %v12120_v53 = vld [vmem:[#allocation115_spill] sm:$0xff]  ;;  %v12122_v50 = vld [vmem:[#allocation117_spill] sm:$0xff] }
 0x4f3   : > { %12113 = vst [vmem:[#allocation100_spill] sm:$0xff] %v9255_v34  ;;  %12115 = vst [vmem:[#allocation102_spill] sm:$0xff] %v9259_v31  ;;  %v9271_v3 = vmul.f32 %v8497_v39, %v12120_v53  ;;  %v9275_v23 = vmul.f32 %v8497_v39, %v12122_v50  ;;  %v12124_v34 = vld [vmem:[#allocation116_spill] sm:$0xff]  ;;  %v12126_v31 = vld [vmem:[#allocation118_spill] sm:$0xff] }
 0x4f4   : > { %12117 = vst [vmem:[#allocation201_spill] sm:$0xff] %v9263_v1  ;;  %12119 = vst [vmem:[#allocation203_spill] sm:$0xff] %v9267_v30  ;;  %v9279_v16 = vmul.f32 %v8497_v39, %v12124_v34  ;;  %v9283_v4 = vmul.f32 %v8497_v39, %v12126_v31  ;;  %v12128_v1 = vld [vmem:[#allocation217_spill] sm:$0xff]  ;;  %v12130_v30 = vld [vmem:[#allocation219_spill] sm:$0xff] }
 0x4f5   : > { %12121 = vst [vmem:[#allocation202_spill] sm:$0xff] %v9271_v3  ;;  %12123 = vst [vmem:[#allocation204_spill] sm:$0xff] %v9275_v23  ;;  %v9287_v12 = vmul.f32 %v8497_v39, %v12128_v1  ;;  %v9291_v53 = vmul.f32 %v8497_v39, %v12130_v30  ;;  %v12132_v3 = vld [vmem:[#allocation218_spill] sm:$0xff]  ;;  %v12134_v23 = vld [vmem:[#allocation220_spill] sm:$0xff] }
 0x4f6   : > { %12125 = vst [vmem:[#allocation103_spill] sm:$0xff] %v9279_v16  ;;  %12127 = vst [vmem:[#allocation105_spill] sm:$0xff] %v9283_v4  ;;  %v9295_v50 = vmul.f32 %v8497_v39, %v12132_v3  ;;  %v9299_v34 = vmul.f32 %v8497_v39, %v12134_v23  ;;  %v12136_v16 = vld [vmem:[#allocation119_spill] sm:$0xff]  ;;  %v12138_v4 = vld [vmem:[#allocation121_spill] sm:$0xff]  ;;  %v9315_v3 = vmul.f32 %v8497_v39, %v12142_v56 }
 0x4f7   : > { %12129 = vst [vmem:[#allocation104_spill] sm:$0xff] %v9287_v12  ;;  %12131 = vst [vmem:[#allocation106_spill] sm:$0xff] %v9291_v53  ;;  %v9303_v31 = vmul.f32 %v8497_v39, %v12136_v16  ;;  %v9307_v1 = vmul.f32 %v8497_v39, %v12138_v4  ;;  %v12140_v12 = vld [vmem:[#allocation120_spill] sm:$0xff]  ;;  %v2573_v53 = vpop.permute.xlu0 %2572  ;;  %v9335_v56 = vmul.f32 %v8497_v39, %v12152_v2 }
 0x4f8   : > { %12133 = vst [vmem:[#allocation205_spill] sm:$0xff] %v9295_v50  ;;  %12135 = vst [vmem:[#allocation207_spill] sm:$0xff] %v9299_v34  ;;  %v9311_v30 = vmul.f32 %v8497_v39, %v12140_v12  ;;  %v12144_v50 = vld [vmem:[#allocation221_spill] sm:$0xff]  ;;  %v12146_v34 = vld [vmem:[#allocation223_spill] sm:$0xff] }
 0x4f9   : > { %12137 = vst [vmem:[#allocation206_spill] sm:$0xff] %v9303_v31  ;;  %12139 = vst [vmem:[#allocation208_spill] sm:$0xff] %v9307_v1  ;;  %v9319_v23 = vmul.f32 %v8497_v39, %v12144_v50  ;;  %v9323_v16 = vmul.f32 %v8497_v39, %v12146_v34  ;;  %v12148_v31 = vld [vmem:[#allocation222_spill] sm:$0xff]  ;;  %v2576_v1 = vpop.permute.xlu1 %2575  ;;  %v12150_v12 = vld [vmem:[#allocation224_spill] sm:$0xff] }
 0x4fa   : > { %12141 = vst [vmem:[#allocation107_spill] sm:$0xff] %v9311_v30  ;;  %12143 = vst [vmem:[#allocation109_spill] sm:$0xff] %v9315_v3  ;;  %v9327_v4 = vmul.f32 %v8497_v39, %v12148_v31  ;;  %v9331_v30 = vmul.f32 %v8497_v39, %v12150_v12  ;;  %v12154_v3 = vld [vmem:[#allocation125_spill] sm:$0xff] }
 0x4fb   : > { %12145 = vst [vmem:[#allocation108_spill] sm:$0xff] %v9319_v23  ;;  %12147 = vst [vmem:[#allocation110_spill] sm:$0xff] %v9323_v16  ;;  %v9339_v50 = vmul.f32 %v8497_v39, %v12154_v3  ;;  %v12156_v23 = vld [vmem:[#allocation124_spill] sm:$0xff]  ;;  %v12158_v16 = vld [vmem:[#allocation126_spill] sm:$0xff]  ;;  %v2579_v3 = vsel %vm2560_vm1, %v8511_v59, %v2573_v53 }
 0x4fc   : > { %12149 = vst [vmem:[#allocation209_spill] sm:$0xff] %v9327_v4  ;;  %12151 = vst [vmem:[#allocation211_spill] sm:$0xff] %v9331_v30  ;;  %v9343_v34 = vmul.f32 %v8497_v39, %v12156_v23  ;;  %v9347_v31 = vmul.f32 %v8497_v39, %v12158_v16  ;;  %v12160_v4 = vld [vmem:[#allocation225_spill] sm:$0xff]  ;;  %v12162_v30 = vld [vmem:[#allocation227_spill] sm:$0xff] }
 0x4fd   : > { %12153 = vst [vmem:[#allocation210_spill] sm:$0xff] %v9335_v56  ;;  %12155 = vst [vmem:[#allocation212_spill] sm:$0xff] %v9339_v50  ;;  %v9351_v12 = vmul.f32 %v8497_v39, %v12160_v4  ;;  %v9355_v2 = vmul.f32 %v8497_v39, %v12162_v30  ;;  %v12164_v50 = vld [vmem:[#allocation226_spill] sm:$0xff]  ;;  %v12165_v23 = vld [vmem:[#allocation228_spill] sm:$0xff]  ;;  %v2580_v4 = vsel %vm2562_vm2, %v2579_v3, %v2576_v1 }
 0x4fe   : > { %12157 = vst [vmem:[#allocation111_spill] sm:$0xff] %v9343_v34  ;;  %12159 = vst [vmem:[#allocation113_spill] sm:$0xff] %v9347_v31  ;;  %v9361_v56 = vmul.f32 %v8497_v39, %v12164_v50  ;;  %v9365_v34 = vmul.f32 %v8497_v39, %v12165_v23  ;;  %v12167_v16 = vld [vmem:[#allocation127_spill] sm:$0xff]  ;;  %v12172_v53 = vld [vmem:[#allocation130_spill] sm:$0xff]  ;;  %v9385_v23 = vrot.slane %v2580_v4, %v8486_v62 }
 0x4ff   : > { %12161 = vst [vmem:[#allocation112_spill] sm:$0xff] %v9351_v12  ;;  %12163 = vst [vmem:[#allocation114_spill] sm:$0xff] %v9355_v2  ;;  %v9369_v31 = vmul.f32 %v8497_v39, %v12167_v16  ;;  %v12168_v12 = vld [vmem:[#allocation129_spill] sm:$0xff]  ;;  %v12170_v2 = vld [vmem:[#allocation128_spill] sm:$0xff]  ;;  %v9382_v50 = vmul.f32 %v8497_v39, %v12172_v53 }
 0x500   : > { %12166 = vst [vmem:[#allocation213_spill] sm:$0xff] %v9365_v34  ;;  %v9374_v30 = vmul.f32 %v8497_v39, %v12168_v12  ;;  %v9378_v59 = vmul.f32 %v8497_v39, %v12170_v2  ;;  %v12173_v34 = vld [vmem:[#allocation229_spill] sm:$0xff]  ;;  %v12174_v1 = vld [vmem:[#allocation231_spill] sm:$0xff]  ;;  %v12175_v12 = vld [vmem:[#allocation230_spill] sm:$0xff]  ;;  %v9405_v62 = vadd.f32 %v9385_v23, %v8501_v28  ;;  %v9413_v4 = vadd.f32 %v9385_v23, %v8509_v47 }
 0x501   : > { %v9389_v16 = vmul.f32 %v8497_v39, %v12173_v34  ;;  %v9393_v3 = vmul.f32 %v8497_v39, %v12174_v1  ;;  %v12176_v2 = vld [vmem:[#allocation232_spill] sm:$0xff]  ;;  %v9409_v34 = vadd.f32 %v9385_v23, %v8505_v20  ;;  %v9417_v53 = vadd.f32 %v9385_v23, %v8515_v58  ;;  %v12190_v1 = vld [vmem:[#allocation131_spill] sm:$0xff] }
 0x502   : > { %12169 = vst [vmem:[#allocation215_spill] sm:$0xff] %v9374_v30  ;;  %12171 = vst [vmem:[#allocation214_spill] sm:$0xff] %v9378_v59  ;;  %v9397_v30 = vmul.f32 %v8497_v39, %v12175_v12  ;;  %v9401_v59 = vmul.f32 %v8497_v39, %v12176_v2  ;;  %v9421_v39 = vadd.f32 %v9385_v23, %v8519_v37  ;;  %v12192_v12 = vld [vmem:[#allocation132_spill] sm:$0xff]  ;;  %v12194_v2 = vld [vmem:[#allocation31_spill] sm:$0xff] }
 0x503   : > { %v9425_v28 = vadd.f32 %v9385_v23, %v8523_v6  ;;  %v9429_v20 = vadd.f32 %v9385_v23, %v8527_v19  ;;  %v9433_v47 = vadd.f32 %v9385_v23, %v8531_v18  ;;  %v9437_v58 = vadd.f32 %v9385_v23, %v8535_v21 }
 0x504   : > { %v9441_v37 = vadd.f32 %v9385_v23, %v8539_v15  ;;  %v9445_v6 = vadd.f32 %v9385_v23, %v8543_v45  ;;  %v9449_v19 = vadd.f32 %v9385_v23, %v8547_v35  ;;  %v9453_v18 = vadd.f32 %v9385_v23, %v8551_v54 }
 0x505   : > { %v9457_v21 = vadd.f32 %v9385_v23, %v8555_v22  ;;  %v9461_v15 = vadd.f32 %v9385_v23, %v8559_v27  ;;  %v9465_v45 = vadd.f32 %v9385_v23, %v8563_v26  ;;  %v9469_v35 = vadd.f32 %v9385_v23, %v8567_v32 }
 0x506   : > { %v9473_v54 = vadd.f32 %v9385_v23, %v8571_v29  ;;  %v9477_v22 = vadd.f32 %v9385_v23, %v8575_v38  ;;  %v9481_v27 = vadd.f32 %v9385_v23, %v8579_v48  ;;  %v9485_v26 = vadd.f32 %v9385_v23, %v8583_v0 }
 0x507   : > { %v9489_v32 = vadd.f32 %v9385_v23, %v8587_v40  ;;  %v9493_v29 = vadd.f32 %v9385_v23, %v8591_v44  ;;  %v9497_v38 = vadd.f32 %v9385_v23, %v8595_v43  ;;  %v9501_v48 = vadd.f32 %v9385_v23, %v8599_v49 }
 0x508   : > { %v9505_v0 = vadd.f32 %v9385_v23, %v8603_v52  ;;  %v9509_v40 = vadd.f32 %v9385_v23, %v8607_v17  ;;  %v9513_v44 = vadd.f32 %v9385_v23, %v8611_v41  ;;  %v9517_v43 = vadd.f32 %v9385_v23, %v8615_v8 }
 0x509   : > { %v9521_v49 = vadd.f32 %v9385_v23, %v8619_v63  ;;  %v9525_v52 = vadd.f32 %v9385_v23, %v8623_v5  ;;  %v9529_v17 = vadd.f32 %v9385_v23, %v8627_v57  ;;  %v9533_v41 = vadd.f32 %v9385_v23, %v8631_v13 }
 0x50a   : > { %v9537_v8 = vadd.f32 %v9385_v23, %v8635_v9  ;;  %v9541_v63 = vadd.f32 %v9385_v23, %v8639_v55  ;;  %v9545_v5 = vadd.f32 %v9385_v23, %v8643_v7  ;;  %v9549_v57 = vadd.f32 %v9385_v23, %v8647_v24 }
 0x50b   : > { %v9553_v13 = vadd.f32 %v9385_v23, %v8651_v46  ;;  %v9557_v9 = vadd.f32 %v9385_v23, %v8655_v42  ;;  %v9561_v55 = vadd.f32 %v9385_v23, %v8659_v33  ;;  %v9565_v7 = vadd.f32 %v9385_v23, %v8663_v36 }
 0x50c   : > { %12177 = vst [vmem:[#allocation216_spill] sm:$0xff] %v9545_v5  ;;  %12178 = vst [vmem:[#allocation115_spill] sm:$0xff] %v9549_v57  ;;  %v9569_v24 = vadd.f32 %v9385_v23, %v8667_v25  ;;  %v9573_v46 = vadd.f32 %v9385_v23, %v8671_v51  ;;  %v9577_v42 = vadd.f32 %v9385_v23, %v8675_v11 }
 0x50d   : > { %12179 = vst [vmem:[#allocation117_spill] sm:$0xff] %v9553_v13  ;;  %12180 = vst [vmem:[#allocation116_spill] sm:$0xff] %v9557_v9  ;;  %v9581_v33 = vadd.f32 %v9385_v23, %v8679_v10  ;;  %v9585_v36 = vadd.f32 %v9385_v23, %v8683_v14  ;;  %v9589_v25 = vadd.f32 %v9385_v23, %v8687_v60 }
 0x50e   : > { %12181 = vst [vmem:[#allocation118_spill] sm:$0xff] %v9561_v55  ;;  %12182 = vst [vmem:[#allocation217_spill] sm:$0xff] %v9565_v7  ;;  %v9593_v51 = vadd.f32 %v9385_v23, %v8691_v61  ;;  %v9597_v11 = vadd.f32 %v9385_v23, %v12190_v1  ;;  %v9601_v10 = vadd.f32 %v9385_v23, %v12192_v12 }
 0x50f   : > { %12183 = vst [vmem:[#allocation219_spill] sm:$0xff] %v9569_v24  ;;  %12184 = vst [vmem:[#allocation218_spill] sm:$0xff] %v9573_v46  ;;  %v9605_v14 = vadd.f32 %v9385_v23, %v12194_v2 }
 0x510   : > { %12185 = vst [vmem:[#allocation220_spill] sm:$0xff] %v9577_v42  ;;  %12186 = vst [vmem:[#allocation119_spill] sm:$0xff] %v9581_v33 }
 0x511   : > { %12187 = vst [vmem:[#allocation121_spill] sm:$0xff] %v9585_v36  ;;  %12188 = vst [vmem:[#allocation120_spill] sm:$0xff] %v9589_v25  ;;  %v12196_v36 = vld [vmem:[#allocation33_spill] sm:$0xff]  ;;  %v12198_v25 = vld [vmem:[#allocation32_spill] sm:$0xff] }
 0x512   : > { %12189 = vst [vmem:[#allocation122_spill] sm:$0xff] %v9593_v51  ;;  %12191 = vst [vmem:[#allocation221_spill] sm:$0xff] %v9597_v11  ;;  %v9609_v60 = vadd.f32 %v9385_v23, %v12196_v36  ;;  %v9613_v61 = vadd.f32 %v9385_v23, %v12198_v25  ;;  %v12200_v51 = vld [vmem:[#allocation34_spill] sm:$0xff]  ;;  %v12202_v11 = vld [vmem:[#allocation133_spill] sm:$0xff] }
 0x513   : > { %12193 = vst [vmem:[#allocation223_spill] sm:$0xff] %v9601_v10  ;;  %12195 = vst [vmem:[#allocation222_spill] sm:$0xff] %v9605_v14  ;;  %v9617_v1 = vadd.f32 %v9385_v23, %v12200_v51  ;;  %v9621_v12 = vadd.f32 %v9385_v23, %v12202_v11  ;;  %v12204_v10 = vld [vmem:[#allocation135_spill] sm:$0xff]  ;;  %v12206_v14 = vld [vmem:[#allocation134_spill] sm:$0xff] }
 0x514   : > { %12197 = vst [vmem:[#allocation224_spill] sm:$0xff] %v9609_v60  ;;  %12199 = vst [vmem:[#allocation123_spill] sm:$0xff] %v9613_v61  ;;  %v9625_v2 = vadd.f32 %v9385_v23, %v12204_v10  ;;  %v9629_v36 = vadd.f32 %v9385_v23, %v12206_v14  ;;  %v12208_v60 = vld [vmem:[#allocation136_spill] sm:$0xff]  ;;  %v12210_v61 = vld [vmem:[#allocation35_spill] sm:$0xff] }
 0x515   : > { %12201 = vst [vmem:[#allocation125_spill] sm:$0xff] %v9617_v1  ;;  %12203 = vst [vmem:[#allocation124_spill] sm:$0xff] %v9621_v12  ;;  %v9633_v25 = vadd.f32 %v9385_v23, %v12208_v60  ;;  %v9637_v51 = vadd.f32 %v9385_v23, %v12210_v61  ;;  %v12212_v1 = vld [vmem:[#allocation37_spill] sm:$0xff]  ;;  %v12214_v12 = vld [vmem:[#allocation36_spill] sm:$0xff] }
 0x516   : > { %12205 = vst [vmem:[#allocation126_spill] sm:$0xff] %v9625_v2  ;;  %12207 = vst [vmem:[#allocation225_spill] sm:$0xff] %v9629_v36  ;;  %v9641_v11 = vadd.f32 %v9385_v23, %v12212_v1  ;;  %v9645_v10 = vadd.f32 %v9385_v23, %v12214_v12  ;;  %v12216_v2 = vld [vmem:[#allocation38_spill] sm:$0xff]  ;;  %v12218_v36 = vld [vmem:[#allocation137_spill] sm:$0xff] }
 0x517   : > { %12209 = vst [vmem:[#allocation227_spill] sm:$0xff] %v9633_v25  ;;  %12211 = vst [vmem:[#allocation226_spill] sm:$0xff] %v9637_v51  ;;  %v9649_v14 = vadd.f32 %v9385_v23, %v12216_v2  ;;  %v9653_v60 = vadd.f32 %v9385_v23, %v12218_v36  ;;  %v12220_v25 = vld [vmem:[#allocation139_spill] sm:$0xff]  ;;  %v12222_v51 = vld [vmem:[#allocation138_spill] sm:$0xff] }
 0x518   : > { %12213 = vst [vmem:[#allocation228_spill] sm:$0xff] %v9641_v11  ;;  %12215 = vst [vmem:[#allocation127_spill] sm:$0xff] %v9645_v10  ;;  %v9657_v61 = vadd.f32 %v9385_v23, %v12220_v25  ;;  %v9661_v1 = vadd.f32 %v9385_v23, %v12222_v51  ;;  %v12224_v11 = vld [vmem:[#allocation140_spill] sm:$0xff]  ;;  %v12226_v10 = vld [vmem:[#allocation39_spill] sm:$0xff] }
 0x519   : > { %12217 = vst [vmem:[#allocation129_spill] sm:$0xff] %v9649_v14  ;;  %12219 = vst [vmem:[#allocation128_spill] sm:$0xff] %v9653_v60  ;;  %v9665_v12 = vadd.f32 %v9385_v23, %v12224_v11  ;;  %v9669_v2 = vadd.f32 %v9385_v23, %v12226_v10  ;;  %v12228_v14 = vld [vmem:[#allocation41_spill] sm:$0xff]  ;;  %v12230_v60 = vld [vmem:[#allocation40_spill] sm:$0xff] }
 0x51a   : > { %12221 = vst [vmem:[#allocation130_spill] sm:$0xff] %v9657_v61  ;;  %12223 = vst [vmem:[#allocation229_spill] sm:$0xff] %v9661_v1  ;;  %v9673_v36 = vadd.f32 %v9385_v23, %v12228_v14  ;;  %v9677_v25 = vadd.f32 %v9385_v23, %v12230_v60  ;;  %v12232_v61 = vld [vmem:[#allocation42_spill] sm:$0xff]  ;;  %v12234_v1 = vld [vmem:[#allocation141_spill] sm:$0xff] }
 0x51b   : > { %12225 = vst [vmem:[#allocation231_spill] sm:$0xff] %v9665_v12  ;;  %12227 = vst [vmem:[#allocation230_spill] sm:$0xff] %v9669_v2  ;;  %v9681_v51 = vadd.f32 %v9385_v23, %v12232_v61  ;;  %v9685_v11 = vadd.f32 %v9385_v23, %v12234_v1  ;;  %v12236_v12 = vld [vmem:[#allocation143_spill] sm:$0xff]  ;;  %v12238_v2 = vld [vmem:[#allocation142_spill] sm:$0xff] }
 0x51c   : > { %12229 = vst [vmem:[#allocation232_spill] sm:$0xff] %v9673_v36  ;;  %12231 = vst [vmem:[#allocation131_spill] sm:$0xff] %v9677_v25  ;;  %v9689_v10 = vadd.f32 %v9385_v23, %v12236_v12  ;;  %v9693_v14 = vadd.f32 %v9385_v23, %v12238_v2  ;;  %v12240_v36 = vld [vmem:[#allocation144_spill] sm:$0xff]  ;;  %v12242_v25 = vld [vmem:[#allocation43_spill] sm:$0xff] }
 0x51d   : > { %12233 = vst [vmem:[#allocation132_spill] sm:$0xff] %v9681_v51  ;;  %12235 = vst [vmem:[#allocation31_spill] sm:$0xff] %v9685_v11  ;;  %v9697_v60 = vadd.f32 %v9385_v23, %v12240_v36  ;;  %v9701_v61 = vadd.f32 %v9385_v23, %v12242_v25  ;;  %v12244_v51 = vld [vmem:[#allocation45_spill] sm:$0xff]  ;;  %v12246_v11 = vld [vmem:[#allocation44_spill] sm:$0xff] }
 0x51e   : > { %12237 = vst [vmem:[#allocation33_spill] sm:$0xff] %v9689_v10  ;;  %12239 = vst [vmem:[#allocation32_spill] sm:$0xff] %v9693_v14  ;;  %v9705_v1 = vadd.f32 %v9385_v23, %v12244_v51  ;;  %v9709_v12 = vadd.f32 %v9385_v23, %v12246_v11  ;;  %v12248_v10 = vld [vmem:[#allocation46_spill] sm:$0xff]  ;;  %v12250_v14 = vld [vmem:[#allocation145_spill] sm:$0xff] }
 0x51f   : > { %12241 = vst [vmem:[#allocation34_spill] sm:$0xff] %v9697_v60  ;;  %12243 = vst [vmem:[#allocation133_spill] sm:$0xff] %v9701_v61  ;;  %v9713_v2 = vadd.f32 %v9385_v23, %v12248_v10  ;;  %v9717_v36 = vadd.f32 %v9385_v23, %v12250_v14  ;;  %v12252_v60 = vld [vmem:[#allocation147_spill] sm:$0xff]  ;;  %v12254_v61 = vld [vmem:[#allocation146_spill] sm:$0xff] }
 0x520   : > { %12245 = vst [vmem:[#allocation135_spill] sm:$0xff] %v9705_v1  ;;  %12247 = vst [vmem:[#allocation134_spill] sm:$0xff] %v9709_v12  ;;  %v9721_v25 = vadd.f32 %v9385_v23, %v12252_v60  ;;  %v9725_v51 = vadd.f32 %v9385_v23, %v12254_v61  ;;  %v12256_v1 = vld [vmem:[#allocation148_spill] sm:$0xff]  ;;  %v12258_v12 = vld [vmem:[#allocation47_spill] sm:$0xff] }
 0x521   : > { %12249 = vst [vmem:[#allocation136_spill] sm:$0xff] %v9713_v2  ;;  %12251 = vst [vmem:[#allocation35_spill] sm:$0xff] %v9717_v36  ;;  %v9729_v11 = vadd.f32 %v9385_v23, %v12256_v1  ;;  %v9733_v10 = vadd.f32 %v9385_v23, %v12258_v12  ;;  %v12260_v2 = vld [vmem:[#allocation49_spill] sm:$0xff]  ;;  %v12262_v36 = vld [vmem:[#allocation48_spill] sm:$0xff] }
 0x522   : > { %12253 = vst [vmem:[#allocation37_spill] sm:$0xff] %v9721_v25  ;;  %12255 = vst [vmem:[#allocation36_spill] sm:$0xff] %v9725_v51  ;;  %v9737_v14 = vadd.f32 %v9385_v23, %v12260_v2  ;;  %v9741_v60 = vadd.f32 %v9385_v23, %v12262_v36  ;;  %v12264_v25 = vld [vmem:[#allocation50_spill] sm:$0xff]  ;;  %v12266_v51 = vld [vmem:[#allocation149_spill] sm:$0xff] }
 0x523   : > { %12257 = vst [vmem:[#allocation38_spill] sm:$0xff] %v9729_v11  ;;  %12259 = vst [vmem:[#allocation137_spill] sm:$0xff] %v9733_v10  ;;  %v9745_v61 = vadd.f32 %v9385_v23, %v12264_v25  ;;  %v9749_v1 = vadd.f32 %v9385_v23, %v12266_v51  ;;  %v12268_v11 = vld [vmem:[#allocation151_spill] sm:$0xff]  ;;  %v12270_v10 = vld [vmem:[#allocation150_spill] sm:$0xff] }
 0x524   : > { %12261 = vst [vmem:[#allocation139_spill] sm:$0xff] %v9737_v14  ;;  %12263 = vst [vmem:[#allocation138_spill] sm:$0xff] %v9741_v60  ;;  %v9753_v12 = vadd.f32 %v9385_v23, %v12268_v11  ;;  %v9757_v2 = vadd.f32 %v9385_v23, %v12270_v10  ;;  %v12272_v14 = vld [vmem:[#allocation152_spill] sm:$0xff]  ;;  %v12274_v60 = vld [vmem:[#allocation51_spill] sm:$0xff] }
 0x525   : > { %12265 = vst [vmem:[#allocation140_spill] sm:$0xff] %v9745_v61  ;;  %12267 = vst [vmem:[#allocation39_spill] sm:$0xff] %v9749_v1  ;;  %v9761_v36 = vadd.f32 %v9385_v23, %v12272_v14  ;;  %v9765_v25 = vadd.f32 %v9385_v23, %v12274_v60  ;;  %v12276_v61 = vld [vmem:[#allocation53_spill] sm:$0xff]  ;;  %v12278_v1 = vld [vmem:[#allocation52_spill] sm:$0xff] }
 0x526   : > { %12269 = vst [vmem:[#allocation41_spill] sm:$0xff] %v9753_v12  ;;  %12271 = vst [vmem:[#allocation40_spill] sm:$0xff] %v9757_v2  ;;  %v9769_v51 = vadd.f32 %v9385_v23, %v12276_v61  ;;  %v9773_v11 = vadd.f32 %v9385_v23, %v12278_v1  ;;  %v12280_v12 = vld [vmem:[#allocation54_spill] sm:$0xff]  ;;  %v12282_v2 = vld [vmem:[#allocation153_spill] sm:$0xff] }
 0x527   : > { %12273 = vst [vmem:[#allocation42_spill] sm:$0xff] %v9761_v36  ;;  %12275 = vst [vmem:[#allocation141_spill] sm:$0xff] %v9765_v25  ;;  %v9777_v10 = vadd.f32 %v9385_v23, %v12280_v12  ;;  %v9781_v14 = vadd.f32 %v9385_v23, %v12282_v2  ;;  %v12284_v36 = vld [vmem:[#allocation155_spill] sm:$0xff]  ;;  %v12286_v25 = vld [vmem:[#allocation154_spill] sm:$0xff] }
 0x528   : > { %12277 = vst [vmem:[#allocation143_spill] sm:$0xff] %v9769_v51  ;;  %12279 = vst [vmem:[#allocation142_spill] sm:$0xff] %v9773_v11  ;;  %v9785_v60 = vadd.f32 %v9385_v23, %v12284_v36  ;;  %v9789_v61 = vadd.f32 %v9385_v23, %v12286_v25  ;;  %v12288_v51 = vld [vmem:[#allocation156_spill] sm:$0xff]  ;;  %v12290_v11 = vld [vmem:[#allocation55_spill] sm:$0xff] }
 0x529   : > { %12281 = vst [vmem:[#allocation144_spill] sm:$0xff] %v9777_v10  ;;  %12283 = vst [vmem:[#allocation43_spill] sm:$0xff] %v9781_v14  ;;  %v9793_v1 = vadd.f32 %v9385_v23, %v12288_v51  ;;  %v9797_v12 = vadd.f32 %v9385_v23, %v12290_v11  ;;  %v12292_v10 = vld [vmem:[#allocation57_spill] sm:$0xff]  ;;  %v12294_v14 = vld [vmem:[#allocation56_spill] sm:$0xff] }
 0x52a   : > { %12285 = vst [vmem:[#allocation45_spill] sm:$0xff] %v9785_v60  ;;  %12287 = vst [vmem:[#allocation44_spill] sm:$0xff] %v9789_v61  ;;  %v9801_v2 = vadd.f32 %v9385_v23, %v12292_v10  ;;  %v9805_v36 = vadd.f32 %v9385_v23, %v12294_v14  ;;  %v12296_v60 = vld [vmem:[#allocation58_spill] sm:$0xff]  ;;  %v12298_v61 = vld [vmem:[#allocation157_spill] sm:$0xff] }
 0x52b   : > { %12289 = vst [vmem:[#allocation46_spill] sm:$0xff] %v9793_v1  ;;  %12291 = vst [vmem:[#allocation145_spill] sm:$0xff] %v9797_v12  ;;  %v9809_v25 = vadd.f32 %v9385_v23, %v12296_v60  ;;  %v9813_v51 = vadd.f32 %v9385_v23, %v12298_v61  ;;  %v12300_v1 = vld [vmem:[#allocation159_spill] sm:$0xff]  ;;  %v12302_v12 = vld [vmem:[#allocation158_spill] sm:$0xff] }
 0x52c   : > { %12293 = vst [vmem:[#allocation147_spill] sm:$0xff] %v9801_v2  ;;  %12295 = vst [vmem:[#allocation146_spill] sm:$0xff] %v9805_v36  ;;  %v9817_v11 = vadd.f32 %v9385_v23, %v12300_v1  ;;  %v9821_v10 = vadd.f32 %v9385_v23, %v12302_v12  ;;  %v12304_v2 = vld [vmem:[#allocation160_spill] sm:$0xff]  ;;  %v12306_v36 = vld [vmem:[#allocation59_spill] sm:$0xff] }
 0x52d   : > { %12297 = vst [vmem:[#allocation148_spill] sm:$0xff] %v9809_v25  ;;  %12299 = vst [vmem:[#allocation47_spill] sm:$0xff] %v9813_v51  ;;  %v9825_v14 = vadd.f32 %v9385_v23, %v12304_v2  ;;  %v9829_v60 = vadd.f32 %v9385_v23, %v12306_v36  ;;  %v12308_v25 = vld [vmem:[#allocation61_spill] sm:$0xff]  ;;  %v12310_v51 = vld [vmem:[#allocation60_spill] sm:$0xff] }
 0x52e   : > { %12301 = vst [vmem:[#allocation49_spill] sm:$0xff] %v9817_v11  ;;  %12303 = vst [vmem:[#allocation48_spill] sm:$0xff] %v9821_v10  ;;  %v9833_v61 = vadd.f32 %v9385_v23, %v12308_v25  ;;  %v9837_v1 = vadd.f32 %v9385_v23, %v12310_v51  ;;  %v12312_v11 = vld [vmem:[#allocation62_spill] sm:$0xff]  ;;  %v12314_v10 = vld [vmem:[#allocation161_spill] sm:$0xff] }
 0x52f   : > { %12305 = vst [vmem:[#allocation50_spill] sm:$0xff] %v9825_v14  ;;  %12307 = vst [vmem:[#allocation149_spill] sm:$0xff] %v9829_v60  ;;  %v9841_v12 = vadd.f32 %v9385_v23, %v12312_v11  ;;  %v9845_v2 = vadd.f32 %v9385_v23, %v12314_v10  ;;  %v12316_v14 = vld [vmem:[#allocation163_spill] sm:$0xff]  ;;  %v12318_v60 = vld [vmem:[#allocation162_spill] sm:$0xff] }
 0x530   : > { %12309 = vst [vmem:[#allocation151_spill] sm:$0xff] %v9833_v61  ;;  %12311 = vst [vmem:[#allocation150_spill] sm:$0xff] %v9837_v1  ;;  %v9849_v36 = vadd.f32 %v9385_v23, %v12316_v14  ;;  %v9853_v25 = vadd.f32 %v9385_v23, %v12318_v60  ;;  %v12320_v61 = vld [vmem:[#allocation164_spill] sm:$0xff]  ;;  %v12322_v1 = vld [vmem:[#allocation63_spill] sm:$0xff] }
 0x531   : > { %12313 = vst [vmem:[#allocation152_spill] sm:$0xff] %v9841_v12  ;;  %12315 = vst [vmem:[#allocation51_spill] sm:$0xff] %v9845_v2  ;;  %v9857_v51 = vadd.f32 %v9385_v23, %v12320_v61  ;;  %v9861_v11 = vadd.f32 %v9385_v23, %v12322_v1  ;;  %v12324_v12 = vld [vmem:[#allocation65_spill] sm:$0xff]  ;;  %v12326_v2 = vld [vmem:[#allocation64_spill] sm:$0xff] }
 0x532   : > { %12317 = vst [vmem:[#allocation53_spill] sm:$0xff] %v9849_v36  ;;  %12319 = vst [vmem:[#allocation52_spill] sm:$0xff] %v9853_v25  ;;  %v9865_v10 = vadd.f32 %v9385_v23, %v12324_v12  ;;  %v9869_v14 = vadd.f32 %v9385_v23, %v12326_v2  ;;  %v12328_v36 = vld [vmem:[#allocation66_spill] sm:$0xff]  ;;  %v12330_v25 = vld [vmem:[#allocation165_spill] sm:$0xff] }
 0x533   : > { %12321 = vst [vmem:[#allocation54_spill] sm:$0xff] %v9857_v51  ;;  %12323 = vst [vmem:[#allocation153_spill] sm:$0xff] %v9861_v11  ;;  %v9873_v60 = vadd.f32 %v9385_v23, %v12328_v36  ;;  %v9877_v61 = vadd.f32 %v9385_v23, %v12330_v25  ;;  %v12332_v51 = vld [vmem:[#allocation167_spill] sm:$0xff]  ;;  %v12334_v11 = vld [vmem:[#allocation166_spill] sm:$0xff] }
 0x534   : > { %12325 = vst [vmem:[#allocation155_spill] sm:$0xff] %v9865_v10  ;;  %12327 = vst [vmem:[#allocation154_spill] sm:$0xff] %v9869_v14  ;;  %v9881_v1 = vadd.f32 %v9385_v23, %v12332_v51  ;;  %v9885_v12 = vadd.f32 %v9385_v23, %v12334_v11  ;;  %v12336_v10 = vld [vmem:[#allocation168_spill] sm:$0xff]  ;;  %v12338_v14 = vld [vmem:[#allocation67_spill] sm:$0xff] }
 0x535   : > { %12329 = vst [vmem:[#allocation156_spill] sm:$0xff] %v9873_v60  ;;  %12331 = vst [vmem:[#allocation55_spill] sm:$0xff] %v9877_v61  ;;  %v9889_v2 = vadd.f32 %v9385_v23, %v12336_v10  ;;  %v9893_v36 = vadd.f32 %v9385_v23, %v12338_v14  ;;  %v12340_v60 = vld [vmem:[#allocation69_spill] sm:$0xff]  ;;  %v12342_v61 = vld [vmem:[#allocation68_spill] sm:$0xff] }
 0x536   : > { %12333 = vst [vmem:[#allocation57_spill] sm:$0xff] %v9881_v1  ;;  %12335 = vst [vmem:[#allocation56_spill] sm:$0xff] %v9885_v12  ;;  %v9897_v25 = vadd.f32 %v9385_v23, %v12340_v60  ;;  %v9901_v51 = vadd.f32 %v9385_v23, %v12342_v61  ;;  %v12344_v1 = vld [vmem:[#allocation70_spill] sm:$0xff]  ;;  %v12346_v12 = vld [vmem:[#allocation169_spill] sm:$0xff] }
 0x537   : > { %12337 = vst [vmem:[#allocation58_spill] sm:$0xff] %v9889_v2  ;;  %12339 = vst [vmem:[#allocation157_spill] sm:$0xff] %v9893_v36  ;;  %v9905_v11 = vadd.f32 %v9385_v23, %v12344_v1  ;;  %v9909_v10 = vadd.f32 %v9385_v23, %v12346_v12  ;;  %v12348_v2 = vld [vmem:[#allocation171_spill] sm:$0xff]  ;;  %v12350_v36 = vld [vmem:[#allocation170_spill] sm:$0xff] }
 0x538   : > { %12341 = vst [vmem:[#allocation159_spill] sm:$0xff] %v9897_v25  ;;  %12343 = vst [vmem:[#allocation158_spill] sm:$0xff] %v9901_v51  ;;  %v9913_v14 = vadd.f32 %v9385_v23, %v12348_v2  ;;  %v9917_v60 = vadd.f32 %v9385_v23, %v12350_v36  ;;  %v12352_v25 = vld [vmem:[#allocation172_spill] sm:$0xff]  ;;  %v12354_v51 = vld [vmem:[#allocation71_spill] sm:$0xff] }
 0x539   : > { %12345 = vst [vmem:[#allocation160_spill] sm:$0xff] %v9905_v11  ;;  %12347 = vst [vmem:[#allocation59_spill] sm:$0xff] %v9909_v10  ;;  %v9921_v61 = vadd.f32 %v9385_v23, %v12352_v25  ;;  %v9925_v1 = vadd.f32 %v9385_v23, %v12354_v51  ;;  %v12356_v11 = vld [vmem:[#allocation73_spill] sm:$0xff]  ;;  %v12358_v10 = vld [vmem:[#allocation72_spill] sm:$0xff] }
 0x53a   : > { %12349 = vst [vmem:[#allocation61_spill] sm:$0xff] %v9913_v14  ;;  %12351 = vst [vmem:[#allocation60_spill] sm:$0xff] %v9917_v60  ;;  %v9929_v12 = vadd.f32 %v9385_v23, %v12356_v11  ;;  %v9933_v2 = vadd.f32 %v9385_v23, %v12358_v10  ;;  %v12360_v14 = vld [vmem:[#allocation74_spill] sm:$0xff]  ;;  %v12362_v60 = vld [vmem:[#allocation173_spill] sm:$0xff] }
 0x53b   : > { %12353 = vst [vmem:[#allocation62_spill] sm:$0xff] %v9921_v61  ;;  %12355 = vst [vmem:[#allocation161_spill] sm:$0xff] %v9925_v1  ;;  %v9937_v36 = vadd.f32 %v9385_v23, %v12360_v14  ;;  %v9941_v25 = vadd.f32 %v9385_v23, %v12362_v60  ;;  %v12364_v61 = vld [vmem:[#allocation175_spill] sm:$0xff]  ;;  %v12366_v1 = vld [vmem:[#allocation174_spill] sm:$0xff] }
 0x53c   : > { %12357 = vst [vmem:[#allocation163_spill] sm:$0xff] %v9929_v12  ;;  %12359 = vst [vmem:[#allocation162_spill] sm:$0xff] %v9933_v2  ;;  %v9945_v51 = vadd.f32 %v9385_v23, %v12364_v61  ;;  %v9949_v11 = vadd.f32 %v9385_v23, %v12366_v1  ;;  %v12368_v12 = vld [vmem:[#allocation176_spill] sm:$0xff]  ;;  %v12370_v2 = vld [vmem:[#allocation75_spill] sm:$0xff] }
 0x53d   : > { %12361 = vst [vmem:[#allocation164_spill] sm:$0xff] %v9937_v36  ;;  %12363 = vst [vmem:[#allocation63_spill] sm:$0xff] %v9941_v25  ;;  %v9953_v10 = vadd.f32 %v9385_v23, %v12368_v12  ;;  %v9957_v14 = vadd.f32 %v9385_v23, %v12370_v2  ;;  %v12372_v36 = vld [vmem:[#allocation77_spill] sm:$0xff]  ;;  %v12374_v25 = vld [vmem:[#allocation76_spill] sm:$0xff] }
 0x53e   : > { %12365 = vst [vmem:[#allocation65_spill] sm:$0xff] %v9945_v51  ;;  %12367 = vst [vmem:[#allocation64_spill] sm:$0xff] %v9949_v11  ;;  %v9961_v60 = vadd.f32 %v9385_v23, %v12372_v36  ;;  %v9965_v61 = vadd.f32 %v9385_v23, %v12374_v25  ;;  %v12376_v51 = vld [vmem:[#allocation78_spill] sm:$0xff]  ;;  %v12378_v11 = vld [vmem:[#allocation177_spill] sm:$0xff] }
 0x53f   : > { %12369 = vst [vmem:[#allocation66_spill] sm:$0xff] %v9953_v10  ;;  %12371 = vst [vmem:[#allocation165_spill] sm:$0xff] %v9957_v14  ;;  %v9969_v1 = vadd.f32 %v9385_v23, %v12376_v51  ;;  %v9973_v12 = vadd.f32 %v9385_v23, %v12378_v11  ;;  %v12380_v10 = vld [vmem:[#allocation179_spill] sm:$0xff]  ;;  %v12382_v14 = vld [vmem:[#allocation178_spill] sm:$0xff] }
 0x540   : > { %12373 = vst [vmem:[#allocation167_spill] sm:$0xff] %v9961_v60  ;;  %12375 = vst [vmem:[#allocation166_spill] sm:$0xff] %v9965_v61  ;;  %v9977_v2 = vadd.f32 %v9385_v23, %v12380_v10  ;;  %v9981_v36 = vadd.f32 %v9385_v23, %v12382_v14  ;;  %v12384_v60 = vld [vmem:[#allocation180_spill] sm:$0xff]  ;;  %v12386_v61 = vld [vmem:[#allocation79_spill] sm:$0xff] }
 0x541   : > { %12377 = vst [vmem:[#allocation168_spill] sm:$0xff] %v9969_v1  ;;  %12379 = vst [vmem:[#allocation67_spill] sm:$0xff] %v9973_v12  ;;  %v9985_v25 = vadd.f32 %v9385_v23, %v12384_v60  ;;  %v9989_v51 = vadd.f32 %v9385_v23, %v12386_v61  ;;  %v12388_v1 = vld [vmem:[#allocation81_spill] sm:$0xff]  ;;  %v12390_v12 = vld [vmem:[#allocation80_spill] sm:$0xff] }
 0x542   : > { %12381 = vst [vmem:[#allocation69_spill] sm:$0xff] %v9977_v2  ;;  %12383 = vst [vmem:[#allocation68_spill] sm:$0xff] %v9981_v36  ;;  %v9993_v11 = vadd.f32 %v9385_v23, %v12388_v1  ;;  %v9997_v10 = vadd.f32 %v9385_v23, %v12390_v12  ;;  %v12392_v2 = vld [vmem:[#allocation82_spill] sm:$0xff]  ;;  %v12394_v36 = vld [vmem:[#allocation181_spill] sm:$0xff] }
 0x543   : > { %12385 = vst [vmem:[#allocation70_spill] sm:$0xff] %v9985_v25  ;;  %12387 = vst [vmem:[#allocation169_spill] sm:$0xff] %v9989_v51  ;;  %v10001_v14 = vadd.f32 %v9385_v23, %v12392_v2  ;;  %v10005_v60 = vadd.f32 %v9385_v23, %v12394_v36  ;;  %v12396_v25 = vld [vmem:[#allocation183_spill] sm:$0xff]  ;;  %v12398_v51 = vld [vmem:[#allocation182_spill] sm:$0xff] }
 0x544   : > { %12389 = vst [vmem:[#allocation171_spill] sm:$0xff] %v9993_v11  ;;  %12391 = vst [vmem:[#allocation170_spill] sm:$0xff] %v9997_v10  ;;  %v10009_v61 = vadd.f32 %v9385_v23, %v12396_v25  ;;  %v10013_v1 = vadd.f32 %v9385_v23, %v12398_v51  ;;  %v12400_v11 = vld [vmem:[#allocation184_spill] sm:$0xff]  ;;  %v12402_v10 = vld [vmem:[#allocation83_spill] sm:$0xff] }
 0x545   : > { %12393 = vst [vmem:[#allocation172_spill] sm:$0xff] %v10001_v14  ;;  %12395 = vst [vmem:[#allocation71_spill] sm:$0xff] %v10005_v60  ;;  %v10017_v12 = vadd.f32 %v9385_v23, %v12400_v11  ;;  %v10021_v2 = vadd.f32 %v9385_v23, %v12402_v10  ;;  %v12404_v14 = vld [vmem:[#allocation85_spill] sm:$0xff]  ;;  %v12406_v60 = vld [vmem:[#allocation84_spill] sm:$0xff] }
 0x546   : > { %12397 = vst [vmem:[#allocation73_spill] sm:$0xff] %v10009_v61  ;;  %12399 = vst [vmem:[#allocation72_spill] sm:$0xff] %v10013_v1  ;;  %v10025_v36 = vadd.f32 %v9385_v23, %v12404_v14  ;;  %v10029_v25 = vadd.f32 %v9385_v23, %v12406_v60  ;;  %v12408_v61 = vld [vmem:[#allocation86_spill] sm:$0xff]  ;;  %v12410_v1 = vld [vmem:[#allocation185_spill] sm:$0xff] }
 0x547   : > { %12401 = vst [vmem:[#allocation74_spill] sm:$0xff] %v10017_v12  ;;  %12403 = vst [vmem:[#allocation173_spill] sm:$0xff] %v10021_v2  ;;  %v10033_v51 = vadd.f32 %v9385_v23, %v12408_v61  ;;  %v10037_v11 = vadd.f32 %v9385_v23, %v12410_v1  ;;  %v12412_v12 = vld [vmem:[#allocation187_spill] sm:$0xff]  ;;  %v12414_v2 = vld [vmem:[#allocation186_spill] sm:$0xff] }
 0x548   : > { %12405 = vst [vmem:[#allocation175_spill] sm:$0xff] %v10025_v36  ;;  %12407 = vst [vmem:[#allocation174_spill] sm:$0xff] %v10029_v25  ;;  %v10041_v10 = vadd.f32 %v9385_v23, %v12412_v12  ;;  %v10045_v14 = vadd.f32 %v9385_v23, %v12414_v2  ;;  %v12416_v36 = vld [vmem:[#allocation188_spill] sm:$0xff]  ;;  %v12418_v25 = vld [vmem:[#allocation87_spill] sm:$0xff] }
 0x549   : > { %12409 = vst [vmem:[#allocation176_spill] sm:$0xff] %v10033_v51  ;;  %12411 = vst [vmem:[#allocation75_spill] sm:$0xff] %v10037_v11  ;;  %v10049_v60 = vadd.f32 %v9385_v23, %v12416_v36  ;;  %v10053_v61 = vadd.f32 %v9385_v23, %v12418_v25  ;;  %v12420_v51 = vld [vmem:[#allocation89_spill] sm:$0xff]  ;;  %v12422_v11 = vld [vmem:[#allocation88_spill] sm:$0xff] }
 0x54a   : > { %12413 = vst [vmem:[#allocation77_spill] sm:$0xff] %v10041_v10  ;;  %12415 = vst [vmem:[#allocation76_spill] sm:$0xff] %v10045_v14  ;;  %v10057_v1 = vadd.f32 %v9385_v23, %v12420_v51  ;;  %v10061_v12 = vadd.f32 %v9385_v23, %v12422_v11  ;;  %v12424_v10 = vld [vmem:[#allocation90_spill] sm:$0xff]  ;;  %v12426_v14 = vld [vmem:[#allocation189_spill] sm:$0xff] }
 0x54b   : > { %12417 = vst [vmem:[#allocation78_spill] sm:$0xff] %v10049_v60  ;;  %12419 = vst [vmem:[#allocation177_spill] sm:$0xff] %v10053_v61  ;;  %v10065_v2 = vadd.f32 %v9385_v23, %v12424_v10  ;;  %v10069_v36 = vadd.f32 %v9385_v23, %v12426_v14  ;;  %v12428_v60 = vld [vmem:[#allocation191_spill] sm:$0xff]  ;;  %v12430_v61 = vld [vmem:[#allocation190_spill] sm:$0xff] }
 0x54c   : > { %12421 = vst [vmem:[#allocation179_spill] sm:$0xff] %v10057_v1  ;;  %12423 = vst [vmem:[#allocation178_spill] sm:$0xff] %v10061_v12  ;;  %v10073_v25 = vadd.f32 %v9385_v23, %v12428_v60  ;;  %v10077_v51 = vadd.f32 %v9385_v23, %v12430_v61  ;;  %v12432_v1 = vld [vmem:[#allocation192_spill] sm:$0xff]  ;;  %v12434_v12 = vld [vmem:[#allocation91_spill] sm:$0xff] }
 0x54d   : > { %12425 = vst [vmem:[#allocation180_spill] sm:$0xff] %v10065_v2  ;;  %12427 = vst [vmem:[#allocation79_spill] sm:$0xff] %v10069_v36  ;;  %v10081_v11 = vadd.f32 %v9385_v23, %v12432_v1  ;;  %v10085_v10 = vadd.f32 %v9385_v23, %v12434_v12  ;;  %v12436_v2 = vld [vmem:[#allocation93_spill] sm:$0xff]  ;;  %v12438_v36 = vld [vmem:[#allocation92_spill] sm:$0xff] }
 0x54e   : > { %12429 = vst [vmem:[#allocation81_spill] sm:$0xff] %v10073_v25  ;;  %12431 = vst [vmem:[#allocation80_spill] sm:$0xff] %v10077_v51  ;;  %v10089_v14 = vadd.f32 %v9385_v23, %v12436_v2  ;;  %v10093_v60 = vadd.f32 %v9385_v23, %v12438_v36  ;;  %v12440_v25 = vld [vmem:[#allocation94_spill] sm:$0xff]  ;;  %v12442_v51 = vld [vmem:[#allocation193_spill] sm:$0xff] }
 0x54f   : > { %12433 = vst [vmem:[#allocation82_spill] sm:$0xff] %v10081_v11  ;;  %12435 = vst [vmem:[#allocation181_spill] sm:$0xff] %v10085_v10  ;;  %v10097_v61 = vadd.f32 %v9385_v23, %v12440_v25  ;;  %v10101_v1 = vadd.f32 %v9385_v23, %v12442_v51  ;;  %v12444_v11 = vld [vmem:[#allocation195_spill] sm:$0xff]  ;;  %v12446_v10 = vld [vmem:[#allocation194_spill] sm:$0xff] }
 0x550   : > { %12437 = vst [vmem:[#allocation183_spill] sm:$0xff] %v10089_v14  ;;  %12439 = vst [vmem:[#allocation182_spill] sm:$0xff] %v10093_v60  ;;  %v10105_v12 = vadd.f32 %v9385_v23, %v12444_v11  ;;  %v10109_v2 = vadd.f32 %v9385_v23, %v12446_v10  ;;  %v12448_v14 = vld [vmem:[#allocation196_spill] sm:$0xff]  ;;  %v12450_v60 = vld [vmem:[#allocation95_spill] sm:$0xff] }
 0x551   : > { %12441 = vst [vmem:[#allocation184_spill] sm:$0xff] %v10097_v61  ;;  %12443 = vst [vmem:[#allocation83_spill] sm:$0xff] %v10101_v1  ;;  %v10113_v36 = vadd.f32 %v9385_v23, %v12448_v14  ;;  %v10117_v25 = vadd.f32 %v9385_v23, %v12450_v60  ;;  %v12452_v61 = vld [vmem:[#allocation97_spill] sm:$0xff]  ;;  %v12454_v1 = vld [vmem:[#allocation96_spill] sm:$0xff] }
 0x552   : > { %12445 = vst [vmem:[#allocation85_spill] sm:$0xff] %v10105_v12  ;;  %12447 = vst [vmem:[#allocation84_spill] sm:$0xff] %v10109_v2  ;;  %v10121_v51 = vadd.f32 %v9385_v23, %v12452_v61  ;;  %v10125_v11 = vadd.f32 %v9385_v23, %v12454_v1  ;;  %v12456_v12 = vld [vmem:[#allocation98_spill] sm:$0xff]  ;;  %v12458_v2 = vld [vmem:[#allocation197_spill] sm:$0xff] }
 0x553   : > { %12449 = vst [vmem:[#allocation86_spill] sm:$0xff] %v10113_v36  ;;  %12451 = vst [vmem:[#allocation185_spill] sm:$0xff] %v10117_v25  ;;  %v10129_v10 = vadd.f32 %v9385_v23, %v12456_v12  ;;  %v10133_v14 = vadd.f32 %v9385_v23, %v12458_v2  ;;  %v12460_v36 = vld [vmem:[#allocation199_spill] sm:$0xff]  ;;  %v12462_v25 = vld [vmem:[#allocation198_spill] sm:$0xff] }
 0x554   : > { %12453 = vst [vmem:[#allocation187_spill] sm:$0xff] %v10121_v51  ;;  %12455 = vst [vmem:[#allocation186_spill] sm:$0xff] %v10125_v11  ;;  %v10137_v60 = vadd.f32 %v9385_v23, %v12460_v36  ;;  %v10141_v61 = vadd.f32 %v9385_v23, %v12462_v25  ;;  %v12464_v51 = vld [vmem:[#allocation200_spill] sm:$0xff]  ;;  %v12466_v11 = vld [vmem:[#allocation99_spill] sm:$0xff] }
 0x555   : > { %12457 = vst [vmem:[#allocation188_spill] sm:$0xff] %v10129_v10  ;;  %12459 = vst [vmem:[#allocation87_spill] sm:$0xff] %v10133_v14  ;;  %v10145_v1 = vadd.f32 %v9385_v23, %v12464_v51  ;;  %v10149_v12 = vadd.f32 %v9385_v23, %v12466_v11  ;;  %v12468_v10 = vld [vmem:[#allocation101_spill] sm:$0xff]  ;;  %v12470_v14 = vld [vmem:[#allocation100_spill] sm:$0xff] }
 0x556   : > { %12461 = vst [vmem:[#allocation89_spill] sm:$0xff] %v10137_v60  ;;  %12463 = vst [vmem:[#allocation88_spill] sm:$0xff] %v10141_v61  ;;  %v10153_v2 = vadd.f32 %v9385_v23, %v12468_v10  ;;  %v10157_v36 = vadd.f32 %v9385_v23, %v12470_v14  ;;  %v12472_v60 = vld [vmem:[#allocation102_spill] sm:$0xff]  ;;  %v12474_v61 = vld [vmem:[#allocation201_spill] sm:$0xff] }
 0x557   : > { %12465 = vst [vmem:[#allocation90_spill] sm:$0xff] %v10145_v1  ;;  %12467 = vst [vmem:[#allocation189_spill] sm:$0xff] %v10149_v12  ;;  %v10161_v25 = vadd.f32 %v9385_v23, %v12472_v60  ;;  %v10165_v51 = vadd.f32 %v9385_v23, %v12474_v61  ;;  %v12476_v1 = vld [vmem:[#allocation203_spill] sm:$0xff]  ;;  %v12478_v12 = vld [vmem:[#allocation202_spill] sm:$0xff] }
 0x558   : > { %12469 = vst [vmem:[#allocation191_spill] sm:$0xff] %v10153_v2  ;;  %12471 = vst [vmem:[#allocation190_spill] sm:$0xff] %v10157_v36  ;;  %v10169_v11 = vadd.f32 %v9385_v23, %v12476_v1  ;;  %v10173_v10 = vadd.f32 %v9385_v23, %v12478_v12  ;;  %v12480_v2 = vld [vmem:[#allocation204_spill] sm:$0xff]  ;;  %v12482_v36 = vld [vmem:[#allocation103_spill] sm:$0xff] }
 0x559   : > { %12473 = vst [vmem:[#allocation192_spill] sm:$0xff] %v10161_v25  ;;  %12475 = vst [vmem:[#allocation91_spill] sm:$0xff] %v10165_v51  ;;  %v10177_v14 = vadd.f32 %v9385_v23, %v12480_v2  ;;  %v10181_v60 = vadd.f32 %v9385_v23, %v12482_v36  ;;  %v12484_v25 = vld [vmem:[#allocation105_spill] sm:$0xff]  ;;  %v12486_v51 = vld [vmem:[#allocation104_spill] sm:$0xff] }
 0x55a   : > { %12477 = vst [vmem:[#allocation93_spill] sm:$0xff] %v10169_v11  ;;  %12479 = vst [vmem:[#allocation92_spill] sm:$0xff] %v10173_v10  ;;  %v10185_v61 = vadd.f32 %v9385_v23, %v12484_v25  ;;  %v10189_v1 = vadd.f32 %v9385_v23, %v12486_v51  ;;  %v12488_v11 = vld [vmem:[#allocation106_spill] sm:$0xff]  ;;  %v12490_v10 = vld [vmem:[#allocation205_spill] sm:$0xff] }
 0x55b   : > { %12481 = vst [vmem:[#allocation94_spill] sm:$0xff] %v10177_v14  ;;  %12483 = vst [vmem:[#allocation193_spill] sm:$0xff] %v10181_v60  ;;  %v10193_v12 = vadd.f32 %v9385_v23, %v12488_v11  ;;  %v10197_v2 = vadd.f32 %v9385_v23, %v12490_v10  ;;  %v12492_v14 = vld [vmem:[#allocation207_spill] sm:$0xff]  ;;  %v12494_v60 = vld [vmem:[#allocation206_spill] sm:$0xff] }
 0x55c   : > { %12485 = vst [vmem:[#allocation195_spill] sm:$0xff] %v10185_v61  ;;  %12487 = vst [vmem:[#allocation194_spill] sm:$0xff] %v10189_v1  ;;  %v10201_v36 = vadd.f32 %v9385_v23, %v12492_v14  ;;  %v10205_v25 = vadd.f32 %v9385_v23, %v12494_v60  ;;  %v12496_v61 = vld [vmem:[#allocation208_spill] sm:$0xff]  ;;  %v12498_v1 = vld [vmem:[#allocation107_spill] sm:$0xff] }
 0x55d   : > { %12489 = vst [vmem:[#allocation196_spill] sm:$0xff] %v10193_v12  ;;  %12491 = vst [vmem:[#allocation95_spill] sm:$0xff] %v10197_v2  ;;  %v10209_v51 = vadd.f32 %v9385_v23, %v12496_v61  ;;  %v10213_v11 = vadd.f32 %v9385_v23, %v12498_v1  ;;  %v12500_v12 = vld [vmem:[#allocation109_spill] sm:$0xff]  ;;  %v12502_v2 = vld [vmem:[#allocation108_spill] sm:$0xff] }
 0x55e   : > { %12493 = vst [vmem:[#allocation97_spill] sm:$0xff] %v10201_v36  ;;  %12495 = vst [vmem:[#allocation96_spill] sm:$0xff] %v10205_v25  ;;  %v10217_v10 = vadd.f32 %v9385_v23, %v12500_v12  ;;  %v10221_v14 = vadd.f32 %v9385_v23, %v12502_v2  ;;  %v12504_v36 = vld [vmem:[#allocation110_spill] sm:$0xff]  ;;  %v12506_v25 = vld [vmem:[#allocation209_spill] sm:$0xff] }
 0x55f   : > { %12497 = vst [vmem:[#allocation98_spill] sm:$0xff] %v10209_v51  ;;  %12499 = vst [vmem:[#allocation197_spill] sm:$0xff] %v10213_v11  ;;  %v10225_v60 = vadd.f32 %v9385_v23, %v12504_v36  ;;  %v10229_v61 = vadd.f32 %v9385_v23, %v12506_v25  ;;  %v12508_v51 = vld [vmem:[#allocation211_spill] sm:$0xff]  ;;  %v12510_v11 = vld [vmem:[#allocation210_spill] sm:$0xff] }
 0x560   : > { %12501 = vst [vmem:[#allocation199_spill] sm:$0xff] %v10217_v10  ;;  %12503 = vst [vmem:[#allocation198_spill] sm:$0xff] %v10221_v14  ;;  %v10233_v1 = vadd.f32 %v9385_v23, %v12508_v51  ;;  %v10237_v12 = vadd.f32 %v9385_v23, %v12510_v11  ;;  %v12512_v10 = vld [vmem:[#allocation212_spill] sm:$0xff]  ;;  %v12514_v14 = vld [vmem:[#allocation111_spill] sm:$0xff] }
 0x561   : > { %12505 = vst [vmem:[#allocation200_spill] sm:$0xff] %v10225_v60  ;;  %12507 = vst [vmem:[#allocation99_spill] sm:$0xff] %v10229_v61  ;;  %v10241_v2 = vadd.f32 %v9385_v23, %v12512_v10  ;;  %v10245_v36 = vadd.f32 %v9385_v23, %v12514_v14  ;;  %v12516_v60 = vld [vmem:[#allocation113_spill] sm:$0xff]  ;;  %v12518_v61 = vld [vmem:[#allocation112_spill] sm:$0xff]  ;;  %v10261_v10 = vadd.f32 %v9385_v23, %v9361_v56 }
 0x562   : > { %12509 = vst [vmem:[#allocation101_spill] sm:$0xff] %v10233_v1  ;;  %12511 = vst [vmem:[#allocation100_spill] sm:$0xff] %v10237_v12  ;;  %v10249_v25 = vadd.f32 %v9385_v23, %v12516_v60  ;;  %v10253_v51 = vadd.f32 %v9385_v23, %v12518_v61  ;;  %v12520_v1 = vld [vmem:[#allocation114_spill] sm:$0xff]  ;;  %v10269_v60 = vadd.f32 %v9385_v23, %v9369_v31 }
 0x563   : > { %12513 = vst [vmem:[#allocation102_spill] sm:$0xff] %v10241_v2  ;;  %12515 = vst [vmem:[#allocation201_spill] sm:$0xff] %v10245_v36  ;;  %v10257_v11 = vadd.f32 %v9385_v23, %v12520_v1  ;;  %v12521_v2 = vld [vmem:[#allocation213_spill] sm:$0xff]  ;;  %v10281_v56 = vadd.f32 %v9385_v23, %v9382_v50  ;;  %v10289_v31 = vadd.f32 %v9385_v23, %v9393_v3  ;;  %v12702_v3 = vmax.f32 %v9409_v34, 0.0 }
 0x564   : > { %12517 = vst [vmem:[#allocation203_spill] sm:$0xff] %v10249_v25  ;;  %12519 = vst [vmem:[#allocation202_spill] sm:$0xff] %v10253_v51  ;;  %v10265_v14 = vadd.f32 %v9385_v23, %v12521_v2  ;;  %v12523_v25 = vld [vmem:[#allocation215_spill] sm:$0xff]  ;;  %v12524_v51 = vld [vmem:[#allocation214_spill] sm:$0xff]  ;;  %v10285_v2 = vadd.f32 %v9385_v23, %v9389_v16  ;;  %v12707_v50 = vmax.f32 %v9429_v20, 0.0  ;;  %v12710_v34 = vmax.f32 %v9441_v37, 0.0 }
 0x565   : > { %v10273_v61 = vadd.f32 %v9385_v23, %v12523_v25  ;;  %v10277_v1 = vadd.f32 %v9385_v23, %v12524_v51  ;;  %12526 = vst [vmem:[#allocation105_spill] sm:$0xff] %v10281_v56  ;;  %12528 = vst [vmem:[#allocation106_spill] sm:$0xff] %v10289_v31  ;;  %v10293_v25 = vadd.f32 %v9385_v23, %v9397_v30  ;;  %v12682_v42 = vld [vmem:[#allocation196_spill] sm:$0xff]  ;;  %v12697_v12 = vmov %v10281_v56 }
 0x566   : > { %12522 = vst [vmem:[#allocation204_spill] sm:$0xff] %v10265_v14  ;;  %12527 = vst [vmem:[#allocation104_spill] sm:$0xff] %v10285_v2  ;;  %v10297_v51 = vadd.f32 %v9385_v23, %v9401_v59  ;;  %v12687_v13 = vld [vmem:[#allocation197_spill] sm:$0xff]  ;;  %v12699_v36 = vmov %v10289_v31  ;;  %v12701_v2 = vmax.f32 %v9405_v62, 0.0  ;;  %v12703_v31 = vmax.f32 %v9413_v4, 0.0 }
 0x567   : > { %12525 = vst [vmem:[#allocation103_spill] sm:$0xff] %v10277_v1  ;;  %12529 = vst [vmem:[#allocation205_spill] sm:$0xff] %v10293_v25  ;;  %v12684_v1 = vld [vmem:[#allocation97_spill] sm:$0xff]  ;;  %v12688_v9 = vld [vmem:[#allocation199_spill] sm:$0xff]  ;;  %v12700_v5 = vmov %v10293_v25  ;;  %v12704_v30 = vmax.f32 %v9417_v53, 0.0  ;;  %v12705_v59 = vmax.f32 %v9421_v39, 0.0 }
 0x568   : > { %v12689_v55 = vld [vmem:[#allocation198_spill] sm:$0xff]  ;;  %v12690_v7 = vld [vmem:[#allocation200_spill] sm:$0xff]  ;;  %v12691_v24 = vld [vmem:[#allocation99_spill] sm:$0xff]  ;;  %v5644_v14 = vpack.c.bf16 %v12702_v3, %v12701_v2  ;;  %v12706_v23 = vmax.f32 %v9425_v28, 0.0  ;;  %v12708_v56 = vmax.f32 %v9433_v47, 0.0  ;;  %v12709_v62 = vmax.f32 %v9437_v58, 0.0 }
 0x569   : > { %v5645_v25 = vpack.c.bf16 %v12704_v30, %v12703_v31  ;;  %v12711_v4 = vmax.f32 %v9445_v6, 0.0  ;;  %v12712_v53 = vmax.f32 %v9449_v19, 0.0  ;;  %v12713_v39 = vmax.f32 %v9453_v18, 0.0 }
 0x56a   : > { %v5646_v33 = vpack.c.bf16 %v12706_v23, %v12705_v59  ;;  %v5647_v16 = vpack.c.bf16 %v12708_v56, %v12707_v50  ;;  %v5648_v2 = vpack.c.bf16 %v12710_v34, %v12709_v62  ;;  %v12714_v28 = vmax.f32 %v9457_v21, 0.0  ;;  %3933 = vst [vmem:[#allocation2] sm:$0xff] %v5644_v14  ;;  %v12738_v34 = vld [vmem:[#allocation115_spill] sm:$0xff] }
 0x56b   : > { %v12695_v57 = vld [vmem:[#allocation202_spill] sm:$0xff]  ;;  %v5649_v31 = vpack.c.bf16 %v12712_v53, %v12711_v4  ;;  %v12715_v20 = vmax.f32 %v9461_v15, 0.0  ;;  %v12716_v47 = vmax.f32 %v9465_v45, 0.0  ;;  %v12717_v58 = vmax.f32 %v9469_v35, 0.0  ;;  %3934 = vst [vmem:[#allocation2 + $0x8] sm:$0xff] %v5645_v25 }
 0x56c   : > { %v5650_v3 = vpack.c.bf16 %v12714_v28, %v12713_v39  ;;  %v12718_v37 = vmax.f32 %v9473_v54, 0.0  ;;  %v12719_v6 = vmax.f32 %v9477_v22, 0.0  ;;  %v12720_v19 = vmax.f32 %v9481_v27, 0.0  ;;  %3935 = vst [vmem:[#allocation2 + $0x10] sm:$0xff] %v5646_v33  ;;  %3936 = vst [vmem:[#allocation2 + $0x18] sm:$0xff] %v5647_v16  ;;  %v12742_v39 = vld [vmem:[#allocation116_spill] sm:$0xff] }
 0x56d   : > { %v5651_v56 = vpack.c.bf16 %v12716_v47, %v12715_v20  ;;  %v12721_v18 = vmax.f32 %v9485_v26, 0.0  ;;  %v12722_v21 = vmax.f32 %v9489_v32, 0.0  ;;  %v12723_v15 = vmax.f32 %v9493_v29, 0.0  ;;  %3937 = vst [vmem:[#allocation2 + $0x20] sm:$0xff] %v5648_v2  ;;  %3938 = vst [vmem:[#allocation2 + $0x28] sm:$0xff] %v5649_v31  ;;  %v12744_v31 = vld [vmem:[#allocation118_spill] sm:$0xff] }
 0x56e   : > { %v12696_v46 = vld [vmem:[#allocation103_spill] sm:$0xff]  ;;  %v5652_v50 = vpack.c.bf16 %v12718_v37, %v12717_v58  ;;  %v5653_v30 = vpack.c.bf16 %v12720_v19, %v12719_v6  ;;  %v12724_v45 = vmax.f32 %v9497_v38, 0.0  ;;  %v12725_v35 = vmax.f32 %v9501_v48, 0.0  ;;  %3939 = vst [vmem:[#allocation2 + $0x30] sm:$0xff] %v5650_v3  ;;  %v12752_v37 = vld [vmem:[#allocation220_spill] sm:$0xff] }
 0x56f   : > { %v5654_v59 = vpack.c.bf16 %v12722_v21, %v12721_v18  ;;  %v12726_v54 = vmax.f32 %v9505_v0, 0.0  ;;  %v12727_v27 = vmax.f32 %v9509_v40, 0.0  ;;  %v12728_v26 = vmax.f32 %v9513_v44, 0.0  ;;  %3940 = vst [vmem:[#allocation2 + $0x38] sm:$0xff] %v5651_v56  ;;  %v12750_v56 = vld [vmem:[#allocation218_spill] sm:$0xff]  ;;  %v12754_v18 = vld [vmem:[#allocation119_spill] sm:$0xff] }
 0x570   : > { %v5655_v23 = vpack.c.bf16 %v12724_v45, %v12723_v15  ;;  %v12729_v62 = vmax.f32 %v9517_v43, 0.0  ;;  %v12730_v29 = vmax.f32 %v9521_v49, 0.0  ;;  %v12731_v14 = vmax.f32 %v9525_v52, 0.0  ;;  %v12736_v43 = vld [vmem:[#allocation216_spill] sm:$0xff]  ;;  %v12740_v52 = vld [vmem:[#allocation117_spill] sm:$0xff]  ;;  %3941 = vst [vmem:[#allocation2 + $0x40] sm:$0xff] %v5652_v50 }
 0x571   : > { %v5656_v22 = vpack.c.bf16 %v12726_v54, %v12725_v35  ;;  %v5657_v32 = vpack.c.bf16 %v12728_v26, %v12727_v27  ;;  %v12732_v33 = vmax.f32 %v9529_v17, 0.0  ;;  %v12733_v48 = vmax.f32 %v9533_v41, 0.0  ;;  %3942 = vst [vmem:[#allocation2 + $0x48] sm:$0xff] %v5653_v30  ;;  %3943 = vst [vmem:[#allocation2 + $0x50] sm:$0xff] %v5654_v59  ;;  %v12746_v41 = vld [vmem:[#allocation217_spill] sm:$0xff]  ;;  %v12758_v54 = vld [vmem:[#allocation120_spill] sm:$0xff] }
 0x572   : > { %v5658_v38 = vpack.c.bf16 %v12730_v29, %v12729_v62  ;;  %v12734_v0 = vmax.f32 %v9537_v8, 0.0  ;;  %v12735_v44 = vmax.f32 %v9541_v63, 0.0  ;;  %v12737_v16 = vmax.f32 %v12736_v43, 0.0  ;;  %3944 = vst [vmem:[#allocation2 + $0x58] sm:$0xff] %v5655_v23  ;;  %v12748_v63 = vld [vmem:[#allocation219_spill] sm:$0xff]  ;;  %v12756_v15 = vld [vmem:[#allocation121_spill] sm:$0xff] }
 0x573   : > { %v5659_v25 = vpack.c.bf16 %v12732_v33, %v12731_v14  ;;  %v12739_v4 = vmax.f32 %v12738_v34, 0.0  ;;  %v12741_v53 = vmax.f32 %v12740_v52, 0.0  ;;  %v12743_v2 = vmax.f32 %v12742_v39, 0.0  ;;  %v12760_v30 = vld [vmem:[#allocation122_spill] sm:$0xff]  ;;  %3945 = vst [vmem:[#allocation2 + $0x60] sm:$0xff] %v5656_v22  ;;  %3946 = vst [vmem:[#allocation2 + $0x68] sm:$0xff] %v5657_v32 }
 0x574   : > { %v5660_v40 = vpack.c.bf16 %v12734_v0, %v12733_v48  ;;  %v5661_v49 = vpack.c.bf16 %v12737_v16, %v12735_v44  ;;  %v12745_v28 = vmax.f32 %v12744_v31, 0.0  ;;  %v12747_v8 = vmax.f32 %v12746_v41, 0.0  ;;  %3947 = vst [vmem:[#allocation2 + $0x70] sm:$0xff] %v5658_v38  ;;  %v12762_v27 = vld [vmem:[#allocation221_spill] sm:$0xff]  ;;  %v12764_v62 = vld [vmem:[#allocation223_spill] sm:$0xff]  ;;  %v12766_v33 = vld [vmem:[#allocation222_spill] sm:$0xff] }
 0x575   : > { %v5662_v17 = vpack.c.bf16 %v12741_v53, %v12739_v4  ;;  %v12749_v20 = vmax.f32 %v12748_v63, 0.0  ;;  %v12751_v58 = vmax.f32 %v12750_v56, 0.0  ;;  %v12753_v6 = vmax.f32 %v12752_v37, 0.0  ;;  %3948 = vst [vmem:[#allocation2 + $0x78] sm:$0xff] %v5659_v25  ;;  %v12768_v0 = vld [vmem:[#allocation224_spill] sm:$0xff]  ;;  %v12770_v16 = vld [vmem:[#allocation123_spill] sm:$0xff] }
 0x576   : > { %v5663_v3 = vpack.c.bf16 %v12745_v28, %v12743_v2  ;;  %v12755_v21 = vmax.f32 %v12754_v18, 0.0  ;;  %v12757_v45 = vmax.f32 %v12756_v15, 0.0  ;;  %v12759_v50 = vmax.f32 %v12758_v54, 0.0  ;;  %v12772_v4 = vld [vmem:[#allocation125_spill] sm:$0xff]  ;;  %v12774_v39 = vld [vmem:[#allocation124_spill] sm:$0xff]  ;;  %v12776_v32 = vld [vmem:[#allocation126_spill] sm:$0xff] }
 0x577   : > { %v5664_v47 = vpack.c.bf16 %v12749_v20, %v12747_v8  ;;  %v5665_v19 = vpack.c.bf16 %v12753_v6, %v12751_v58  ;;  %v12761_v59 = vmax.f32 %v12760_v30, 0.0  ;;  %v12763_v26 = vmax.f32 %v12762_v27, 0.0  ;;  %3949 = vst [vmem:[#allocation2 + $0x80] sm:$0xff] %v5660_v40  ;;  %3950 = vst [vmem:[#allocation2 + $0x88] sm:$0xff] %v5661_v49  ;;  %v12778_v2 = vld [vmem:[#allocation225_spill] sm:$0xff]  ;;  %v12780_v28 = vld [vmem:[#allocation227_spill] sm:$0xff] }
 0x578   : > { %v5666_v35 = vpack.c.bf16 %v12757_v45, %v12755_v21  ;;  %v12765_v29 = vmax.f32 %v12764_v62, 0.0  ;;  %v12767_v48 = vmax.f32 %v12766_v33, 0.0  ;;  %v12769_v44 = vmax.f32 %v12768_v0, 0.0  ;;  %3951 = vst [vmem:[#allocation2 + $0x90] sm:$0xff] %v5662_v17  ;;  %3952 = vst [vmem:[#allocation2 + $0x98] sm:$0xff] %v5663_v3  ;;  %v12782_v63 = vld [vmem:[#allocation226_spill] sm:$0xff] }
 0x579   : > { %v5667_v23 = vpack.c.bf16 %v12761_v59, %v12759_v50  ;;  %v12771_v34 = vmax.f32 %v12770_v16, 0.0  ;;  %v12773_v52 = vmax.f32 %v12772_v4, 0.0  ;;  %v12775_v22 = vmax.f32 %v12774_v39, 0.0  ;;  %v12784_v56 = vld [vmem:[#allocation228_spill] sm:$0xff]  ;;  %v12786_v6 = vld [vmem:[#allocation127_spill] sm:$0xff]  ;;  %v12788_v21 = vld [vmem:[#allocation129_spill] sm:$0xff] }
 0x57a   : > { %v5668_v14 = vpack.c.bf16 %v12765_v29, %v12763_v26  ;;  %v5669_v43 = vpack.c.bf16 %v12769_v44, %v12767_v48  ;;  %v12777_v38 = vmax.f32 %v12776_v32, 0.0  ;;  %v12779_v31 = vmax.f32 %v12778_v2, 0.0  ;;  %v12790_v54 = vld [vmem:[#allocation128_spill] sm:$0xff]  ;;  %v12792_v49 = vld [vmem:[#allocation130_spill] sm:$0xff]  ;;  %3953 = vst [vmem:[#allocation2 + $0xa0] sm:$0xff] %v5664_v47  ;;  %3954 = vst [vmem:[#allocation2 + $0xa8] sm:$0xff] %v5665_v19 }
 0x57b   : > { %v5670_v53 = vpack.c.bf16 %v12773_v52, %v12771_v34  ;;  %v12781_v41 = vmax.f32 %v12780_v28, 0.0  ;;  %v12783_v20 = vmax.f32 %v12782_v63, 0.0  ;;  %v12785_v58 = vmax.f32 %v12784_v56, 0.0  ;;  %3955 = vst [vmem:[#allocation2 + $0xb0] sm:$0xff] %v5666_v35  ;;  %3956 = vst [vmem:[#allocation2 + $0xb8] sm:$0xff] %v5667_v23  ;;  %v12794_v50 = vld [vmem:[#allocation229_spill] sm:$0xff] }
 0x57c   : > { %v5671_v25 = vpack.c.bf16 %v12777_v38, %v12775_v22  ;;  %v12787_v18 = vmax.f32 %v12786_v6, 0.0  ;;  %v12789_v15 = vmax.f32 %v12788_v21, 0.0  ;;  %v12791_v40 = vmax.f32 %v12790_v54, 0.0  ;;  %v12796_v59 = vld [vmem:[#allocation231_spill] sm:$0xff]  ;;  %v12798_v62 = vld [vmem:[#allocation230_spill] sm:$0xff]  ;;  %v12800_v33 = vld [vmem:[#allocation232_spill] sm:$0xff] }
 0x57d   : > { %v5672_v8 = vpack.c.bf16 %v12781_v41, %v12779_v31  ;;  %v5673_v37 = vpack.c.bf16 %v12785_v58, %v12783_v20  ;;  %v12793_v17 = vmax.f32 %v12792_v49, 0.0  ;;  %v12795_v30 = vmax.f32 %v12794_v50, 0.0  ;;  %v12802_v44 = vld [vmem:[#allocation131_spill] sm:$0xff]  ;;  %v12804_v34 = vld [vmem:[#allocation132_spill] sm:$0xff]  ;;  %v12808_v19 = vld [vmem:[#allocation33_spill] sm:$0xff]  ;;  %3957 = vst [vmem:[#allocation2 + $0xc0] sm:$0xff] %v5668_v14 }
 0x57e   : > { %v5674_v45 = vpack.c.bf16 %v12789_v15, %v12787_v18  ;;  %v12797_v27 = vmax.f32 %v12796_v59, 0.0  ;;  %v12799_v29 = vmax.f32 %v12798_v62, 0.0  ;;  %v12801_v48 = vmax.f32 %v12800_v33, 0.0  ;;  %v12806_v39 = vld [vmem:[#allocation31_spill] sm:$0xff]  ;;  %3958 = vst [vmem:[#allocation2 + $0xc8] sm:$0xff] %v5669_v43  ;;  %3959 = vst [vmem:[#allocation2 + $0xd0] sm:$0xff] %v5670_v53 }
 0x57f   : > { %v5675_v3 = vpack.c.bf16 %v12793_v17, %v12791_v40  ;;  %v12803_v16 = vmax.f32 %v12802_v44, 0.0  ;;  %v12805_v4 = vmax.f32 %v12804_v34, 0.0  ;;  %v12807_v47 = vmax.f32 %v12806_v39, 0.0  ;;  %3960 = vst [vmem:[#allocation2 + $0xd8] sm:$0xff] %v5671_v25  ;;  %v12810_v22 = vld [vmem:[#allocation32_spill] sm:$0xff]  ;;  %v12812_v38 = vld [vmem:[#allocation34_spill] sm:$0xff] }
 0x580   : > { %v5676_v26 = vpack.c.bf16 %v12797_v27, %v12795_v30  ;;  %v5677_v0 = vpack.c.bf16 %v12801_v48, %v12799_v29  ;;  %v12809_v35 = vmax.f32 %v12808_v19, 0.0  ;;  %v12811_v32 = vmax.f32 %v12810_v22, 0.0  ;;  %v12814_v28 = vld [vmem:[#allocation133_spill] sm:$0xff]  ;;  %v12816_v63 = vld [vmem:[#allocation135_spill] sm:$0xff]  ;;  %v12818_v58 = vld [vmem:[#allocation134_spill] sm:$0xff]  ;;  %3961 = vst [vmem:[#allocation2 + $0xe0] sm:$0xff] %v5672_v8 }
 0x581   : > { %v5678_v52 = vpack.c.bf16 %v12805_v4, %v12803_v16  ;;  %v12813_v2 = vmax.f32 %v12812_v38, 0.0  ;;  %v12815_v41 = vmax.f32 %v12814_v28, 0.0  ;;  %v12817_v20 = vmax.f32 %v12816_v63, 0.0  ;;  %v12820_v18 = vld [vmem:[#allocation136_spill] sm:$0xff]  ;;  %v12822_v54 = vld [vmem:[#allocation35_spill] sm:$0xff]  ;;  %v12824_v43 = vld [vmem:[#allocation37_spill] sm:$0xff] }
 0x582   : > { %v5679_v23 = vpack.c.bf16 %v12809_v35, %v12807_v47  ;;  %v12819_v6 = vmax.f32 %v12818_v58, 0.0  ;;  %v12821_v21 = vmax.f32 %v12820_v18, 0.0  ;;  %v12823_v14 = vmax.f32 %v12822_v54, 0.0  ;;  %3962 = vst [vmem:[#allocation2 + $0xe8] sm:$0xff] %v5673_v37  ;;  %3963 = vst [vmem:[#allocation2 + $0xf0] sm:$0xff] %v5674_v45  ;;  %v12826_v40 = vld [vmem:[#allocation36_spill] sm:$0xff] }
 0x583   : > { %v5680_v31 = vpack.c.bf16 %v12813_v2, %v12811_v32  ;;  %v5681_v56 = vpack.c.bf16 %v12817_v20, %v12815_v41  ;;  %v12825_v53 = vmax.f32 %v12824_v43, 0.0  ;;  %3964 = vst [vmem:[#allocation2 + $0xf8] sm:$0xff] %v5675_v3  ;;  %v12827_v49 = vmax.f32 %v12826_v40, 0.0  ;;  %v12828_v17 = vld [vmem:[#allocation38_spill] sm:$0xff]  ;;  %v12830_v59 = vld [vmem:[#allocation137_spill] sm:$0xff]  ;;  %v12832_v62 = vld [vmem:[#allocation139_spill] sm:$0xff] }
 0x584   : > { %v5682_v15 = vpack.c.bf16 %v12821_v21, %v12819_v6  ;;  %v12829_v50 = vmax.f32 %v12828_v17, 0.0  ;;  %v12831_v27 = vmax.f32 %v12830_v59, 0.0  ;;  %v12833_v29 = vmax.f32 %v12832_v62, 0.0  ;;  %v12834_v48 = vld [vmem:[#allocation138_spill] sm:$0xff]  ;;  %v12836_v16 = vld [vmem:[#allocation140_spill] sm:$0xff]  ;;  %v12838_v39 = vld [vmem:[#allocation39_spill] sm:$0xff] }
 0x585   : > { %v5683_v25 = vpack.c.bf16 %v12825_v53, %v12823_v14  ;;  %v12835_v44 = vmax.f32 %v12834_v48, 0.0  ;;  %v12837_v34 = vmax.f32 %v12836_v16, 0.0  ;;  %v12839_v8 = vmax.f32 %v12838_v39, 0.0  ;;  %v12840_v37 = vld [vmem:[#allocation41_spill] sm:$0xff]  ;;  %3965 = vst [vmem:[#allocation2 + $0x100] sm:$0xff] %v5676_v26  ;;  %3966 = vst [vmem:[#allocation2 + $0x108] sm:$0xff] %v5677_v0 }
 0x586   : > { %v5684_v30 = vpack.c.bf16 %v12829_v50, %v12827_v49  ;;  %v5685_v33 = vpack.c.bf16 %v12833_v29, %v12831_v27  ;;  %v12841_v45 = vmax.f32 %v12840_v37, 0.0  ;;  %3967 = vst [vmem:[#allocation2 + $0x110] sm:$0xff] %v5678_v52  ;;  %3968 = vst [vmem:[#allocation2 + $0x118] sm:$0xff] %v5679_v23  ;;  %v12842_v47 = vld [vmem:[#allocation40_spill] sm:$0xff]  ;;  %v12844_v35 = vld [vmem:[#allocation42_spill] sm:$0xff] }
 0x587   : > { %v5686_v4 = vpack.c.bf16 %v12837_v34, %v12835_v44  ;;  %v12843_v19 = vmax.f32 %v12842_v47, 0.0  ;;  %v12845_v22 = vmax.f32 %v12844_v35, 0.0  ;;  %v12846_v38 = vld [vmem:[#allocation141_spill] sm:$0xff]  ;;  %v12848_v28 = vld [vmem:[#allocation143_spill] sm:$0xff]  ;;  %v12850_v20 = vld [vmem:[#allocation142_spill] sm:$0xff]  ;;  %3969 = vst [vmem:[#allocation2 + $0x120] sm:$0xff] %v5680_v31 }
 0x588   : > { %v5687_v3 = vpack.c.bf16 %v12841_v45, %v12839_v8  ;;  %v12847_v2 = vmax.f32 %v12846_v38, 0.0  ;;  %v12849_v41 = vmax.f32 %v12848_v28, 0.0  ;;  %v12851_v58 = vmax.f32 %v12850_v20, 0.0  ;;  %v12852_v6 = vld [vmem:[#allocation144_spill] sm:$0xff]  ;;  %v12854_v54 = vld [vmem:[#allocation43_spill] sm:$0xff]  ;;  %v12856_v0 = vld [vmem:[#allocation45_spill] sm:$0xff] }
 0x589   : > { %v5688_v32 = vpack.c.bf16 %v12845_v22, %v12843_v19  ;;  %v12853_v18 = vmax.f32 %v12852_v6, 0.0  ;;  %v12855_v26 = vmax.f32 %v12854_v54, 0.0  ;;  %v12857_v52 = vmax.f32 %v12856_v0, 0.0  ;;  %3970 = vst [vmem:[#allocation2 + $0x128] sm:$0xff] %v5681_v56  ;;  %3971 = vst [vmem:[#allocation2 + $0x130] sm:$0xff] %v5682_v15  ;;  %v12858_v14 = vld [vmem:[#allocation44_spill] sm:$0xff] }
 0x58a   : > { %v5689_v63 = vpack.c.bf16 %v12849_v41, %v12847_v2  ;;  %3972 = vst [vmem:[#allocation2 + $0x138] sm:$0xff] %v5683_v25  ;;  %v12859_v43 = vmax.f32 %v12858_v14, 0.0  ;;  %v12860_v53 = vld [vmem:[#allocation46_spill] sm:$0xff]  ;;  %v12862_v17 = vld [vmem:[#allocation145_spill] sm:$0xff]  ;;  %v12864_v59 = vld [vmem:[#allocation147_spill] sm:$0xff] }
 0x58b   : > { %v5690_v21 = vpack.c.bf16 %v12853_v18, %v12851_v58  ;;  %v5691_v23 = vpack.c.bf16 %v12857_v52, %v12855_v26  ;;  %v12861_v40 = vmax.f32 %v12860_v53, 0.0  ;;  %v12863_v50 = vmax.f32 %v12862_v17, 0.0  ;;  %v12866_v29 = vld [vmem:[#allocation146_spill] sm:$0xff]  ;;  %v12868_v44 = vld [vmem:[#allocation148_spill] sm:$0xff]  ;;  %v12870_v39 = vld [vmem:[#allocation47_spill] sm:$0xff]  ;;  %3973 = vst [vmem:[#allocation2 + $0x140] sm:$0xff] %v5684_v30 }
 0x58c   : > { %v12865_v27 = vmax.f32 %v12864_v59, 0.0  ;;  %v12867_v48 = vmax.f32 %v12866_v29, 0.0  ;;  %v12869_v16 = vmax.f32 %v12868_v44, 0.0  ;;  %v12871_v31 = vmax.f32 %v12870_v39, 0.0  ;;  %v12872_v56 = vld [vmem:[#allocation49_spill] sm:$0xff]  ;;  %3974 = vst [vmem:[#allocation2 + $0x148] sm:$0xff] %v5685_v33 }
 0x58d   : > { %v5692_v49 = vpack.c.bf16 %v12861_v40, %v12859_v43  ;;  %v12873_v15 = vmax.f32 %v12872_v56, 0.0  ;;  %3975 = vst [vmem:[#allocation2 + $0x150] sm:$0xff] %v5686_v4  ;;  %3976 = vst [vmem:[#allocation2 + $0x158] sm:$0xff] %v5687_v3  ;;  %v12874_v8 = vld [vmem:[#allocation48_spill] sm:$0xff]  ;;  %v12876_v45 = vld [vmem:[#allocation50_spill] sm:$0xff] }
 0x58e   : > { %v5693_v62 = vpack.c.bf16 %v12865_v27, %v12863_v50  ;;  %v5694_v34 = vpack.c.bf16 %v12869_v16, %v12867_v48  ;;  %v12875_v37 = vmax.f32 %v12874_v8, 0.0  ;;  %v12877_v47 = vmax.f32 %v12876_v45, 0.0  ;;  %v12878_v35 = vld [vmem:[#allocation149_spill] sm:$0xff]  ;;  %v12880_v38 = vld [vmem:[#allocation151_spill] sm:$0xff]  ;;  %v12882_v41 = vld [vmem:[#allocation150_spill] sm:$0xff]  ;;  %3977 = vst [vmem:[#allocation2 + $0x160] sm:$0xff] %v5688_v32 }
 0x58f   : > { %v5695_v25 = vpack.c.bf16 %v12873_v15, %v12871_v31  ;;  %v12879_v22 = vmax.f32 %v12878_v35, 0.0  ;;  %v12881_v2 = vmax.f32 %v12880_v38, 0.0  ;;  %v12883_v20 = vmax.f32 %v12882_v41, 0.0  ;;  %v12884_v58 = vld [vmem:[#allocation152_spill] sm:$0xff]  ;;  %v12886_v54 = vld [vmem:[#allocation51_spill] sm:$0xff]  ;;  %v12888_v33 = vld [vmem:[#allocation53_spill] sm:$0xff] }
 0x590   : > { %v5696_v19 = vpack.c.bf16 %v12877_v47, %v12875_v37  ;;  %v12885_v6 = vmax.f32 %v12884_v58, 0.0  ;;  %v12887_v30 = vmax.f32 %v12886_v54, 0.0  ;;  %v12889_v4 = vmax.f32 %v12888_v33, 0.0  ;;  %3978 = vst [vmem:[#allocation2 + $0x168] sm:$0xff] %v5689_v63  ;;  %3979 = vst [vmem:[#allocation2 + $0x170] sm:$0xff] %v5690_v21  ;;  %v12890_v26 = vld [vmem:[#allocation52_spill] sm:$0xff] }
 0x591   : > { %v5697_v28 = vpack.c.bf16 %v12881_v2, %v12879_v22  ;;  %3980 = vst [vmem:[#allocation2 + $0x178] sm:$0xff] %v5691_v23  ;;  %v12891_v0 = vmax.f32 %v12890_v26, 0.0  ;;  %v12892_v52 = vld [vmem:[#allocation54_spill] sm:$0xff]  ;;  %v12894_v53 = vld [vmem:[#allocation153_spill] sm:$0xff]  ;;  %v12896_v17 = vld [vmem:[#allocation155_spill] sm:$0xff] }
 0x592   : > { %v5698_v18 = vpack.c.bf16 %v12885_v6, %v12883_v20  ;;  %v5699_v3 = vpack.c.bf16 %v12889_v4, %v12887_v30  ;;  %v12893_v14 = vmax.f32 %v12892_v52, 0.0  ;;  %v12895_v40 = vmax.f32 %v12894_v53, 0.0  ;;  %v12898_v27 = vld [vmem:[#allocation154_spill] sm:$0xff]  ;;  %v12900_v48 = vld [vmem:[#allocation156_spill] sm:$0xff]  ;;  %v12902_v39 = vld [vmem:[#allocation55_spill] sm:$0xff]  ;;  %3981 = vst [vmem:[#allocation2 + $0x180] sm:$0xff] %v5692_v49 }
 0x593   : > { %v12897_v50 = vmax.f32 %v12896_v17, 0.0  ;;  %v12899_v29 = vmax.f32 %v12898_v27, 0.0  ;;  %v12901_v44 = vmax.f32 %v12900_v48, 0.0  ;;  %v12903_v32 = vmax.f32 %v12902_v39, 0.0  ;;  %v12904_v63 = vld [vmem:[#allocation57_spill] sm:$0xff]  ;;  %3982 = vst [vmem:[#allocation2 + $0x188] sm:$0xff] %v5693_v62 }
 0x594   : > { %v5700_v43 = vpack.c.bf16 %v12893_v14, %v12891_v0  ;;  %v12905_v21 = vmax.f32 %v12904_v63, 0.0  ;;  %3983 = vst [vmem:[#allocation2 + $0x190] sm:$0xff] %v5694_v34  ;;  %3984 = vst [vmem:[#allocation2 + $0x198] sm:$0xff] %v5695_v25  ;;  %v12906_v31 = vld [vmem:[#allocation56_spill] sm:$0xff]  ;;  %v12908_v15 = vld [vmem:[#allocation58_spill] sm:$0xff] }
 0x595   : > { %v5701_v59 = vpack.c.bf16 %v12897_v50, %v12895_v40  ;;  %v5702_v16 = vpack.c.bf16 %v12901_v44, %v12899_v29  ;;  %v12907_v56 = vmax.f32 %v12906_v31, 0.0  ;;  %v12909_v8 = vmax.f32 %v12908_v15, 0.0  ;;  %v12910_v45 = vld [vmem:[#allocation157_spill] sm:$0xff]  ;;  %v12912_v35 = vld [vmem:[#allocation159_spill] sm:$0xff]  ;;  %v12914_v2 = vld [vmem:[#allocation158_spill] sm:$0xff]  ;;  %3985 = vst [vmem:[#allocation2 + $0x1a0] sm:$0xff] %v5696_v19 }
 0x596   : > { %v5703_v23 = vpack.c.bf16 %v12905_v21, %v12903_v32  ;;  %v12911_v47 = vmax.f32 %v12910_v45, 0.0  ;;  %v12913_v22 = vmax.f32 %v12912_v35, 0.0  ;;  %v12915_v41 = vmax.f32 %v12914_v2, 0.0  ;;  %v12916_v20 = vld [vmem:[#allocation160_spill] sm:$0xff]  ;;  %v12918_v54 = vld [vmem:[#allocation59_spill] sm:$0xff]  ;;  %v12920_v62 = vld [vmem:[#allocation61_spill] sm:$0xff] }
 0x597   : > { %v5704_v37 = vpack.c.bf16 %v12909_v8, %v12907_v56  ;;  %v12917_v58 = vmax.f32 %v12916_v20, 0.0  ;;  %v12919_v49 = vmax.f32 %v12918_v54, 0.0  ;;  %v12921_v34 = vmax.f32 %v12920_v62, 0.0  ;;  %3986 = vst [vmem:[#allocation2 + $0x1a8] sm:$0xff] %v5697_v28  ;;  %3987 = vst [vmem:[#allocation2 + $0x1b0] sm:$0xff] %v5698_v18  ;;  %v12922_v30 = vld [vmem:[#allocation60_spill] sm:$0xff] }
 0x598   : > { %v5705_v38 = vpack.c.bf16 %v12913_v22, %v12911_v47  ;;  %3988 = vst [vmem:[#allocation2 + $0x1b8] sm:$0xff] %v5699_v3  ;;  %v12923_v33 = vmax.f32 %v12922_v30, 0.0  ;;  %v12924_v4 = vld [vmem:[#allocation62_spill] sm:$0xff]  ;;  %v12926_v52 = vld [vmem:[#allocation161_spill] sm:$0xff]  ;;  %v12928_v53 = vld [vmem:[#allocation163_spill] sm:$0xff] }
 0x599   : > { %v5706_v6 = vpack.c.bf16 %v12917_v58, %v12915_v41  ;;  %v5707_v25 = vpack.c.bf16 %v12921_v34, %v12919_v49  ;;  %v12925_v26 = vmax.f32 %v12924_v4, 0.0  ;;  %v12927_v14 = vmax.f32 %v12926_v52, 0.0  ;;  %v12930_v50 = vld [vmem:[#allocation162_spill] sm:$0xff]  ;;  %v12932_v29 = vld [vmem:[#allocation164_spill] sm:$0xff]  ;;  %v12934_v39 = vld [vmem:[#allocation63_spill] sm:$0xff]  ;;  %3989 = vst [vmem:[#allocation2 + $0x1c0] sm:$0xff] %v5700_v43 }
 0x59a   : > { %v12929_v40 = vmax.f32 %v12928_v53, 0.0  ;;  %v12931_v27 = vmax.f32 %v12930_v50, 0.0  ;;  %v12933_v48 = vmax.f32 %v12932_v29, 0.0  ;;  %v12935_v19 = vmax.f32 %v12934_v39, 0.0  ;;  %v12936_v28 = vld [vmem:[#allocation65_spill] sm:$0xff]  ;;  %3990 = vst [vmem:[#allocation2 + $0x1c8] sm:$0xff] %v5701_v59 }
 0x59b   : > { %v5708_v0 = vpack.c.bf16 %v12925_v26, %v12923_v33  ;;  %v12937_v18 = vmax.f32 %v12936_v28, 0.0  ;;  %3991 = vst [vmem:[#allocation2 + $0x1d0] sm:$0xff] %v5702_v16  ;;  %3992 = vst [vmem:[#allocation2 + $0x1d8] sm:$0xff] %v5703_v23  ;;  %v12938_v32 = vld [vmem:[#allocation64_spill] sm:$0xff]  ;;  %v12940_v21 = vld [vmem:[#allocation66_spill] sm:$0xff] }
 0x59c   : > { %v5709_v17 = vpack.c.bf16 %v12929_v40, %v12927_v14  ;;  %v5710_v44 = vpack.c.bf16 %v12933_v48, %v12931_v27  ;;  %v12939_v63 = vmax.f32 %v12938_v32, 0.0  ;;  %v12941_v31 = vmax.f32 %v12940_v21, 0.0  ;;  %v12942_v15 = vld [vmem:[#allocation165_spill] sm:$0xff]  ;;  %v12944_v45 = vld [vmem:[#allocation167_spill] sm:$0xff]  ;;  %v12946_v22 = vld [vmem:[#allocation166_spill] sm:$0xff]  ;;  %3993 = vst [vmem:[#allocation2 + $0x1e0] sm:$0xff] %v5704_v37 }
 0x59d   : > { %v5711_v3 = vpack.c.bf16 %v12937_v18, %v12935_v19  ;;  %v12943_v8 = vmax.f32 %v12942_v15, 0.0  ;;  %v12945_v47 = vmax.f32 %v12944_v45, 0.0  ;;  %v12947_v2 = vmax.f32 %v12946_v22, 0.0  ;;  %v12948_v41 = vld [vmem:[#allocation168_spill] sm:$0xff]  ;;  %v12950_v54 = vld [vmem:[#allocation67_spill] sm:$0xff]  ;;  %v12952_v59 = vld [vmem:[#allocation69_spill] sm:$0xff] }
 0x59e   : > { %v5712_v56 = vpack.c.bf16 %v12941_v31, %v12939_v63  ;;  %v12949_v20 = vmax.f32 %v12948_v41, 0.0  ;;  %v12951_v43 = vmax.f32 %v12950_v54, 0.0  ;;  %v12953_v16 = vmax.f32 %v12952_v59, 0.0  ;;  %3994 = vst [vmem:[#allocation2 + $0x1e8] sm:$0xff] %v5705_v38  ;;  %3995 = vst [vmem:[#allocation2 + $0x1f0] sm:$0xff] %v5706_v6  ;;  %v12954_v49 = vld [vmem:[#allocation68_spill] sm:$0xff] }
 0x59f   : > { %v5713_v35 = vpack.c.bf16 %v12945_v47, %v12943_v8  ;;  %3996 = vst [vmem:[#allocation2 + $0x1f8] sm:$0xff] %v5707_v25  ;;  %v12955_v62 = vmax.f32 %v12954_v49, 0.0  ;;  %v12956_v34 = vld [vmem:[#allocation70_spill] sm:$0xff]  ;;  %v12958_v4 = vld [vmem:[#allocation169_spill] sm:$0xff]  ;;  %v12960_v52 = vld [vmem:[#allocation171_spill] sm:$0xff] }
 0x5a0   : > { %v5714_v58 = vpack.c.bf16 %v12949_v20, %v12947_v2  ;;  %v5715_v23 = vpack.c.bf16 %v12953_v16, %v12951_v43  ;;  %v12957_v30 = vmax.f32 %v12956_v34, 0.0  ;;  %v12959_v26 = vmax.f32 %v12958_v4, 0.0  ;;  %v12962_v40 = vld [vmem:[#allocation170_spill] sm:$0xff]  ;;  %v12964_v27 = vld [vmem:[#allocation172_spill] sm:$0xff]  ;;  %v12966_v39 = vld [vmem:[#allocation71_spill] sm:$0xff]  ;;  %3997 = vst [vmem:[#allocation2 + $0x200] sm:$0xff] %v5708_v0 }
 0x5a1   : > { %v12961_v14 = vmax.f32 %v12960_v52, 0.0  ;;  %v12963_v50 = vmax.f32 %v12962_v40, 0.0  ;;  %v12965_v29 = vmax.f32 %v12964_v27, 0.0  ;;  %v12967_v37 = vmax.f32 %v12966_v39, 0.0  ;;  %v12968_v38 = vld [vmem:[#allocation73_spill] sm:$0xff]  ;;  %3998 = vst [vmem:[#allocation2 + $0x208] sm:$0xff] %v5709_v17 }
 0x5a2   : > { %v5716_v33 = vpack.c.bf16 %v12957_v30, %v12955_v62  ;;  %v12969_v6 = vmax.f32 %v12968_v38, 0.0  ;;  %3999 = vst [vmem:[#allocation2 + $0x210] sm:$0xff] %v5710_v44  ;;  %4000 = vst [vmem:[#allocation2 + $0x218] sm:$0xff] %v5711_v3  ;;  %v12970_v19 = vld [vmem:[#allocation72_spill] sm:$0xff]  ;;  %v12972_v18 = vld [vmem:[#allocation74_spill] sm:$0xff] }
 0x5a3   : > { %v5717_v53 = vpack.c.bf16 %v12961_v14, %v12959_v26  ;;  %v5718_v48 = vpack.c.bf16 %v12965_v29, %v12963_v50  ;;  %v12971_v28 = vmax.f32 %v12970_v19, 0.0  ;;  %v12973_v32 = vmax.f32 %v12972_v18, 0.0  ;;  %v12974_v21 = vld [vmem:[#allocation173_spill] sm:$0xff]  ;;  %v12976_v15 = vld [vmem:[#allocation175_spill] sm:$0xff]  ;;  %v12978_v47 = vld [vmem:[#allocation174_spill] sm:$0xff]  ;;  %4001 = vst [vmem:[#allocation2 + $0x220] sm:$0xff] %v5712_v56 }
 0x5a4   : > { %v5719_v25 = vpack.c.bf16 %v12969_v6, %v12967_v37  ;;  %v12975_v31 = vmax.f32 %v12974_v21, 0.0  ;;  %v12977_v8 = vmax.f32 %v12976_v15, 0.0  ;;  %v12979_v22 = vmax.f32 %v12978_v47, 0.0  ;;  %v12980_v2 = vld [vmem:[#allocation176_spill] sm:$0xff]  ;;  %v12982_v54 = vld [vmem:[#allocation75_spill] sm:$0xff]  ;;  %v12984_v17 = vld [vmem:[#allocation77_spill] sm:$0xff] }
 0x5a5   : > { %v5720_v63 = vpack.c.bf16 %v12973_v32, %v12971_v28  ;;  %v12981_v41 = vmax.f32 %v12980_v2, 0.0  ;;  %v12983_v0 = vmax.f32 %v12982_v54, 0.0  ;;  %v12985_v44 = vmax.f32 %v12984_v17, 0.0  ;;  %4002 = vst [vmem:[#allocation2 + $0x228] sm:$0xff] %v5713_v35  ;;  %4003 = vst [vmem:[#allocation2 + $0x230] sm:$0xff] %v5714_v58  ;;  %v12986_v43 = vld [vmem:[#allocation76_spill] sm:$0xff] }
 0x5a6   : > { %v5721_v45 = vpack.c.bf16 %v12977_v8, %v12975_v31  ;;  %4004 = vst [vmem:[#allocation2 + $0x238] sm:$0xff] %v5715_v23  ;;  %v12987_v59 = vmax.f32 %v12986_v43, 0.0  ;;  %v12988_v16 = vld [vmem:[#allocation78_spill] sm:$0xff]  ;;  %v12990_v34 = vld [vmem:[#allocation177_spill] sm:$0xff]  ;;  %v12992_v4 = vld [vmem:[#allocation179_spill] sm:$0xff] }
 0x5a7   : > { %v5722_v20 = vpack.c.bf16 %v12981_v41, %v12979_v22  ;;  %v5723_v3 = vpack.c.bf16 %v12985_v44, %v12983_v0  ;;  %v12989_v49 = vmax.f32 %v12988_v16, 0.0  ;;  %v12991_v30 = vmax.f32 %v12990_v34, 0.0  ;;  %v12994_v14 = vld [vmem:[#allocation178_spill] sm:$0xff]  ;;  %v12996_v50 = vld [vmem:[#allocation180_spill] sm:$0xff]  ;;  %v12998_v39 = vld [vmem:[#allocation79_spill] sm:$0xff]  ;;  %4005 = vst [vmem:[#allocation2 + $0x240] sm:$0xff] %v5716_v33 }
 0x5a8   : > { %v12993_v26 = vmax.f32 %v12992_v4, 0.0  ;;  %v12995_v40 = vmax.f32 %v12994_v14, 0.0  ;;  %v12997_v27 = vmax.f32 %v12996_v50, 0.0  ;;  %v12999_v56 = vmax.f32 %v12998_v39, 0.0  ;;  %v13000_v35 = vld [vmem:[#allocation81_spill] sm:$0xff]  ;;  %4006 = vst [vmem:[#allocation2 + $0x248] sm:$0xff] %v5717_v53 }
 0x5a9   : > { %v5724_v62 = vpack.c.bf16 %v12989_v49, %v12987_v59  ;;  %v13001_v58 = vmax.f32 %v13000_v35, 0.0  ;;  %4007 = vst [vmem:[#allocation2 + $0x250] sm:$0xff] %v5718_v48  ;;  %4008 = vst [vmem:[#allocation2 + $0x258] sm:$0xff] %v5719_v25  ;;  %v13002_v37 = vld [vmem:[#allocation80_spill] sm:$0xff]  ;;  %v13004_v6 = vld [vmem:[#allocation82_spill] sm:$0xff] }
 0x5aa   : > { %v5725_v52 = vpack.c.bf16 %v12993_v26, %v12991_v30  ;;  %v5726_v29 = vpack.c.bf16 %v12997_v27, %v12995_v40  ;;  %v13003_v38 = vmax.f32 %v13002_v37, 0.0  ;;  %v13005_v19 = vmax.f32 %v13004_v6, 0.0  ;;  %v13006_v18 = vld [vmem:[#allocation181_spill] sm:$0xff]  ;;  %v13008_v21 = vld [vmem:[#allocation183_spill] sm:$0xff]  ;;  %v13010_v8 = vld [vmem:[#allocation182_spill] sm:$0xff]  ;;  %4009 = vst [vmem:[#allocation2 + $0x260] sm:$0xff] %v5720_v63 }
 0x5ab   : > { %v5727_v23 = vpack.c.bf16 %v13001_v58, %v12999_v56  ;;  %v13007_v32 = vmax.f32 %v13006_v18, 0.0  ;;  %v13009_v31 = vmax.f32 %v13008_v21, 0.0  ;;  %v13011_v47 = vmax.f32 %v13010_v8, 0.0  ;;  %v13012_v22 = vld [vmem:[#allocation184_spill] sm:$0xff]  ;;  %v13014_v54 = vld [vmem:[#allocation83_spill] sm:$0xff]  ;;  %v13016_v53 = vld [vmem:[#allocation85_spill] sm:$0xff] }
 0x5ac   : > { %v5728_v28 = vpack.c.bf16 %v13005_v19, %v13003_v38  ;;  %v13013_v2 = vmax.f32 %v13012_v22, 0.0  ;;  %v13015_v33 = vmax.f32 %v13014_v54, 0.0  ;;  %v13017_v48 = vmax.f32 %v13016_v53, 0.0  ;;  %4010 = vst [vmem:[#allocation2 + $0x268] sm:$0xff] %v5721_v45  ;;  %4011 = vst [vmem:[#allocation2 + $0x270] sm:$0xff] %v5722_v20  ;;  %v13018_v0 = vld [vmem:[#allocation84_spill] sm:$0xff] }
 0x5ad   : > { %v5729_v15 = vpack.c.bf16 %v13009_v31, %v13007_v32  ;;  %4012 = vst [vmem:[#allocation2 + $0x278] sm:$0xff] %v5723_v3  ;;  %v13019_v17 = vmax.f32 %v13018_v0, 0.0  ;;  %v13020_v44 = vld [vmem:[#allocation86_spill] sm:$0xff]  ;;  %v13022_v16 = vld [vmem:[#allocation185_spill] sm:$0xff]  ;;  %v13024_v34 = vld [vmem:[#allocation187_spill] sm:$0xff] }
 0x5ae   : > { %v5730_v41 = vpack.c.bf16 %v13013_v2, %v13011_v47  ;;  %v5731_v25 = vpack.c.bf16 %v13017_v48, %v13015_v33  ;;  %v13021_v43 = vmax.f32 %v13020_v44, 0.0  ;;  %v13023_v49 = vmax.f32 %v13022_v16, 0.0  ;;  %v13026_v26 = vld [vmem:[#allocation186_spill] sm:$0xff]  ;;  %v13028_v40 = vld [vmem:[#allocation188_spill] sm:$0xff]  ;;  %v13030_v39 = vld [vmem:[#allocation87_spill] sm:$0xff]  ;;  %4013 = vst [vmem:[#allocation2 + $0x280] sm:$0xff] %v5724_v62 }
 0x5af   : > { %v13025_v30 = vmax.f32 %v13024_v34, 0.0  ;;  %v13027_v14 = vmax.f32 %v13026_v26, 0.0  ;;  %v13029_v50 = vmax.f32 %v13028_v40, 0.0  ;;  %v13031_v63 = vmax.f32 %v13030_v39, 0.0  ;;  %v13032_v45 = vld [vmem:[#allocation89_spill] sm:$0xff]  ;;  %4014 = vst [vmem:[#allocation2 + $0x288] sm:$0xff] %v5725_v52 }
 0x5b0   : > { %v5732_v59 = vpack.c.bf16 %v13021_v43, %v13019_v17  ;;  %v13033_v20 = vmax.f32 %v13032_v45, 0.0  ;;  %4015 = vst [vmem:[#allocation2 + $0x290] sm:$0xff] %v5726_v29  ;;  %4016 = vst [vmem:[#allocation2 + $0x298] sm:$0xff] %v5727_v23  ;;  %v13034_v56 = vld [vmem:[#allocation88_spill] sm:$0xff]  ;;  %v13036_v58 = vld [vmem:[#allocation90_spill] sm:$0xff] }
 0x5b1   : > { %v5733_v4 = vpack.c.bf16 %v13025_v30, %v13023_v49  ;;  %v5734_v27 = vpack.c.bf16 %v13029_v50, %v13027_v14  ;;  %v13035_v35 = vmax.f32 %v13034_v56, 0.0  ;;  %v13037_v37 = vmax.f32 %v13036_v58, 0.0  ;;  %v13038_v6 = vld [vmem:[#allocation189_spill] sm:$0xff]  ;;  %v13040_v18 = vld [vmem:[#allocation191_spill] sm:$0xff]  ;;  %v13042_v31 = vld [vmem:[#allocation190_spill] sm:$0xff]  ;;  %4017 = vst [vmem:[#allocation2 + $0x2a0] sm:$0xff] %v5728_v28 }
 0x5b2   : > { %v5735_v3 = vpack.c.bf16 %v13033_v20, %v13031_v63  ;;  %v13039_v19 = vmax.f32 %v13038_v6, 0.0  ;;  %v13041_v32 = vmax.f32 %v13040_v18, 0.0  ;;  %v13043_v8 = vmax.f32 %v13042_v31, 0.0  ;;  %v13044_v47 = vld [vmem:[#allocation192_spill] sm:$0xff]  ;;  %v13046_v54 = vld [vmem:[#allocation91_spill] sm:$0xff]  ;;  %v13048_v52 = vld [vmem:[#allocation93_spill] sm:$0xff] }
 0x5b3   : > { %v5736_v38 = vpack.c.bf16 %v13037_v37, %v13035_v35  ;;  %v13045_v22 = vmax.f32 %v13044_v47, 0.0  ;;  %v13047_v62 = vmax.f32 %v13046_v54, 0.0  ;;  %v13049_v29 = vmax.f32 %v13048_v52, 0.0  ;;  %4018 = vst [vmem:[#allocation2 + $0x2a8] sm:$0xff] %v5729_v15  ;;  %4019 = vst [vmem:[#allocation2 + $0x2b0] sm:$0xff] %v5730_v41  ;;  %v13050_v33 = vld [vmem:[#allocation92_spill] sm:$0xff] }
 0x5b4   : > { %v5737_v21 = vpack.c.bf16 %v13041_v32, %v13039_v19  ;;  %4020 = vst [vmem:[#allocation2 + $0x2b8] sm:$0xff] %v5731_v25  ;;  %v13051_v53 = vmax.f32 %v13050_v33, 0.0  ;;  %v13052_v48 = vld [vmem:[#allocation94_spill] sm:$0xff]  ;;  %v13054_v44 = vld [vmem:[#allocation193_spill] sm:$0xff]  ;;  %v13056_v16 = vld [vmem:[#allocation195_spill] sm:$0xff]  ;;  %v13060_v14 = vmax.f32 %v12682_v42, 0.0 }
 0x5b5   : > { %v5738_v2 = vpack.c.bf16 %v13045_v22, %v13043_v8  ;;  %v5739_v23 = vpack.c.bf16 %v13049_v29, %v13047_v62  ;;  %v13053_v0 = vmax.f32 %v13052_v48, 0.0  ;;  %v13055_v43 = vmax.f32 %v13054_v44, 0.0  ;;  %v13058_v30 = vld [vmem:[#allocation194_spill] sm:$0xff]  ;;  %v13061_v50 = vld [vmem:[#allocation95_spill] sm:$0xff]  ;;  %4021 = vst [vmem:[#allocation2 + $0x2c0] sm:$0xff] %v5732_v59  ;;  %4022 = vst [vmem:[#allocation2 + $0x2c8] sm:$0xff] %v5733_v4 }
 0x5b6   : > { %v13057_v49 = vmax.f32 %v13056_v16, 0.0  ;;  %v13059_v26 = vmax.f32 %v13058_v30, 0.0  ;;  %v13062_v28 = vmax.f32 %v13061_v50, 0.0  ;;  %v13063_v15 = vmax.f32 %v12684_v1, 0.0  ;;  %4023 = vst [vmem:[#allocation2 + $0x2d0] sm:$0xff] %v5734_v27  ;;  %4024 = vst [vmem:[#allocation2 + $0x2d8] sm:$0xff] %v5735_v3 }
 0x5b7   : > { %v5740_v17 = vpack.c.bf16 %v13053_v0, %v13051_v53  ;;  %v13064_v25 = vld [vmem:[#allocation96_spill] sm:$0xff]  ;;  %v13066_v63 = vld [vmem:[#allocation98_spill] sm:$0xff]  ;;  %v13068_v56 = vmax.f32 %v12687_v13, 0.0  ;;  %v13069_v35 = vmax.f32 %v12688_v9, 0.0  ;;  %v13070_v58 = vmax.f32 %v12689_v55, 0.0  ;;  %v13073_v4 = vld [vmem:[#allocation101_spill] sm:$0xff] }
 0x5b8   : > { %v5741_v34 = vpack.c.bf16 %v13057_v49, %v13055_v43  ;;  %v5742_v40 = vpack.c.bf16 %v13060_v14, %v13059_v26  ;;  %v5743_v41 = vpack.c.bf16 %v13063_v15, %v13062_v28  ;;  %v13065_v39 = vmax.f32 %v13064_v25, 0.0  ;;  %4025 = vst [vmem:[#allocation2 + $0x2e0] sm:$0xff] %v5736_v38  ;;  %4026 = vst [vmem:[#allocation2 + $0x2e8] sm:$0xff] %v5737_v21  ;;  %v13075_v6 = vld [vmem:[#allocation100_spill] sm:$0xff]  ;;  %v13077_v13 = vld [vmem:[#allocation102_spill] sm:$0xff] }
 0x5b9   : > { %v13067_v45 = vmax.f32 %v13066_v63, 0.0  ;;  %v5745_v42 = vpack.c.bf16 %v13069_v35, %v13068_v56  ;;  %v13071_v37 = vmax.f32 %v12690_v7, 0.0  ;;  %v13072_v59 = vmax.f32 %v12691_v24, 0.0  ;;  %4027 = vst [vmem:[#allocation2 + $0x2f0] sm:$0xff] %v5738_v2  ;;  %4028 = vst [vmem:[#allocation2 + $0x2f8] sm:$0xff] %v5739_v23  ;;  %v13079_v32 = vld [vmem:[#allocation201_spill] sm:$0xff] }
 0x5ba   : > { %v13074_v27 = vmax.f32 %v13073_v4, 0.0  ;;  %v13076_v19 = vmax.f32 %v13075_v6, 0.0  ;;  %v13078_v18 = vmax.f32 %v13077_v13, 0.0  ;;  %v13080_v31 = vmax.f32 %v13079_v32, 0.0  ;;  %v13081_v55 = vld [vmem:[#allocation203_spill] sm:$0xff]  ;;  %v13086_v21 = vld [vmem:[#allocation204_spill] sm:$0xff] }
 0x5bb   : > { %v5744_v20 = vpack.c.bf16 %v13067_v45, %v13065_v39  ;;  %v5746_v1 = vpack.c.bf16 %v13071_v37, %v13070_v58  ;;  %v13082_v8 = vmax.f32 %v13081_v55, 0.0  ;;  %v13083_v47 = vmax.f32 %v12695_v57, 0.0  ;;  %4029 = vst [vmem:[#allocation2 + $0x300] sm:$0xff] %v5740_v17  ;;  %4030 = vst [vmem:[#allocation2 + $0x308] sm:$0xff] %v5741_v34  ;;  %v13092_v33 = vld [vmem:[#allocation104_spill] sm:$0xff] }
 0x5bc   : > { %v5747_v3 = vpack.c.bf16 %v13074_v27, %v13072_v59  ;;  %v5748_v9 = vpack.c.bf16 %v13078_v18, %v13076_v19  ;;  %v13084_v24 = vmax.f32 %v10257_v11, 0.0  ;;  %v13085_v38 = vmax.f32 %v10261_v10, 0.0  ;;  %4031 = vst [vmem:[#allocation2 + $0x310] sm:$0xff] %v5742_v40  ;;  %4032 = vst [vmem:[#allocation2 + $0x318] sm:$0xff] %v5743_v41 }
 0x5bd   : > { %v5749_v7 = vpack.c.bf16 %v13082_v8, %v13080_v31  ;;  %v13087_v2 = vmax.f32 %v13086_v21, 0.0  ;;  %v13088_v62 = vmax.f32 %v10269_v60, 0.0  ;;  %v13089_v52 = vmax.f32 %v10273_v61, 0.0  ;;  %4033 = vst [vmem:[#allocation2 + $0x320] sm:$0xff] %v5744_v20  ;;  %4034 = vst [vmem:[#allocation2 + $0x328] sm:$0xff] %v5745_v42 }
 0x5be   : > { %v5750_v22 = vpack.c.bf16 %v13084_v24, %v13083_v47  ;;  %v13090_v23 = vmax.f32 %v12696_v46, 0.0  ;;  %v13091_v57 = vmax.f32 %v12697_v12, 0.0  ;;  %v13093_v53 = vmax.f32 %v13092_v33, 0.0  ;;  %4035 = vst [vmem:[#allocation2 + $0x330] sm:$0xff] %v5746_v1  ;;  %4036 = vst [vmem:[#allocation2 + $0x338] sm:$0xff] %v5747_v3 }
 0x5bf   : > { %v5751_v54 = vpack.c.bf16 %v13087_v2, %v13085_v38  ;;  %v5752_v29 = vpack.c.bf16 %v13089_v52, %v13088_v62  ;;  %v13094_v10 = vmax.f32 %v12699_v36, 0.0  ;;  %v13095_v0 = vmax.f32 %v12700_v5, 0.0  ;;  %4037 = vst [vmem:[#allocation2 + $0x340] sm:$0xff] %v5748_v9  ;;  %4038 = vst [vmem:[#allocation2 + $0x348] sm:$0xff] %v5749_v7 }
 0x5c0   : > { %v5753_v11 = vpack.c.bf16 %v13091_v57, %v13090_v23  ;;  %v13096_v17 = vmax.f32 %v10297_v51, 0.0  ;;  %4039 = vst [vmem:[#allocation2 + $0x350] sm:$0xff] %v5750_v22  ;;  %v6701_v46 = vmov 0.0  }
 0x5c1   : > { %v5754_v48 = vpack.c.bf16 %v13094_v10, %v13093_v53  ;;  %4040 = vst [vmem:[#allocation2 + $0x358] sm:$0xff] %v5751_v54  ;;  %4041 = vst [vmem:[#allocation2 + $0x360] sm:$0xff] %v5752_v29 }
 0x5c2   : > { %v5755_v44 = vpack.c.bf16 %v13096_v17, %v13095_v0  ;;  %4042 = vst [vmem:[#allocation2 + $0x368] sm:$0xff] %v5753_v11  ;;  %4045 = vst [vmem:[#allocation3] sm:$0xff] %v6701_v46 }
 0x5c3   : > { %4043 = vst [vmem:[#allocation2 + $0x370] sm:$0xff] %v5754_v48 }
 0x5c4   : > { %4044 = vst [vmem:[#allocation2 + $0x378] sm:$0xff] %v5755_v44 }
 0x5c5 PF: > { %p5475_p2 = scmp.le.s32.totalorder %s6792_s27, 0 }
 0x5c6   : > { %v6245_v5 = vld [vmem:[%s7068_s20 + $0x140] sm:$0xff] (!%p5475_p2)   ;;  %v6249_v61 = vld [vmem:[%s7068_s20 + $0x148] sm:$0xff] (!%p5475_p2)   ;;  %v6253_v49 = vld [vmem:[%s7068_s20 + $0x150] sm:$0xff] (!%p5475_p2)   ;;  %s5476_s24 = sadd.s32 (!%p5475_p2), 4294967295, %s6792_s27 }
 0x5c7   : > { %4049 = sbr.rel (%p5475_p2) target bundleno = 1766 (0x6e6), region = 116  ;;  %v6246_v12 = vld [vmem:[%s7068_s20 + $0x1c0] sm:$0xff] (!%p5475_p2)   ;;  %5762 = vmatprep.subr.bf16.mxu0 (!%p5475_p2), %v6245_v5  ;;  %v6250_v51 = vld [vmem:[%s7068_s20 + $0x1c8] sm:$0xff] (!%p5475_p2)   ;;  %v6254_v34 = vld [vmem:[%s7068_s20 + $0x1d0] sm:$0xff] (!%p5475_p2)   ;;  %s5757_s29 = sshll.u32 (!%p5475_p2), %s5476_s24, 7 }
 0x5c8   : > { %v6247_v36 = vld [vmem:[%s7068_s20 + $0x100] sm:$0xff] (!%p5475_p2)   ;;  %5784 = vmatprep.subr.bf16.mxu1 (!%p5475_p2), %v6246_v12  ;;  %v6251_v43 = vld [vmem:[%s7068_s20 + $0x108] sm:$0xff] (!%p5475_p2)   ;;  %v6255_v30 = vld [vmem:[%s7068_s20 + $0x110] sm:$0xff] (!%p5475_p2)   ;;  %s11005_s18 = scalar_lea.vmem (!%p5475_p2), [#allocation2], %s5757_s29 }
 0x5c9   : > { %v6248_v60 = vld [vmem:[%s7068_s20 + $0x180] sm:$0xff] (!%p5475_p2)   ;;  %5763 = vmatpush3.bf16.msra.mxu0 (!%p5475_p2), %v6247_v36  ;;  %v6252_v16 = vld [vmem:[%s7068_s20 + $0x188] sm:$0xff] (!%p5475_p2)   ;;  %v6256_v26 = vld [vmem:[%s7068_s20 + $0x190] sm:$0xff] (!%p5475_p2)  }
 0x5ca   : > { %5785 = vmatpush3.bf16.msra.mxu1 (!%p5475_p2), %v6248_v60  ;;  %5764 = vmatprep.subr.bf16.mxu0 (!%p5475_p2), %v6249_v61  ;;  %v6257_v14 = vld [vmem:[%s7068_s20 + $0x158] sm:$0xff] (!%p5475_p2)   ;;  %v6261_v15 = vld [vmem:[%s7068_s20 + $0x160] sm:$0xff] (!%p5475_p2)   ;;  %v6265_v63 = vld [vmem:[%s7068_s20 + $0x168] sm:$0xff] (!%p5475_p2)  }
 0x5cb   : > { %5786 = vmatprep.subr.bf16.mxu1 (!%p5475_p2), %v6250_v51  ;;  %v6258_v40 = vld [vmem:[%s7068_s20 + $0x1d8] sm:$0xff] (!%p5475_p2)   ;;  %v6262_v41 = vld [vmem:[%s7068_s20 + $0x1e0] sm:$0xff] (!%p5475_p2)   ;;  %v6266_v45 = vld [vmem:[%s7068_s20 + $0x1e8] sm:$0xff] (!%p5475_p2)  }
 0x5cc   : > { %v6259_v50 = vld [vmem:[%s7068_s20 + $0x118] sm:$0xff] (!%p5475_p2)   ;;  %v6263_v25 = vld [vmem:[%s7068_s20 + $0x120] sm:$0xff] (!%p5475_p2)   ;;  %v6267_v20 = vld [vmem:[%s7068_s20 + $0x128] sm:$0xff] (!%p5475_p2)  }
 0x5cd   : > { %5765 = vmatpush3.bf16.msra.mxu0 (!%p5475_p2), %v6251_v43  ;;  %v6260_v28 = vld [vmem:[%s7068_s20 + $0x198] sm:$0xff] (!%p5475_p2)   ;;  %v6264_v39 = vld [vmem:[%s7068_s20 + $0x1a0] sm:$0xff] (!%p5475_p2)   ;;  %v6268_v56 = vld [vmem:[%s7068_s20 + $0x1a8] sm:$0xff] (!%p5475_p2)  }
 0x5ce   : > { %5787 = vmatpush3.bf16.msra.mxu1 %v6252_v16  ;;  %5766 = vmatprep.subr.bf16.mxu0 %v6253_v49  ;;  %v6269_v35 = vld [vmem:[%s7068_s20 + $0x170] sm:$0xff]   ;;  %v6273_v1 = vld [vmem:[%s7068_s20 + $0x178] sm:$0xff]   ;;  %v5490_v6 = vld [vmem:[%s11005_s18 + $0x50] sm:$0xff] }
 0x5cf   : > { %5788 = vmatprep.subr.bf16.mxu1 %v6254_v34  ;;  %v6270_v42 = vld [vmem:[%s7068_s20 + $0x1f0] sm:$0xff]   ;;  %v6274_v59 = vld [vmem:[%s7068_s20 + $0x1f8] sm:$0xff]   ;;  %v5497_v13 = vld [vmem:[%s11005_s18 + $0x70] sm:$0xff] }
 0x5d0   : > { %v6271_v58 = vld [vmem:[%s7068_s20 + $0x130] sm:$0xff]   ;;  %v6275_v4 = vld [vmem:[%s7068_s20 + $0x138] sm:$0xff]   ;;  %v4157_v31 = vmax.bf16 %v5497_v13, %v5490_v6  ;;  %v6277_v24 = vld [vmem:[%s7068_s20 + $0x40] sm:$0xff]  }
 0x5d1   : > { %5767 = vmatpush3.bf16.msra.mxu0 %v6255_v30  ;;  %v6272_v37 = vld [vmem:[%s7068_s20 + $0x1b0] sm:$0xff]   ;;  %v6276_v27 = vld [vmem:[%s7068_s20 + $0x1b8] sm:$0xff]   ;;  %v6278_v38 = vld [vmem:[%s7068_s20 + $0xc0] sm:$0xff]  }
 0x5d2   : > { %5789 = vmatpush3.bf16.msra.mxu1 %v6256_v26  ;;  %5768 = vmatprep.subr.bf16.mxu0 %v6257_v14  ;;  %v5488_v3 = vld [vmem:[%s11005_s18 + $0x40] sm:$0xff]  ;;  %v5489_v9 = vld [vmem:[%s11005_s18 + $0x48] sm:$0xff]  ;;  %v5491_v32 = vld [vmem:[%s11005_s18 + $0x58] sm:$0xff] }
 0x5d3   : > { %5790 = vmatprep.subr.bf16.mxu1 %v6258_v40  ;;  %v5495_v19 = vld [vmem:[%s11005_s18 + $0x60] sm:$0xff]  ;;  %v5496_v55 = vld [vmem:[%s11005_s18 + $0x68] sm:$0xff]  ;;  %v5498_v8 = vld [vmem:[%s11005_s18 + $0x78] sm:$0xff] }
 0x5d4   : > { %v4155_v18 = vmax.bf16 %v5495_v19, %v5488_v3  ;;  %v4156_v7 = vmax.bf16 %v5496_v55, %v5489_v9  ;;  %v4158_v47 = vmax.bf16 %v5498_v8, %v5491_v32  ;;  %v6279_v2 = vld [vmem:[%s7068_s20] sm:$0xff]   ;;  %v6281_v57 = vld [vmem:[%s7068_s20 + $0x48] sm:$0xff]   ;;  %v6285_v10 = vld [vmem:[%s7068_s20 + $0x50] sm:$0xff]  }
 0x5d5   : > { %5769 = vmatpush3.bf16.msra.mxu0 %v6259_v50  ;;  %v6280_v52 = vld [vmem:[%s7068_s20 + $0x80] sm:$0xff]   ;;  %v6282_v11 = vld [vmem:[%s7068_s20 + $0xc8] sm:$0xff]   ;;  %v6286_v48 = vld [vmem:[%s7068_s20 + $0xd0] sm:$0xff]  }
 0x5d6   : > { %5791 = vmatpush3.bf16.msra.mxu1 %v6260_v28  ;;  %5770 = vmatprep.subr.bf16.mxu0 %v6261_v15  ;;  %v4159_v22 = vmax.bf16 %v4157_v31, %v4155_v18  ;;  %v4160_v21 = vmax.bf16 %v4158_v47, %v4156_v7  ;;  %v6283_v33 = vld [vmem:[%s7068_s20 + $0x8] sm:$0xff]   ;;  %v6287_v0 = vld [vmem:[%s7068_s20 + $0x10] sm:$0xff]   ;;  %v6289_v44 = vld [vmem:[%s7068_s20 + $0x58] sm:$0xff]  }
 0x5d7   : > { %5792 = vmatprep.subr.bf16.mxu1 %v6262_v41  ;;  %v6284_v53 = vld [vmem:[%s7068_s20 + $0x88] sm:$0xff]   ;;  %v6288_v17 = vld [vmem:[%s7068_s20 + $0x90] sm:$0xff]   ;;  %v6290_v46 = vld [vmem:[%s7068_s20 + $0xd8] sm:$0xff]  }
 0x5d8   : > { %v5564_v54 = vcombine.high %v4159_v22, %v4159_v22  ;;  %v5563_v62 = vcombine.low %v4159_v22, %v4159_v22  ;;  %v5566_v29 = vcombine.high %v4160_v21, %v4160_v21  ;;  %v5565_v23 = vcombine.low %v4160_v21, %v4160_v21  ;;  %v6291_v5 = vld [vmem:[%s7068_s20 + $0x18] sm:$0xff]   ;;  %v6293_v36 = vld [vmem:[%s7068_s20 + $0x60] sm:$0xff]   ;;  %v6297_v43 = vld [vmem:[%s7068_s20 + $0x68] sm:$0xff]  }
 0x5d9   : > { %5771 = vmatpush3.bf16.msra.mxu0 %v6263_v25  ;;  %v6292_v12 = vld [vmem:[%s7068_s20 + $0x98] sm:$0xff]   ;;  %v6294_v60 = vld [vmem:[%s7068_s20 + $0xe0] sm:$0xff]   ;;  %v6298_v16 = vld [vmem:[%s7068_s20 + $0xe8] sm:$0xff]  }
 0x5da   : > { %5793 = vmatpush3.bf16.msra.mxu1 %v6264_v39  ;;  %5772 = vmatprep.subr.bf16.mxu0 %v6265_v63  ;;  %v6295_v61 = vld [vmem:[%s7068_s20 + $0x20] sm:$0xff]   ;;  %v6299_v49 = vld [vmem:[%s7068_s20 + $0x28] sm:$0xff]   ;;  %v6301_v30 = vld [vmem:[%s7068_s20 + $0x70] sm:$0xff]  }
 0x5db   : > { %5794 = vmatprep.subr.bf16.mxu1 %v6266_v45  ;;  %4464 = vmatprep.mubr.bf16.mxu0 %v5564_v54  ;;  %v6296_v51 = vld [vmem:[%s7068_s20 + $0xa0] sm:$0xff]   ;;  %v6300_v34 = vld [vmem:[%s7068_s20 + $0xa8] sm:$0xff]   ;;  %v6302_v26 = vld [vmem:[%s7068_s20 + $0xf0] sm:$0xff]  }
 0x5dc   : > { %4504 = vmatprep.mubr.bf16.mxu1 %v5566_v29  ;;  %v6303_v14 = vld [vmem:[%s7068_s20 + $0x30] sm:$0xff]   ;;  %v6305_v50 = vld [vmem:[%s7068_s20 + $0x78] sm:$0xff]   ;;  %v4057_v39 = vld [vmem:[%s11005_s18 + $0x10] sm:$0xff] }
 0x5dd   : > { %5773 = vmatpush3.bf16.msra.mxu0 %v6267_v20  ;;  %v6304_v40 = vld [vmem:[%s7068_s20 + $0xb0] sm:$0xff]   ;;  %v6306_v28 = vld [vmem:[%s7068_s20 + $0xf8] sm:$0xff]   ;;  %v5484_v45 = vld [vmem:[%s11005_s18 + $0x30] sm:$0xff] }
 0x5de   : > { %5795 = vmatpush3.bf16.msra.mxu1 %v6268_v56  ;;  %5774 = vmatprep.subr.bf16.mxu0 %v6269_v35  ;;  %v6307_v15 = vld [vmem:[%s7068_s20 + $0x38] sm:$0xff]   ;;  %v4069_v56 = vmax.bf16 %v5484_v45, %v4057_v39 }
 0x5df   : > { %5796 = vmatprep.subr.bf16.mxu1 %v6270_v42  ;;  %v6308_v41 = vld [vmem:[%s7068_s20 + $0xb8] sm:$0xff]   ;;  %v4058_v42 = vld [vmem:[%s11005_s18 + $0x18] sm:$0xff] }
 0x5e0   : > { %v4055_v25 = vld [vmem:[%s11005_s18] sm:$0xff]  ;;  %v4056_v35 = vld [vmem:[%s11005_s18 + $0x8] sm:$0xff] }
 0x5e1   : > { %5775 = vmatpush3.bf16.msra.mxu0 %v6271_v58  ;;  %v5482_v63 = vld [vmem:[%s11005_s18 + $0x20] sm:$0xff]  ;;  %v5483_v58 = vld [vmem:[%s11005_s18 + $0x28] sm:$0xff] }
 0x5e2   : > { %5797 = vmatpush3.bf16.msra.mxu1 %v6272_v37  ;;  %5776 = vmatprep.subr.bf16.mxu0 %v6273_v1  ;;  %v4067_v20 = vmax.bf16 %v5482_v63, %v4055_v25  ;;  %v5485_v37 = vld [vmem:[%s11005_s18 + $0x38] sm:$0xff]  ;;  %v4068_v1 = vmax.bf16 %v5483_v58, %v4056_v35 }
 0x5e3   : > { %5798 = vmatprep.subr.bf16.mxu1 %v6274_v59 }
 0x5e4   : > { %v4071_v59 = vmax.bf16 %v4069_v56, %v4067_v20 }
 0x5e5   : > { %5777 = vmatpush3.bf16.msra.mxu0 %v6275_v4  ;;  %v4070_v4 = vmax.bf16 %v5485_v37, %v4058_v42 }
 0x5e6   : > { %5799 = vmatpush3.bf16.msra.mxu1 %v6276_v27  ;;  %5806 = vmatprep.subr.bf16.mxu0 %v6277_v24  ;;  %v5600_v27 = vcombine.high %v4071_v59, %v4071_v59  ;;  %v5599_v6 = vcombine.low %v4071_v59, %v4071_v59 }
 0x5e7   : > { %5828 = vmatprep.subr.bf16.mxu1 %v6278_v38  ;;  %v4072_v3 = vmax.bf16 %v4070_v4, %v4068_v1 }
 0x5e8   : > { %4465 = vmatmul.mubr.bf16.vlgmr.msra.gmra.mrb[0].mxu0 %v5563_v62 }
 0x5e9   : > { %4505 = vmatmul.mubr.bf16.vlgmr.msra.gmra.mrb[0].mxu1 %v5565_v23  ;;  %5807 = vmatpush3.bf16.msra.mxu0 %v6279_v2  ;;  %v5602_v19 = vcombine.high %v4072_v3, %v4072_v3  ;;  %v5601_v13 = vcombine.low %v4072_v3, %v4072_v3 }
 0x5ea   : > { %5829 = vmatpush3.bf16.msra.mxu1 %v6280_v52  ;;  %5808 = vmatprep.subr.bf16.mxu0 %v6281_v57 }
 0x5eb   : > { %5830 = vmatprep.subr.bf16.mxu1 %v6282_v11  ;;  %4750 = vmatprep.mubr.bf16.mxu0 %v5600_v27 }
 0x5ec   : > { %4790 = vmatprep.mubr.bf16.mxu1 %v5602_v19 }
 0x5ed   : > { %5809 = vmatpush3.bf16.msra.mxu0 %v6283_v33 }
 0x5ee   : > { %5831 = vmatpush3.bf16.msra.mxu1 %v6284_v53  ;;  %5810 = vmatprep.subr.bf16.mxu0 %v6285_v10  ;;  %v4798_v53 = vld [vmem:[#allocation3] sm:$0xff] }
 0x5ef   : > { %5832 = vmatprep.subr.bf16.mxu1 %v6286_v48 }
 0x5f1   : > { %5811 = vmatpush3.bf16.msra.mxu0 %v6287_v0 }
 0x5f2   : > { %5833 = vmatpush3.bf16.msra.mxu1 %v6288_v17  ;;  %5812 = vmatprep.subr.bf16.mxu0 %v6289_v44 }
 0x5f3   : > { %5834 = vmatprep.subr.bf16.mxu1 %v6290_v46 }
 0x5f5   : > { %5813 = vmatpush3.bf16.msra.mxu0 %v6291_v5 }
 0x5f6   : > { %5835 = vmatpush3.bf16.msra.mxu1 %v6292_v12  ;;  %5814 = vmatprep.subr.bf16.mxu0 %v6293_v36 }
 0x5f7   : > { %5836 = vmatprep.subr.bf16.mxu1 %v6294_v60 }
 0x5f9   : > { %5815 = vmatpush3.bf16.msra.mxu0 %v6295_v61 }
 0x5fa   : > { %5837 = vmatpush3.bf16.msra.mxu1 %v6296_v51  ;;  %5816 = vmatprep.subr.bf16.mxu0 %v6297_v43 }
 0x5fb   : > { %5838 = vmatprep.subr.bf16.mxu1 %v6298_v16 }
 0x5fd   : > { %5817 = vmatpush3.bf16.msra.mxu0 %v6299_v49 }
 0x5fe   : > { %5839 = vmatpush3.bf16.msra.mxu1 %v6300_v34  ;;  %5818 = vmatprep.subr.bf16.mxu0 %v6301_v30 }
 0x5ff   : > { %5840 = vmatprep.subr.bf16.mxu1 %v6302_v26 }
 0x601   : > { %5819 = vmatpush3.bf16.msra.mxu0 %v6303_v14 }
 0x602   : > { %5841 = vmatpush3.bf16.msra.mxu1 %v6304_v40  ;;  %5820 = vmatprep.subr.bf16.mxu0 %v6305_v50 }
 0x603   : > { %5842 = vmatprep.subr.bf16.mxu1 %v6306_v28 }
 0x605   : > { %5821 = vmatpush3.bf16.msra.mxu0 %v6307_v15 }
 0x606   : > { %5843 = vmatpush3.bf16.msra.mxu1 %v6308_v41 }
 0x608   : > { %4751 = vmatmul.mubr.bf16.vlgmr.msra.gmra.mrb[4].mxu0 %v5599_v6 }
 0x609   : > { %4791 = vmatmul.mubr.bf16.vlgmr.msra.gmra.mrb[4].mxu1 %v5601_v13 }
 0x6bb   : > { %v5778_v18 = vpop.f32.mrb[0].mxu0 }
 0x6bc   : > { %v5800_v9 = vpop.f32.mrb[0].mxu1  ;;  %v5779_v32 = vpop.f32.mrb[1].mxu0 }
 0x6bd   : > { %v5780_v31 = vadd.f32 %v5779_v32, %v5778_v18  ;;  %v5801_v55 = vpop.f32.mrb[1].mxu1  ;;  %v5781_v8 = vpop.f32.mrb[2].mxu0 }
 0x6be   : > { %v5802_v7 = vadd.f32 %v5801_v55, %v5800_v9  ;;  %v5803_v47 = vpop.f32.mrb[2].mxu1  ;;  %v5782_v24 = vpop.f32.mrb[3].mxu0 }
 0x6bf   : > { %v5804_v22 = vpop.f32.mrb[3].mxu1 }
 0x6c0   : > { %v4507_v38 = vadd.f32 %v5802_v7, %v5780_v31 }
 0x6db   : > { %v5822_v21 = vpop.f32.mrb[4].mxu0 }
 0x6dc   : > { %v5823_v2 = vpop.f32.mrb[5].mxu0  ;;  %v5844_v54 = vpop.f32.mrb[4].mxu1 }
 0x6dd   : > { %v5824_v62 = vadd.f32 %v5823_v2, %v5822_v21  ;;  %v5825_v52 = vpop.f32.mrb[6].mxu0  ;;  %v5845_v29 = vpop.f32.mrb[5].mxu1 }
 0x6de   : > { %v5826_v23 = vpop.f32.mrb[7].mxu0  ;;  %v5846_v11 = vadd.f32 %v5845_v29, %v5844_v54  ;;  %v5847_v33 = vpop.f32.mrb[6].mxu1 }
 0x6df   : > { %v4753_v57 = vadd.f32 %v5824_v62, %v4507_v38  ;;  %v5848_v10 = vpop.f32.mrb[7].mxu1 }
 0x6e1   : > { %v4793_v48 = vadd.f32 %v5846_v11, %v4753_v57 }
 0x6e3   : > { %v4799_v0 = vadd.f32 %v4798_v53, %v4793_v48 }
 0x6e5   : > { %4800 = vst [vmem:[#allocation3] sm:$0xff] %v4799_v0 }
 0x6e6 PF: > { %p5635_p8 = scmp.ne.s32.totalorder %s6792_s27, 7 }
 0x6e7   : > { %v4815_v17 = vld [vmem:[#allocation13] sm:$0xff] (!%p5635_p8)  ;;  %v4816_v44 = vld [vmem:[#allocation13 + $0x8] sm:$0xff] (!%p5635_p8)  ;;  %v4817_v46 = vld [vmem:[#allocation13 + $0x10] sm:$0xff] (!%p5635_p8)  ;;  %v6702_v5 = vmov (!%p5635_p8), 0.0|0.0   ;;  %vm6703_vm3 = vmmov (!%p5635_p8), 0   ;;  %v6704_v60 = vmov (!%p5635_p8), 0.0  }
 0x6e8   : > { %4804 = sbr.rel (%p5635_p8) target bundleno = 2462 (0x99e), region = 120  ;;  %6006 = vmatprep.subr.bf16.mxu0 (!%p5635_p8), %v6702_v5  ;;  %v6007_v12 = vpack.c.bf16 (!%p5635_p8), %v4816_v44, %v4815_v17  ;;  %v4818_v36 = vld [vmem:[#allocation13 + $0x18] sm:$0xff] (!%p5635_p8)  ;;  %5933 = vmatprep.mubr.msk.f32.mxu0 (!%p5635_p8), %vm6703_vm3, %v6704_v60  ;;  %v4819_v51 = vld [vmem:[#allocation13 + $0x20] sm:$0xff] (!%p5635_p8)  ;;  %v4820_v43 = vld [vmem:[#allocation13 + $0x28] sm:$0xff] (!%p5635_p8)  ;;  %s13097_s13 = sld [smem:[#allocation236_spill]] (!%p5635_p8)  ;;  %vm5092_vm4 = vcmask (!%p5635_p8), 253952  }
 0x6e9   : > { %6030 = vmatprep.subr.bf16.mxu1 (!%p5635_p8), %v6702_v5  ;;  %5968 = vmatprep.mubr.msk.f32.mxu1 (!%p5635_p8), %vm6703_vm3, %v6704_v60  ;;  %v6010_v61 = vpack.c.bf16 (!%p5635_p8), %v4818_v36, %v4817_v46  ;;  %v4917_v16 = vld [vmem:[#allocation16] sm:$0xff] (!%p5635_p8)  ;;  %v4918_v49 = vld [vmem:[#allocation16 + $0x8] sm:$0xff] (!%p5635_p8)  ;;  %v4919_v34 = vld [vmem:[#allocation16 + $0x10] sm:$0xff] (!%p5635_p8)  ;;  %v6013_v30 = vpack.c.bf16 (!%p5635_p8), %v4820_v43, %v4819_v51 }
 0x6ea   : > { %6008 = vmatpush3.bf16.msra.mxu0 (!%p5635_p8), %v6007_v12  ;;  %v6031_v26 = vpack.c.bf16 (!%p5635_p8), %v4918_v49, %v4917_v16  ;;  %v4920_v14 = vld [vmem:[#allocation16 + $0x18] sm:$0xff] (!%p5635_p8)  ;;  %v4821_v40 = vld [vmem:[#allocation13 + $0x30] sm:$0xff] (!%p5635_p8)  ;;  %v4921_v15 = vld [vmem:[#allocation16 + $0x20] sm:$0xff] (!%p5635_p8) }
 0x6eb   : > { %6009 = vmatprep.subr.bf16.mxu0 (!%p5635_p8), %v6702_v5  ;;  %v4822_v50 = vld [vmem:[#allocation13 + $0x38] sm:$0xff] (!%p5635_p8)  ;;  %v6034_v28 = vpack.c.bf16 (!%p5635_p8), %v4920_v14, %v4919_v34  ;;  %v4922_v41 = vld [vmem:[#allocation16 + $0x28] sm:$0xff] (!%p5635_p8)  ;;  %v4823_v39 = vld [vmem:[#allocation13 + $0x40] sm:$0xff] (!%p5635_p8) }
 0x6ec   : > { %6032 = vmatpush3.bf16.msra.mxu1 (!%p5635_p8), %v6031_v26  ;;  %v6016_v25 = vpack.c.bf16 (!%p5635_p8), %v4822_v50, %v4821_v40  ;;  %v4824_v63 = vld [vmem:[#allocation13 + $0x48] sm:$0xff] (!%p5635_p8)  ;;  %v6037_v45 = vpack.c.bf16 (!%p5635_p8), %v4922_v41, %v4921_v15  ;;  %v4825_v56 = vld [vmem:[#allocation13 + $0x50] sm:$0xff] (!%p5635_p8)  ;;  %v4826_v35 = vld [vmem:[#allocation13 + $0x58] sm:$0xff] (!%p5635_p8) }
 0x6ed   : > { %6033 = vmatprep.subr.bf16.mxu1 (!%p5635_p8), %v6702_v5  ;;  %v6019_v20 = vpack.c.bf16 (!%p5635_p8), %v4824_v63, %v4823_v39  ;;  %v6022_v42 = vpack.c.bf16 (!%p5635_p8), %v4826_v35, %v4825_v56  ;;  %v4827_v58 = vld [vmem:[#allocation13 + $0x60] sm:$0xff] (!%p5635_p8)  ;;  %v4828_v37 = vld [vmem:[#allocation13 + $0x68] sm:$0xff] (!%p5635_p8)  ;;  %v4805_v59 = vld [vmem:[#allocation3] sm:$0xff] (!%p5635_p8) }
 0x6ee   : > { %6011 = vmatpush3.bf16.msra.mxu0 (!%p5635_p8), %v6010_v61  ;;  %v6025_v1 = vpack.c.bf16 (!%p5635_p8), %v4828_v37, %v4827_v58  ;;  %v5636_v4 = vld [vmem:[#allocation12] ss:$0 sm:$0xff] (!%p5635_p8)  ;;  %v4829_v27 = vld [vmem:[#allocation13 + $0x70] sm:$0xff] (!%p5635_p8)  ;;  %v4925_v31 = vld [vmem:[#allocation16 + $0x40] sm:$0xff] (!%p5635_p8) }
 0x6ef   : > { %6012 = vmatprep.subr.bf16.mxu0 %v6702_v5  ;;  %v4830_v3 = vld [vmem:[#allocation13 + $0x78] sm:$0xff]  ;;  %v4813_v6 = vadd.f32 %v5636_v4, %v4805_v59  ;;  %v4926_v55 = vld [vmem:[#allocation16 + $0x48] sm:$0xff]  ;;  %v4929_v22 = vld [vmem:[#allocation16 + $0x60] sm:$0xff] }
 0x6f0   : > { %6035 = vmatpush3.bf16.msra.mxu1 %v6034_v28  ;;  %v6028_v19 = vpack.c.bf16 %v4830_v3, %v4829_v27  ;;  %v4923_v18 = vld [vmem:[#allocation16 + $0x30] sm:$0xff]  ;;  %v4924_v9 = vld [vmem:[#allocation16 + $0x38] sm:$0xff]  ;;  %v6043_v8 = vpack.c.bf16 %v4926_v55, %v4925_v31  ;;  %v4930_v38 = vld [vmem:[#allocation16 + $0x68] sm:$0xff] }
 0x6f1   : > { %6036 = vmatprep.subr.bf16.mxu1 %v6702_v5  ;;  %v4814_v13 = vmax.f32 %v4813_v6, 0.0  ;;  %v6040_v32 = vpack.c.bf16 %v4924_v9, %v4923_v18  ;;  %v4927_v7 = vld [vmem:[#allocation16 + $0x50] sm:$0xff]  ;;  %v4928_v47 = vld [vmem:[#allocation16 + $0x58] sm:$0xff]  ;;  %v6049_v21 = vpack.c.bf16 %v4930_v38, %v4929_v22  ;;  %v5007_v23 = vld [vmem:[%s13097_s13 + $0x10] sm:$0xff] }
 0x6f2   : > { %6014 = vmatpush3.bf16.msra.mxu0 %v6013_v30  ;;  %v6046_v24 = vpack.c.bf16 %v4928_v47, %v4927_v7  ;;  %v4931_v2 = vld [vmem:[#allocation16 + $0x70] sm:$0xff]  ;;  %v4932_v54 = vld [vmem:[#allocation16 + $0x78] sm:$0xff]  ;;  %v5008_v11 = vld [vmem:[%s13097_s13 + $0x18] sm:$0xff] }
 0x6f3   : > { %6015 = vmatprep.subr.bf16.mxu0 %v6702_v5  ;;  %v6052_v62 = vpack.c.bf16 %v4932_v54, %v4931_v2  ;;  %v5005_v52 = vld [vmem:[%s13097_s13] sm:$0xff]  ;;  %v5006_v29 = vld [vmem:[%s13097_s13 + $0x8] sm:$0xff]  ;;  %v6058_v33 = vpack.c.bf16 %v5008_v11, %v5007_v23  ;;  %v5011_v0 = vld [vmem:[%s13097_s13 + $0x30] sm:$0xff] }
 0x6f4   : > { %6038 = vmatpush3.bf16.msra.mxu1 %v6037_v45  ;;  %v6055_v57 = vpack.c.bf16 %v5006_v29, %v5005_v52  ;;  %v5009_v53 = vld [vmem:[%s13097_s13 + $0x20] sm:$0xff]  ;;  %v5010_v10 = vld [vmem:[%s13097_s13 + $0x28] sm:$0xff]  ;;  %v5012_v17 = vld [vmem:[%s13097_s13 + $0x38] sm:$0xff] }
 0x6f5   : > { %6039 = vmatprep.subr.bf16.mxu1 %v6702_v5  ;;  %v6061_v48 = vpack.c.bf16 %v5010_v10, %v5009_v53  ;;  %v6064_v44 = vpack.c.bf16 %v5012_v17, %v5011_v0  ;;  %v5013_v46 = vld [vmem:[%s13097_s13 + $0x40] sm:$0xff]  ;;  %v5014_v12 = vld [vmem:[%s13097_s13 + $0x48] sm:$0xff]  ;;  %v5016_v61 = vld [vmem:[%s13097_s13 + $0x58] sm:$0xff] }
 0x6f6   : > { %6017 = vmatpush3.bf16.msra.mxu0 %v6016_v25  ;;  %v6067_v36 = vpack.c.bf16 %v5014_v12, %v5013_v46  ;;  %v5017_v43 = vld [vmem:[%s13097_s13 + $0x60] sm:$0xff]  ;;  %v5018_v16 = vld [vmem:[%s13097_s13 + $0x68] sm:$0xff]  ;;  %v5019_v45 = vld [vmem:[%s13097_s13 + $0x70] sm:$0xff] }
 0x6f7   : > { %6018 = vmatprep.subr.bf16.mxu0 %v6702_v5  ;;  %v6073_v49 = vpack.c.bf16 %v5018_v16, %v5017_v43  ;;  %v5637_v34 = vld [vmem:[#allocation15] ss:$0 sm:$0xff]  ;;  %v4933_v56 = vld [vmem:[#allocation18] sm:$0x1] }
 0x6f8   : > { %6041 = vmatpush3.bf16.msra.mxu1 %v6040_v32 }
 0x6f9   : > { %6042 = vmatprep.subr.bf16.mxu1 %v6702_v5 }
 0x6fa   : > { %6020 = vmatpush3.bf16.msra.mxu0 %v6019_v20 }
 0x6fb   : > { %6021 = vmatprep.subr.bf16.mxu0 %v6702_v5 }
 0x6fc   : > { %6044 = vmatpush3.bf16.msra.mxu1 %v6043_v8 }
 0x6fd   : > { %6045 = vmatprep.subr.bf16.mxu1 %v6702_v5 }
 0x6fe   : > { %6023 = vmatpush3.bf16.msra.mxu0 %v6022_v42 }
 0x6ff   : > { %6024 = vmatprep.subr.bf16.mxu0 %v6702_v5 }
 0x700   : > { %6047 = vmatpush3.bf16.msra.mxu1 %v6046_v24 }
 0x701   : > { %6048 = vmatprep.subr.bf16.mxu1 %v6702_v5 }
 0x702   : > { %6026 = vmatpush3.bf16.msra.mxu0 %v6025_v1  ;;  %v5021_v1 = vld [vmem:[#allocation19] sm:$0x1] }
 0x703   : > { %6027 = vmatprep.subr.bf16.mxu0 %v6702_v5 }
 0x704   : > { %6050 = vmatpush3.bf16.msra.mxu1 %v6049_v21 }
 0x705   : > { %6051 = vmatprep.subr.bf16.mxu1 %v6702_v5 }
 0x706   : > { %6029 = vmatpush3.bf16.msra.mxu0 %v6028_v19 }
 0x707   : > { %6054 = vmatprep.subr.bf16.mxu0 %v6702_v5 }
 0x708   : > { %6053 = vmatpush3.bf16.msra.mxu1 %v6052_v62 }
 0x709   : > { %5934 = vmatmul.mubr.f32.vlgmr.msra.gmra.mrb[0].mxu0 %v4814_v13 }
 0x70a   : > { %6003 = vmatprep.mubr.msk.f32.mxu0 %vm6703_vm3, %v6704_v60  ;;  %6056 = vmatpush3.bf16.msra.mxu0 %v6055_v57  ;;  %v5015_v60 = vld [vmem:[%s13097_s13 + $0x50] sm:$0xff] }
 0x70b   : > { %6057 = vmatprep.subr.bf16.mxu0 %v6702_v5  ;;  %v6070_v51 = vpack.c.bf16 %v5016_v61, %v5015_v60 }
 0x70e   : > { %6059 = vmatpush3.bf16.msra.mxu0 %v6058_v33 }
 0x70f   : > { %6060 = vmatprep.subr.bf16.mxu0 %v6702_v5 }
 0x712   : > { %6062 = vmatpush3.bf16.msra.mxu0 %v6061_v48 }
 0x713   : > { %6063 = vmatprep.subr.bf16.mxu0 %v6702_v5 }
 0x716   : > { %6065 = vmatpush3.bf16.msra.mxu0 %v6064_v44 }
 0x717   : > { %6066 = vmatprep.subr.bf16.mxu0 %v6702_v5 }
 0x71a   : > { %6068 = vmatpush3.bf16.msra.mxu0 %v6067_v36 }
 0x71b   : > { %6069 = vmatprep.subr.bf16.mxu0 %v6702_v5 }
 0x71e   : > { %6071 = vmatpush3.bf16.msra.mxu0 %v6070_v51 }
 0x71f   : > { %6072 = vmatprep.subr.bf16.mxu0 %v6702_v5 }
 0x722   : > { %6074 = vmatpush3.bf16.msra.mxu0 %v6073_v49 }
 0x723   : > { %6075 = vmatprep.subr.bf16.mxu0 %v6702_v5  ;;  %v5020_v5 = vld [vmem:[%s13097_s13 + $0x78] sm:$0xff] }
 0x724   : > { %v6076_v20 = vpack.c.bf16 %v5020_v5, %v5019_v45 }
 0x726   : > { %6077 = vmatpush3.bf16.msra.mxu0 %v6076_v20 }
 0x7dc   : > { %v4904_v30 = vpop.f32.mrb[0].mxu0 }
 0x7dd   : > { %v4905_v26 = vadd.f32 %v5637_v34, %v4904_v30  ;;  %v5935_v14 = vpop.f32.mrb[1].mxu0 }
 0x7df   : > { %v4908_v40 = vmax.f32 %v4905_v26, 0.0 }
 0x7e1   : > { %v4909_v50 = vrot.slane %v4908_v40, 4 }
 0x7e3   : > { %v4910_v28 = vadd.f32 %v4909_v50, %v4908_v40 }
 0x7e5   : > { %v4911_v15 = vrot.slane %v4910_v28, 2 }
 0x7e7   : > { %v4912_v41 = vadd.f32 %v4911_v15, %v4910_v28 }
 0x7e9   : > { %v4913_v25 = vrot.slane %v4912_v41, 1 }
 0x7eb   : > { %v4914_v39 = vadd.f32 %v4913_v25, %v4912_v41 }
 0x7ed   : > { %v4916_v63 = vmul.f32 0.125, %v4914_v39 }
 0x7ef   : > { %5969 = vmatmul.mubr.f32.vlgmr.msra.gmra.mrb[0].mxu1 %v4916_v63 }
 0x8c2   : > { %v5000_v35 = vpop.f32.mrb[0].mxu1 }
 0x8c3   : > { %v5001_v42 = vadd.f32 %v5000_v35, %v4933_v56  ;;  %v5970_v58 = vpop.f32.mrb[1].mxu1 }
 0x8c5   : > { %v5004_v37 = vmax.f32 %v5001_v42, 0.0 }
 0x8c7   : > { %6004 = vmatmul.mubr.f32.vlgmr.msra.gmra.mrb[2].mxu0 %v5004_v37 }
 0x99a   : > { %v5088_v59 = vpop.f32.mrb[2].mxu0 }
 0x99b   : > { %v5089_v4 = vadd.f32 %v5088_v59, %v5021_v1  ;;  %v6005_v27 = vpop.f32.mrb[3].mxu0 }
 0x99d   : > { %5093 = vst.msk [vmem:[#allocation21] sm:$0x1] %vm5092_vm4, %v5089_v4 }
 0x99e PF: > { %p6171_p1 = scmp.eq.s32.totalorder %s6792_s27, 7  ;;  %s6705_s20 = smov [#allocation21]  }
 0x99f   : > { %s5101_s0 = sshll.u32 %s6705_s20, 4  ;;  %s5102_s0 = int_to_ptr.vmem [resolvable:$true] %s5101_s0 }
 0x9a0   : > { %s6591_s2 = scalar_lea.vmem %s5102_s0, 16  ;;  %s6597_s26 = scalar_lea.vmem %s5102_s0, 32 }
 0x9a1   : > { %p6592_p4 = scmp.ne.s32.totalorder %s5102_s0, %s6591_s2  ;;  %p6598_p11 = scmp.lt.s32.totalorder %s5102_s0, %s5102_s0 }
 0x9a2   : > { %p6599_p12 = scmp.lt.s32.totalorder %s6597_s26, %s6591_s2 }
 0x9a3   : > { %p6593_p10 = pnand %p6592_p4, %p6171_p1 }
 0x9a4   : > { %p6600_p0 = por %p6599_p12, %p6598_p11 }
 0x9a5   : > { %p6594_p13 = pneg %p6593_p10 }
 0x9a7   : > { %p6601_p5 = pnand %p6600_p0, %p6594_p13 }
 0x9a9   : > { %6604 = shalt.err (!%p6601_p5)
}
 0x9aa   : > { %s13098_s30 = sld [smem:[#allocation237_spill]] }
 0x9b0   : > { %s6605_s14 = scalar_lea.hbm %s13098_s30, 16 }
 0x9b1   : > { %p6606_p7 = scmp.ne.s32.totalorder %s13098_s30, %s6605_s14  ;;  %p6611_p3 = scmp.lt.u32.totalorder %s6605_s14, %s13098_s30 }
 0x9b3   : > { %p6607_p6 = pnand %p6606_p7, %p6171_p1 }
 0x9b5   : > { %p6608_p9 = pneg %p6607_p6 }
 0x9b7   : > { %p6613_p2 = pnand %p6611_p3, %p6608_p9 }
 0x9b9   : > { %6616 = shalt.err (!%p6613_p2)
}
 0x9ba   : > { %6117 = dma.vmem_to_hbm [thread:$0]  (%p6171_p1), %s5102_s0, 16, %s13098_s30, [#allocation6]  }
 0x9bb   : > { %6662 = dma.done.wait (%p6171_p1), [#allocation6], 16  }
 0x9bc   : > { %6664 = vsyncadd (%p6171_p1), [#allocation6], 4294967280 }
 0x9bd PF: > { %p28_p8 = scmp.ge.s32.totalorder %s6994_s25, 10   ;;  %s13099_s21 = smov %s6671_s22 }
 0x9be   : > { %s13100_s22 = smov %s6675_s23  ;;  %s13101_s23 = smov %s7013_s17 }
 0x9bf   : > { %s13102_s24 = smov %s6994_s25  ;;  %30 = sbr.rel (!%p28_p8) target bundleno = 15 (0xf), region = 159 }
 0x9c6   :  { %5114 = vsyncpa [#allocation5], 1 }
 0x9c7   :  { %5116 = vsyncpa [#allocation5 + $0x1], 1 }
 0x9c8   :  { %5117 = vsyncpa [#allocation8], 1 }
 0x9c9   :  { %5118 = vsyncpa [#allocation11], 1 }
 0x9ca   :  { %5120 = vsyncpa [#allocation11 + $0x1], 1 }
 0x9cb   :  { %5121 = vsyncpa [#allocation14], 1 }
 0x9cc   :  { %5122 = vsyncpa [#allocation17], 1 }
 0x9cd   :  { %5123 = vsyncpa [#allocation20], 1 }
 0x9ce   :  { %5124 = vsyncpa [#allocation6], 1 }
 0x9cf   :  { %5126 = vsyncpa [#allocation6 + $0x1], 1 }

</bundles_post_ra>
